<compile_context>
chip_gen: v7x
topology: tpu7x:2x2x1
jax: 0.10.0
libtpu: 0.0.40
codegen_flags: <defaults>
</compile_context>

<pallas_src>
import functools

import jax
import jax.numpy as jnp
from jax.experimental import pallas as pl
from jax.experimental.pallas import tpu as pltpu

_EPS = 1e-5


def _rup(x, m):
    return ((x + m - 1) // m) * m


def _cdiv(a, b):
    return -(-a // b)


def _chip_plan():
    """(vmem_limit_bytes, max row tile) per TPU generation."""
    try:
        kind = jax.devices()[0].device_kind.lower()
    except Exception:
        kind = ""
    if "v7" in kind or "7x" in kind:
        return 48 * 2 ** 20, 1024          # v7x: 64 MiB VMEM/TC -> smaller budget
    if "v5" in kind or "v6" in kind:
        return 96 * 2 ** 20, 2048          # v5e / v6e: 128 MiB VMEM
    return 32 * 2 ** 20, 512               # unknown chip: stay conservative


def _pick_tr(cinp, coutp, ntaps, min_tr, total, limit, trcap):
    """Largest 128-multiple row tile whose per-layer VMEM footprint fits."""
    lo = max(128, min_tr)
    hi = max(lo, min(trcap, _rup(total, 128)))
    best = lo
    for cand in (256, 512, 1024, 2048):
        if cand <= best or cand > hi:
            continue
        fp = (2 * ntaps * coutp * cinp * 2      # resident tap weights (2 bufs)
              + 8 * cinp * cand * 2             # two X specs + concat + slice temps
              + 2 * cand * 4                    # validity mask
              + 2 * coutp * cand * 2            # bf16 Y out (2 bufs)
              + coutp * cand * 4)               # f32 accumulator
        if fp <= limit // 2:
            best = cand
    return best


# ---------------------------------------------------------------------------
# Kernels
# ---------------------------------------------------------------------------
def _apply_act(z, act):
    if act == "relu":
        return jnp.maximum(z, 0.0)
    if act == "tanh":
        return jnp.tanh(z)
    return z


def _conv_stats_kernel(w_ref, x0_ref, x1_ref, m_ref, y_ref, s_ref, *, shifts, tr):
    """Implicit-GEMM conv row-tile + fused masked BN batch-stat partials."""
    x = jnp.concatenate([x0_ref[...], x1_ref[...]], axis=1)      # (Cinp, 2*TR) bf16
    acc = jnp.dot(w_ref[0], x[:, shifts[0]:shifts[0] + tr],
                  preferred_element_type=jnp.float32)
    for ti in range(1, len(shifts)):
        sh = shifts[ti]
        acc = acc + jnp.dot(w_ref[ti], x[:, sh:sh + tr],
                            preferred_element_type=jnp.float32)
    y_ref[...] = acc.astype(y_ref.dtype)                         # bf16 intermediate
    m = m_ref[...]                                               # (1, TR) validity
    ym = acc * m
    s1 = jnp.sum(ym, axis=1, keepdims=True)
    s2 = jnp.sum(ym * acc, axis=1, keepdims=True)
    s_ref[0] = jnp.concatenate([s1, s2], axis=1)                 # (Coutp, 2)


def _conv_bias_act_kernel(w_ref, x0_ref, x1_ref, b_ref, o_ref, *, shifts, tr, act):
    x = jnp.concatenate([x0_ref[...], x1_ref[...]], axis=1)
    acc = jnp.dot(w_ref[0], x[:, shifts[0]:shifts[0] + tr],
                  preferred_element_type=jnp.float32)
    for ti in range(1, len(shifts)):
        sh = shifts[ti]
        acc = acc + jnp.dot(w_ref[ti], x[:, sh:sh + tr],
                            preferred_element_type=jnp.float32)
    o_ref[...] = _apply_act(acc + b_ref[...], act)


def _affine_kernel(y_ref, s_ref, b_ref, o_ref, *, act):
    z = y_ref[...].astype(jnp.float32) * s_ref[...] + b_ref[...]
    o_ref[...] = _apply_act(z, act).astype(o_ref.dtype)


def _affine_res_kernel(y_ref, s_ref, b_ref, x0_ref, x1_ref, o_ref, *, act, rshift, tr):
    # Residual read straight from the block-input frame with a static flat shift.
    res = jnp.concatenate([x0_ref[...], x1_ref[...]], axis=1)[:, rshift:rshift + tr]
    z = (y_ref[...].astype(jnp.float32) * s_ref[...] + b_ref[...]
         + res.astype(jnp.float32))
    o_ref[...] = _apply_act(z, act).astype(o_ref.dtype)


# ---------------------------------------------------------------------------
# pallas_call wrappers
# ---------------------------------------------------------------------------
def _conv_stats_call(wt, xf, mask, shifts, geom):
    ntaps, coutp, cinp = wt.shape
    tr, n_r, limit = geom["tr"], geom["n_r"], geom["limit"]
    kern = functools.partial(_conv_stats_kernel, shifts=tuple(shifts), tr=tr)
    # NOTE: the weight block is grid-invariant (constant index_map), so it is
    # DMA'd only once; pl.Buffered(1) could also drop its second buffer.
    return pl.pallas_call(
        kern,
        out_shape=(jax.ShapeDtypeStruct((coutp, geom["lout"]), jnp.bfloat16),
                   jax.ShapeDtypeStruct((n_r, coutp, 2), jnp.float32)),
        grid_spec=pltpu.PrefetchScalarGridSpec(
            num_scalar_prefetch=0,
            grid=(n_r,),
            in_specs=[
                pl.BlockSpec((ntaps, coutp, cinp), lambda r: (0, 0, 0)),
                pl.BlockSpec((cinp, tr), lambda r: (0, r)),
                pl.BlockSpec((cinp, tr), lambda r: (0, r + 1)),
                pl.BlockSpec((1, tr), lambda r: (0, r)),
            ],
            out_specs=[
                pl.BlockSpec((coutp, tr), lambda r: (0, r)),
                pl.BlockSpec((1, coutp, 2), lambda r: (r, 0, 0)),
            ],
        ),
        compiler_params=pltpu.CompilerParams(
            dimension_semantics=("parallel",),
            vmem_limit_bytes=limit),
    )(wt, xf, xf, mask)


def _conv_bias_act_call(wt, xf, bias, shifts, geom, act):
    ntaps, coutp, cinp = wt.shape
    tr, n_r, limit = geom["tr"], geom["n_r"], geom["limit"]
    kern = functools.partial(_conv_bias_act_kernel,
                             shifts=tuple(shifts), tr=tr, act=act)
    return pl.pallas_call(
        kern,
        out_shape=jax.ShapeDtypeStruct((coutp, geom["lout"]), jnp.float32),
        grid_spec=pltpu.PrefetchScalarGridSpec(
            num_scalar_prefetch=0,
            grid=(n_r,),
            in_specs=[
                pl.BlockSpec((ntaps, coutp, cinp), lambda r: (0, 0, 0)),
                pl.BlockSpec((cinp, tr), lambda r: (0, r)),
                pl.BlockSpec((cinp, tr), lambda r: (0, r + 1)),
                pl.BlockSpec((coutp, 1), lambda r: (0, 0)),
            ],
            out_specs=pl.BlockSpec((coutp, tr), lambda r: (0, r)),
        ),
        compiler_params=pltpu.CompilerParams(
            dimension_semantics=("parallel",),
            vmem_limit_bytes=limit),
    )(wt, xf, xf, bias)


def _affine_call(y, scale, shift, act, geom, residual=None, rshift=0):
    coutp = y.shape[0]
    tr, n_r, limit = geom["tr"], geom["n_r"], geom["limit"]
    mat = pl.BlockSpec((coutp, tr), lambda r: (0, r))
    vec = pl.BlockSpec((coutp, 1), lambda r: (0, 0))
    if residual is None:
        kern = functools.partial(_affine_kernel, act=act)
        ins = (y, scale, shift)
        in_specs = [mat, vec, vec]
    else:
        kern = functools.partial(_affine_res_kernel, act=act, rshift=rshift, tr=tr)
        ins = (y, scale, shift, residual, residual)
        in_specs = [mat, vec, vec,
                    pl.BlockSpec((coutp, tr), lambda r: (0, r)),
                    pl.BlockSpec((coutp, tr), lambda r: (0, r + 1))]
    return pl.pallas_call(
        kern,
        out_shape=jax.ShapeDtypeStruct(y.shape, jnp.bfloat16),
        grid_spec=pltpu.PrefetchScalarGridSpec(
            num_scalar_prefetch=0, grid=(n_r,),
            in_specs=in_specs, out_specs=mat),
        compiler_params=pltpu.CompilerParams(
            dimension_semantics=("parallel",),
            vmem_limit_bytes=limit),
    )(*ins)


# ---------------------------------------------------------------------------
# Plain-JAX glue: frame packing, masks, extraction, BN finalize.
# TODO(synk): reflection/zero padding, the polyphase split/interleave and the
# valid-window extraction remain XLA data-movement glue (one bf16 pass each).
# ---------------------------------------------------------------------------
def _plan_geom(lp, n, hp, wp, ho, wo, shifts):
    limit, trcap = _chip_plan()
    lframe = hp * wp
    total = n * lframe
    min_tr = max(128, _rup(max(shifts), 128)) if max(shifts) > 0 else 128
    tr = _pick_tr(lp["cinp"], lp["coutp"], len(shifts), min_tr, total, limit, trcap)
    n_r = _cdiv(total, tr)
    return dict(tr=tr, n_r=n_r, lout=n_r * tr, lin=(n_r + 1) * tr,
                lframe=lframe, wp=wp, ho=ho, wo=wo, n=n, limit=limit)


def _build_frame(xp, cinp, geom):
    c, n, hp, wp = xp.shape
    total = n * hp * wp
    xf = xp.astype(jnp.bfloat16).reshape(c, total)
    return jnp.pad(xf, ((0, cinp - c), (0, geom["lin"] - total)))


def _valid_mask(geom):
    pos = jnp.arange(geom["lout"], dtype=jnp.int32)
    nidx = pos // geom["lframe"]
    q = pos - nidx * geom["lframe"]
    row = q // geom["wp"]
    col = q - row * geom["wp"]
    valid = (nidx < geom["n"]) & (row < geom["ho"]) & (col < geom["wo"])
    return valid.astype(jnp.float32)[None, :]


def _extract(y, geom, cout):
    n, lframe, ho, wp, wo = (geom["n"], geom["lframe"], geom["ho"],
                             geom["wp"], geom["wo"])
    v = y[:cout, :n * lframe].reshape(cout, n, lframe)
    return v[:, :, :ho * wp].reshape(cout, n, ho, wp)[:, :, :, :wo]


def _conv_frame_run(xp, lp):
    _, n, hp, wp = xp.shape
    taps = lp["taps"]
    kh = max(dy for dy, _ in taps) + 1
    kw = max(dx for _, dx in taps) + 1
    ho, wo = hp - kh + 1, wp - kw + 1
    shifts = [dy * wp + dx for dy, dx in taps]
    geom = _plan_geom(lp, n, hp, wp, ho, wo, shifts)
    xf = _build_frame(xp, lp["cinp"], geom)
    mask = _valid_mask(geom)
    y, st = _conv_stats_call(lp["wt"], xf, mask, shifts, geom)
    return xf, geom, y, st


def _bn_from_stats(st, gamma, beta, count, coutp):
    s = jnp.sum(st, axis=0)                         # (coutp, 2)
    mu = s[:, 0] / count
    var = jnp.maximum(s[:, 1] / count - mu * mu, 0.0)
    g = jnp.pad(gamma, (0, coutp - gamma.shape[0]))
    b = jnp.pad(beta, (0, coutp - beta.shape[0]))
    scale = g / jnp.sqrt(var + _EPS)
    shift = b - scale * mu
    return scale.reshape(coutp, 1), shift.reshape(coutp, 1)


# ---------------------------------------------------------------------------
# Layers
# ---------------------------------------------------------------------------
def _conv_bn_act_layer(x, lp, *, pad, pad_mode, act):
    _, n, _, _ = x.shape
    xb = x.astype(jnp.bfloat16)
    mode = "reflect" if pad_mode == "reflect" else "constant"
    xp = jnp.pad(xb, ((0, 0), (0, 0), (pad, pad), (pad, pad)), mode=mode)
    _, geom, y, st = _conv_frame_run(xp, lp)
    count = float(n) * geom["ho"] * geom["wo"]
    scale, shift = _bn_from_stats(st, lp["gamma"], lp["beta"], count, lp["coutp"])
    out = _affine_call(y, scale, shift, act, geom)
    return _extract(out, geom, lp["cout"])


def _resnet_block(x, blk):
    _, n, h, w = x.shape
    xb = x.astype(jnp.bfloat16)
    count = float(n) * h * w
    # conv1: reflect pad 1 + 3x3 conv + BN + ReLU
    xp1 = jnp.pad(xb, ((0, 0), (0, 0), (1, 1), (1, 1)), mode="reflect")
    xf1, g1, y1, st1 = _conv_frame_run(xp1, blk["c1"])
    s1, t1 = _bn_from_stats(st1, blk["c1"]["gamma"], blk["c1"]["beta"], count,
                            blk["c1"]["coutp"])
    h1 = _affine_call(y1, s1, t1, "relu", g1)
    h1e = _extract(h1, g1, blk["c1"]["cout"])
    # conv2: reflect pad 1 + 3x3 conv + BN; skip connection fused into the
    # affine kernel directly from conv1's input frame (flat shift Wp+1).
    xp2 = jnp.pad(h1e, ((0, 0), (0, 0), (1, 1), (1, 1)), mode="reflect")
    _, g2, y2, st2 = _conv_frame_run(xp2, blk["c2"])
    assert (g1["tr"], g1["n_r"], g1["wp"]) == (g2["tr"], g2["n_r"], g2["wp"])
    assert xf1.shape[0] == y2.shape[0]
    s2, t2 = _bn_from_stats(st2, blk["c2"]["gamma"], blk["c2"]["beta"], count,
                            blk["c2"]["coutp"])
    out = _affine_call(y2, s2, t2, "none", g2, residual=xf1, rshift=g2["wp"] + 1)
    return _extract(out, g2, blk["c2"]["cout"])


def _down_layer(x, lp):
    _, n, h, w = x.shape
    ho, wo = h // 2, w // 2
    xb = x.astype(jnp.bfloat16)
    xp = jnp.pad(xb, ((0, 0), (0, 0), (1, 1), (1, 1)))          # zero pad 1
    # stride-2 conv as a 2x2 stride-1 conv over the 4 input-parity planes
    ph = jnp.concatenate([xp[:, :, a::2, b::2]
                          for a in range(2) for b in range(2)], axis=0)
    _, geom, y, st = _conv_frame_run(ph, lp)
    count = float(n) * ho * wo
    scale, shift = _bn_from_stats(st, lp["gamma"], lp["beta"], count, lp["coutp"])
    out = _affine_call(y, scale, shift, "relu", geom)
    return _extract(out, geom, lp["cout"])


def _up_layer(x, lp):
    _, n, h, w = x.shape
    cout = lp["cout"]
    xb = x.astype(jnp.bfloat16)
    xp = jnp.pad(xb, ((0, 0), (0, 0), (0, 1), (0, 1)))          # bottom/right pad
    _, geom, y, st = _conv_frame_run(xp, lp)                    # all 4 phases fused
    # BN batch stats over all 4 interleaved output phases of each real channel
    s = jnp.sum(st, axis=0)[:4 * cout].reshape(4, cout, 2)
    count = 4.0 * n * h * w
    mu = jnp.sum(s[..., 0], axis=0) / count
    var = jnp.maximum(jnp.sum(s[..., 1], axis=0) / count - mu * mu, 0.0)
    scale = lp["gamma"] / jnp.sqrt(var + _EPS)
    shift = lp["beta"] - scale * mu
    coutp = lp["coutp"]
    scale4 = jnp.pad(jnp.tile(scale, 4), (0, coutp - 4 * cout)).reshape(coutp, 1)
    shift4 = jnp.pad(jnp.tile(shift, 4), (0, coutp - 4 * cout)).reshape(coutp, 1)
    out = _affine_call(y, scale4, shift4, "relu", geom)
    v = _extract(out, geom, 4 * cout)                           # (4*Cout, N, H, W)
    v = v.reshape(2, 2, cout, n, h, w)
    return jnp.transpose(v, (2, 3, 4, 0, 5, 1)).reshape(cout, n, 2 * h, 2 * w)


def _tail_layer(x, lp, pad):
    xb = x.astype(jnp.bfloat16)
    xp = jnp.pad(xb, ((0, 0), (0, 0), (pad, pad), (pad, pad)), mode="reflect")
    _, n, hp, wp = xp.shape
    taps = lp["taps"]
    kh = max(dy for dy, _ in taps) + 1
    kw = max(dx for _, dx in taps) + 1
    ho, wo = hp - kh + 1, wp - kw + 1
    shifts = [dy * wp + dx for dy, dx in taps]
    geom = _plan_geom(lp, n, hp, wp, ho, wo, shifts)
    xf = _build_frame(xp, lp["cinp"], geom)
    y = _conv_bias_act_call(lp["wt"], xf, lp["bias"], shifts, geom, "tanh")
    return _extract(y, geom, lp["cout"]).astype(jnp.float32)


def generator_forward(prep, x_nchw):
    x = jnp.transpose(x_nchw, (1, 0, 2, 3))                     # (C, N, H, W)
    x = _conv_bn_act_layer(x, prep["head"], pad=3, pad_mode="reflect", act="relu")
    for lp in prep["down"]:
        x = _down_layer(x, lp)
    for blk in prep["blocks"]:
        x = _resnet_block(x, blk)
    for lp in prep["up"]:
        x = _up_layer(x, lp)
    y = _tail_layer(x, prep["tail"], pad=3)
    return jnp.transpose(y, (1, 0, 2, 3))                       # back to NCHW


# ---------------------------------------------------------------------------
# One-time parameter preprocessing (hoisted out of the forward pass)
# ---------------------------------------------------------------------------
def _prep_std_conv(lp):
    w = lp["w"]
    cout, cin, kh, kw = w.shape
    coutp, cinp = _rup(cout, 16), _rup(cin, 16)
    wt = jnp.transpose(w, (2, 3, 0, 1)).reshape(kh * kw, cout, cin)
    wt = jnp.pad(wt, ((0, 0), (0, coutp - cout), (0, cinp - cin))).astype(jnp.bfloat16)
    return {"wt": wt, "taps": [(dy, dx) for dy in range(kh) for dx in range(kw)],
            "cout": cout, "coutp": coutp, "cinp": cinp,
            "gamma": lp["gamma"].astype(jnp.float32),
            "beta": lp["beta"].astype(jnp.float32)}


def _prep_down_conv(lp):
    w = lp["w"]                                                  # (Cout, Cin, 3, 3)
    cout, cin = w.shape[:2]
    coutp, cinp = _rup(cout, 16), _rup(4 * cin, 16)
    zeros = jnp.zeros((cout, cin), w.dtype)
    mats = []
    for sy in range(2):
        for sx in range(2):
            blocks = []
            for a in range(2):
                for b in range(2):
                    dy, dx = 2 * sy + a, 2 * sx + b
                    blocks.append(w[:, :, dy, dx] if (dy <= 2 and dx <= 2) else zeros)
            mats.append(jnp.concatenate(blocks, axis=1))
    wt = jnp.stack(mats, axis=0)
    wt = jnp.pad(wt, ((0, 0), (0, coutp - cout),
                      (0, cinp - 4 * cin))).astype(jnp.bfloat16)
    return {"wt": wt, "taps": [(0, 0), (0, 1), (1, 0), (1, 1)],
            "cout": cout, "coutp": coutp, "cinp": cinp,
            "gamma": lp["gamma"].astype(jnp.float32),
            "beta": lp["beta"].astype(jnp.float32)}


def _prep_up_conv(lp):
    w = lp["w"]                                                  # (Cin, Cout, 3, 3)
    cin, cout = w.shape[:2]
    coutp, cinp = _rup(4 * cout, 16), _rup(cin, 16)

    def kidx(par, s):                    # kernel index for output parity / tap offset
        if par == 0:
            return 1 if s == 0 else None
        return 0 if s == 1 else 2

    zeros = jnp.zeros((cout, cin), w.dtype)
    mats = []
    for sy in range(2):
        for sx in range(2):
            rows = []
            for py in range(2):
                for px in range(2):
                    ky, kx = kidx(py, sy), kidx(px, sx)
                    rows.append(zeros if (ky is None or kx is None)
                                else jnp.transpose(w[:, :, ky, kx]))
            mats.append(jnp.concatenate(rows, axis=0))
    wt = jnp.stack(mats, axis=0)                                 # (4, 4*Cout, Cin)
    wt = jnp.pad(wt, ((0, 0), (0, coutp - 4 * cout),
                      (0, cinp - cin))).astype(jnp.bfloat16)
    return {"wt": wt, "taps": [(0, 0), (0, 1), (1, 0), (1, 1)],
            "cout": cout, "coutp": coutp, "cinp": cinp,
            "gamma": lp["gamma"].astype(jnp.float32),
            "beta": lp["beta"].astype(jnp.float32)}


def _prep_tail_conv(lp):
    w = lp["w"]
    cout, cin, kh, kw = w.shape
    coutp, cinp = _rup(cout, 16), _rup(cin, 16)
    wt = jnp.transpose(w, (2, 3, 0, 1)).reshape(kh * kw, cout, cin)
    wt = jnp.pad(wt, ((0, 0), (0, coutp - cout), (0, cinp - cin))).astype(jnp.bfloat16)
    bias = jnp.pad(lp["b"], (0, coutp - cout)).astype(jnp.float32).reshape(coutp, 1)
    return {"wt": wt, "taps": [(dy, dx) for dy in range(kh) for dx in range(kw)],
            "cout": cout, "coutp": coutp, "cinp": cinp, "bias": bias}


def preprocess_params(params):
    return {
        "head": _prep_std_conv(params["head"]),
        "down": [_prep_down_conv(lp) for lp in params["down"]],
        "blocks": [{"c1": _prep_std_conv(b["c1"]), "c2": _prep_std_conv(b["c2"])}
                   for b in params["blocks"]],
        "up": [_prep_up_conv(lp) for lp in params["up"]],
        "tail": _prep_tail_conv(params["tail"]),
    }


# ---------------------------------------------------------------------------
# Deterministic synthetic params (shapes follow ResnetGenerator.__init__)
# ---------------------------------------------------------------------------
def init_params(key, input_nc, output_nc, ngf, n_blocks):
    keys = iter(jax.random.split(key, 8 + 4 * n_blocks + 16))

    def conv(cout, cin, k):
        w = jax.random.normal(next(keys), (cout, cin, k, k), jnp.float32)
        w = w * (1.0 / (cin * k * k) ** 0.5)
        b = 0.02 * jax.random.normal(next(keys), (cout,), jnp.float32)
        return {"w": w, "b": b}

    def convT(cin, cout, k):     # PyTorch ConvTranspose2d weight layout (Cin,Cout,k,k)
        w = jax.random.normal(next(keys), (cin, cout, k, k), jnp.float32)
        w = w * (1.0 / (cin * k * k) ** 0.5)
        b = 0.02 * jax.random.normal(next(keys), (cout,), jnp.float32)
        return {"w": w, "b": b}

    def bn(c):
        return {"gamma": jnp.ones((c,), jnp.float32),
                "beta": jnp.zeros((c,), jnp.float32)}

    dim = ngf * 4
    return {
        "head": {**conv(ngf, input_nc, 7), **bn(ngf)},
        "down": [{**conv(ngf * 2, ngf, 3), **bn(ngf * 2)},
                 {**conv(ngf * 4, ngf * 2, 3), **bn(ngf * 4)}],
        "blocks": [{"c1": {**conv(dim, dim, 3), **bn(dim)},
                    "c2": {**conv(dim, dim, 3), **bn(dim)}}
                   for _ in range(n_blocks)],
        "up": [{**convT(ngf * 4, ngf * 2, 3), **bn(ngf * 2)},
               {**convT(ngf * 2, ngf, 3), **bn(ngf)}],
        "tail": conv(output_nc, ngf, 7),
    }


# ---------------------------------------------------------------------------
# Pure-JAX f32 reference (PyTorch semantics) for a tolerance check
# ---------------------------------------------------------------------------
def _ref_forward(params, x_nchw):
    def conv(x, w, b, stride=1, pad=0):
        y = jax.lax.conv_general_dilated(
            x, w, (stride, stride), [(pad, pad), (pad, pad)],
            dimension_numbers=("NCHW", "OIHW", "NCHW"))
        return y + b.reshape(1, -1, 1, 1)

    def bn(y, g, be):
        mu = jnp.mean(y, axis=(0, 2, 3), keepdims=True)
        var = jnp.mean((y - mu) ** 2, axis=(0, 2, 3), keepdims=True)
        return (g.reshape(1, -1, 1, 1) * (y - mu) / jnp.sqrt(var + _EPS)
                + be.reshape(1, -1, 1, 1))

    def reflect(x, p):
        return jnp.pad(x, ((0, 0), (0, 0), (p, p), (p, p)), mode="reflect")

    def convT(x, w, b):          # ConvTranspose2d k=3, s=2, p=1, op=1
        wf = jnp.transpose(jnp.flip(w, (2, 3)), (1, 0, 2, 3))
        y = jax.lax.conv_general_dilated(
            x, wf, (1, 1), [(1, 2), (1, 2)], lhs_dilation=(2, 2),
            dimension_numbers=("NCHW", "OIHW", "NCHW"))
        return y + b.reshape(1, -1, 1, 1)

    p = params
    h = x_nchw
    h = jax.nn.relu(bn(conv(reflect(h, 3), p["head"]["w"], p["head"]["b"]),
                       p["head"]["gamma"], p["head"]["beta"]))
    for lp in p["down"]:
        h = jax.nn.relu(bn(conv(h, lp["w"], lp["b"], stride=2, pad=1),
                           lp["gamma"], lp["beta"]))
    for blk in p["blocks"]:
        r = h
        h = jax.nn.relu(bn(conv(reflect(h, 1), blk["c1"]["w"], blk["c1"]["b"]),
                           blk["c1"]["gamma"], blk["c1"]["beta"]))
        h = bn(conv(reflect(h, 1), blk["c2"]["w"], blk["c2"]["b"]),
               blk["c2"]["gamma"], blk["c2"]["beta"])
        h = r + h
    for lp in p["up"]:
        h = jax.nn.relu(bn(convT(h, lp["w"], lp["b"]), lp["gamma"], lp["beta"]))
    return jnp.tanh(conv(reflect(h, 3), p["tail"]["w"], p["tail"]["b"]))


if __name__ == "__main__":
    key = jax.random.PRNGKey(0)
    pkey, xkey = jax.random.split(key)

    # Small config: input_nc=4, output_nc=3, ngf=8, n_blocks=2, use_dropout=False.
    params = init_params(pkey, input_nc=4, output_nc=3, ngf=8, n_blocks=2)
    x = jax.random.normal(xkey, (2, 4, 16, 16), jnp.float32)     # NCHW like PyTorch

    prep = preprocess_params(params)                             # one-time reformat
    fwd = jax.jit(lambda inp: generator_forward(prep, inp))
    out = fwd(x)
    jax.block_until_ready(out)

    assert out.shape == (2, 3, 16, 16), out.shape
    assert bool(jnp.all(jnp.isfinite(out)))
    assert bool(jnp.all(jnp.abs(out) <= 1.0))                    # tanh range

    ref = _ref_forward(params, x)
    err = float(jnp.max(jnp.abs(out - ref)))
    assert err < 0.25, f"max |pallas - reference| = {err}"        # bf16 tolerance
    print("KERNEL_OK")
</pallas_src>

<mosaic_0001>
module attributes {stable_mosaic.version = 11 : i64} {
  func.func @_conv_stats_kernel(%arg0: i32, %arg1: memref<49x16x16xbf16, #tpu.memory_space<vmem>>, %arg2: memref<16x512xbf16, #tpu.memory_space<vmem>>, %arg3: memref<16x512xbf16, #tpu.memory_space<vmem>>, %arg4: memref<1x512xf32, #tpu.memory_space<vmem>>, %arg5: memref<16x512xbf16, #tpu.memory_space<vmem>>, %arg6: memref<1x16x2xf32, #tpu.memory_space<vmem>>) attributes {dimension_semantics = [#tpu.dimension_semantics<parallel>], iteration_bounds = array<i64: 2>, scalar_prefetch = 0 : i64, scratch_operands = 0 : i64, tpu.core_type = #tpu.core_type<tc>, window_params = [{pipeline_mode = #tpu.pipeline_mode<synchronous>, transform_indices = @transform_0, window_bounds = array<i64: 49, 16, 16>}, {transform_indices = @transform_1, window_bounds = array<i64: 16, 512>}, {transform_indices = @transform_2, window_bounds = array<i64: 16, 512>}, {transform_indices = @transform_3, window_bounds = array<i64: 1, 512>}, {transform_indices = @transform_4, window_bounds = array<i64: 16, 512>}, {transform_indices = @transform_5, window_bounds = array<i64: 1, 16, 2>}]} {
    %c0 = arith.constant 0 : index
    %c0_0 = arith.constant 0 : index
    %0 = vector.load %arg2[%c0, %c0_0] : memref<16x512xbf16, #tpu.memory_space<vmem>>, vector<16x512xbf16>
    %c0_1 = arith.constant 0 : index
    %c0_2 = arith.constant 0 : index
    %1 = vector.load %arg3[%c0_1, %c0_2] : memref<16x512xbf16, #tpu.memory_space<vmem>>, vector<16x512xbf16>
    %2 = tpu.concatenate %0, %1 in 1 : vector<16x512xbf16>, vector<16x512xbf16> -> vector<16x1024xbf16>
    %c0_3 = arith.constant 0 : index
    %c0_4 = arith.constant 0 : index
    %c0_5 = arith.constant 0 : index
    %3 = vector.load %arg1[%c0_3, %c0_4, %c0_5] : memref<49x16x16xbf16, #tpu.memory_space<vmem>>, vector<1x16x16xbf16>
    %4 = vector.shape_cast %3 : vector<1x16x16xbf16> to vector<16x16xbf16>
    %5 = vector.extract_strided_slice %2 {offsets = [0, 0], sizes = [16, 512], strides = [1, 1]} : vector<16x1024xbf16> to vector<16x512xbf16>
    %cst = arith.constant dense<0.000000e+00> : vector<16x512xf32>
    %6 = tpu.matmul %4, %5, %cst {dimension_numbers = #tpu.dot_dimension_numbers<[1], [0], [0], [1], [0, 0, 1, 1], [], []>} : vector<16x16xbf16>, vector<16x512xbf16>, vector<16x512xf32> -> vector<16x512xf32>
    %c1 = arith.constant 1 : index
    %c0_6 = arith.constant 0 : index
    %c0_7 = arith.constant 0 : index
    %7 = vector.load %arg1[%c1, %c0_6, %c0_7] : memref<49x16x16xbf16, #tpu.memory_space<vmem>>, vector<1x16x16xbf16>
    %8 = vector.shape_cast %7 : vector<1x16x16xbf16> to vector<16x16xbf16>
    %9 = vector.extract_strided_slice %2 {offsets = [0, 1], sizes = [16, 512], strides = [1, 1]} : vector<16x1024xbf16> to vector<16x512xbf16>
    %cst_8 = arith.constant dense<0.000000e+00> : vector<16x512xf32>
    %10 = tpu.matmul %8, %9, %cst_8 {dimension_numbers = #tpu.dot_dimension_numbers<[1], [0], [0], [1], [0, 0, 1, 1], [], []>} : vector<16x16xbf16>, vector<16x512xbf16>, vector<16x512xf32> -> vector<16x512xf32>
    %11 = arith.addf %6, %10 : vector<16x512xf32>
    %c2 = arith.constant 2 : index
    %c0_9 = arith.constant 0 : index
    %c0_10 = arith.constant 0 : index
    %12 = vector.load %arg1[%c2, %c0_9, %c0_10] : memref<49x16x16xbf16, #tpu.memory_space<vmem>>, vector<1x16x16xbf16>
    %13 = vector.shape_cast %12 : vector<1x16x16xbf16> to vector<16x16xbf16>
    %14 = vector.extract_strided_slice %2 {offsets = [0, 2], sizes = [16, 512], strides = [1, 1]} : vector<16x1024xbf16> to vector<16x512xbf16>
    %cst_11 = arith.constant dense<0.000000e+00> : vector<16x512xf32>
    %15 = tpu.matmul %13, %14, %cst_11 {dimension_numbers = #tpu.dot_dimension_numbers<[1], [0], [0], [1], [0, 0, 1, 1], [], []>} : vector<16x16xbf16>, vector<16x512xbf16>, vector<16x512xf32> -> vector<16x512xf32>
    %16 = arith.addf %11, %15 : vector<16x512xf32>
    %c3 = arith.constant 3 : index
    %c0_12 = arith.constant 0 : index
    %c0_13 = arith.constant 0 : index
    %17 = vector.load %arg1[%c3, %c0_12, %c0_13] : memref<49x16x16xbf16, #tpu.memory_space<vmem>>, vector<1x16x16xbf16>
    %18 = vector.shape_cast %17 : vector<1x16x16xbf16> to vector<16x16xbf16>
    %19 = vector.extract_strided_slice %2 {offsets = [0, 3], sizes = [16, 512], strides = [1, 1]} : vector<16x1024xbf16> to vector<16x512xbf16>
    %cst_14 = arith.constant dense<0.000000e+00> : vector<16x512xf32>
    %20 = tpu.matmul %18, %19, %cst_14 {dimension_numbers = #tpu.dot_dimension_numbers<[1], [0], [0], [1], [0, 0, 1, 1], [], []>} : vector<16x16xbf16>, vector<16x512xbf16>, vector<16x512xf32> -> vector<16x512xf32>
    %21 = arith.addf %16, %20 : vector<16x512xf32>
    %c4 = arith.constant 4 : index
    %c0_15 = arith.constant 0 : index
    %c0_16 = arith.constant 0 : index
    %22 = vector.load %arg1[%c4, %c0_15, %c0_16] : memref<49x16x16xbf16, #tpu.memory_space<vmem>>, vector<1x16x16xbf16>
    %23 = vector.shape_cast %22 : vector<1x16x16xbf16> to vector<16x16xbf16>
    %24 = vector.extract_strided_slice %2 {offsets = [0, 4], sizes = [16, 512], strides = [1, 1]} : vector<16x1024xbf16> to vector<16x512xbf16>
    %cst_17 = arith.constant dense<0.000000e+00> : vector<16x512xf32>
    %25 = tpu.matmul %23, %24, %cst_17 {dimension_numbers = #tpu.dot_dimension_numbers<[1], [0], [0], [1], [0, 0, 1, 1], [], []>} : vector<16x16xbf16>, vector<16x512xbf16>, vector<16x512xf32> -> vector<16x512xf32>
    %26 = arith.addf %21, %25 : vector<16x512xf32>
    %c5 = arith.constant 5 : index
    %c0_18 = arith.constant 0 : index
    %c0_19 = arith.constant 0 : index
    %27 = vector.load %arg1[%c5, %c0_18, %c0_19] : memref<49x16x16xbf16, #tpu.memory_space<vmem>>, vector<1x16x16xbf16>
    %28 = vector.shape_cast %27 : vector<1x16x16xbf16> to vector<16x16xbf16>
    %29 = vector.extract_strided_slice %2 {offsets = [0, 5], sizes = [16, 512], strides = [1, 1]} : vector<16x1024xbf16> to vector<16x512xbf16>
    %cst_20 = arith.constant dense<0.000000e+00> : vector<16x512xf32>
    %30 = tpu.matmul %28, %29, %cst_20 {dimension_numbers = #tpu.dot_dimension_numbers<[1], [0], [0], [1], [0, 0, 1, 1], [], []>} : vector<16x16xbf16>, vector<16x512xbf16>, vector<16x512xf32> -> vector<16x512xf32>
    %31 = arith.addf %26, %30 : vector<16x512xf32>
    %c6 = arith.constant 6 : index
    %c0_21 = arith.constant 0 : index
    %c0_22 = arith.constant 0 : index
    %32 = vector.load %arg1[%c6, %c0_21, %c0_22] : memref<49x16x16xbf16, #tpu.memory_space<vmem>>, vector<1x16x16xbf16>
    %33 = vector.shape_cast %32 : vector<1x16x16xbf16> to vector<16x16xbf16>
    %34 = vector.extract_strided_slice %2 {offsets = [0, 6], sizes = [16, 512], strides = [1, 1]} : vector<16x1024xbf16> to vector<16x512xbf16>
    %cst_23 = arith.constant dense<0.000000e+00> : vector<16x512xf32>
    %35 = tpu.matmul %33, %34, %cst_23 {dimension_numbers = #tpu.dot_dimension_numbers<[1], [0], [0], [1], [0, 0, 1, 1], [], []>} : vector<16x16xbf16>, vector<16x512xbf16>, vector<16x512xf32> -> vector<16x512xf32>
    %36 = arith.addf %31, %35 : vector<16x512xf32>
    %c7 = arith.constant 7 : index
    %c0_24 = arith.constant 0 : index
    %c0_25 = arith.constant 0 : index
    %37 = vector.load %arg1[%c7, %c0_24, %c0_25] : memref<49x16x16xbf16, #tpu.memory_space<vmem>>, vector<1x16x16xbf16>
    %38 = vector.shape_cast %37 : vector<1x16x16xbf16> to vector<16x16xbf16>
    %39 = vector.extract_strided_slice %2 {offsets = [0, 22], sizes = [16, 512], strides = [1, 1]} : vector<16x1024xbf16> to vector<16x512xbf16>
    %cst_26 = arith.constant dense<0.000000e+00> : vector<16x512xf32>
    %40 = tpu.matmul %38, %39, %cst_26 {dimension_numbers = #tpu.dot_dimension_numbers<[1], [0], [0], [1], [0, 0, 1, 1], [], []>} : vector<16x16xbf16>, vector<16x512xbf16>, vector<16x512xf32> -> vector<16x512xf32>
    %41 = arith.addf %36, %40 : vector<16x512xf32>
    %c8 = arith.constant 8 : index
    %c0_27 = arith.constant 0 : index
    %c0_28 = arith.constant 0 : index
    %42 = vector.load %arg1[%c8, %c0_27, %c0_28] : memref<49x16x16xbf16, #tpu.memory_space<vmem>>, vector<1x16x16xbf16>
    %43 = vector.shape_cast %42 : vector<1x16x16xbf16> to vector<16x16xbf16>
    %44 = vector.extract_strided_slice %2 {offsets = [0, 23], sizes = [16, 512], strides = [1, 1]} : vector<16x1024xbf16> to vector<16x512xbf16>
    %cst_29 = arith.constant dense<0.000000e+00> : vector<16x512xf32>
    %45 = tpu.matmul %43, %44, %cst_29 {dimension_numbers = #tpu.dot_dimension_numbers<[1], [0], [0], [1], [0, 0, 1, 1], [], []>} : vector<16x16xbf16>, vector<16x512xbf16>, vector<16x512xf32> -> vector<16x512xf32>
    %46 = arith.addf %41, %45 : vector<16x512xf32>
    %c9 = arith.constant 9 : index
    %c0_30 = arith.constant 0 : index
    %c0_31 = arith.constant 0 : index
    %47 = vector.load %arg1[%c9, %c0_30, %c0_31] : memref<49x16x16xbf16, #tpu.memory_space<vmem>>, vector<1x16x16xbf16>
    %48 = vector.shape_cast %47 : vector<1x16x16xbf16> to vector<16x16xbf16>
    %49 = vector.extract_strided_slice %2 {offsets = [0, 24], sizes = [16, 512], strides = [1, 1]} : vector<16x1024xbf16> to vector<16x512xbf16>
    %cst_32 = arith.constant dense<0.000000e+00> : vector<16x512xf32>
    %50 = tpu.matmul %48, %49, %cst_32 {dimension_numbers = #tpu.dot_dimension_numbers<[1], [0], [0], [1], [0, 0, 1, 1], [], []>} : vector<16x16xbf16>, vector<16x512xbf16>, vector<16x512xf32> -> vector<16x512xf32>
    %51 = arith.addf %46, %50 : vector<16x512xf32>
    %c10 = arith.constant 10 : index
    %c0_33 = arith.constant 0 : index
    %c0_34 = arith.constant 0 : index
    %52 = vector.load %arg1[%c10, %c0_33, %c0_34] : memref<49x16x16xbf16, #tpu.memory_space<vmem>>, vector<1x16x16xbf16>
    %53 = vector.shape_cast %52 : vector<1x16x16xbf16> to vector<16x16xbf16>
    %54 = vector.extract_strided_slice %2 {offsets = [0, 25], sizes = [16, 512], strides = [1, 1]} : vector<16x1024xbf16> to vector<16x512xbf16>
    %cst_35 = arith.constant dense<0.000000e+00> : vector<16x512xf32>
    %55 = tpu.matmul %53, %54, %cst_35 {dimension_numbers = #tpu.dot_dimension_numbers<[1], [0], [0], [1], [0, 0, 1, 1], [], []>} : vector<16x16xbf16>, vector<16x512xbf16>, vector<16x512xf32> -> vector<16x512xf32>
    %56 = arith.addf %51, %55 : vector<16x512xf32>
    %c11 = arith.constant 11 : index
    %c0_36 = arith.constant 0 : index
    %c0_37 = arith.constant 0 : index
    %57 = vector.load %arg1[%c11, %c0_36, %c0_37] : memref<49x16x16xbf16, #tpu.memory_space<vmem>>, vector<1x16x16xbf16>
    %58 = vector.shape_cast %57 : vector<1x16x16xbf16> to vector<16x16xbf16>
    %59 = vector.extract_strided_slice %2 {offsets = [0, 26], sizes = [16, 512], strides = [1, 1]} : vector<16x1024xbf16> to vector<16x512xbf16>
    %cst_38 = arith.constant dense<0.000000e+00> : vector<16x512xf32>
    %60 = tpu.matmul %58, %59, %cst_38 {dimension_numbers = #tpu.dot_dimension_numbers<[1], [0], [0], [1], [0, 0, 1, 1], [], []>} : vector<16x16xbf16>, vector<16x512xbf16>, vector<16x512xf32> -> vector<16x512xf32>
    %61 = arith.addf %56, %60 : vector<16x512xf32>
    %c12 = arith.constant 12 : index
    %c0_39 = arith.constant 0 : index
    %c0_40 = arith.constant 0 : index
    %62 = vector.load %arg1[%c12, %c0_39, %c0_40] : memref<49x16x16xbf16, #tpu.memory_space<vmem>>, vector<1x16x16xbf16>
    %63 = vector.shape_cast %62 : vector<1x16x16xbf16> to vector<16x16xbf16>
    %64 = vector.extract_strided_slice %2 {offsets = [0, 27], sizes = [16, 512], strides = [1, 1]} : vector<16x1024xbf16> to vector<16x512xbf16>
    %cst_41 = arith.constant dense<0.000000e+00> : vector<16x512xf32>
    %65 = tpu.matmul %63, %64, %cst_41 {dimension_numbers = #tpu.dot_dimension_numbers<[1], [0], [0], [1], [0, 0, 1, 1], [], []>} : vector<16x16xbf16>, vector<16x512xbf16>, vector<16x512xf32> -> vector<16x512xf32>
    %66 = arith.addf %61, %65 : vector<16x512xf32>
    %c13 = arith.constant 13 : index
    %c0_42 = arith.constant 0 : index
    %c0_43 = arith.constant 0 : index
    %67 = vector.load %arg1[%c13, %c0_42, %c0_43] : memref<49x16x16xbf16, #tpu.memory_space<vmem>>, vector<1x16x16xbf16>
    %68 = vector.shape_cast %67 : vector<1x16x16xbf16> to vector<16x16xbf16>
    %69 = vector.extract_strided_slice %2 {offsets = [0, 28], sizes = [16, 512], strides = [1, 1]} : vector<16x1024xbf16> to vector<16x512xbf16>
    %cst_44 = arith.constant dense<0.000000e+00> : vector<16x512xf32>
    %70 = tpu.matmul %68, %69, %cst_44 {dimension_numbers = #tpu.dot_dimension_numbers<[1], [0], [0], [1], [0, 0, 1, 1], [], []>} : vector<16x16xbf16>, vector<16x512xbf16>, vector<16x512xf32> -> vector<16x512xf32>
    %71 = arith.addf %66, %70 : vector<16x512xf32>
    %c14 = arith.constant 14 : index
    %c0_45 = arith.constant 0 : index
    %c0_46 = arith.constant 0 : index
    %72 = vector.load %arg1[%c14, %c0_45, %c0_46] : memref<49x16x16xbf16, #tpu.memory_space<vmem>>, vector<1x16x16xbf16>
    %73 = vector.shape_cast %72 : vector<1x16x16xbf16> to vector<16x16xbf16>
    %74 = vector.extract_strided_slice %2 {offsets = [0, 44], sizes = [16, 512], strides = [1, 1]} : vector<16x1024xbf16> to vector<16x512xbf16>
    %cst_47 = arith.constant dense<0.000000e+00> : vector<16x512xf32>
    %75 = tpu.matmul %73, %74, %cst_47 {dimension_numbers = #tpu.dot_dimension_numbers<[1], [0], [0], [1], [0, 0, 1, 1], [], []>} : vector<16x16xbf16>, vector<16x512xbf16>, vector<16x512xf32> -> vector<16x512xf32>
    %76 = arith.addf %71, %75 : vector<16x512xf32>
    %c15 = arith.constant 15 : index
    %c0_48 = arith.constant 0 : index
    %c0_49 = arith.constant 0 : index
    %77 = vector.load %arg1[%c15, %c0_48, %c0_49] : memref<49x16x16xbf16, #tpu.memory_space<vmem>>, vector<1x16x16xbf16>
    %78 = vector.shape_cast %77 : vector<1x16x16xbf16> to vector<16x16xbf16>
    %79 = vector.extract_strided_slice %2 {offsets = [0, 45], sizes = [16, 512], strides = [1, 1]} : vector<16x1024xbf16> to vector<16x512xbf16>
    %cst_50 = arith.constant dense<0.000000e+00> : vector<16x512xf32>
    %80 = tpu.matmul %78, %79, %cst_50 {dimension_numbers = #tpu.dot_dimension_numbers<[1], [0], [0], [1], [0, 0, 1, 1], [], []>} : vector<16x16xbf16>, vector<16x512xbf16>, vector<16x512xf32> -> vector<16x512xf32>
    %81 = arith.addf %76, %80 : vector<16x512xf32>
    %c16 = arith.constant 16 : index
    %c0_51 = arith.constant 0 : index
    %c0_52 = arith.constant 0 : index
    %82 = vector.load %arg1[%c16, %c0_51, %c0_52] : memref<49x16x16xbf16, #tpu.memory_space<vmem>>, vector<1x16x16xbf16>
    %83 = vector.shape_cast %82 : vector<1x16x16xbf16> to vector<16x16xbf16>
    %84 = vector.extract_strided_slice %2 {offsets = [0, 46], sizes = [16, 512], strides = [1, 1]} : vector<16x1024xbf16> to vector<16x512xbf16>
    %cst_53 = arith.constant dense<0.000000e+00> : vector<16x512xf32>
    %85 = tpu.matmul %83, %84, %cst_53 {dimension_numbers = #tpu.dot_dimension_numbers<[1], [0], [0], [1], [0, 0, 1, 1], [], []>} : vector<16x16xbf16>, vector<16x512xbf16>, vector<16x512xf32> -> vector<16x512xf32>
    %86 = arith.addf %81, %85 : vector<16x512xf32>
    %c17 = arith.constant 17 : index
    %c0_54 = arith.constant 0 : index
    %c0_55 = arith.constant 0 : index
    %87 = vector.load %arg1[%c17, %c0_54, %c0_55] : memref<49x16x16xbf16, #tpu.memory_space<vmem>>, vector<1x16x16xbf16>
    %88 = vector.shape_cast %87 : vector<1x16x16xbf16> to vector<16x16xbf16>
    %89 = vector.extract_strided_slice %2 {offsets = [0, 47], sizes = [16, 512], strides = [1, 1]} : vector<16x1024xbf16> to vector<16x512xbf16>
    %cst_56 = arith.constant dense<0.000000e+00> : vector<16x512xf32>
    %90 = tpu.matmul %88, %89, %cst_56 {dimension_numbers = #tpu.dot_dimension_numbers<[1], [0], [0], [1], [0, 0, 1, 1], [], []>} : vector<16x16xbf16>, vector<16x512xbf16>, vector<16x512xf32> -> vector<16x512xf32>
    %91 = arith.addf %86, %90 : vector<16x512xf32>
    %c18 = arith.constant 18 : index
    %c0_57 = arith.constant 0 : index
    %c0_58 = arith.constant 0 : index
    %92 = vector.load %arg1[%c18, %c0_57, %c0_58] : memref<49x16x16xbf16, #tpu.memory_space<vmem>>, vector<1x16x16xbf16>
    %93 = vector.shape_cast %92 : vector<1x16x16xbf16> to vector<16x16xbf16>
    %94 = vector.extract_strided_slice %2 {offsets = [0, 48], sizes = [16, 512], strides = [1, 1]} : vector<16x1024xbf16> to vector<16x512xbf16>
    %cst_59 = arith.constant dense<0.000000e+00> : vector<16x512xf32>
    %95 = tpu.matmul %93, %94, %cst_59 {dimension_numbers = #tpu.dot_dimension_numbers<[1], [0], [0], [1], [0, 0, 1, 1], [], []>} : vector<16x16xbf16>, vector<16x512xbf16>, vector<16x512xf32> -> vector<16x512xf32>
    %96 = arith.addf %91, %95 : vector<16x512xf32>
    %c19 = arith.constant 19 : index
    %c0_60 = arith.constant 0 : index
    %c0_61 = arith.constant 0 : index
    %97 = vector.load %arg1[%c19, %c0_60, %c0_61] : memref<49x16x16xbf16, #tpu.memory_space<vmem>>, vector<1x16x16xbf16>
    %98 = vector.shape_cast %97 : vector<1x16x16xbf16> to vector<16x16xbf16>
    %99 = vector.extract_strided_slice %2 {offsets = [0, 49], sizes = [16, 512], strides = [1, 1]} : vector<16x1024xbf16> to vector<16x512xbf16>
    %cst_62 = arith.constant dense<0.000000e+00> : vector<16x512xf32>
    %100 = tpu.matmul %98, %99, %cst_62 {dimension_numbers = #tpu.dot_dimension_numbers<[1], [0], [0], [1], [0, 0, 1, 1], [], []>} : vector<16x16xbf16>, vector<16x512xbf16>, vector<16x512xf32> -> vector<16x512xf32>
    %101 = arith.addf %96, %100 : vector<16x512xf32>
    %c20 = arith.constant 20 : index
    %c0_63 = arith.constant 0 : index
    %c0_64 = arith.constant 0 : index
    %102 = vector.load %arg1[%c20, %c0_63, %c0_64] : memref<49x16x16xbf16, #tpu.memory_space<vmem>>, vector<1x16x16xbf16>
    %103 = vector.shape_cast %102 : vector<1x16x16xbf16> to vector<16x16xbf16>
    %104 = vector.extract_strided_slice %2 {offsets = [0, 50], sizes = [16, 512], strides = [1, 1]} : vector<16x1024xbf16> to vector<16x512xbf16>
    %cst_65 = arith.constant dense<0.000000e+00> : vector<16x512xf32>
    %105 = tpu.matmul %103, %104, %cst_65 {dimension_numbers = #tpu.dot_dimension_numbers<[1], [0], [0], [1], [0, 0, 1, 1], [], []>} : vector<16x16xbf16>, vector<16x512xbf16>, vector<16x512xf32> -> vector<16x512xf32>
    %106 = arith.addf %101, %105 : vector<16x512xf32>
    %c21 = arith.constant 21 : index
    %c0_66 = arith.constant 0 : index
    %c0_67 = arith.constant 0 : index
    %107 = vector.load %arg1[%c21, %c0_66, %c0_67] : memref<49x16x16xbf16, #tpu.memory_space<vmem>>, vector<1x16x16xbf16>
    %108 = vector.shape_cast %107 : vector<1x16x16xbf16> to vector<16x16xbf16>
    %109 = vector.extract_strided_slice %2 {offsets = [0, 66], sizes = [16, 512], strides = [1, 1]} : vector<16x1024xbf16> to vector<16x512xbf16>
    %cst_68 = arith.constant dense<0.000000e+00> : vector<16x512xf32>
    %110 = tpu.matmul %108, %109, %cst_68 {dimension_numbers = #tpu.dot_dimension_numbers<[1], [0], [0], [1], [0, 0, 1, 1], [], []>} : vector<16x16xbf16>, vector<16x512xbf16>, vector<16x512xf32> -> vector<16x512xf32>
    %111 = arith.addf %106, %110 : vector<16x512xf32>
    %c22 = arith.constant 22 : index
    %c0_69 = arith.constant 0 : index
    %c0_70 = arith.constant 0 : index
    %112 = vector.load %arg1[%c22, %c0_69, %c0_70] : memref<49x16x16xbf16, #tpu.memory_space<vmem>>, vector<1x16x16xbf16>
    %113 = vector.shape_cast %112 : vector<1x16x16xbf16> to vector<16x16xbf16>
    %114 = vector.extract_strided_slice %2 {offsets = [0, 67], sizes = [16, 512], strides = [1, 1]} : vector<16x1024xbf16> to vector<16x512xbf16>
    %cst_71 = arith.constant dense<0.000000e+00> : vector<16x512xf32>
    %115 = tpu.matmul %113, %114, %cst_71 {dimension_numbers = #tpu.dot_dimension_numbers<[1], [0], [0], [1], [0, 0, 1, 1], [], []>} : vector<16x16xbf16>, vector<16x512xbf16>, vector<16x512xf32> -> vector<16x512xf32>
    %116 = arith.addf %111, %115 : vector<16x512xf32>
    %c23 = arith.constant 23 : index
    %c0_72 = arith.constant 0 : index
    %c0_73 = arith.constant 0 : index
    %117 = vector.load %arg1[%c23, %c0_72, %c0_73] : memref<49x16x16xbf16, #tpu.memory_space<vmem>>, vector<1x16x16xbf16>
    %118 = vector.shape_cast %117 : vector<1x16x16xbf16> to vector<16x16xbf16>
    %119 = vector.extract_strided_slice %2 {offsets = [0, 68], sizes = [16, 512], strides = [1, 1]} : vector<16x1024xbf16> to vector<16x512xbf16>
    %cst_74 = arith.constant dense<0.000000e+00> : vector<16x512xf32>
    %120 = tpu.matmul %118, %119, %cst_74 {dimension_numbers = #tpu.dot_dimension_numbers<[1], [0], [0], [1], [0, 0, 1, 1], [], []>} : vector<16x16xbf16>, vector<16x512xbf16>, vector<16x512xf32> -> vector<16x512xf32>
    %121 = arith.addf %116, %120 : vector<16x512xf32>
    %c24 = arith.constant 24 : index
    %c0_75 = arith.constant 0 : index
    %c0_76 = arith.constant 0 : index
    %122 = vector.load %arg1[%c24, %c0_75, %c0_76] : memref<49x16x16xbf16, #tpu.memory_space<vmem>>, vector<1x16x16xbf16>
    %123 = vector.shape_cast %122 : vector<1x16x16xbf16> to vector<16x16xbf16>
    %124 = vector.extract_strided_slice %2 {offsets = [0, 69], sizes = [16, 512], strides = [1, 1]} : vector<16x1024xbf16> to vector<16x512xbf16>
    %cst_77 = arith.constant dense<0.000000e+00> : vector<16x512xf32>
    %125 = tpu.matmul %123, %124, %cst_77 {dimension_numbers = #tpu.dot_dimension_numbers<[1], [0], [0], [1], [0, 0, 1, 1], [], []>} : vector<16x16xbf16>, vector<16x512xbf16>, vector<16x512xf32> -> vector<16x512xf32>
    %126 = arith.addf %121, %125 : vector<16x512xf32>
    %c25 = arith.constant 25 : index
    %c0_78 = arith.constant 0 : index
    %c0_79 = arith.constant 0 : index
    %127 = vector.load %arg1[%c25, %c0_78, %c0_79] : memref<49x16x16xbf16, #tpu.memory_space<vmem>>, vector<1x16x16xbf16>
    %128 = vector.shape_cast %127 : vector<1x16x16xbf16> to vector<16x16xbf16>
    %129 = vector.extract_strided_slice %2 {offsets = [0, 70], sizes = [16, 512], strides = [1, 1]} : vector<16x1024xbf16> to vector<16x512xbf16>
    %cst_80 = arith.constant dense<0.000000e+00> : vector<16x512xf32>
    %130 = tpu.matmul %128, %129, %cst_80 {dimension_numbers = #tpu.dot_dimension_numbers<[1], [0], [0], [1], [0, 0, 1, 1], [], []>} : vector<16x16xbf16>, vector<16x512xbf16>, vector<16x512xf32> -> vector<16x512xf32>
    %131 = arith.addf %126, %130 : vector<16x512xf32>
    %c26 = arith.constant 26 : index
    %c0_81 = arith.constant 0 : index
    %c0_82 = arith.constant 0 : index
    %132 = vector.load %arg1[%c26, %c0_81, %c0_82] : memref<49x16x16xbf16, #tpu.memory_space<vmem>>, vector<1x16x16xbf16>
    %133 = vector.shape_cast %132 : vector<1x16x16xbf16> to vector<16x16xbf16>
    %134 = vector.extract_strided_slice %2 {offsets = [0, 71], sizes = [16, 512], strides = [1, 1]} : vector<16x1024xbf16> to vector<16x512xbf16>
    %cst_83 = arith.constant dense<0.000000e+00> : vector<16x512xf32>
    %135 = tpu.matmul %133, %134, %cst_83 {dimension_numbers = #tpu.dot_dimension_numbers<[1], [0], [0], [1], [0, 0, 1, 1], [], []>} : vector<16x16xbf16>, vector<16x512xbf16>, vector<16x512xf32> -> vector<16x512xf32>
    %136 = arith.addf %131, %135 : vector<16x512xf32>
    %c27 = arith.constant 27 : index
    %c0_84 = arith.constant 0 : index
    %c0_85 = arith.constant 0 : index
    %137 = vector.load %arg1[%c27, %c0_84, %c0_85] : memref<49x16x16xbf16, #tpu.memory_space<vmem>>, vector<1x16x16xbf16>
    %138 = vector.shape_cast %137 : vector<1x16x16xbf16> to vector<16x16xbf16>
    %139 = vector.extract_strided_slice %2 {offsets = [0, 72], sizes = [16, 512], strides = [1, 1]} : vector<16x1024xbf16> to vector<16x512xbf16>
    %cst_86 = arith.constant dense<0.000000e+00> : vector<16x512xf32>
    %140 = tpu.matmul %138, %139, %cst_86 {dimension_numbers = #tpu.dot_dimension_numbers<[1], [0], [0], [1], [0, 0, 1, 1], [], []>} : vector<16x16xbf16>, vector<16x512xbf16>, vector<16x512xf32> -> vector<16x512xf32>
    %141 = arith.addf %136, %140 : vector<16x512xf32>
    %c28 = arith.constant 28 : index
    %c0_87 = arith.constant 0 : index
    %c0_88 = arith.constant 0 : index
    %142 = vector.load %arg1[%c28, %c0_87, %c0_88] : memref<49x16x16xbf16, #tpu.memory_space<vmem>>, vector<1x16x16xbf16>
    %143 = vector.shape_cast %142 : vector<1x16x16xbf16> to vector<16x16xbf16>
    %144 = vector.extract_strided_slice %2 {offsets = [0, 88], sizes = [16, 512], strides = [1, 1]} : vector<16x1024xbf16> to vector<16x512xbf16>
    %cst_89 = arith.constant dense<0.000000e+00> : vector<16x512xf32>
    %145 = tpu.matmul %143, %144, %cst_89 {dimension_numbers = #tpu.dot_dimension_numbers<[1], [0], [0], [1], [0, 0, 1, 1], [], []>} : vector<16x16xbf16>, vector<16x512xbf16>, vector<16x512xf32> -> vector<16x512xf32>
    %146 = arith.addf %141, %145 : vector<16x512xf32>
    %c29 = arith.constant 29 : index
    %c0_90 = arith.constant 0 : index
    %c0_91 = arith.constant 0 : index
    %147 = vector.load %arg1[%c29, %c0_90, %c0_91] : memref<49x16x16xbf16, #tpu.memory_space<vmem>>, vector<1x16x16xbf16>
    %148 = vector.shape_cast %147 : vector<1x16x16xbf16> to vector<16x16xbf16>
    %149 = vector.extract_strided_slice %2 {offsets = [0, 89], sizes = [16, 512], strides = [1, 1]} : vector<16x1024xbf16> to vector<16x512xbf16>
    %cst_92 = arith.constant dense<0.000000e+00> : vector<16x512xf32>
    %150 = tpu.matmul %148, %149, %cst_92 {dimension_numbers = #tpu.dot_dimension_numbers<[1], [0], [0], [1], [0, 0, 1, 1], [], []>} : vector<16x16xbf16>, vector<16x512xbf16>, vector<16x512xf32> -> vector<16x512xf32>
    %151 = arith.addf %146, %150 : vector<16x512xf32>
    %c30 = arith.constant 30 : index
    %c0_93 = arith.constant 0 : index
    %c0_94 = arith.constant 0 : index
    %152 = vector.load %arg1[%c30, %c0_93, %c0_94] : memref<49x16x16xbf16, #tpu.memory_space<vmem>>, vector<1x16x16xbf16>
    %153 = vector.shape_cast %152 : vector<1x16x16xbf16> to vector<16x16xbf16>
    %154 = vector.extract_strided_slice %2 {offsets = [0, 90], sizes = [16, 512], strides = [1, 1]} : vector<16x1024xbf16> to vector<16x512xbf16>
    %cst_95 = arith.constant dense<0.000000e+00> : vector<16x512xf32>
    %155 = tpu.matmul %153, %154, %cst_95 {dimension_numbers = #tpu.dot_dimension_numbers<[1], [0], [0], [1], [0, 0, 1, 1], [], []>} : vector<16x16xbf16>, vector<16x512xbf16>, vector<16x512xf32> -> vector<16x512xf32>
    %156 = arith.addf %151, %155 : vector<16x512xf32>
    %c31 = arith.constant 31 : index
    %c0_96 = arith.constant 0 : index
    %c0_97 = arith.constant 0 : index
    %157 = vector.load %arg1[%c31, %c0_96, %c0_97] : memref<49x16x16xbf16, #tpu.memory_space<vmem>>, vector<1x16x16xbf16>
    %158 = vector.shape_cast %157 : vector<1x16x16xbf16> to vector<16x16xbf16>
    %159 = vector.extract_strided_slice %2 {offsets = [0, 91], sizes = [16, 512], strides = [1, 1]} : vector<16x1024xbf16> to vector<16x512xbf16>
    %cst_98 = arith.constant dense<0.000000e+00> : vector<16x512xf32>
    %160 = tpu.matmul %158, %159, %cst_98 {dimension_numbers = #tpu.dot_dimension_numbers<[1], [0], [0], [1], [0, 0, 1, 1], [], []>} : vector<16x16xbf16>, vector<16x512xbf16>, vector<16x512xf32> -> vector<16x512xf32>
    %161 = arith.addf %156, %160 : vector<16x512xf32>
    %c32 = arith.constant 32 : index
    %c0_99 = arith.constant 0 : index
    %c0_100 = arith.constant 0 : index
    %162 = vector.load %arg1[%c32, %c0_99, %c0_100] : memref<49x16x16xbf16, #tpu.memory_space<vmem>>, vector<1x16x16xbf16>
    %163 = vector.shape_cast %162 : vector<1x16x16xbf16> to vector<16x16xbf16>
    %164 = vector.extract_strided_slice %2 {offsets = [0, 92], sizes = [16, 512], strides = [1, 1]} : vector<16x1024xbf16> to vector<16x512xbf16>
    %cst_101 = arith.constant dense<0.000000e+00> : vector<16x512xf32>
    %165 = tpu.matmul %163, %164, %cst_101 {dimension_numbers = #tpu.dot_dimension_numbers<[1], [0], [0], [1], [0, 0, 1, 1], [], []>} : vector<16x16xbf16>, vector<16x512xbf16>, vector<16x512xf32> -> vector<16x512xf32>
    %166 = arith.addf %161, %165 : vector<16x512xf32>
    %c33 = arith.constant 33 : index
    %c0_102 = arith.constant 0 : index
    %c0_103 = arith.constant 0 : index
    %167 = vector.load %arg1[%c33, %c0_102, %c0_103] : memref<49x16x16xbf16, #tpu.memory_space<vmem>>, vector<1x16x16xbf16>
    %168 = vector.shape_cast %167 : vector<1x16x16xbf16> to vector<16x16xbf16>
    %169 = vector.extract_strided_slice %2 {offsets = [0, 93], sizes = [16, 512], strides = [1, 1]} : vector<16x1024xbf16> to vector<16x512xbf16>
    %cst_104 = arith.constant dense<0.000000e+00> : vector<16x512xf32>
    %170 = tpu.matmul %168, %169, %cst_104 {dimension_numbers = #tpu.dot_dimension_numbers<[1], [0], [0], [1], [0, 0, 1, 1], [], []>} : vector<16x16xbf16>, vector<16x512xbf16>, vector<16x512xf32> -> vector<16x512xf32>
    %171 = arith.addf %166, %170 : vector<16x512xf32>
    %c34 = arith.constant 34 : index
    %c0_105 = arith.constant 0 : index
    %c0_106 = arith.constant 0 : index
    %172 = vector.load %arg1[%c34, %c0_105, %c0_106] : memref<49x16x16xbf16, #tpu.memory_space<vmem>>, vector<1x16x16xbf16>
    %173 = vector.shape_cast %172 : vector<1x16x16xbf16> to vector<16x16xbf16>
    %174 = vector.extract_strided_slice %2 {offsets = [0, 94], sizes = [16, 512], strides = [1, 1]} : vector<16x1024xbf16> to vector<16x512xbf16>
    %cst_107 = arith.constant dense<0.000000e+00> : vector<16x512xf32>
    %175 = tpu.matmul %173, %174, %cst_107 {dimension_numbers = #tpu.dot_dimension_numbers<[1], [0], [0], [1], [0, 0, 1, 1], [], []>} : vector<16x16xbf16>, vector<16x512xbf16>, vector<16x512xf32> -> vector<16x512xf32>
    %176 = arith.addf %171, %175 : vector<16x512xf32>
    %c35 = arith.constant 35 : index
    %c0_108 = arith.constant 0 : index
    %c0_109 = arith.constant 0 : index
    %177 = vector.load %arg1[%c35, %c0_108, %c0_109] : memref<49x16x16xbf16, #tpu.memory_space<vmem>>, vector<1x16x16xbf16>
    %178 = vector.shape_cast %177 : vector<1x16x16xbf16> to vector<16x16xbf16>
    %179 = vector.extract_strided_slice %2 {offsets = [0, 110], sizes = [16, 512], strides = [1, 1]} : vector<16x1024xbf16> to vector<16x512xbf16>
    %cst_110 = arith.constant dense<0.000000e+00> : vector<16x512xf32>
    %180 = tpu.matmul %178, %179, %cst_110 {dimension_numbers = #tpu.dot_dimension_numbers<[1], [0], [0], [1], [0, 0, 1, 1], [], []>} : vector<16x16xbf16>, vector<16x512xbf16>, vector<16x512xf32> -> vector<16x512xf32>
    %181 = arith.addf %176, %180 : vector<16x512xf32>
    %c36 = arith.constant 36 : index
    %c0_111 = arith.constant 0 : index
    %c0_112 = arith.constant 0 : index
    %182 = vector.load %arg1[%c36, %c0_111, %c0_112] : memref<49x16x16xbf16, #tpu.memory_space<vmem>>, vector<1x16x16xbf16>
    %183 = vector.shape_cast %182 : vector<1x16x16xbf16> to vector<16x16xbf16>
    %184 = vector.extract_strided_slice %2 {offsets = [0, 111], sizes = [16, 512], strides = [1, 1]} : vector<16x1024xbf16> to vector<16x512xbf16>
    %cst_113 = arith.constant dense<0.000000e+00> : vector<16x512xf32>
    %185 = tpu.matmul %183, %184, %cst_113 {dimension_numbers = #tpu.dot_dimension_numbers<[1], [0], [0], [1], [0, 0, 1, 1], [], []>} : vector<16x16xbf16>, vector<16x512xbf16>, vector<16x512xf32> -> vector<16x512xf32>
    %186 = arith.addf %181, %185 : vector<16x512xf32>
    %c37 = arith.constant 37 : index
    %c0_114 = arith.constant 0 : index
    %c0_115 = arith.constant 0 : index
    %187 = vector.load %arg1[%c37, %c0_114, %c0_115] : memref<49x16x16xbf16, #tpu.memory_space<vmem>>, vector<1x16x16xbf16>
    %188 = vector.shape_cast %187 : vector<1x16x16xbf16> to vector<16x16xbf16>
    %189 = vector.extract_strided_slice %2 {offsets = [0, 112], sizes = [16, 512], strides = [1, 1]} : vector<16x1024xbf16> to vector<16x512xbf16>
    %cst_116 = arith.constant dense<0.000000e+00> : vector<16x512xf32>
    %190 = tpu.matmul %188, %189, %cst_116 {dimension_numbers = #tpu.dot_dimension_numbers<[1], [0], [0], [1], [0, 0, 1, 1], [], []>} : vector<16x16xbf16>, vector<16x512xbf16>, vector<16x512xf32> -> vector<16x512xf32>
    %191 = arith.addf %186, %190 : vector<16x512xf32>
    %c38 = arith.constant 38 : index
    %c0_117 = arith.constant 0 : index
    %c0_118 = arith.constant 0 : index
    %192 = vector.load %arg1[%c38, %c0_117, %c0_118] : memref<49x16x16xbf16, #tpu.memory_space<vmem>>, vector<1x16x16xbf16>
    %193 = vector.shape_cast %192 : vector<1x16x16xbf16> to vector<16x16xbf16>
    %194 = vector.extract_strided_slice %2 {offsets = [0, 113], sizes = [16, 512], strides = [1, 1]} : vector<16x1024xbf16> to vector<16x512xbf16>
    %cst_119 = arith.constant dense<0.000000e+00> : vector<16x512xf32>
    %195 = tpu.matmul %193, %194, %cst_119 {dimension_numbers = #tpu.dot_dimension_numbers<[1], [0], [0], [1], [0, 0, 1, 1], [], []>} : vector<16x16xbf16>, vector<16x512xbf16>, vector<16x512xf32> -> vector<16x512xf32>
    %196 = arith.addf %191, %195 : vector<16x512xf32>
    %c39 = arith.constant 39 : index
    %c0_120 = arith.constant 0 : index
    %c0_121 = arith.constant 0 : index
    %197 = vector.load %arg1[%c39, %c0_120, %c0_121] : memref<49x16x16xbf16, #tpu.memory_space<vmem>>, vector<1x16x16xbf16>
    %198 = vector.shape_cast %197 : vector<1x16x16xbf16> to vector<16x16xbf16>
    %199 = vector.extract_strided_slice %2 {offsets = [0, 114], sizes = [16, 512], strides = [1, 1]} : vector<16x1024xbf16> to vector<16x512xbf16>
    %cst_122 = arith.constant dense<0.000000e+00> : vector<16x512xf32>
    %200 = tpu.matmul %198, %199, %cst_122 {dimension_numbers = #tpu.dot_dimension_numbers<[1], [0], [0], [1], [0, 0, 1, 1], [], []>} : vector<16x16xbf16>, vector<16x512xbf16>, vector<16x512xf32> -> vector<16x512xf32>
    %201 = arith.addf %196, %200 : vector<16x512xf32>
    %c40 = arith.constant 40 : index
    %c0_123 = arith.constant 0 : index
    %c0_124 = arith.constant 0 : index
    %202 = vector.load %arg1[%c40, %c0_123, %c0_124] : memref<49x16x16xbf16, #tpu.memory_space<vmem>>, vector<1x16x16xbf16>
    %203 = vector.shape_cast %202 : vector<1x16x16xbf16> to vector<16x16xbf16>
    %204 = vector.extract_strided_slice %2 {offsets = [0, 115], sizes = [16, 512], strides = [1, 1]} : vector<16x1024xbf16> to vector<16x512xbf16>
    %cst_125 = arith.constant dense<0.000000e+00> : vector<16x512xf32>
    %205 = tpu.matmul %203, %204, %cst_125 {dimension_numbers = #tpu.dot_dimension_numbers<[1], [0], [0], [1], [0, 0, 1, 1], [], []>} : vector<16x16xbf16>, vector<16x512xbf16>, vector<16x512xf32> -> vector<16x512xf32>
    %206 = arith.addf %201, %205 : vector<16x512xf32>
    %c41 = arith.constant 41 : index
    %c0_126 = arith.constant 0 : index
    %c0_127 = arith.constant 0 : index
    %207 = vector.load %arg1[%c41, %c0_126, %c0_127] : memref<49x16x16xbf16, #tpu.memory_space<vmem>>, vector<1x16x16xbf16>
    %208 = vector.shape_cast %207 : vector<1x16x16xbf16> to vector<16x16xbf16>
    %209 = vector.extract_strided_slice %2 {offsets = [0, 116], sizes = [16, 512], strides = [1, 1]} : vector<16x1024xbf16> to vector<16x512xbf16>
    %cst_128 = arith.constant dense<0.000000e+00> : vector<16x512xf32>
    %210 = tpu.matmul %208, %209, %cst_128 {dimension_numbers = #tpu.dot_dimension_numbers<[1], [0], [0], [1], [0, 0, 1, 1], [], []>} : vector<16x16xbf16>, vector<16x512xbf16>, vector<16x512xf32> -> vector<16x512xf32>
    %211 = arith.addf %206, %210 : vector<16x512xf32>
    %c42 = arith.constant 42 : index
    %c0_129 = arith.constant 0 : index
    %c0_130 = arith.constant 0 : index
    %212 = vector.load %arg1[%c42, %c0_129, %c0_130] : memref<49x16x16xbf16, #tpu.memory_space<vmem>>, vector<1x16x16xbf16>
    %213 = vector.shape_cast %212 : vector<1x16x16xbf16> to vector<16x16xbf16>
    %214 = vector.extract_strided_slice %2 {offsets = [0, 132], sizes = [16, 512], strides = [1, 1]} : vector<16x1024xbf16> to vector<16x512xbf16>
    %cst_131 = arith.constant dense<0.000000e+00> : vector<16x512xf32>
    %215 = tpu.matmul %213, %214, %cst_131 {dimension_numbers = #tpu.dot_dimension_numbers<[1], [0], [0], [1], [0, 0, 1, 1], [], []>} : vector<16x16xbf16>, vector<16x512xbf16>, vector<16x512xf32> -> vector<16x512xf32>
    %216 = arith.addf %211, %215 : vector<16x512xf32>
    %c43 = arith.constant 43 : index
    %c0_132 = arith.constant 0 : index
    %c0_133 = arith.constant 0 : index
    %217 = vector.load %arg1[%c43, %c0_132, %c0_133] : memref<49x16x16xbf16, #tpu.memory_space<vmem>>, vector<1x16x16xbf16>
    %218 = vector.shape_cast %217 : vector<1x16x16xbf16> to vector<16x16xbf16>
    %219 = vector.extract_strided_slice %2 {offsets = [0, 133], sizes = [16, 512], strides = [1, 1]} : vector<16x1024xbf16> to vector<16x512xbf16>
    %cst_134 = arith.constant dense<0.000000e+00> : vector<16x512xf32>
    %220 = tpu.matmul %218, %219, %cst_134 {dimension_numbers = #tpu.dot_dimension_numbers<[1], [0], [0], [1], [0, 0, 1, 1], [], []>} : vector<16x16xbf16>, vector<16x512xbf16>, vector<16x512xf32> -> vector<16x512xf32>
    %221 = arith.addf %216, %220 : vector<16x512xf32>
    %c44 = arith.constant 44 : index
    %c0_135 = arith.constant 0 : index
    %c0_136 = arith.constant 0 : index
    %222 = vector.load %arg1[%c44, %c0_135, %c0_136] : memref<49x16x16xbf16, #tpu.memory_space<vmem>>, vector<1x16x16xbf16>
    %223 = vector.shape_cast %222 : vector<1x16x16xbf16> to vector<16x16xbf16>
    %224 = vector.extract_strided_slice %2 {offsets = [0, 134], sizes = [16, 512], strides = [1, 1]} : vector<16x1024xbf16> to vector<16x512xbf16>
    %cst_137 = arith.constant dense<0.000000e+00> : vector<16x512xf32>
    %225 = tpu.matmul %223, %224, %cst_137 {dimension_numbers = #tpu.dot_dimension_numbers<[1], [0], [0], [1], [0, 0, 1, 1], [], []>} : vector<16x16xbf16>, vector<16x512xbf16>, vector<16x512xf32> -> vector<16x512xf32>
    %226 = arith.addf %221, %225 : vector<16x512xf32>
    %c45 = arith.constant 45 : index
    %c0_138 = arith.constant 0 : index
    %c0_139 = arith.constant 0 : index
    %227 = vector.load %arg1[%c45, %c0_138, %c0_139] : memref<49x16x16xbf16, #tpu.memory_space<vmem>>, vector<1x16x16xbf16>
    %228 = vector.shape_cast %227 : vector<1x16x16xbf16> to vector<16x16xbf16>
    %229 = vector.extract_strided_slice %2 {offsets = [0, 135], sizes = [16, 512], strides = [1, 1]} : vector<16x1024xbf16> to vector<16x512xbf16>
    %cst_140 = arith.constant dense<0.000000e+00> : vector<16x512xf32>
    %230 = tpu.matmul %228, %229, %cst_140 {dimension_numbers = #tpu.dot_dimension_numbers<[1], [0], [0], [1], [0, 0, 1, 1], [], []>} : vector<16x16xbf16>, vector<16x512xbf16>, vector<16x512xf32> -> vector<16x512xf32>
    %231 = arith.addf %226, %230 : vector<16x512xf32>
    %c46 = arith.constant 46 : index
    %c0_141 = arith.constant 0 : index
    %c0_142 = arith.constant 0 : index
    %232 = vector.load %arg1[%c46, %c0_141, %c0_142] : memref<49x16x16xbf16, #tpu.memory_space<vmem>>, vector<1x16x16xbf16>
    %233 = vector.shape_cast %232 : vector<1x16x16xbf16> to vector<16x16xbf16>
    %234 = vector.extract_strided_slice %2 {offsets = [0, 136], sizes = [16, 512], strides = [1, 1]} : vector<16x1024xbf16> to vector<16x512xbf16>
    %cst_143 = arith.constant dense<0.000000e+00> : vector<16x512xf32>
    %235 = tpu.matmul %233, %234, %cst_143 {dimension_numbers = #tpu.dot_dimension_numbers<[1], [0], [0], [1], [0, 0, 1, 1], [], []>} : vector<16x16xbf16>, vector<16x512xbf16>, vector<16x512xf32> -> vector<16x512xf32>
    %236 = arith.addf %231, %235 : vector<16x512xf32>
    %c47 = arith.constant 47 : index
    %c0_144 = arith.constant 0 : index
    %c0_145 = arith.constant 0 : index
    %237 = vector.load %arg1[%c47, %c0_144, %c0_145] : memref<49x16x16xbf16, #tpu.memory_space<vmem>>, vector<1x16x16xbf16>
    %238 = vector.shape_cast %237 : vector<1x16x16xbf16> to vector<16x16xbf16>
    %239 = vector.extract_strided_slice %2 {offsets = [0, 137], sizes = [16, 512], strides = [1, 1]} : vector<16x1024xbf16> to vector<16x512xbf16>
    %cst_146 = arith.constant dense<0.000000e+00> : vector<16x512xf32>
    %240 = tpu.matmul %238, %239, %cst_146 {dimension_numbers = #tpu.dot_dimension_numbers<[1], [0], [0], [1], [0, 0, 1, 1], [], []>} : vector<16x16xbf16>, vector<16x512xbf16>, vector<16x512xf32> -> vector<16x512xf32>
    %241 = arith.addf %236, %240 : vector<16x512xf32>
    %c48 = arith.constant 48 : index
    %c0_147 = arith.constant 0 : index
    %c0_148 = arith.constant 0 : index
    %242 = vector.load %arg1[%c48, %c0_147, %c0_148] : memref<49x16x16xbf16, #tpu.memory_space<vmem>>, vector<1x16x16xbf16>
    %243 = vector.shape_cast %242 : vector<1x16x16xbf16> to vector<16x16xbf16>
    %244 = vector.extract_strided_slice %2 {offsets = [0, 138], sizes = [16, 512], strides = [1, 1]} : vector<16x1024xbf16> to vector<16x512xbf16>
    %cst_149 = arith.constant dense<0.000000e+00> : vector<16x512xf32>
    %245 = tpu.matmul %243, %244, %cst_149 {dimension_numbers = #tpu.dot_dimension_numbers<[1], [0], [0], [1], [0, 0, 1, 1], [], []>} : vector<16x16xbf16>, vector<16x512xbf16>, vector<16x512xf32> -> vector<16x512xf32>
    %246 = arith.addf %241, %245 : vector<16x512xf32>
    %247 = arith.truncf %246 : vector<16x512xf32> to vector<16x512xbf16>
    %c0_150 = arith.constant 0 : index
    %c0_151 = arith.constant 0 : index
    %248 = vector.load %arg5[%c0_150, %c0_151] : memref<16x512xbf16, #tpu.memory_space<vmem>>, vector<16x512xbf16>
    tpu.vector_store %arg5[%c0_150, %c0_151], %247 {strides = array<i32>} : memref<16x512xbf16, #tpu.memory_space<vmem>>, vector<16x512xbf16>,
    %c0_152 = arith.constant 0 : index
    %c0_153 = arith.constant 0 : index
    %249 = vector.load %arg4[%c0_152, %c0_153] : memref<1x512xf32, #tpu.memory_space<vmem>>, vector<1x512xf32>
    %250 = vector.broadcast %249 : vector<1x512xf32> to vector<16x512xf32>
    %251 = arith.mulf %246, %250 : vector<16x512xf32>
    %cst_154 = arith.constant dense<0.000000e+00> : vector<16xf32>
    %252 = vector.multi_reduction <add>, %251, %cst_154 [1] : vector<16x512xf32> to vector<16xf32>
    %253 = vector.shape_cast %252 : vector<16xf32> to vector<16x1xf32>
    %254 = arith.mulf %251, %246 : vector<16x512xf32>
    %cst_155 = arith.constant dense<0.000000e+00> : vector<16xf32>
    %255 = vector.multi_reduction <add>, %254, %cst_155 [1] : vector<16x512xf32> to vector<16xf32>
    %256 = vector.shape_cast %255 : vector<16xf32> to vector<16x1xf32>
    %257 = tpu.concatenate %253, %256 in 1 : vector<16x1xf32>, vector<16x1xf32> -> vector<16x2xf32>
    %c0_156 = arith.constant 0 : index
    %c0_157 = arith.constant 0 : index
    %c0_158 = arith.constant 0 : index
    %258 = vector.load %arg6[%c0_156, %c0_157, %c0_158] : memref<1x16x2xf32, #tpu.memory_space<vmem>>, vector<1x16x2xf32>
    %259 = vector.shape_cast %258 : vector<1x16x2xf32> to vector<16x2xf32>
    %260 = vector.shape_cast %257 : vector<16x2xf32> to vector<1x16x2xf32>
    tpu.vector_store %arg6[%c0_156, %c0_157, %c0_158], %260 {strides = array<i32>} : memref<1x16x2xf32, #tpu.memory_space<vmem>>, vector<1x16x2xf32>,
    return
  }
  func.func @transform_0(%arg0: i32) -> (i32, i32, i32) {
    %c0_i32 = arith.constant 0 : i32
    %c0_i32_0 = arith.constant 0 : i32
    %c0_i32_1 = arith.constant 0 : i32
    %c0_i32_2 = arith.constant 0 : i32
    return %c0_i32, %c0_i32_0, %c0_i32_1 : i32, i32, i32
  }
  func.func @transform_1(%arg0: i32) -> (i32, i32) {
    %c0_i32 = arith.constant 0 : i32
    %c0_i32_0 = arith.constant 0 : i32
    return %c0_i32, %arg0 : i32, i32
  }
  func.func @transform_2(%arg0: i32) -> (i32, i32) {
    %c1_i32 = arith.constant 1 : i32
    %0 = arith.addi %arg0, %c1_i32 : i32
    %c0_i32 = arith.constant 0 : i32
    %c0_i32_0 = arith.constant 0 : i32
    return %c0_i32, %0 : i32, i32
  }
  func.func @transform_3(%arg0: i32) -> (i32, i32) {
    %c0_i32 = arith.constant 0 : i32
    %c0_i32_0 = arith.constant 0 : i32
    return %c0_i32, %arg0 : i32, i32
  }
  func.func @transform_4(%arg0: i32) -> (i32, i32) {
    %c0_i32 = arith.constant 0 : i32
    %c0_i32_0 = arith.constant 0 : i32
    return %c0_i32, %arg0 : i32, i32
  }
  func.func @transform_5(%arg0: i32) -> (i32, i32, i32) {
    %c0_i32 = arith.constant 0 : i32
    %c0_i32_0 = arith.constant 0 : i32
    %c0_i32_1 = arith.constant 0 : i32
    return %arg0, %c0_i32, %c0_i32_0 : i32, i32, i32
  }
}

module attributes {stable_mosaic.version = 11 : i64} {
  func.func @_affine_kernel(%arg0: i32, %arg1: memref<16x512xbf16, #tpu.memory_space<vmem>>, %arg2: memref<16x1xf32, #tpu.memory_space<vmem>>, %arg3: memref<16x1xf32, #tpu.memory_space<vmem>>, %arg4: memref<16x512xbf16, #tpu.memory_space<vmem>>) attributes {dimension_semantics = [#tpu.dimension_semantics<parallel>], iteration_bounds = array<i64: 2>, scalar_prefetch = 0 : i64, scratch_operands = 0 : i64, tpu.core_type = #tpu.core_type<tc>, window_params = [{transform_indices = @transform_0, window_bounds = array<i64: 16, 512>}, {pipeline_mode = #tpu.pipeline_mode<synchronous>, transform_indices = @transform_1, window_bounds = array<i64: 16, 1>}, {pipeline_mode = #tpu.pipeline_mode<synchronous>, transform_indices = @transform_2, window_bounds = array<i64: 16, 1>}, {transform_indices = @transform_3, window_bounds = array<i64: 16, 512>}]} {
    %c0 = arith.constant 0 : index
    %c0_0 = arith.constant 0 : index
    %0 = vector.load %arg1[%c0, %c0_0] : memref<16x512xbf16, #tpu.memory_space<vmem>>, vector<16x512xbf16>
    %1 = arith.extf %0 : vector<16x512xbf16> to vector<16x512xf32>
    %c0_1 = arith.constant 0 : index
    %c0_2 = arith.constant 0 : index
    %2 = vector.load %arg2[%c0_1, %c0_2] : memref<16x1xf32, #tpu.memory_space<vmem>>, vector<16x1xf32>
    %3 = vector.broadcast %2 : vector<16x1xf32> to vector<16x512xf32>
    %4 = arith.mulf %1, %3 : vector<16x512xf32>
    %c0_3 = arith.constant 0 : index
    %c0_4 = arith.constant 0 : index
    %5 = vector.load %arg3[%c0_3, %c0_4] : memref<16x1xf32, #tpu.memory_space<vmem>>, vector<16x1xf32>
    %6 = vector.broadcast %5 : vector<16x1xf32> to vector<16x512xf32>
    %7 = arith.addf %4, %6 : vector<16x512xf32>
    %cst = arith.constant 0.000000e+00 : f32
    %8 = vector.broadcast %cst : f32 to vector<16x512xf32>
    %9 = arith.maximumf %7, %8 : vector<16x512xf32>
    %10 = arith.truncf %9 : vector<16x512xf32> to vector<16x512xbf16>
    %c0_5 = arith.constant 0 : index
    %c0_6 = arith.constant 0 : index
    %11 = vector.load %arg4[%c0_5, %c0_6] : memref<16x512xbf16, #tpu.memory_space<vmem>>, vector<16x512xbf16>
    tpu.vector_store %arg4[%c0_5, %c0_6], %10 {strides = array<i32>} : memref<16x512xbf16, #tpu.memory_space<vmem>>, vector<16x512xbf16>,
    return
  }
  func.func @transform_0(%arg0: i32) -> (i32, i32) {
    %c0_i32 = arith.constant 0 : i32
    %c0_i32_0 = arith.constant 0 : i32
    return %c0_i32, %arg0 : i32, i32
  }
  func.func @transform_1(%arg0: i32) -> (i32, i32) {
    %c0_i32 = arith.constant 0 : i32
    %c0_i32_0 = arith.constant 0 : i32
    %c0_i32_1 = arith.constant 0 : i32
    return %c0_i32, %c0_i32_0 : i32, i32
  }
  func.func @transform_2(%arg0: i32) -> (i32, i32) {
    %c0_i32 = arith.constant 0 : i32
    %c0_i32_0 = arith.constant 0 : i32
    %c0_i32_1 = arith.constant 0 : i32
    return %c0_i32, %c0_i32_0 : i32, i32
  }
  func.func @transform_3(%arg0: i32) -> (i32, i32) {
    %c0_i32 = arith.constant 0 : i32
    %c0_i32_0 = arith.constant 0 : i32
    return %c0_i32, %arg0 : i32, i32
  }
}

module attributes {stable_mosaic.version = 11 : i64} {
  func.func @_affine_kernel(%arg0: i32, %arg1: memref<16x256xbf16, #tpu.memory_space<vmem>>, %arg2: memref<16x1xf32, #tpu.memory_space<vmem>>, %arg3: memref<16x1xf32, #tpu.memory_space<vmem>>, %arg4: memref<16x256xbf16, #tpu.memory_space<vmem>>) attributes {dimension_semantics = [#tpu.dimension_semantics<parallel>], iteration_bounds = array<i64: 1>, scalar_prefetch = 0 : i64, scratch_operands = 0 : i64, tpu.core_type = #tpu.core_type<tc>, window_params = [{transform_indices = @transform_0, window_bounds = array<i64: 16, 256>}, {pipeline_mode = #tpu.pipeline_mode<synchronous>, transform_indices = @transform_1, window_bounds = array<i64: 16, 1>}, {pipeline_mode = #tpu.pipeline_mode<synchronous>, transform_indices = @transform_2, window_bounds = array<i64: 16, 1>}, {transform_indices = @transform_3, window_bounds = array<i64: 16, 256>}]} {
    %c0 = arith.constant 0 : index
    %c0_0 = arith.constant 0 : index
    %0 = vector.load %arg1[%c0, %c0_0] : memref<16x256xbf16, #tpu.memory_space<vmem>>, vector<16x256xbf16>
    %1 = arith.extf %0 : vector<16x256xbf16> to vector<16x256xf32>
    %c0_1 = arith.constant 0 : index
    %c0_2 = arith.constant 0 : index
    %2 = vector.load %arg2[%c0_1, %c0_2] : memref<16x1xf32, #tpu.memory_space<vmem>>, vector<16x1xf32>
    %3 = vector.broadcast %2 : vector<16x1xf32> to vector<16x256xf32>
    %4 = arith.mulf %1, %3 : vector<16x256xf32>
    %c0_3 = arith.constant 0 : index
    %c0_4 = arith.constant 0 : index
    %5 = vector.load %arg3[%c0_3, %c0_4] : memref<16x1xf32, #tpu.memory_space<vmem>>, vector<16x1xf32>
    %6 = vector.broadcast %5 : vector<16x1xf32> to vector<16x256xf32>
    %7 = arith.addf %4, %6 : vector<16x256xf32>
    %cst = arith.constant 0.000000e+00 : f32
    %8 = vector.broadcast %cst : f32 to vector<16x256xf32>
    %9 = arith.maximumf %7, %8 : vector<16x256xf32>
    %10 = arith.truncf %9 : vector<16x256xf32> to vector<16x256xbf16>
    %c0_5 = arith.constant 0 : index
    %c0_6 = arith.constant 0 : index
    %11 = vector.load %arg4[%c0_5, %c0_6] : memref<16x256xbf16, #tpu.memory_space<vmem>>, vector<16x256xbf16>
    tpu.vector_store %arg4[%c0_5, %c0_6], %10 {strides = array<i32>} : memref<16x256xbf16, #tpu.memory_space<vmem>>, vector<16x256xbf16>,
    return
  }
  func.func @transform_0(%arg0: i32) -> (i32, i32) {
    %c0_i32 = arith.constant 0 : i32
    %c0_i32_0 = arith.constant 0 : i32
    return %c0_i32, %arg0 : i32, i32
  }
  func.func @transform_1(%arg0: i32) -> (i32, i32) {
    %c0_i32 = arith.constant 0 : i32
    %c0_i32_0 = arith.constant 0 : i32
    %c0_i32_1 = arith.constant 0 : i32
    return %c0_i32, %c0_i32_0 : i32, i32
  }
  func.func @transform_2(%arg0: i32) -> (i32, i32) {
    %c0_i32 = arith.constant 0 : i32
    %c0_i32_0 = arith.constant 0 : i32
    %c0_i32_1 = arith.constant 0 : i32
    return %c0_i32, %c0_i32_0 : i32, i32
  }
  func.func @transform_3(%arg0: i32) -> (i32, i32) {
    %c0_i32 = arith.constant 0 : i32
    %c0_i32_0 = arith.constant 0 : i32
    return %c0_i32, %arg0 : i32, i32
  }
}

module attributes {stable_mosaic.version = 11 : i64} {
  func.func @_conv_stats_kernel(%arg0: i32, %arg1: memref<4x16x32xbf16, #tpu.memory_space<vmem>>, %arg2: memref<32x256xbf16, #tpu.memory_space<vmem>>, %arg3: memref<32x256xbf16, #tpu.memory_space<vmem>>, %arg4: memref<1x256xf32, #tpu.memory_space<vmem>>, %arg5: memref<16x256xbf16, #tpu.memory_space<vmem>>, %arg6: memref<1x16x2xf32, #tpu.memory_space<vmem>>) attributes {dimension_semantics = [#tpu.dimension_semantics<parallel>], iteration_bounds = array<i64: 1>, scalar_prefetch = 0 : i64, scratch_operands = 0 : i64, tpu.core_type = #tpu.core_type<tc>, window_params = [{pipeline_mode = #tpu.pipeline_mode<synchronous>, transform_indices = @transform_0, window_bounds = array<i64: 4, 16, 32>}, {transform_indices = @transform_1, window_bounds = array<i64: 32, 256>}, {transform_indices = @transform_2, window_bounds = array<i64: 32, 256>}, {transform_indices = @transform_3, window_bounds = array<i64: 1, 256>}, {transform_indices = @transform_4, window_bounds = array<i64: 16, 256>}, {transform_indices = @transform_5, window_bounds = array<i64: 1, 16, 2>}]} {
    %c0 = arith.constant 0 : index
    %c0_0 = arith.constant 0 : index
    %0 = vector.load %arg2[%c0, %c0_0] : memref<32x256xbf16, #tpu.memory_space<vmem>>, vector<32x256xbf16>
    %c0_1 = arith.constant 0 : index
    %c0_2 = arith.constant 0 : index
    %1 = vector.load %arg3[%c0_1, %c0_2] : memref<32x256xbf16, #tpu.memory_space<vmem>>, vector<32x256xbf16>
    %2 = tpu.concatenate %0, %1 in 1 : vector<32x256xbf16>, vector<32x256xbf16> -> vector<32x512xbf16>
    %c0_3 = arith.constant 0 : index
    %c0_4 = arith.constant 0 : index
    %c0_5 = arith.constant 0 : index
    %3 = vector.load %arg1[%c0_3, %c0_4, %c0_5] : memref<4x16x32xbf16, #tpu.memory_space<vmem>>, vector<1x16x32xbf16>
    %4 = vector.shape_cast %3 : vector<1x16x32xbf16> to vector<16x32xbf16>
    %5 = vector.extract_strided_slice %2 {offsets = [0, 0], sizes = [32, 256], strides = [1, 1]} : vector<32x512xbf16> to vector<32x256xbf16>
    %cst = arith.constant dense<0.000000e+00> : vector<16x256xf32>
    %6 = tpu.matmul %4, %5, %cst {dimension_numbers = #tpu.dot_dimension_numbers<[1], [0], [0], [1], [0, 0, 1, 1], [], []>} : vector<16x32xbf16>, vector<32x256xbf16>, vector<16x256xf32> -> vector<16x256xf32>
    %c1 = arith.constant 1 : index
    %c0_6 = arith.constant 0 : index
    %c0_7 = arith.constant 0 : index
    %7 = vector.load %arg1[%c1, %c0_6, %c0_7] : memref<4x16x32xbf16, #tpu.memory_space<vmem>>, vector<1x16x32xbf16>
    %8 = vector.shape_cast %7 : vector<1x16x32xbf16> to vector<16x32xbf16>
    %9 = vector.extract_strided_slice %2 {offsets = [0, 1], sizes = [32, 256], strides = [1, 1]} : vector<32x512xbf16> to vector<32x256xbf16>
    %cst_8 = arith.constant dense<0.000000e+00> : vector<16x256xf32>
    %10 = tpu.matmul %8, %9, %cst_8 {dimension_numbers = #tpu.dot_dimension_numbers<[1], [0], [0], [1], [0, 0, 1, 1], [], []>} : vector<16x32xbf16>, vector<32x256xbf16>, vector<16x256xf32> -> vector<16x256xf32>
    %11 = arith.addf %6, %10 : vector<16x256xf32>
    %c2 = arith.constant 2 : index
    %c0_9 = arith.constant 0 : index
    %c0_10 = arith.constant 0 : index
    %12 = vector.load %arg1[%c2, %c0_9, %c0_10] : memref<4x16x32xbf16, #tpu.memory_space<vmem>>, vector<1x16x32xbf16>
    %13 = vector.shape_cast %12 : vector<1x16x32xbf16> to vector<16x32xbf16>
    %14 = vector.extract_strided_slice %2 {offsets = [0, 9], sizes = [32, 256], strides = [1, 1]} : vector<32x512xbf16> to vector<32x256xbf16>
    %cst_11 = arith.constant dense<0.000000e+00> : vector<16x256xf32>
    %15 = tpu.matmul %13, %14, %cst_11 {dimension_numbers = #tpu.dot_dimension_numbers<[1], [0], [0], [1], [0, 0, 1, 1], [], []>} : vector<16x32xbf16>, vector<32x256xbf16>, vector<16x256xf32> -> vector<16x256xf32>
    %16 = arith.addf %11, %15 : vector<16x256xf32>
    %c3 = arith.constant 3 : index
    %c0_12 = arith.constant 0 : index
    %c0_13 = arith.constant 0 : index
    %17 = vector.load %arg1[%c3, %c0_12, %c0_13] : memref<4x16x32xbf16, #tpu.memory_space<vmem>>, vector<1x16x32xbf16>
    %18 = vector.shape_cast %17 : vector<1x16x32xbf16> to vector<16x32xbf16>
    %19 = vector.extract_strided_slice %2 {offsets = [0, 10], sizes = [32, 256], strides = [1, 1]} : vector<32x512xbf16> to vector<32x256xbf16>
    %cst_14 = arith.constant dense<0.000000e+00> : vector<16x256xf32>
    %20 = tpu.matmul %18, %19, %cst_14 {dimension_numbers = #tpu.dot_dimension_numbers<[1], [0], [0], [1], [0, 0, 1, 1], [], []>} : vector<16x32xbf16>, vector<32x256xbf16>, vector<16x256xf32> -> vector<16x256xf32>
    %21 = arith.addf %16, %20 : vector<16x256xf32>
    %22 = arith.truncf %21 : vector<16x256xf32> to vector<16x256xbf16>
    %c0_15 = arith.constant 0 : index
    %c0_16 = arith.constant 0 : index
    %23 = vector.load %arg5[%c0_15, %c0_16] : memref<16x256xbf16, #tpu.memory_space<vmem>>, vector<16x256xbf16>
    tpu.vector_store %arg5[%c0_15, %c0_16], %22 {strides = array<i32>} : memref<16x256xbf16, #tpu.memory_space<vmem>>, vector<16x256xbf16>,
    %c0_17 = arith.constant 0 : index
    %c0_18 = arith.constant 0 : index
    %24 = vector.load %arg4[%c0_17, %c0_18] : memref<1x256xf32, #tpu.memory_space<vmem>>, vector<1x256xf32>
    %25 = vector.broadcast %24 : vector<1x256xf32> to vector<16x256xf32>
    %26 = arith.mulf %21, %25 : vector<16x256xf32>
    %cst_19 = arith.constant dense<0.000000e+00> : vector<16xf32>
    %27 = vector.multi_reduction <add>, %26, %cst_19 [1] : vector<16x256xf32> to vector<16xf32>
    %28 = vector.shape_cast %27 : vector<16xf32> to vector<16x1xf32>
    %29 = arith.mulf %26, %21 : vector<16x256xf32>
    %cst_20 = arith.constant dense<0.000000e+00> : vector<16xf32>
    %30 = vector.multi_reduction <add>, %29, %cst_20 [1] : vector<16x256xf32> to vector<16xf32>
    %31 = vector.shape_cast %30 : vector<16xf32> to vector<16x1xf32>
    %32 = tpu.concatenate %28, %31 in 1 : vector<16x1xf32>, vector<16x1xf32> -> vector<16x2xf32>
    %c0_21 = arith.constant 0 : index
    %c0_22 = arith.constant 0 : index
    %c0_23 = arith.constant 0 : index
    %33 = vector.load %arg6[%c0_21, %c0_22, %c0_23] : memref<1x16x2xf32, #tpu.memory_space<vmem>>, vector<1x16x2xf32>
    %34 = vector.shape_cast %33 : vector<1x16x2xf32> to vector<16x2xf32>
    %35 = vector.shape_cast %32 : vector<16x2xf32> to vector<1x16x2xf32>
    tpu.vector_store %arg6[%c0_21, %c0_22, %c0_23], %35 {strides = array<i32>} : memref<1x16x2xf32, #tpu.memory_space<vmem>>, vector<1x16x2xf32>,
    return
  }
  func.func @transform_0(%arg0: i32) -> (i32, i32, i32) {
    %c0_i32 = arith.constant 0 : i32
    %c0_i32_0 = arith.constant 0 : i32
    %c0_i32_1 = arith.constant 0 : i32
    %c0_i32_2 = arith.constant 0 : i32
    return %c0_i32, %c0_i32_0, %c0_i32_1 : i32, i32, i32
  }
  func.func @transform_1(%arg0: i32) -> (i32, i32) {
    %c0_i32 = arith.constant 0 : i32
    %c0_i32_0 = arith.constant 0 : i32
    return %c0_i32, %arg0 : i32, i32
  }
  func.func @transform_2(%arg0: i32) -> (i32, i32) {
    %c1_i32 = arith.constant 1 : i32
    %0 = arith.addi %arg0, %c1_i32 : i32
    %c0_i32 = arith.constant 0 : i32
    %c0_i32_0 = arith.constant 0 : i32
    return %c0_i32, %0 : i32, i32
  }
  func.func @transform_3(%arg0: i32) -> (i32, i32) {
    %c0_i32 = arith.constant 0 : i32
    %c0_i32_0 = arith.constant 0 : i32
    return %c0_i32, %arg0 : i32, i32
  }
  func.func @transform_4(%arg0: i32) -> (i32, i32) {
    %c0_i32 = arith.constant 0 : i32
    %c0_i32_0 = arith.constant 0 : i32
    return %c0_i32, %arg0 : i32, i32
  }
  func.func @transform_5(%arg0: i32) -> (i32, i32, i32) {
    %c0_i32 = arith.constant 0 : i32
    %c0_i32_0 = arith.constant 0 : i32
    %c0_i32_1 = arith.constant 0 : i32
    return %arg0, %c0_i32, %c0_i32_0 : i32, i32, i32
  }
}

module attributes {stable_mosaic.version = 11 : i64} {
  func.func @_affine_kernel(%arg0: i32, %arg1: memref<32x128xbf16, #tpu.memory_space<vmem>>, %arg2: memref<32x1xf32, #tpu.memory_space<vmem>>, %arg3: memref<32x1xf32, #tpu.memory_space<vmem>>, %arg4: memref<32x128xbf16, #tpu.memory_space<vmem>>) attributes {dimension_semantics = [#tpu.dimension_semantics<parallel>], iteration_bounds = array<i64: 1>, scalar_prefetch = 0 : i64, scratch_operands = 0 : i64, tpu.core_type = #tpu.core_type<tc>, window_params = [{transform_indices = @transform_0, window_bounds = array<i64: 32, 128>}, {pipeline_mode = #tpu.pipeline_mode<synchronous>, transform_indices = @transform_1, window_bounds = array<i64: 32, 1>}, {pipeline_mode = #tpu.pipeline_mode<synchronous>, transform_indices = @transform_2, window_bounds = array<i64: 32, 1>}, {transform_indices = @transform_3, window_bounds = array<i64: 32, 128>}]} {
    %c0 = arith.constant 0 : index
    %c0_0 = arith.constant 0 : index
    %0 = vector.load %arg1[%c0, %c0_0] : memref<32x128xbf16, #tpu.memory_space<vmem>>, vector<32x128xbf16>
    %1 = arith.extf %0 : vector<32x128xbf16> to vector<32x128xf32>
    %c0_1 = arith.constant 0 : index
    %c0_2 = arith.constant 0 : index
    %2 = vector.load %arg2[%c0_1, %c0_2] : memref<32x1xf32, #tpu.memory_space<vmem>>, vector<32x1xf32>
    %3 = vector.broadcast %2 : vector<32x1xf32> to vector<32x128xf32>
    %4 = arith.mulf %1, %3 : vector<32x128xf32>
    %c0_3 = arith.constant 0 : index
    %c0_4 = arith.constant 0 : index
    %5 = vector.load %arg3[%c0_3, %c0_4] : memref<32x1xf32, #tpu.memory_space<vmem>>, vector<32x1xf32>
    %6 = vector.broadcast %5 : vector<32x1xf32> to vector<32x128xf32>
    %7 = arith.addf %4, %6 : vector<32x128xf32>
    %cst = arith.constant 0.000000e+00 : f32
    %8 = vector.broadcast %cst : f32 to vector<32x128xf32>
    %9 = arith.maximumf %7, %8 : vector<32x128xf32>
    %10 = arith.truncf %9 : vector<32x128xf32> to vector<32x128xbf16>
    %c0_5 = arith.constant 0 : index
    %c0_6 = arith.constant 0 : index
    %11 = vector.load %arg4[%c0_5, %c0_6] : memref<32x128xbf16, #tpu.memory_space<vmem>>, vector<32x128xbf16>
    tpu.vector_store %arg4[%c0_5, %c0_6], %10 {strides = array<i32>} : memref<32x128xbf16, #tpu.memory_space<vmem>>, vector<32x128xbf16>,
    return
  }
  func.func @transform_0(%arg0: i32) -> (i32, i32) {
    %c0_i32 = arith.constant 0 : i32
    %c0_i32_0 = arith.constant 0 : i32
    return %c0_i32, %arg0 : i32, i32
  }
  func.func @transform_1(%arg0: i32) -> (i32, i32) {
    %c0_i32 = arith.constant 0 : i32
    %c0_i32_0 = arith.constant 0 : i32
    %c0_i32_1 = arith.constant 0 : i32
    return %c0_i32, %c0_i32_0 : i32, i32
  }
  func.func @transform_2(%arg0: i32) -> (i32, i32) {
    %c0_i32 = arith.constant 0 : i32
    %c0_i32_0 = arith.constant 0 : i32
    %c0_i32_1 = arith.constant 0 : i32
    return %c0_i32, %c0_i32_0 : i32, i32
  }
  func.func @transform_3(%arg0: i32) -> (i32, i32) {
    %c0_i32 = arith.constant 0 : i32
    %c0_i32_0 = arith.constant 0 : i32
    return %c0_i32, %arg0 : i32, i32
  }
}

module attributes {stable_mosaic.version = 11 : i64} {
  func.func @_conv_stats_kernel(%arg0: i32, %arg1: memref<4x32x64xbf16, #tpu.memory_space<vmem>>, %arg2: memref<64x128xbf16, #tpu.memory_space<vmem>>, %arg3: memref<64x128xbf16, #tpu.memory_space<vmem>>, %arg4: memref<1x128xf32, #tpu.memory_space<vmem>>, %arg5: memref<32x128xbf16, #tpu.memory_space<vmem>>, %arg6: memref<1x32x2xf32, #tpu.memory_space<vmem>>) attributes {dimension_semantics = [#tpu.dimension_semantics<parallel>], iteration_bounds = array<i64: 1>, scalar_prefetch = 0 : i64, scratch_operands = 0 : i64, tpu.core_type = #tpu.core_type<tc>, window_params = [{pipeline_mode = #tpu.pipeline_mode<synchronous>, transform_indices = @transform_0, window_bounds = array<i64: 4, 32, 64>}, {transform_indices = @transform_1, window_bounds = array<i64: 64, 128>}, {transform_indices = @transform_2, window_bounds = array<i64: 64, 128>}, {transform_indices = @transform_3, window_bounds = array<i64: 1, 128>}, {transform_indices = @transform_4, window_bounds = array<i64: 32, 128>}, {transform_indices = @transform_5, window_bounds = array<i64: 1, 32, 2>}]} {
    %c0 = arith.constant 0 : index
    %c0_0 = arith.constant 0 : index
    %0 = vector.load %arg2[%c0, %c0_0] : memref<64x128xbf16, #tpu.memory_space<vmem>>, vector<64x128xbf16>
    %c0_1 = arith.constant 0 : index
    %c0_2 = arith.constant 0 : index
    %1 = vector.load %arg3[%c0_1, %c0_2] : memref<64x128xbf16, #tpu.memory_space<vmem>>, vector<64x128xbf16>
    %2 = tpu.concatenate %0, %1 in 1 : vector<64x128xbf16>, vector<64x128xbf16> -> vector<64x256xbf16>
    %c0_3 = arith.constant 0 : index
    %c0_4 = arith.constant 0 : index
    %c0_5 = arith.constant 0 : index
    %3 = vector.load %arg1[%c0_3, %c0_4, %c0_5] : memref<4x32x64xbf16, #tpu.memory_space<vmem>>, vector<1x32x64xbf16>
    %4 = vector.shape_cast %3 : vector<1x32x64xbf16> to vector<32x64xbf16>
    %5 = vector.extract_strided_slice %2 {offsets = [0, 0], sizes = [64, 128], strides = [1, 1]} : vector<64x256xbf16> to vector<64x128xbf16>
    %cst = arith.constant dense<0.000000e+00> : vector<32x128xf32>
    %6 = tpu.matmul %4, %5, %cst {dimension_numbers = #tpu.dot_dimension_numbers<[1], [0], [0], [1], [0, 0, 1, 1], [], []>} : vector<32x64xbf16>, vector<64x128xbf16>, vector<32x128xf32> -> vector<32x128xf32>
    %c1 = arith.constant 1 : index
    %c0_6 = arith.constant 0 : index
    %c0_7 = arith.constant 0 : index
    %7 = vector.load %arg1[%c1, %c0_6, %c0_7] : memref<4x32x64xbf16, #tpu.memory_space<vmem>>, vector<1x32x64xbf16>
    %8 = vector.shape_cast %7 : vector<1x32x64xbf16> to vector<32x64xbf16>
    %9 = vector.extract_strided_slice %2 {offsets = [0, 1], sizes = [64, 128], strides = [1, 1]} : vector<64x256xbf16> to vector<64x128xbf16>
    %cst_8 = arith.constant dense<0.000000e+00> : vector<32x128xf32>
    %10 = tpu.matmul %8, %9, %cst_8 {dimension_numbers = #tpu.dot_dimension_numbers<[1], [0], [0], [1], [0, 0, 1, 1], [], []>} : vector<32x64xbf16>, vector<64x128xbf16>, vector<32x128xf32> -> vector<32x128xf32>
    %11 = arith.addf %6, %10 : vector<32x128xf32>
    %c2 = arith.constant 2 : index
    %c0_9 = arith.constant 0 : index
    %c0_10 = arith.constant 0 : index
    %12 = vector.load %arg1[%c2, %c0_9, %c0_10] : memref<4x32x64xbf16, #tpu.memory_space<vmem>>, vector<1x32x64xbf16>
    %13 = vector.shape_cast %12 : vector<1x32x64xbf16> to vector<32x64xbf16>
    %14 = vector.extract_strided_slice %2 {offsets = [0, 5], sizes = [64, 128], strides = [1, 1]} : vector<64x256xbf16> to vector<64x128xbf16>
    %cst_11 = arith.constant dense<0.000000e+00> : vector<32x128xf32>
    %15 = tpu.matmul %13, %14, %cst_11 {dimension_numbers = #tpu.dot_dimension_numbers<[1], [0], [0], [1], [0, 0, 1, 1], [], []>} : vector<32x64xbf16>, vector<64x128xbf16>, vector<32x128xf32> -> vector<32x128xf32>
    %16 = arith.addf %11, %15 : vector<32x128xf32>
    %c3 = arith.constant 3 : index
    %c0_12 = arith.constant 0 : index
    %c0_13 = arith.constant 0 : index
    %17 = vector.load %arg1[%c3, %c0_12, %c0_13] : memref<4x32x64xbf16, #tpu.memory_space<vmem>>, vector<1x32x64xbf16>
    %18 = vector.shape_cast %17 : vector<1x32x64xbf16> to vector<32x64xbf16>
    %19 = vector.extract_strided_slice %2 {offsets = [0, 6], sizes = [64, 128], strides = [1, 1]} : vector<64x256xbf16> to vector<64x128xbf16>
    %cst_14 = arith.constant dense<0.000000e+00> : vector<32x128xf32>
    %20 = tpu.matmul %18, %19, %cst_14 {dimension_numbers = #tpu.dot_dimension_numbers<[1], [0], [0], [1], [0, 0, 1, 1], [], []>} : vector<32x64xbf16>, vector<64x128xbf16>, vector<32x128xf32> -> vector<32x128xf32>
    %21 = arith.addf %16, %20 : vector<32x128xf32>
    %22 = arith.truncf %21 : vector<32x128xf32> to vector<32x128xbf16>
    %c0_15 = arith.constant 0 : index
    %c0_16 = arith.constant 0 : index
    %23 = vector.load %arg5[%c0_15, %c0_16] : memref<32x128xbf16, #tpu.memory_space<vmem>>, vector<32x128xbf16>
    tpu.vector_store %arg5[%c0_15, %c0_16], %22 {strides = array<i32>} : memref<32x128xbf16, #tpu.memory_space<vmem>>, vector<32x128xbf16>,
    %c0_17 = arith.constant 0 : index
    %c0_18 = arith.constant 0 : index
    %24 = vector.load %arg4[%c0_17, %c0_18] : memref<1x128xf32, #tpu.memory_space<vmem>>, vector<1x128xf32>
    %25 = vector.broadcast %24 : vector<1x128xf32> to vector<32x128xf32>
    %26 = arith.mulf %21, %25 : vector<32x128xf32>
    %cst_19 = arith.constant dense<0.000000e+00> : vector<32xf32>
    %27 = vector.multi_reduction <add>, %26, %cst_19 [1] : vector<32x128xf32> to vector<32xf32>
    %28 = vector.shape_cast %27 : vector<32xf32> to vector<32x1xf32>
    %29 = arith.mulf %26, %21 : vector<32x128xf32>
    %cst_20 = arith.constant dense<0.000000e+00> : vector<32xf32>
    %30 = vector.multi_reduction <add>, %29, %cst_20 [1] : vector<32x128xf32> to vector<32xf32>
    %31 = vector.shape_cast %30 : vector<32xf32> to vector<32x1xf32>
    %32 = tpu.concatenate %28, %31 in 1 : vector<32x1xf32>, vector<32x1xf32> -> vector<32x2xf32>
    %c0_21 = arith.constant 0 : index
    %c0_22 = arith.constant 0 : index
    %c0_23 = arith.constant 0 : index
    %33 = vector.load %arg6[%c0_21, %c0_22, %c0_23] : memref<1x32x2xf32, #tpu.memory_space<vmem>>, vector<1x32x2xf32>
    %34 = vector.shape_cast %33 : vector<1x32x2xf32> to vector<32x2xf32>
    %35 = vector.shape_cast %32 : vector<32x2xf32> to vector<1x32x2xf32>
    tpu.vector_store %arg6[%c0_21, %c0_22, %c0_23], %35 {strides = array<i32>} : memref<1x32x2xf32, #tpu.memory_space<vmem>>, vector<1x32x2xf32>,
    return
  }
  func.func @transform_0(%arg0: i32) -> (i32, i32, i32) {
    %c0_i32 = arith.constant 0 : i32
    %c0_i32_0 = arith.constant 0 : i32
    %c0_i32_1 = arith.constant 0 : i32
    %c0_i32_2 = arith.constant 0 : i32
    return %c0_i32, %c0_i32_0, %c0_i32_1 : i32, i32, i32
  }
  func.func @transform_1(%arg0: i32) -> (i32, i32) {
    %c0_i32 = arith.constant 0 : i32
    %c0_i32_0 = arith.constant 0 : i32
    return %c0_i32, %arg0 : i32, i32
  }
  func.func @transform_2(%arg0: i32) -> (i32, i32) {
    %c1_i32 = arith.constant 1 : i32
    %0 = arith.addi %arg0, %c1_i32 : i32
    %c0_i32 = arith.constant 0 : i32
    %c0_i32_0 = arith.constant 0 : i32
    return %c0_i32, %0 : i32, i32
  }
  func.func @transform_3(%arg0: i32) -> (i32, i32) {
    %c0_i32 = arith.constant 0 : i32
    %c0_i32_0 = arith.constant 0 : i32
    return %c0_i32, %arg0 : i32, i32
  }
  func.func @transform_4(%arg0: i32) -> (i32, i32) {
    %c0_i32 = arith.constant 0 : i32
    %c0_i32_0 = arith.constant 0 : i32
    return %c0_i32, %arg0 : i32, i32
  }
  func.func @transform_5(%arg0: i32) -> (i32, i32, i32) {
    %c0_i32 = arith.constant 0 : i32
    %c0_i32_0 = arith.constant 0 : i32
    %c0_i32_1 = arith.constant 0 : i32
    return %arg0, %c0_i32, %c0_i32_0 : i32, i32, i32
  }
}

module attributes {stable_mosaic.version = 11 : i64} {
  func.func @_conv_stats_kernel(%arg0: i32, %arg1: memref<9x32x32xbf16, #tpu.memory_space<vmem>>, %arg2: memref<32x128xbf16, #tpu.memory_space<vmem>>, %arg3: memref<32x128xbf16, #tpu.memory_space<vmem>>, %arg4: memref<1x128xf32, #tpu.memory_space<vmem>>, %arg5: memref<32x128xbf16, #tpu.memory_space<vmem>>, %arg6: memref<1x32x2xf32, #tpu.memory_space<vmem>>) attributes {dimension_semantics = [#tpu.dimension_semantics<parallel>], iteration_bounds = array<i64: 1>, scalar_prefetch = 0 : i64, scratch_operands = 0 : i64, tpu.core_type = #tpu.core_type<tc>, window_params = [{pipeline_mode = #tpu.pipeline_mode<synchronous>, transform_indices = @transform_0, window_bounds = array<i64: 9, 32, 32>}, {transform_indices = @transform_1, window_bounds = array<i64: 32, 128>}, {transform_indices = @transform_2, window_bounds = array<i64: 32, 128>}, {transform_indices = @transform_3, window_bounds = array<i64: 1, 128>}, {transform_indices = @transform_4, window_bounds = array<i64: 32, 128>}, {transform_indices = @transform_5, window_bounds = array<i64: 1, 32, 2>}]} {
    %c0 = arith.constant 0 : index
    %c0_0 = arith.constant 0 : index
    %0 = vector.load %arg2[%c0, %c0_0] : memref<32x128xbf16, #tpu.memory_space<vmem>>, vector<32x128xbf16>
    %c0_1 = arith.constant 0 : index
    %c0_2 = arith.constant 0 : index
    %1 = vector.load %arg3[%c0_1, %c0_2] : memref<32x128xbf16, #tpu.memory_space<vmem>>, vector<32x128xbf16>
    %2 = tpu.concatenate %0, %1 in 1 : vector<32x128xbf16>, vector<32x128xbf16> -> vector<32x256xbf16>
    %c0_3 = arith.constant 0 : index
    %c0_4 = arith.constant 0 : index
    %c0_5 = arith.constant 0 : index
    %3 = vector.load %arg1[%c0_3, %c0_4, %c0_5] : memref<9x32x32xbf16, #tpu.memory_space<vmem>>, vector<1x32x32xbf16>
    %4 = vector.shape_cast %3 : vector<1x32x32xbf16> to vector<32x32xbf16>
    %5 = vector.extract_strided_slice %2 {offsets = [0, 0], sizes = [32, 128], strides = [1, 1]} : vector<32x256xbf16> to vector<32x128xbf16>
    %cst = arith.constant dense<0.000000e+00> : vector<32x128xf32>
    %6 = tpu.matmul %4, %5, %cst {dimension_numbers = #tpu.dot_dimension_numbers<[1], [0], [0], [1], [0, 0, 1, 1], [], []>} : vector<32x32xbf16>, vector<32x128xbf16>, vector<32x128xf32> -> vector<32x128xf32>
    %c1 = arith.constant 1 : index
    %c0_6 = arith.constant 0 : index
    %c0_7 = arith.constant 0 : index
    %7 = vector.load %arg1[%c1, %c0_6, %c0_7] : memref<9x32x32xbf16, #tpu.memory_space<vmem>>, vector<1x32x32xbf16>
    %8 = vector.shape_cast %7 : vector<1x32x32xbf16> to vector<32x32xbf16>
    %9 = vector.extract_strided_slice %2 {offsets = [0, 1], sizes = [32, 128], strides = [1, 1]} : vector<32x256xbf16> to vector<32x128xbf16>
    %cst_8 = arith.constant dense<0.000000e+00> : vector<32x128xf32>
    %10 = tpu.matmul %8, %9, %cst_8 {dimension_numbers = #tpu.dot_dimension_numbers<[1], [0], [0], [1], [0, 0, 1, 1], [], []>} : vector<32x32xbf16>, vector<32x128xbf16>, vector<32x128xf32> -> vector<32x128xf32>
    %11 = arith.addf %6, %10 : vector<32x128xf32>
    %c2 = arith.constant 2 : index
    %c0_9 = arith.constant 0 : index
    %c0_10 = arith.constant 0 : index
    %12 = vector.load %arg1[%c2, %c0_9, %c0_10] : memref<9x32x32xbf16, #tpu.memory_space<vmem>>, vector<1x32x32xbf16>
    %13 = vector.shape_cast %12 : vector<1x32x32xbf16> to vector<32x32xbf16>
    %14 = vector.extract_strided_slice %2 {offsets = [0, 2], sizes = [32, 128], strides = [1, 1]} : vector<32x256xbf16> to vector<32x128xbf16>
    %cst_11 = arith.constant dense<0.000000e+00> : vector<32x128xf32>
    %15 = tpu.matmul %13, %14, %cst_11 {dimension_numbers = #tpu.dot_dimension_numbers<[1], [0], [0], [1], [0, 0, 1, 1], [], []>} : vector<32x32xbf16>, vector<32x128xbf16>, vector<32x128xf32> -> vector<32x128xf32>
    %16 = arith.addf %11, %15 : vector<32x128xf32>
    %c3 = arith.constant 3 : index
    %c0_12 = arith.constant 0 : index
    %c0_13 = arith.constant 0 : index
    %17 = vector.load %arg1[%c3, %c0_12, %c0_13] : memref<9x32x32xbf16, #tpu.memory_space<vmem>>, vector<1x32x32xbf16>
    %18 = vector.shape_cast %17 : vector<1x32x32xbf16> to vector<32x32xbf16>
    %19 = vector.extract_strided_slice %2 {offsets = [0, 6], sizes = [32, 128], strides = [1, 1]} : vector<32x256xbf16> to vector<32x128xbf16>
    %cst_14 = arith.constant dense<0.000000e+00> : vector<32x128xf32>
    %20 = tpu.matmul %18, %19, %cst_14 {dimension_numbers = #tpu.dot_dimension_numbers<[1], [0], [0], [1], [0, 0, 1, 1], [], []>} : vector<32x32xbf16>, vector<32x128xbf16>, vector<32x128xf32> -> vector<32x128xf32>
    %21 = arith.addf %16, %20 : vector<32x128xf32>
    %c4 = arith.constant 4 : index
    %c0_15 = arith.constant 0 : index
    %c0_16 = arith.constant 0 : index
    %22 = vector.load %arg1[%c4, %c0_15, %c0_16] : memref<9x32x32xbf16, #tpu.memory_space<vmem>>, vector<1x32x32xbf16>
    %23 = vector.shape_cast %22 : vector<1x32x32xbf16> to vector<32x32xbf16>
    %24 = vector.extract_strided_slice %2 {offsets = [0, 7], sizes = [32, 128], strides = [1, 1]} : vector<32x256xbf16> to vector<32x128xbf16>
    %cst_17 = arith.constant dense<0.000000e+00> : vector<32x128xf32>
    %25 = tpu.matmul %23, %24, %cst_17 {dimension_numbers = #tpu.dot_dimension_numbers<[1], [0], [0], [1], [0, 0, 1, 1], [], []>} : vector<32x32xbf16>, vector<32x128xbf16>, vector<32x128xf32> -> vector<32x128xf32>
    %26 = arith.addf %21, %25 : vector<32x128xf32>
    %c5 = arith.constant 5 : index
    %c0_18 = arith.constant 0 : index
    %c0_19 = arith.constant 0 : index
    %27 = vector.load %arg1[%c5, %c0_18, %c0_19] : memref<9x32x32xbf16, #tpu.memory_space<vmem>>, vector<1x32x32xbf16>
    %28 = vector.shape_cast %27 : vector<1x32x32xbf16> to vector<32x32xbf16>
    %29 = vector.extract_strided_slice %2 {offsets = [0, 8], sizes = [32, 128], strides = [1, 1]} : vector<32x256xbf16> to vector<32x128xbf16>
    %cst_20 = arith.constant dense<0.000000e+00> : vector<32x128xf32>
    %30 = tpu.matmul %28, %29, %cst_20 {dimension_numbers = #tpu.dot_dimension_numbers<[1], [0], [0], [1], [0, 0, 1, 1], [], []>} : vector<32x32xbf16>, vector<32x128xbf16>, vector<32x128xf32> -> vector<32x128xf32>
    %31 = arith.addf %26, %30 : vector<32x128xf32>
    %c6 = arith.constant 6 : index
    %c0_21 = arith.constant 0 : index
    %c0_22 = arith.constant 0 : index
    %32 = vector.load %arg1[%c6, %c0_21, %c0_22] : memref<9x32x32xbf16, #tpu.memory_space<vmem>>, vector<1x32x32xbf16>
    %33 = vector.shape_cast %32 : vector<1x32x32xbf16> to vector<32x32xbf16>
    %34 = vector.extract_strided_slice %2 {offsets = [0, 12], sizes = [32, 128], strides = [1, 1]} : vector<32x256xbf16> to vector<32x128xbf16>
    %cst_23 = arith.constant dense<0.000000e+00> : vector<32x128xf32>
    %35 = tpu.matmul %33, %34, %cst_23 {dimension_numbers = #tpu.dot_dimension_numbers<[1], [0], [0], [1], [0, 0, 1, 1], [], []>} : vector<32x32xbf16>, vector<32x128xbf16>, vector<32x128xf32> -> vector<32x128xf32>
    %36 = arith.addf %31, %35 : vector<32x128xf32>
    %c7 = arith.constant 7 : index
    %c0_24 = arith.constant 0 : index
    %c0_25 = arith.constant 0 : index
    %37 = vector.load %arg1[%c7, %c0_24, %c0_25] : memref<9x32x32xbf16, #tpu.memory_space<vmem>>, vector<1x32x32xbf16>
    %38 = vector.shape_cast %37 : vector<1x32x32xbf16> to vector<32x32xbf16>
    %39 = vector.extract_strided_slice %2 {offsets = [0, 13], sizes = [32, 128], strides = [1, 1]} : vector<32x256xbf16> to vector<32x128xbf16>
    %cst_26 = arith.constant dense<0.000000e+00> : vector<32x128xf32>
    %40 = tpu.matmul %38, %39, %cst_26 {dimension_numbers = #tpu.dot_dimension_numbers<[1], [0], [0], [1], [0, 0, 1, 1], [], []>} : vector<32x32xbf16>, vector<32x128xbf16>, vector<32x128xf32> -> vector<32x128xf32>
    %41 = arith.addf %36, %40 : vector<32x128xf32>
    %c8 = arith.constant 8 : index
    %c0_27 = arith.constant 0 : index
    %c0_28 = arith.constant 0 : index
    %42 = vector.load %arg1[%c8, %c0_27, %c0_28] : memref<9x32x32xbf16, #tpu.memory_space<vmem>>, vector<1x32x32xbf16>
    %43 = vector.shape_cast %42 : vector<1x32x32xbf16> to vector<32x32xbf16>
    %44 = vector.extract_strided_slice %2 {offsets = [0, 14], sizes = [32, 128], strides = [1, 1]} : vector<32x256xbf16> to vector<32x128xbf16>
    %cst_29 = arith.constant dense<0.000000e+00> : vector<32x128xf32>
    %45 = tpu.matmul %43, %44, %cst_29 {dimension_numbers = #tpu.dot_dimension_numbers<[1], [0], [0], [1], [0, 0, 1, 1], [], []>} : vector<32x32xbf16>, vector<32x128xbf16>, vector<32x128xf32> -> vector<32x128xf32>
    %46 = arith.addf %41, %45 : vector<32x128xf32>
    %47 = arith.truncf %46 : vector<32x128xf32> to vector<32x128xbf16>
    %c0_30 = arith.constant 0 : index
    %c0_31 = arith.constant 0 : index
    %48 = vector.load %arg5[%c0_30, %c0_31] : memref<32x128xbf16, #tpu.memory_space<vmem>>, vector<32x128xbf16>
    tpu.vector_store %arg5[%c0_30, %c0_31], %47 {strides = array<i32>} : memref<32x128xbf16, #tpu.memory_space<vmem>>, vector<32x128xbf16>,
    %c0_32 = arith.constant 0 : index
    %c0_33 = arith.constant 0 : index
    %49 = vector.load %arg4[%c0_32, %c0_33] : memref<1x128xf32, #tpu.memory_space<vmem>>, vector<1x128xf32>
    %50 = vector.broadcast %49 : vector<1x128xf32> to vector<32x128xf32>
    %51 = arith.mulf %46, %50 : vector<32x128xf32>
    %cst_34 = arith.constant dense<0.000000e+00> : vector<32xf32>
    %52 = vector.multi_reduction <add>, %51, %cst_34 [1] : vector<32x128xf32> to vector<32xf32>
    %53 = vector.shape_cast %52 : vector<32xf32> to vector<32x1xf32>
    %54 = arith.mulf %51, %46 : vector<32x128xf32>
    %cst_35 = arith.constant dense<0.000000e+00> : vector<32xf32>
    %55 = vector.multi_reduction <add>, %54, %cst_35 [1] : vector<32x128xf32> to vector<32xf32>
    %56 = vector.shape_cast %55 : vector<32xf32> to vector<32x1xf32>
    %57 = tpu.concatenate %53, %56 in 1 : vector<32x1xf32>, vector<32x1xf32> -> vector<32x2xf32>
    %c0_36 = arith.constant 0 : index
    %c0_37 = arith.constant 0 : index
    %c0_38 = arith.constant 0 : index
    %58 = vector.load %arg6[%c0_36, %c0_37, %c0_38] : memref<1x32x2xf32, #tpu.memory_space<vmem>>, vector<1x32x2xf32>
    %59 = vector.shape_cast %58 : vector<1x32x2xf32> to vector<32x2xf32>
    %60 = vector.shape_cast %57 : vector<32x2xf32> to vector<1x32x2xf32>
    tpu.vector_store %arg6[%c0_36, %c0_37, %c0_38], %60 {strides = array<i32>} : memref<1x32x2xf32, #tpu.memory_space<vmem>>, vector<1x32x2xf32>,
    return
  }
  func.func @transform_0(%arg0: i32) -> (i32, i32, i32) {
    %c0_i32 = arith.constant 0 : i32
    %c0_i32_0 = arith.constant 0 : i32
    %c0_i32_1 = arith.constant 0 : i32
    %c0_i32_2 = arith.constant 0 : i32
    return %c0_i32, %c0_i32_0, %c0_i32_1 : i32, i32, i32
  }
  func.func @transform_1(%arg0: i32) -> (i32, i32) {
    %c0_i32 = arith.constant 0 : i32
    %c0_i32_0 = arith.constant 0 : i32
    return %c0_i32, %arg0 : i32, i32
  }
  func.func @transform_2(%arg0: i32) -> (i32, i32) {
    %c1_i32 = arith.constant 1 : i32
    %0 = arith.addi %arg0, %c1_i32 : i32
    %c0_i32 = arith.constant 0 : i32
    %c0_i32_0 = arith.constant 0 : i32
    return %c0_i32, %0 : i32, i32
  }
  func.func @transform_3(%arg0: i32) -> (i32, i32) {
    %c0_i32 = arith.constant 0 : i32
    %c0_i32_0 = arith.constant 0 : i32
    return %c0_i32, %arg0 : i32, i32
  }
  func.func @transform_4(%arg0: i32) -> (i32, i32) {
    %c0_i32 = arith.constant 0 : i32
    %c0_i32_0 = arith.constant 0 : i32
    return %c0_i32, %arg0 : i32, i32
  }
  func.func @transform_5(%arg0: i32) -> (i32, i32, i32) {
    %c0_i32 = arith.constant 0 : i32
    %c0_i32_0 = arith.constant 0 : i32
    %c0_i32_1 = arith.constant 0 : i32
    return %arg0, %c0_i32, %c0_i32_0 : i32, i32, i32
  }
}

module attributes {stable_mosaic.version = 11 : i64} {
  func.func @_affine_res_kernel(%arg0: i32, %arg1: memref<32x128xbf16, #tpu.memory_space<vmem>>, %arg2: memref<32x1xf32, #tpu.memory_space<vmem>>, %arg3: memref<32x1xf32, #tpu.memory_space<vmem>>, %arg4: memref<32x128xbf16, #tpu.memory_space<vmem>>, %arg5: memref<32x128xbf16, #tpu.memory_space<vmem>>, %arg6: memref<32x128xbf16, #tpu.memory_space<vmem>>) attributes {dimension_semantics = [#tpu.dimension_semantics<parallel>], iteration_bounds = array<i64: 1>, scalar_prefetch = 0 : i64, scratch_operands = 0 : i64, tpu.core_type = #tpu.core_type<tc>, window_params = [{transform_indices = @transform_0, window_bounds = array<i64: 32, 128>}, {pipeline_mode = #tpu.pipeline_mode<synchronous>, transform_indices = @transform_1, window_bounds = array<i64: 32, 1>}, {pipeline_mode = #tpu.pipeline_mode<synchronous>, transform_indices = @transform_2, window_bounds = array<i64: 32, 1>}, {transform_indices = @transform_3, window_bounds = array<i64: 32, 128>}, {transform_indices = @transform_4, window_bounds = array<i64: 32, 128>}, {transform_indices = @transform_5, window_bounds = array<i64: 32, 128>}]} {
    %c0 = arith.constant 0 : index
    %c0_0 = arith.constant 0 : index
    %0 = vector.load %arg4[%c0, %c0_0] : memref<32x128xbf16, #tpu.memory_space<vmem>>, vector<32x128xbf16>
    %c0_1 = arith.constant 0 : index
    %c0_2 = arith.constant 0 : index
    %1 = vector.load %arg5[%c0_1, %c0_2] : memref<32x128xbf16, #tpu.memory_space<vmem>>, vector<32x128xbf16>
    %2 = tpu.concatenate %0, %1 in 1 : vector<32x128xbf16>, vector<32x128xbf16> -> vector<32x256xbf16>
    %3 = vector.extract_strided_slice %2 {offsets = [0, 7], sizes = [32, 128], strides = [1, 1]} : vector<32x256xbf16> to vector<32x128xbf16>
    %c0_3 = arith.constant 0 : index
    %c0_4 = arith.constant 0 : index
    %4 = vector.load %arg1[%c0_3, %c0_4] : memref<32x128xbf16, #tpu.memory_space<vmem>>, vector<32x128xbf16>
    %5 = arith.extf %4 : vector<32x128xbf16> to vector<32x128xf32>
    %c0_5 = arith.constant 0 : index
    %c0_6 = arith.constant 0 : index
    %6 = vector.load %arg2[%c0_5, %c0_6] : memref<32x1xf32, #tpu.memory_space<vmem>>, vector<32x1xf32>
    %7 = vector.broadcast %6 : vector<32x1xf32> to vector<32x128xf32>
    %8 = arith.mulf %5, %7 : vector<32x128xf32>
    %c0_7 = arith.constant 0 : index
    %c0_8 = arith.constant 0 : index
    %9 = vector.load %arg3[%c0_7, %c0_8] : memref<32x1xf32, #tpu.memory_space<vmem>>, vector<32x1xf32>
    %10 = vector.broadcast %9 : vector<32x1xf32> to vector<32x128xf32>
    %11 = arith.addf %8, %10 : vector<32x128xf32>
    %12 = arith.extf %3 : vector<32x128xbf16> to vector<32x128xf32>
    %13 = arith.addf %11, %12 : vector<32x128xf32>
    %14 = arith.truncf %13 : vector<32x128xf32> to vector<32x128xbf16>
    %c0_9 = arith.constant 0 : index
    %c0_10 = arith.constant 0 : index
    %15 = vector.load %arg6[%c0_9, %c0_10] : memref<32x128xbf16, #tpu.memory_space<vmem>>, vector<32x128xbf16>
    tpu.vector_store %arg6[%c0_9, %c0_10], %14 {strides = array<i32>} : memref<32x128xbf16, #tpu.memory_space<vmem>>, vector<32x128xbf16>,
    return
  }
  func.func @transform_0(%arg0: i32) -> (i32, i32) {
    %c0_i32 = arith.constant 0 : i32
    %c0_i32_0 = arith.constant 0 : i32
    return %c0_i32, %arg0 : i32, i32
  }
  func.func @transform_1(%arg0: i32) -> (i32, i32) {
    %c0_i32 = arith.constant 0 : i32
    %c0_i32_0 = arith.constant 0 : i32
    %c0_i32_1 = arith.constant 0 : i32
    return %c0_i32, %c0_i32_0 : i32, i32
  }
  func.func @transform_2(%arg0: i32) -> (i32, i32) {
    %c0_i32 = arith.constant 0 : i32
    %c0_i32_0 = arith.constant 0 : i32
    %c0_i32_1 = arith.constant 0 : i32
    return %c0_i32, %c0_i32_0 : i32, i32
  }
  func.func @transform_3(%arg0: i32) -> (i32, i32) {
    %c0_i32 = arith.constant 0 : i32
    %c0_i32_0 = arith.constant 0 : i32
    return %c0_i32, %arg0 : i32, i32
  }
  func.func @transform_4(%arg0: i32) -> (i32, i32) {
    %c1_i32 = arith.constant 1 : i32
    %0 = arith.addi %arg0, %c1_i32 : i32
    %c0_i32 = arith.constant 0 : i32
    %c0_i32_0 = arith.constant 0 : i32
    return %c0_i32, %0 : i32, i32
  }
  func.func @transform_5(%arg0: i32) -> (i32, i32) {
    %c0_i32 = arith.constant 0 : i32
    %c0_i32_0 = arith.constant 0 : i32
    return %c0_i32, %arg0 : i32, i32
  }
}

module attributes {stable_mosaic.version = 11 : i64} {
  func.func @_conv_stats_kernel(%arg0: i32, %arg1: memref<4x64x32xbf16, #tpu.memory_space<vmem>>, %arg2: memref<32x128xbf16, #tpu.memory_space<vmem>>, %arg3: memref<32x128xbf16, #tpu.memory_space<vmem>>, %arg4: memref<1x128xf32, #tpu.memory_space<vmem>>, %arg5: memref<64x128xbf16, #tpu.memory_space<vmem>>, %arg6: memref<1x64x2xf32, #tpu.memory_space<vmem>>) attributes {dimension_semantics = [#tpu.dimension_semantics<parallel>], iteration_bounds = array<i64: 1>, scalar_prefetch = 0 : i64, scratch_operands = 0 : i64, tpu.core_type = #tpu.core_type<tc>, window_params = [{pipeline_mode = #tpu.pipeline_mode<synchronous>, transform_indices = @transform_0, window_bounds = array<i64: 4, 64, 32>}, {transform_indices = @transform_1, window_bounds = array<i64: 32, 128>}, {transform_indices = @transform_2, window_bounds = array<i64: 32, 128>}, {transform_indices = @transform_3, window_bounds = array<i64: 1, 128>}, {transform_indices = @transform_4, window_bounds = array<i64: 64, 128>}, {transform_indices = @transform_5, window_bounds = array<i64: 1, 64, 2>}]} {
    %c0 = arith.constant 0 : index
    %c0_0 = arith.constant 0 : index
    %0 = vector.load %arg2[%c0, %c0_0] : memref<32x128xbf16, #tpu.memory_space<vmem>>, vector<32x128xbf16>
    %c0_1 = arith.constant 0 : index
    %c0_2 = arith.constant 0 : index
    %1 = vector.load %arg3[%c0_1, %c0_2] : memref<32x128xbf16, #tpu.memory_space<vmem>>, vector<32x128xbf16>
    %2 = tpu.concatenate %0, %1 in 1 : vector<32x128xbf16>, vector<32x128xbf16> -> vector<32x256xbf16>
    %c0_3 = arith.constant 0 : index
    %c0_4 = arith.constant 0 : index
    %c0_5 = arith.constant 0 : index
    %3 = vector.load %arg1[%c0_3, %c0_4, %c0_5] : memref<4x64x32xbf16, #tpu.memory_space<vmem>>, vector<1x64x32xbf16>
    %4 = vector.shape_cast %3 : vector<1x64x32xbf16> to vector<64x32xbf16>
    %5 = vector.extract_strided_slice %2 {offsets = [0, 0], sizes = [32, 128], strides = [1, 1]} : vector<32x256xbf16> to vector<32x128xbf16>
    %cst = arith.constant dense<0.000000e+00> : vector<64x128xf32>
    %6 = tpu.matmul %4, %5, %cst {dimension_numbers = #tpu.dot_dimension_numbers<[1], [0], [0], [1], [0, 0, 1, 1], [], []>} : vector<64x32xbf16>, vector<32x128xbf16>, vector<64x128xf32> -> vector<64x128xf32>
    %c1 = arith.constant 1 : index
    %c0_6 = arith.constant 0 : index
    %c0_7 = arith.constant 0 : index
    %7 = vector.load %arg1[%c1, %c0_6, %c0_7] : memref<4x64x32xbf16, #tpu.memory_space<vmem>>, vector<1x64x32xbf16>
    %8 = vector.shape_cast %7 : vector<1x64x32xbf16> to vector<64x32xbf16>
    %9 = vector.extract_strided_slice %2 {offsets = [0, 1], sizes = [32, 128], strides = [1, 1]} : vector<32x256xbf16> to vector<32x128xbf16>
    %cst_8 = arith.constant dense<0.000000e+00> : vector<64x128xf32>
    %10 = tpu.matmul %8, %9, %cst_8 {dimension_numbers = #tpu.dot_dimension_numbers<[1], [0], [0], [1], [0, 0, 1, 1], [], []>} : vector<64x32xbf16>, vector<32x128xbf16>, vector<64x128xf32> -> vector<64x128xf32>
    %11 = arith.addf %6, %10 : vector<64x128xf32>
    %c2 = arith.constant 2 : index
    %c0_9 = arith.constant 0 : index
    %c0_10 = arith.constant 0 : index
    %12 = vector.load %arg1[%c2, %c0_9, %c0_10] : memref<4x64x32xbf16, #tpu.memory_space<vmem>>, vector<1x64x32xbf16>
    %13 = vector.shape_cast %12 : vector<1x64x32xbf16> to vector<64x32xbf16>
    %14 = vector.extract_strided_slice %2 {offsets = [0, 5], sizes = [32, 128], strides = [1, 1]} : vector<32x256xbf16> to vector<32x128xbf16>
    %cst_11 = arith.constant dense<0.000000e+00> : vector<64x128xf32>
    %15 = tpu.matmul %13, %14, %cst_11 {dimension_numbers = #tpu.dot_dimension_numbers<[1], [0], [0], [1], [0, 0, 1, 1], [], []>} : vector<64x32xbf16>, vector<32x128xbf16>, vector<64x128xf32> -> vector<64x128xf32>
    %16 = arith.addf %11, %15 : vector<64x128xf32>
    %c3 = arith.constant 3 : index
    %c0_12 = arith.constant 0 : index
    %c0_13 = arith.constant 0 : index
    %17 = vector.load %arg1[%c3, %c0_12, %c0_13] : memref<4x64x32xbf16, #tpu.memory_space<vmem>>, vector<1x64x32xbf16>
    %18 = vector.shape_cast %17 : vector<1x64x32xbf16> to vector<64x32xbf16>
    %19 = vector.extract_strided_slice %2 {offsets = [0, 6], sizes = [32, 128], strides = [1, 1]} : vector<32x256xbf16> to vector<32x128xbf16>
    %cst_14 = arith.constant dense<0.000000e+00> : vector<64x128xf32>
    %20 = tpu.matmul %18, %19, %cst_14 {dimension_numbers = #tpu.dot_dimension_numbers<[1], [0], [0], [1], [0, 0, 1, 1], [], []>} : vector<64x32xbf16>, vector<32x128xbf16>, vector<64x128xf32> -> vector<64x128xf32>
    %21 = arith.addf %16, %20 : vector<64x128xf32>
    %22 = arith.truncf %21 : vector<64x128xf32> to vector<64x128xbf16>
    %c0_15 = arith.constant 0 : index
    %c0_16 = arith.constant 0 : index
    %23 = vector.load %arg5[%c0_15, %c0_16] : memref<64x128xbf16, #tpu.memory_space<vmem>>, vector<64x128xbf16>
    tpu.vector_store %arg5[%c0_15, %c0_16], %22 {strides = array<i32>} : memref<64x128xbf16, #tpu.memory_space<vmem>>, vector<64x128xbf16>,
    %c0_17 = arith.constant 0 : index
    %c0_18 = arith.constant 0 : index
    %24 = vector.load %arg4[%c0_17, %c0_18] : memref<1x128xf32, #tpu.memory_space<vmem>>, vector<1x128xf32>
    %25 = vector.broadcast %24 : vector<1x128xf32> to vector<64x128xf32>
    %26 = arith.mulf %21, %25 : vector<64x128xf32>
    %cst_19 = arith.constant dense<0.000000e+00> : vector<64xf32>
    %27 = vector.multi_reduction <add>, %26, %cst_19 [1] : vector<64x128xf32> to vector<64xf32>
    %28 = vector.shape_cast %27 : vector<64xf32> to vector<64x1xf32>
    %29 = arith.mulf %26, %21 : vector<64x128xf32>
    %cst_20 = arith.constant dense<0.000000e+00> : vector<64xf32>
    %30 = vector.multi_reduction <add>, %29, %cst_20 [1] : vector<64x128xf32> to vector<64xf32>
    %31 = vector.shape_cast %30 : vector<64xf32> to vector<64x1xf32>
    %32 = tpu.concatenate %28, %31 in 1 : vector<64x1xf32>, vector<64x1xf32> -> vector<64x2xf32>
    %c0_21 = arith.constant 0 : index
    %c0_22 = arith.constant 0 : index
    %c0_23 = arith.constant 0 : index
    %33 = vector.load %arg6[%c0_21, %c0_22, %c0_23] : memref<1x64x2xf32, #tpu.memory_space<vmem>>, vector<1x64x2xf32>
    %34 = vector.shape_cast %33 : vector<1x64x2xf32> to vector<64x2xf32>
    %35 = vector.shape_cast %32 : vector<64x2xf32> to vector<1x64x2xf32>
    tpu.vector_store %arg6[%c0_21, %c0_22, %c0_23], %35 {strides = array<i32>} : memref<1x64x2xf32, #tpu.memory_space<vmem>>, vector<1x64x2xf32>,
    return
  }
  func.func @transform_0(%arg0: i32) -> (i32, i32, i32) {
    %c0_i32 = arith.constant 0 : i32
    %c0_i32_0 = arith.constant 0 : i32
    %c0_i32_1 = arith.constant 0 : i32
    %c0_i32_2 = arith.constant 0 : i32
    return %c0_i32, %c0_i32_0, %c0_i32_1 : i32, i32, i32
  }
  func.func @transform_1(%arg0: i32) -> (i32, i32) {
    %c0_i32 = arith.constant 0 : i32
    %c0_i32_0 = arith.constant 0 : i32
    return %c0_i32, %arg0 : i32, i32
  }
  func.func @transform_2(%arg0: i32) -> (i32, i32) {
    %c1_i32 = arith.constant 1 : i32
    %0 = arith.addi %arg0, %c1_i32 : i32
    %c0_i32 = arith.constant 0 : i32
    %c0_i32_0 = arith.constant 0 : i32
    return %c0_i32, %0 : i32, i32
  }
  func.func @transform_3(%arg0: i32) -> (i32, i32) {
    %c0_i32 = arith.constant 0 : i32
    %c0_i32_0 = arith.constant 0 : i32
    return %c0_i32, %arg0 : i32, i32
  }
  func.func @transform_4(%arg0: i32) -> (i32, i32) {
    %c0_i32 = arith.constant 0 : i32
    %c0_i32_0 = arith.constant 0 : i32
    return %c0_i32, %arg0 : i32, i32
  }
  func.func @transform_5(%arg0: i32) -> (i32, i32, i32) {
    %c0_i32 = arith.constant 0 : i32
    %c0_i32_0 = arith.constant 0 : i32
    %c0_i32_1 = arith.constant 0 : i32
    return %arg0, %c0_i32, %c0_i32_0 : i32, i32, i32
  }
}

module attributes {stable_mosaic.version = 11 : i64} {
  func.func @_affine_kernel(%arg0: i32, %arg1: memref<64x128xbf16, #tpu.memory_space<vmem>>, %arg2: memref<64x1xf32, #tpu.memory_space<vmem>>, %arg3: memref<64x1xf32, #tpu.memory_space<vmem>>, %arg4: memref<64x128xbf16, #tpu.memory_space<vmem>>) attributes {dimension_semantics = [#tpu.dimension_semantics<parallel>], iteration_bounds = array<i64: 1>, scalar_prefetch = 0 : i64, scratch_operands = 0 : i64, tpu.core_type = #tpu.core_type<tc>, window_params = [{transform_indices = @transform_0, window_bounds = array<i64: 64, 128>}, {pipeline_mode = #tpu.pipeline_mode<synchronous>, transform_indices = @transform_1, window_bounds = array<i64: 64, 1>}, {pipeline_mode = #tpu.pipeline_mode<synchronous>, transform_indices = @transform_2, window_bounds = array<i64: 64, 1>}, {transform_indices = @transform_3, window_bounds = array<i64: 64, 128>}]} {
    %c0 = arith.constant 0 : index
    %c0_0 = arith.constant 0 : index
    %0 = vector.load %arg1[%c0, %c0_0] : memref<64x128xbf16, #tpu.memory_space<vmem>>, vector<64x128xbf16>
    %1 = arith.extf %0 : vector<64x128xbf16> to vector<64x128xf32>
    %c0_1 = arith.constant 0 : index
    %c0_2 = arith.constant 0 : index
    %2 = vector.load %arg2[%c0_1, %c0_2] : memref<64x1xf32, #tpu.memory_space<vmem>>, vector<64x1xf32>
    %3 = vector.broadcast %2 : vector<64x1xf32> to vector<64x128xf32>
    %4 = arith.mulf %1, %3 : vector<64x128xf32>
    %c0_3 = arith.constant 0 : index
    %c0_4 = arith.constant 0 : index
    %5 = vector.load %arg3[%c0_3, %c0_4] : memref<64x1xf32, #tpu.memory_space<vmem>>, vector<64x1xf32>
    %6 = vector.broadcast %5 : vector<64x1xf32> to vector<64x128xf32>
    %7 = arith.addf %4, %6 : vector<64x128xf32>
    %cst = arith.constant 0.000000e+00 : f32
    %8 = vector.broadcast %cst : f32 to vector<64x128xf32>
    %9 = arith.maximumf %7, %8 : vector<64x128xf32>
    %10 = arith.truncf %9 : vector<64x128xf32> to vector<64x128xbf16>
    %c0_5 = arith.constant 0 : index
    %c0_6 = arith.constant 0 : index
    %11 = vector.load %arg4[%c0_5, %c0_6] : memref<64x128xbf16, #tpu.memory_space<vmem>>, vector<64x128xbf16>
    tpu.vector_store %arg4[%c0_5, %c0_6], %10 {strides = array<i32>} : memref<64x128xbf16, #tpu.memory_space<vmem>>, vector<64x128xbf16>,
    return
  }
  func.func @transform_0(%arg0: i32) -> (i32, i32) {
    %c0_i32 = arith.constant 0 : i32
    %c0_i32_0 = arith.constant 0 : i32
    return %c0_i32, %arg0 : i32, i32
  }
  func.func @transform_1(%arg0: i32) -> (i32, i32) {
    %c0_i32 = arith.constant 0 : i32
    %c0_i32_0 = arith.constant 0 : i32
    %c0_i32_1 = arith.constant 0 : i32
    return %c0_i32, %c0_i32_0 : i32, i32
  }
  func.func @transform_2(%arg0: i32) -> (i32, i32) {
    %c0_i32 = arith.constant 0 : i32
    %c0_i32_0 = arith.constant 0 : i32
    %c0_i32_1 = arith.constant 0 : i32
    return %c0_i32, %c0_i32_0 : i32, i32
  }
  func.func @transform_3(%arg0: i32) -> (i32, i32) {
    %c0_i32 = arith.constant 0 : i32
    %c0_i32_0 = arith.constant 0 : i32
    return %c0_i32, %arg0 : i32, i32
  }
}

module attributes {stable_mosaic.version = 11 : i64} {
  func.func @_affine_kernel(%arg0: i32, %arg1: memref<32x256xbf16, #tpu.memory_space<vmem>>, %arg2: memref<32x1xf32, #tpu.memory_space<vmem>>, %arg3: memref<32x1xf32, #tpu.memory_space<vmem>>, %arg4: memref<32x256xbf16, #tpu.memory_space<vmem>>) attributes {dimension_semantics = [#tpu.dimension_semantics<parallel>], iteration_bounds = array<i64: 1>, scalar_prefetch = 0 : i64, scratch_operands = 0 : i64, tpu.core_type = #tpu.core_type<tc>, window_params = [{transform_indices = @transform_0, window_bounds = array<i64: 32, 256>}, {pipeline_mode = #tpu.pipeline_mode<synchronous>, transform_indices = @transform_1, window_bounds = array<i64: 32, 1>}, {pipeline_mode = #tpu.pipeline_mode<synchronous>, transform_indices = @transform_2, window_bounds = array<i64: 32, 1>}, {transform_indices = @transform_3, window_bounds = array<i64: 32, 256>}]} {
    %c0 = arith.constant 0 : index
    %c0_0 = arith.constant 0 : index
    %0 = vector.load %arg1[%c0, %c0_0] : memref<32x256xbf16, #tpu.memory_space<vmem>>, vector<32x256xbf16>
    %1 = arith.extf %0 : vector<32x256xbf16> to vector<32x256xf32>
    %c0_1 = arith.constant 0 : index
    %c0_2 = arith.constant 0 : index
    %2 = vector.load %arg2[%c0_1, %c0_2] : memref<32x1xf32, #tpu.memory_space<vmem>>, vector<32x1xf32>
    %3 = vector.broadcast %2 : vector<32x1xf32> to vector<32x256xf32>
    %4 = arith.mulf %1, %3 : vector<32x256xf32>
    %c0_3 = arith.constant 0 : index
    %c0_4 = arith.constant 0 : index
    %5 = vector.load %arg3[%c0_3, %c0_4] : memref<32x1xf32, #tpu.memory_space<vmem>>, vector<32x1xf32>
    %6 = vector.broadcast %5 : vector<32x1xf32> to vector<32x256xf32>
    %7 = arith.addf %4, %6 : vector<32x256xf32>
    %cst = arith.constant 0.000000e+00 : f32
    %8 = vector.broadcast %cst : f32 to vector<32x256xf32>
    %9 = arith.maximumf %7, %8 : vector<32x256xf32>
    %10 = arith.truncf %9 : vector<32x256xf32> to vector<32x256xbf16>
    %c0_5 = arith.constant 0 : index
    %c0_6 = arith.constant 0 : index
    %11 = vector.load %arg4[%c0_5, %c0_6] : memref<32x256xbf16, #tpu.memory_space<vmem>>, vector<32x256xbf16>
    tpu.vector_store %arg4[%c0_5, %c0_6], %10 {strides = array<i32>} : memref<32x256xbf16, #tpu.memory_space<vmem>>, vector<32x256xbf16>,
    return
  }
  func.func @transform_0(%arg0: i32) -> (i32, i32) {
    %c0_i32 = arith.constant 0 : i32
    %c0_i32_0 = arith.constant 0 : i32
    return %c0_i32, %arg0 : i32, i32
  }
  func.func @transform_1(%arg0: i32) -> (i32, i32) {
    %c0_i32 = arith.constant 0 : i32
    %c0_i32_0 = arith.constant 0 : i32
    %c0_i32_1 = arith.constant 0 : i32
    return %c0_i32, %c0_i32_0 : i32, i32
  }
  func.func @transform_2(%arg0: i32) -> (i32, i32) {
    %c0_i32 = arith.constant 0 : i32
    %c0_i32_0 = arith.constant 0 : i32
    %c0_i32_1 = arith.constant 0 : i32
    return %c0_i32, %c0_i32_0 : i32, i32
  }
  func.func @transform_3(%arg0: i32) -> (i32, i32) {
    %c0_i32 = arith.constant 0 : i32
    %c0_i32_0 = arith.constant 0 : i32
    return %c0_i32, %arg0 : i32, i32
  }
}

module attributes {stable_mosaic.version = 11 : i64} {
  func.func @_conv_stats_kernel(%arg0: i32, %arg1: memref<4x32x16xbf16, #tpu.memory_space<vmem>>, %arg2: memref<16x256xbf16, #tpu.memory_space<vmem>>, %arg3: memref<16x256xbf16, #tpu.memory_space<vmem>>, %arg4: memref<1x256xf32, #tpu.memory_space<vmem>>, %arg5: memref<32x256xbf16, #tpu.memory_space<vmem>>, %arg6: memref<1x32x2xf32, #tpu.memory_space<vmem>>) attributes {dimension_semantics = [#tpu.dimension_semantics<parallel>], iteration_bounds = array<i64: 1>, scalar_prefetch = 0 : i64, scratch_operands = 0 : i64, tpu.core_type = #tpu.core_type<tc>, window_params = [{pipeline_mode = #tpu.pipeline_mode<synchronous>, transform_indices = @transform_0, window_bounds = array<i64: 4, 32, 16>}, {transform_indices = @transform_1, window_bounds = array<i64: 16, 256>}, {transform_indices = @transform_2, window_bounds = array<i64: 16, 256>}, {transform_indices = @transform_3, window_bounds = array<i64: 1, 256>}, {transform_indices = @transform_4, window_bounds = array<i64: 32, 256>}, {transform_indices = @transform_5, window_bounds = array<i64: 1, 32, 2>}]} {
    %c0 = arith.constant 0 : index
    %c0_0 = arith.constant 0 : index
    %0 = vector.load %arg2[%c0, %c0_0] : memref<16x256xbf16, #tpu.memory_space<vmem>>, vector<16x256xbf16>
    %c0_1 = arith.constant 0 : index
    %c0_2 = arith.constant 0 : index
    %1 = vector.load %arg3[%c0_1, %c0_2] : memref<16x256xbf16, #tpu.memory_space<vmem>>, vector<16x256xbf16>
    %2 = tpu.concatenate %0, %1 in 1 : vector<16x256xbf16>, vector<16x256xbf16> -> vector<16x512xbf16>
    %c0_3 = arith.constant 0 : index
    %c0_4 = arith.constant 0 : index
    %c0_5 = arith.constant 0 : index
    %3 = vector.load %arg1[%c0_3, %c0_4, %c0_5] : memref<4x32x16xbf16, #tpu.memory_space<vmem>>, vector<1x32x16xbf16>
    %4 = vector.shape_cast %3 : vector<1x32x16xbf16> to vector<32x16xbf16>
    %5 = vector.extract_strided_slice %2 {offsets = [0, 0], sizes = [16, 256], strides = [1, 1]} : vector<16x512xbf16> to vector<16x256xbf16>
    %cst = arith.constant dense<0.000000e+00> : vector<32x256xf32>
    %6 = tpu.matmul %4, %5, %cst {dimension_numbers = #tpu.dot_dimension_numbers<[1], [0], [0], [1], [0, 0, 1, 1], [], []>} : vector<32x16xbf16>, vector<16x256xbf16>, vector<32x256xf32> -> vector<32x256xf32>
    %c1 = arith.constant 1 : index
    %c0_6 = arith.constant 0 : index
    %c0_7 = arith.constant 0 : index
    %7 = vector.load %arg1[%c1, %c0_6, %c0_7] : memref<4x32x16xbf16, #tpu.memory_space<vmem>>, vector<1x32x16xbf16>
    %8 = vector.shape_cast %7 : vector<1x32x16xbf16> to vector<32x16xbf16>
    %9 = vector.extract_strided_slice %2 {offsets = [0, 1], sizes = [16, 256], strides = [1, 1]} : vector<16x512xbf16> to vector<16x256xbf16>
    %cst_8 = arith.constant dense<0.000000e+00> : vector<32x256xf32>
    %10 = tpu.matmul %8, %9, %cst_8 {dimension_numbers = #tpu.dot_dimension_numbers<[1], [0], [0], [1], [0, 0, 1, 1], [], []>} : vector<32x16xbf16>, vector<16x256xbf16>, vector<32x256xf32> -> vector<32x256xf32>
    %11 = arith.addf %6, %10 : vector<32x256xf32>
    %c2 = arith.constant 2 : index
    %c0_9 = arith.constant 0 : index
    %c0_10 = arith.constant 0 : index
    %12 = vector.load %arg1[%c2, %c0_9, %c0_10] : memref<4x32x16xbf16, #tpu.memory_space<vmem>>, vector<1x32x16xbf16>
    %13 = vector.shape_cast %12 : vector<1x32x16xbf16> to vector<32x16xbf16>
    %14 = vector.extract_strided_slice %2 {offsets = [0, 9], sizes = [16, 256], strides = [1, 1]} : vector<16x512xbf16> to vector<16x256xbf16>
    %cst_11 = arith.constant dense<0.000000e+00> : vector<32x256xf32>
    %15 = tpu.matmul %13, %14, %cst_11 {dimension_numbers = #tpu.dot_dimension_numbers<[1], [0], [0], [1], [0, 0, 1, 1], [], []>} : vector<32x16xbf16>, vector<16x256xbf16>, vector<32x256xf32> -> vector<32x256xf32>
    %16 = arith.addf %11, %15 : vector<32x256xf32>
    %c3 = arith.constant 3 : index
    %c0_12 = arith.constant 0 : index
    %c0_13 = arith.constant 0 : index
    %17 = vector.load %arg1[%c3, %c0_12, %c0_13] : memref<4x32x16xbf16, #tpu.memory_space<vmem>>, vector<1x32x16xbf16>
    %18 = vector.shape_cast %17 : vector<1x32x16xbf16> to vector<32x16xbf16>
    %19 = vector.extract_strided_slice %2 {offsets = [0, 10], sizes = [16, 256], strides = [1, 1]} : vector<16x512xbf16> to vector<16x256xbf16>
    %cst_14 = arith.constant dense<0.000000e+00> : vector<32x256xf32>
    %20 = tpu.matmul %18, %19, %cst_14 {dimension_numbers = #tpu.dot_dimension_numbers<[1], [0], [0], [1], [0, 0, 1, 1], [], []>} : vector<32x16xbf16>, vector<16x256xbf16>, vector<32x256xf32> -> vector<32x256xf32>
    %21 = arith.addf %16, %20 : vector<32x256xf32>
    %22 = arith.truncf %21 : vector<32x256xf32> to vector<32x256xbf16>
    %c0_15 = arith.constant 0 : index
    %c0_16 = arith.constant 0 : index
    %23 = vector.load %arg5[%c0_15, %c0_16] : memref<32x256xbf16, #tpu.memory_space<vmem>>, vector<32x256xbf16>
    tpu.vector_store %arg5[%c0_15, %c0_16], %22 {strides = array<i32>} : memref<32x256xbf16, #tpu.memory_space<vmem>>, vector<32x256xbf16>,
    %c0_17 = arith.constant 0 : index
    %c0_18 = arith.constant 0 : index
    %24 = vector.load %arg4[%c0_17, %c0_18] : memref<1x256xf32, #tpu.memory_space<vmem>>, vector<1x256xf32>
    %25 = vector.broadcast %24 : vector<1x256xf32> to vector<32x256xf32>
    %26 = arith.mulf %21, %25 : vector<32x256xf32>
    %cst_19 = arith.constant dense<0.000000e+00> : vector<32xf32>
    %27 = vector.multi_reduction <add>, %26, %cst_19 [1] : vector<32x256xf32> to vector<32xf32>
    %28 = vector.shape_cast %27 : vector<32xf32> to vector<32x1xf32>
    %29 = arith.mulf %26, %21 : vector<32x256xf32>
    %cst_20 = arith.constant dense<0.000000e+00> : vector<32xf32>
    %30 = vector.multi_reduction <add>, %29, %cst_20 [1] : vector<32x256xf32> to vector<32xf32>
    %31 = vector.shape_cast %30 : vector<32xf32> to vector<32x1xf32>
    %32 = tpu.concatenate %28, %31 in 1 : vector<32x1xf32>, vector<32x1xf32> -> vector<32x2xf32>
    %c0_21 = arith.constant 0 : index
    %c0_22 = arith.constant 0 : index
    %c0_23 = arith.constant 0 : index
    %33 = vector.load %arg6[%c0_21, %c0_22, %c0_23] : memref<1x32x2xf32, #tpu.memory_space<vmem>>, vector<1x32x2xf32>
    %34 = vector.shape_cast %33 : vector<1x32x2xf32> to vector<32x2xf32>
    %35 = vector.shape_cast %32 : vector<32x2xf32> to vector<1x32x2xf32>
    tpu.vector_store %arg6[%c0_21, %c0_22, %c0_23], %35 {strides = array<i32>} : memref<1x32x2xf32, #tpu.memory_space<vmem>>, vector<1x32x2xf32>,
    return
  }
  func.func @transform_0(%arg0: i32) -> (i32, i32, i32) {
    %c0_i32 = arith.constant 0 : i32
    %c0_i32_0 = arith.constant 0 : i32
    %c0_i32_1 = arith.constant 0 : i32
    %c0_i32_2 = arith.constant 0 : i32
    return %c0_i32, %c0_i32_0, %c0_i32_1 : i32, i32, i32
  }
  func.func @transform_1(%arg0: i32) -> (i32, i32) {
    %c0_i32 = arith.constant 0 : i32
    %c0_i32_0 = arith.constant 0 : i32
    return %c0_i32, %arg0 : i32, i32
  }
  func.func @transform_2(%arg0: i32) -> (i32, i32) {
    %c1_i32 = arith.constant 1 : i32
    %0 = arith.addi %arg0, %c1_i32 : i32
    %c0_i32 = arith.constant 0 : i32
    %c0_i32_0 = arith.constant 0 : i32
    return %c0_i32, %0 : i32, i32
  }
  func.func @transform_3(%arg0: i32) -> (i32, i32) {
    %c0_i32 = arith.constant 0 : i32
    %c0_i32_0 = arith.constant 0 : i32
    return %c0_i32, %arg0 : i32, i32
  }
  func.func @transform_4(%arg0: i32) -> (i32, i32) {
    %c0_i32 = arith.constant 0 : i32
    %c0_i32_0 = arith.constant 0 : i32
    return %c0_i32, %arg0 : i32, i32
  }
  func.func @transform_5(%arg0: i32) -> (i32, i32, i32) {
    %c0_i32 = arith.constant 0 : i32
    %c0_i32_0 = arith.constant 0 : i32
    %c0_i32_1 = arith.constant 0 : i32
    return %arg0, %c0_i32, %c0_i32_0 : i32, i32, i32
  }
}

module attributes {stable_mosaic.version = 11 : i64} {
  func.func @_conv_bias_act_kernel(%arg0: i32, %arg1: memref<49x16x16xbf16, #tpu.memory_space<vmem>>, %arg2: memref<16x512xbf16, #tpu.memory_space<vmem>>, %arg3: memref<16x512xbf16, #tpu.memory_space<vmem>>, %arg4: memref<16x1xf32, #tpu.memory_space<vmem>>, %arg5: memref<16x512xf32, #tpu.memory_space<vmem>>) attributes {dimension_semantics = [#tpu.dimension_semantics<parallel>], iteration_bounds = array<i64: 2>, scalar_prefetch = 0 : i64, scratch_operands = 0 : i64, tpu.core_type = #tpu.core_type<tc>, window_params = [{pipeline_mode = #tpu.pipeline_mode<synchronous>, transform_indices = @transform_0, window_bounds = array<i64: 49, 16, 16>}, {transform_indices = @transform_1, window_bounds = array<i64: 16, 512>}, {transform_indices = @transform_2, window_bounds = array<i64: 16, 512>}, {pipeline_mode = #tpu.pipeline_mode<synchronous>, transform_indices = @transform_3, window_bounds = array<i64: 16, 1>}, {transform_indices = @transform_4, window_bounds = array<i64: 16, 512>}]} {
    %c0 = arith.constant 0 : index
    %c0_0 = arith.constant 0 : index
    %0 = vector.load %arg2[%c0, %c0_0] : memref<16x512xbf16, #tpu.memory_space<vmem>>, vector<16x512xbf16>
    %c0_1 = arith.constant 0 : index
    %c0_2 = arith.constant 0 : index
    %1 = vector.load %arg3[%c0_1, %c0_2] : memref<16x512xbf16, #tpu.memory_space<vmem>>, vector<16x512xbf16>
    %2 = tpu.concatenate %0, %1 in 1 : vector<16x512xbf16>, vector<16x512xbf16> -> vector<16x1024xbf16>
    %c0_3 = arith.constant 0 : index
    %c0_4 = arith.constant 0 : index
    %c0_5 = arith.constant 0 : index
    %3 = vector.load %arg1[%c0_3, %c0_4, %c0_5] : memref<49x16x16xbf16, #tpu.memory_space<vmem>>, vector<1x16x16xbf16>
    %4 = vector.shape_cast %3 : vector<1x16x16xbf16> to vector<16x16xbf16>
    %5 = vector.extract_strided_slice %2 {offsets = [0, 0], sizes = [16, 512], strides = [1, 1]} : vector<16x1024xbf16> to vector<16x512xbf16>
    %cst = arith.constant dense<0.000000e+00> : vector<16x512xf32>
    %6 = tpu.matmul %4, %5, %cst {dimension_numbers = #tpu.dot_dimension_numbers<[1], [0], [0], [1], [0, 0, 1, 1], [], []>} : vector<16x16xbf16>, vector<16x512xbf16>, vector<16x512xf32> -> vector<16x512xf32>
    %c1 = arith.constant 1 : index
    %c0_6 = arith.constant 0 : index
    %c0_7 = arith.constant 0 : index
    %7 = vector.load %arg1[%c1, %c0_6, %c0_7] : memref<49x16x16xbf16, #tpu.memory_space<vmem>>, vector<1x16x16xbf16>
    %8 = vector.shape_cast %7 : vector<1x16x16xbf16> to vector<16x16xbf16>
    %9 = vector.extract_strided_slice %2 {offsets = [0, 1], sizes = [16, 512], strides = [1, 1]} : vector<16x1024xbf16> to vector<16x512xbf16>
    %cst_8 = arith.constant dense<0.000000e+00> : vector<16x512xf32>
    %10 = tpu.matmul %8, %9, %cst_8 {dimension_numbers = #tpu.dot_dimension_numbers<[1], [0], [0], [1], [0, 0, 1, 1], [], []>} : vector<16x16xbf16>, vector<16x512xbf16>, vector<16x512xf32> -> vector<16x512xf32>
    %11 = arith.addf %6, %10 : vector<16x512xf32>
    %c2 = arith.constant 2 : index
    %c0_9 = arith.constant 0 : index
    %c0_10 = arith.constant 0 : index
    %12 = vector.load %arg1[%c2, %c0_9, %c0_10] : memref<49x16x16xbf16, #tpu.memory_space<vmem>>, vector<1x16x16xbf16>
    %13 = vector.shape_cast %12 : vector<1x16x16xbf16> to vector<16x16xbf16>
    %14 = vector.extract_strided_slice %2 {offsets = [0, 2], sizes = [16, 512], strides = [1, 1]} : vector<16x1024xbf16> to vector<16x512xbf16>
    %cst_11 = arith.constant dense<0.000000e+00> : vector<16x512xf32>
    %15 = tpu.matmul %13, %14, %cst_11 {dimension_numbers = #tpu.dot_dimension_numbers<[1], [0], [0], [1], [0, 0, 1, 1], [], []>} : vector<16x16xbf16>, vector<16x512xbf16>, vector<16x512xf32> -> vector<16x512xf32>
    %16 = arith.addf %11, %15 : vector<16x512xf32>
    %c3 = arith.constant 3 : index
    %c0_12 = arith.constant 0 : index
    %c0_13 = arith.constant 0 : index
    %17 = vector.load %arg1[%c3, %c0_12, %c0_13] : memref<49x16x16xbf16, #tpu.memory_space<vmem>>, vector<1x16x16xbf16>
    %18 = vector.shape_cast %17 : vector<1x16x16xbf16> to vector<16x16xbf16>
    %19 = vector.extract_strided_slice %2 {offsets = [0, 3], sizes = [16, 512], strides = [1, 1]} : vector<16x1024xbf16> to vector<16x512xbf16>
    %cst_14 = arith.constant dense<0.000000e+00> : vector<16x512xf32>
    %20 = tpu.matmul %18, %19, %cst_14 {dimension_numbers = #tpu.dot_dimension_numbers<[1], [0], [0], [1], [0, 0, 1, 1], [], []>} : vector<16x16xbf16>, vector<16x512xbf16>, vector<16x512xf32> -> vector<16x512xf32>
    %21 = arith.addf %16, %20 : vector<16x512xf32>
    %c4 = arith.constant 4 : index
    %c0_15 = arith.constant 0 : index
    %c0_16 = arith.constant 0 : index
    %22 = vector.load %arg1[%c4, %c0_15, %c0_16] : memref<49x16x16xbf16, #tpu.memory_space<vmem>>, vector<1x16x16xbf16>
    %23 = vector.shape_cast %22 : vector<1x16x16xbf16> to vector<16x16xbf16>
    %24 = vector.extract_strided_slice %2 {offsets = [0, 4], sizes = [16, 512], strides = [1, 1]} : vector<16x1024xbf16> to vector<16x512xbf16>
    %cst_17 = arith.constant dense<0.000000e+00> : vector<16x512xf32>
    %25 = tpu.matmul %23, %24, %cst_17 {dimension_numbers = #tpu.dot_dimension_numbers<[1], [0], [0], [1], [0, 0, 1, 1], [], []>} : vector<16x16xbf16>, vector<16x512xbf16>, vector<16x512xf32> -> vector<16x512xf32>
    %26 = arith.addf %21, %25 : vector<16x512xf32>
    %c5 = arith.constant 5 : index
    %c0_18 = arith.constant 0 : index
    %c0_19 = arith.constant 0 : index
    %27 = vector.load %arg1[%c5, %c0_18, %c0_19] : memref<49x16x16xbf16, #tpu.memory_space<vmem>>, vector<1x16x16xbf16>
    %28 = vector.shape_cast %27 : vector<1x16x16xbf16> to vector<16x16xbf16>
    %29 = vector.extract_strided_slice %2 {offsets = [0, 5], sizes = [16, 512], strides = [1, 1]} : vector<16x1024xbf16> to vector<16x512xbf16>
    %cst_20 = arith.constant dense<0.000000e+00> : vector<16x512xf32>
    %30 = tpu.matmul %28, %29, %cst_20 {dimension_numbers = #tpu.dot_dimension_numbers<[1], [0], [0], [1], [0, 0, 1, 1], [], []>} : vector<16x16xbf16>, vector<16x512xbf16>, vector<16x512xf32> -> vector<16x512xf32>
    %31 = arith.addf %26, %30 : vector<16x512xf32>
    %c6 = arith.constant 6 : index
    %c0_21 = arith.constant 0 : index
    %c0_22 = arith.constant 0 : index
    %32 = vector.load %arg1[%c6, %c0_21, %c0_22] : memref<49x16x16xbf16, #tpu.memory_space<vmem>>, vector<1x16x16xbf16>
    %33 = vector.shape_cast %32 : vector<1x16x16xbf16> to vector<16x16xbf16>
    %34 = vector.extract_strided_slice %2 {offsets = [0, 6], sizes = [16, 512], strides = [1, 1]} : vector<16x1024xbf16> to vector<16x512xbf16>
    %cst_23 = arith.constant dense<0.000000e+00> : vector<16x512xf32>
    %35 = tpu.matmul %33, %34, %cst_23 {dimension_numbers = #tpu.dot_dimension_numbers<[1], [0], [0], [1], [0, 0, 1, 1], [], []>} : vector<16x16xbf16>, vector<16x512xbf16>, vector<16x512xf32> -> vector<16x512xf32>
    %36 = arith.addf %31, %35 : vector<16x512xf32>
    %c7 = arith.constant 7 : index
    %c0_24 = arith.constant 0 : index
    %c0_25 = arith.constant 0 : index
    %37 = vector.load %arg1[%c7, %c0_24, %c0_25] : memref<49x16x16xbf16, #tpu.memory_space<vmem>>, vector<1x16x16xbf16>
    %38 = vector.shape_cast %37 : vector<1x16x16xbf16> to vector<16x16xbf16>
    %39 = vector.extract_strided_slice %2 {offsets = [0, 22], sizes = [16, 512], strides = [1, 1]} : vector<16x1024xbf16> to vector<16x512xbf16>
    %cst_26 = arith.constant dense<0.000000e+00> : vector<16x512xf32>
    %40 = tpu.matmul %38, %39, %cst_26 {dimension_numbers = #tpu.dot_dimension_numbers<[1], [0], [0], [1], [0, 0, 1, 1], [], []>} : vector<16x16xbf16>, vector<16x512xbf16>, vector<16x512xf32> -> vector<16x512xf32>
    %41 = arith.addf %36, %40 : vector<16x512xf32>
    %c8 = arith.constant 8 : index
    %c0_27 = arith.constant 0 : index
    %c0_28 = arith.constant 0 : index
    %42 = vector.load %arg1[%c8, %c0_27, %c0_28] : memref<49x16x16xbf16, #tpu.memory_space<vmem>>, vector<1x16x16xbf16>
    %43 = vector.shape_cast %42 : vector<1x16x16xbf16> to vector<16x16xbf16>
    %44 = vector.extract_strided_slice %2 {offsets = [0, 23], sizes = [16, 512], strides = [1, 1]} : vector<16x1024xbf16> to vector<16x512xbf16>
    %cst_29 = arith.constant dense<0.000000e+00> : vector<16x512xf32>
    %45 = tpu.matmul %43, %44, %cst_29 {dimension_numbers = #tpu.dot_dimension_numbers<[1], [0], [0], [1], [0, 0, 1, 1], [], []>} : vector<16x16xbf16>, vector<16x512xbf16>, vector<16x512xf32> -> vector<16x512xf32>
    %46 = arith.addf %41, %45 : vector<16x512xf32>
    %c9 = arith.constant 9 : index
    %c0_30 = arith.constant 0 : index
    %c0_31 = arith.constant 0 : index
    %47 = vector.load %arg1[%c9, %c0_30, %c0_31] : memref<49x16x16xbf16, #tpu.memory_space<vmem>>, vector<1x16x16xbf16>
    %48 = vector.shape_cast %47 : vector<1x16x16xbf16> to vector<16x16xbf16>
    %49 = vector.extract_strided_slice %2 {offsets = [0, 24], sizes = [16, 512], strides = [1, 1]} : vector<16x1024xbf16> to vector<16x512xbf16>
    %cst_32 = arith.constant dense<0.000000e+00> : vector<16x512xf32>
    %50 = tpu.matmul %48, %49, %cst_32 {dimension_numbers = #tpu.dot_dimension_numbers<[1], [0], [0], [1], [0, 0, 1, 1], [], []>} : vector<16x16xbf16>, vector<16x512xbf16>, vector<16x512xf32> -> vector<16x512xf32>
    %51 = arith.addf %46, %50 : vector<16x512xf32>
    %c10 = arith.constant 10 : index
    %c0_33 = arith.constant 0 : index
    %c0_34 = arith.constant 0 : index
    %52 = vector.load %arg1[%c10, %c0_33, %c0_34] : memref<49x16x16xbf16, #tpu.memory_space<vmem>>, vector<1x16x16xbf16>
    %53 = vector.shape_cast %52 : vector<1x16x16xbf16> to vector<16x16xbf16>
    %54 = vector.extract_strided_slice %2 {offsets = [0, 25], sizes = [16, 512], strides = [1, 1]} : vector<16x1024xbf16> to vector<16x512xbf16>
    %cst_35 = arith.constant dense<0.000000e+00> : vector<16x512xf32>
    %55 = tpu.matmul %53, %54, %cst_35 {dimension_numbers = #tpu.dot_dimension_numbers<[1], [0], [0], [1], [0, 0, 1, 1], [], []>} : vector<16x16xbf16>, vector<16x512xbf16>, vector<16x512xf32> -> vector<16x512xf32>
    %56 = arith.addf %51, %55 : vector<16x512xf32>
    %c11 = arith.constant 11 : index
    %c0_36 = arith.constant 0 : index
    %c0_37 = arith.constant 0 : index
    %57 = vector.load %arg1[%c11, %c0_36, %c0_37] : memref<49x16x16xbf16, #tpu.memory_space<vmem>>, vector<1x16x16xbf16>
    %58 = vector.shape_cast %57 : vector<1x16x16xbf16> to vector<16x16xbf16>
    %59 = vector.extract_strided_slice %2 {offsets = [0, 26], sizes = [16, 512], strides = [1, 1]} : vector<16x1024xbf16> to vector<16x512xbf16>
    %cst_38 = arith.constant dense<0.000000e+00> : vector<16x512xf32>
    %60 = tpu.matmul %58, %59, %cst_38 {dimension_numbers = #tpu.dot_dimension_numbers<[1], [0], [0], [1], [0, 0, 1, 1], [], []>} : vector<16x16xbf16>, vector<16x512xbf16>, vector<16x512xf32> -> vector<16x512xf32>
    %61 = arith.addf %56, %60 : vector<16x512xf32>
    %c12 = arith.constant 12 : index
    %c0_39 = arith.constant 0 : index
    %c0_40 = arith.constant 0 : index
    %62 = vector.load %arg1[%c12, %c0_39, %c0_40] : memref<49x16x16xbf16, #tpu.memory_space<vmem>>, vector<1x16x16xbf16>
    %63 = vector.shape_cast %62 : vector<1x16x16xbf16> to vector<16x16xbf16>
    %64 = vector.extract_strided_slice %2 {offsets = [0, 27], sizes = [16, 512], strides = [1, 1]} : vector<16x1024xbf16> to vector<16x512xbf16>
    %cst_41 = arith.constant dense<0.000000e+00> : vector<16x512xf32>
    %65 = tpu.matmul %63, %64, %cst_41 {dimension_numbers = #tpu.dot_dimension_numbers<[1], [0], [0], [1], [0, 0, 1, 1], [], []>} : vector<16x16xbf16>, vector<16x512xbf16>, vector<16x512xf32> -> vector<16x512xf32>
    %66 = arith.addf %61, %65 : vector<16x512xf32>
    %c13 = arith.constant 13 : index
    %c0_42 = arith.constant 0 : index
    %c0_43 = arith.constant 0 : index
    %67 = vector.load %arg1[%c13, %c0_42, %c0_43] : memref<49x16x16xbf16, #tpu.memory_space<vmem>>, vector<1x16x16xbf16>
    %68 = vector.shape_cast %67 : vector<1x16x16xbf16> to vector<16x16xbf16>
    %69 = vector.extract_strided_slice %2 {offsets = [0, 28], sizes = [16, 512], strides = [1, 1]} : vector<16x1024xbf16> to vector<16x512xbf16>
    %cst_44 = arith.constant dense<0.000000e+00> : vector<16x512xf32>
    %70 = tpu.matmul %68, %69, %cst_44 {dimension_numbers = #tpu.dot_dimension_numbers<[1], [0], [0], [1], [0, 0, 1, 1], [], []>} : vector<16x16xbf16>, vector<16x512xbf16>, vector<16x512xf32> -> vector<16x512xf32>
    %71 = arith.addf %66, %70 : vector<16x512xf32>
    %c14 = arith.constant 14 : index
    %c0_45 = arith.constant 0 : index
    %c0_46 = arith.constant 0 : index
    %72 = vector.load %arg1[%c14, %c0_45, %c0_46] : memref<49x16x16xbf16, #tpu.memory_space<vmem>>, vector<1x16x16xbf16>
    %73 = vector.shape_cast %72 : vector<1x16x16xbf16> to vector<16x16xbf16>
    %74 = vector.extract_strided_slice %2 {offsets = [0, 44], sizes = [16, 512], strides = [1, 1]} : vector<16x1024xbf16> to vector<16x512xbf16>
    %cst_47 = arith.constant dense<0.000000e+00> : vector<16x512xf32>
    %75 = tpu.matmul %73, %74, %cst_47 {dimension_numbers = #tpu.dot_dimension_numbers<[1], [0], [0], [1], [0, 0, 1, 1], [], []>} : vector<16x16xbf16>, vector<16x512xbf16>, vector<16x512xf32> -> vector<16x512xf32>
    %76 = arith.addf %71, %75 : vector<16x512xf32>
    %c15 = arith.constant 15 : index
    %c0_48 = arith.constant 0 : index
    %c0_49 = arith.constant 0 : index
    %77 = vector.load %arg1[%c15, %c0_48, %c0_49] : memref<49x16x16xbf16, #tpu.memory_space<vmem>>, vector<1x16x16xbf16>
    %78 = vector.shape_cast %77 : vector<1x16x16xbf16> to vector<16x16xbf16>
    %79 = vector.extract_strided_slice %2 {offsets = [0, 45], sizes = [16, 512], strides = [1, 1]} : vector<16x1024xbf16> to vector<16x512xbf16>
    %cst_50 = arith.constant dense<0.000000e+00> : vector<16x512xf32>
    %80 = tpu.matmul %78, %79, %cst_50 {dimension_numbers = #tpu.dot_dimension_numbers<[1], [0], [0], [1], [0, 0, 1, 1], [], []>} : vector<16x16xbf16>, vector<16x512xbf16>, vector<16x512xf32> -> vector<16x512xf32>
    %81 = arith.addf %76, %80 : vector<16x512xf32>
    %c16 = arith.constant 16 : index
    %c0_51 = arith.constant 0 : index
    %c0_52 = arith.constant 0 : index
    %82 = vector.load %arg1[%c16, %c0_51, %c0_52] : memref<49x16x16xbf16, #tpu.memory_space<vmem>>, vector<1x16x16xbf16>
    %83 = vector.shape_cast %82 : vector<1x16x16xbf16> to vector<16x16xbf16>
    %84 = vector.extract_strided_slice %2 {offsets = [0, 46], sizes = [16, 512], strides = [1, 1]} : vector<16x1024xbf16> to vector<16x512xbf16>
    %cst_53 = arith.constant dense<0.000000e+00> : vector<16x512xf32>
    %85 = tpu.matmul %83, %84, %cst_53 {dimension_numbers = #tpu.dot_dimension_numbers<[1], [0], [0], [1], [0, 0, 1, 1], [], []>} : vector<16x16xbf16>, vector<16x512xbf16>, vector<16x512xf32> -> vector<16x512xf32>
    %86 = arith.addf %81, %85 : vector<16x512xf32>
    %c17 = arith.constant 17 : index
    %c0_54 = arith.constant 0 : index
    %c0_55 = arith.constant 0 : index
    %87 = vector.load %arg1[%c17, %c0_54, %c0_55] : memref<49x16x16xbf16, #tpu.memory_space<vmem>>, vector<1x16x16xbf16>
    %88 = vector.shape_cast %87 : vector<1x16x16xbf16> to vector<16x16xbf16>
    %89 = vector.extract_strided_slice %2 {offsets = [0, 47], sizes = [16, 512], strides = [1, 1]} : vector<16x1024xbf16> to vector<16x512xbf16>
    %cst_56 = arith.constant dense<0.000000e+00> : vector<16x512xf32>
    %90 = tpu.matmul %88, %89, %cst_56 {dimension_numbers = #tpu.dot_dimension_numbers<[1], [0], [0], [1], [0, 0, 1, 1], [], []>} : vector<16x16xbf16>, vector<16x512xbf16>, vector<16x512xf32> -> vector<16x512xf32>
    %91 = arith.addf %86, %90 : vector<16x512xf32>
    %c18 = arith.constant 18 : index
    %c0_57 = arith.constant 0 : index
    %c0_58 = arith.constant 0 : index
    %92 = vector.load %arg1[%c18, %c0_57, %c0_58] : memref<49x16x16xbf16, #tpu.memory_space<vmem>>, vector<1x16x16xbf16>
    %93 = vector.shape_cast %92 : vector<1x16x16xbf16> to vector<16x16xbf16>
    %94 = vector.extract_strided_slice %2 {offsets = [0, 48], sizes = [16, 512], strides = [1, 1]} : vector<16x1024xbf16> to vector<16x512xbf16>
    %cst_59 = arith.constant dense<0.000000e+00> : vector<16x512xf32>
    %95 = tpu.matmul %93, %94, %cst_59 {dimension_numbers = #tpu.dot_dimension_numbers<[1], [0], [0], [1], [0, 0, 1, 1], [], []>} : vector<16x16xbf16>, vector<16x512xbf16>, vector<16x512xf32> -> vector<16x512xf32>
    %96 = arith.addf %91, %95 : vector<16x512xf32>
    %c19 = arith.constant 19 : index
    %c0_60 = arith.constant 0 : index
    %c0_61 = arith.constant 0 : index
    %97 = vector.load %arg1[%c19, %c0_60, %c0_61] : memref<49x16x16xbf16, #tpu.memory_space<vmem>>, vector<1x16x16xbf16>
    %98 = vector.shape_cast %97 : vector<1x16x16xbf16> to vector<16x16xbf16>
    %99 = vector.extract_strided_slice %2 {offsets = [0, 49], sizes = [16, 512], strides = [1, 1]} : vector<16x1024xbf16> to vector<16x512xbf16>
    %cst_62 = arith.constant dense<0.000000e+00> : vector<16x512xf32>
    %100 = tpu.matmul %98, %99, %cst_62 {dimension_numbers = #tpu.dot_dimension_numbers<[1], [0], [0], [1], [0, 0, 1, 1], [], []>} : vector<16x16xbf16>, vector<16x512xbf16>, vector<16x512xf32> -> vector<16x512xf32>
    %101 = arith.addf %96, %100 : vector<16x512xf32>
    %c20 = arith.constant 20 : index
    %c0_63 = arith.constant 0 : index
    %c0_64 = arith.constant 0 : index
    %102 = vector.load %arg1[%c20, %c0_63, %c0_64] : memref<49x16x16xbf16, #tpu.memory_space<vmem>>, vector<1x16x16xbf16>
    %103 = vector.shape_cast %102 : vector<1x16x16xbf16> to vector<16x16xbf16>
    %104 = vector.extract_strided_slice %2 {offsets = [0, 50], sizes = [16, 512], strides = [1, 1]} : vector<16x1024xbf16> to vector<16x512xbf16>
    %cst_65 = arith.constant dense<0.000000e+00> : vector<16x512xf32>
    %105 = tpu.matmul %103, %104, %cst_65 {dimension_numbers = #tpu.dot_dimension_numbers<[1], [0], [0], [1], [0, 0, 1, 1], [], []>} : vector<16x16xbf16>, vector<16x512xbf16>, vector<16x512xf32> -> vector<16x512xf32>
    %106 = arith.addf %101, %105 : vector<16x512xf32>
    %c21 = arith.constant 21 : index
    %c0_66 = arith.constant 0 : index
    %c0_67 = arith.constant 0 : index
    %107 = vector.load %arg1[%c21, %c0_66, %c0_67] : memref<49x16x16xbf16, #tpu.memory_space<vmem>>, vector<1x16x16xbf16>
    %108 = vector.shape_cast %107 : vector<1x16x16xbf16> to vector<16x16xbf16>
    %109 = vector.extract_strided_slice %2 {offsets = [0, 66], sizes = [16, 512], strides = [1, 1]} : vector<16x1024xbf16> to vector<16x512xbf16>
    %cst_68 = arith.constant dense<0.000000e+00> : vector<16x512xf32>
    %110 = tpu.matmul %108, %109, %cst_68 {dimension_numbers = #tpu.dot_dimension_numbers<[1], [0], [0], [1], [0, 0, 1, 1], [], []>} : vector<16x16xbf16>, vector<16x512xbf16>, vector<16x512xf32> -> vector<16x512xf32>
    %111 = arith.addf %106, %110 : vector<16x512xf32>
    %c22 = arith.constant 22 : index
    %c0_69 = arith.constant 0 : index
    %c0_70 = arith.constant 0 : index
    %112 = vector.load %arg1[%c22, %c0_69, %c0_70] : memref<49x16x16xbf16, #tpu.memory_space<vmem>>, vector<1x16x16xbf16>
    %113 = vector.shape_cast %112 : vector<1x16x16xbf16> to vector<16x16xbf16>
    %114 = vector.extract_strided_slice %2 {offsets = [0, 67], sizes = [16, 512], strides = [1, 1]} : vector<16x1024xbf16> to vector<16x512xbf16>
    %cst_71 = arith.constant dense<0.000000e+00> : vector<16x512xf32>
    %115 = tpu.matmul %113, %114, %cst_71 {dimension_numbers = #tpu.dot_dimension_numbers<[1], [0], [0], [1], [0, 0, 1, 1], [], []>} : vector<16x16xbf16>, vector<16x512xbf16>, vector<16x512xf32> -> vector<16x512xf32>
    %116 = arith.addf %111, %115 : vector<16x512xf32>
    %c23 = arith.constant 23 : index
    %c0_72 = arith.constant 0 : index
    %c0_73 = arith.constant 0 : index
    %117 = vector.load %arg1[%c23, %c0_72, %c0_73] : memref<49x16x16xbf16, #tpu.memory_space<vmem>>, vector<1x16x16xbf16>
    %118 = vector.shape_cast %117 : vector<1x16x16xbf16> to vector<16x16xbf16>
    %119 = vector.extract_strided_slice %2 {offsets = [0, 68], sizes = [16, 512], strides = [1, 1]} : vector<16x1024xbf16> to vector<16x512xbf16>
    %cst_74 = arith.constant dense<0.000000e+00> : vector<16x512xf32>
    %120 = tpu.matmul %118, %119, %cst_74 {dimension_numbers = #tpu.dot_dimension_numbers<[1], [0], [0], [1], [0, 0, 1, 1], [], []>} : vector<16x16xbf16>, vector<16x512xbf16>, vector<16x512xf32> -> vector<16x512xf32>
    %121 = arith.addf %116, %120 : vector<16x512xf32>
    %c24 = arith.constant 24 : index
    %c0_75 = arith.constant 0 : index
    %c0_76 = arith.constant 0 : index
    %122 = vector.load %arg1[%c24, %c0_75, %c0_76] : memref<49x16x16xbf16, #tpu.memory_space<vmem>>, vector<1x16x16xbf16>
    %123 = vector.shape_cast %122 : vector<1x16x16xbf16> to vector<16x16xbf16>
    %124 = vector.extract_strided_slice %2 {offsets = [0, 69], sizes = [16, 512], strides = [1, 1]} : vector<16x1024xbf16> to vector<16x512xbf16>
    %cst_77 = arith.constant dense<0.000000e+00> : vector<16x512xf32>
    %125 = tpu.matmul %123, %124, %cst_77 {dimension_numbers = #tpu.dot_dimension_numbers<[1], [0], [0], [1], [0, 0, 1, 1], [], []>} : vector<16x16xbf16>, vector<16x512xbf16>, vector<16x512xf32> -> vector<16x512xf32>
    %126 = arith.addf %121, %125 : vector<16x512xf32>
    %c25 = arith.constant 25 : index
    %c0_78 = arith.constant 0 : index
    %c0_79 = arith.constant 0 : index
    %127 = vector.load %arg1[%c25, %c0_78, %c0_79] : memref<49x16x16xbf16, #tpu.memory_space<vmem>>, vector<1x16x16xbf16>
    %128 = vector.shape_cast %127 : vector<1x16x16xbf16> to vector<16x16xbf16>
    %129 = vector.extract_strided_slice %2 {offsets = [0, 70], sizes = [16, 512], strides = [1, 1]} : vector<16x1024xbf16> to vector<16x512xbf16>
    %cst_80 = arith.constant dense<0.000000e+00> : vector<16x512xf32>
    %130 = tpu.matmul %128, %129, %cst_80 {dimension_numbers = #tpu.dot_dimension_numbers<[1], [0], [0], [1], [0, 0, 1, 1], [], []>} : vector<16x16xbf16>, vector<16x512xbf16>, vector<16x512xf32> -> vector<16x512xf32>
    %131 = arith.addf %126, %130 : vector<16x512xf32>
    %c26 = arith.constant 26 : index
    %c0_81 = arith.constant 0 : index
    %c0_82 = arith.constant 0 : index
    %132 = vector.load %arg1[%c26, %c0_81, %c0_82] : memref<49x16x16xbf16, #tpu.memory_space<vmem>>, vector<1x16x16xbf16>
    %133 = vector.shape_cast %132 : vector<1x16x16xbf16> to vector<16x16xbf16>
    %134 = vector.extract_strided_slice %2 {offsets = [0, 71], sizes = [16, 512], strides = [1, 1]} : vector<16x1024xbf16> to vector<16x512xbf16>
    %cst_83 = arith.constant dense<0.000000e+00> : vector<16x512xf32>
    %135 = tpu.matmul %133, %134, %cst_83 {dimension_numbers = #tpu.dot_dimension_numbers<[1], [0], [0], [1], [0, 0, 1, 1], [], []>} : vector<16x16xbf16>, vector<16x512xbf16>, vector<16x512xf32> -> vector<16x512xf32>
    %136 = arith.addf %131, %135 : vector<16x512xf32>
    %c27 = arith.constant 27 : index
    %c0_84 = arith.constant 0 : index
    %c0_85 = arith.constant 0 : index
    %137 = vector.load %arg1[%c27, %c0_84, %c0_85] : memref<49x16x16xbf16, #tpu.memory_space<vmem>>, vector<1x16x16xbf16>
    %138 = vector.shape_cast %137 : vector<1x16x16xbf16> to vector<16x16xbf16>
    %139 = vector.extract_strided_slice %2 {offsets = [0, 72], sizes = [16, 512], strides = [1, 1]} : vector<16x1024xbf16> to vector<16x512xbf16>
    %cst_86 = arith.constant dense<0.000000e+00> : vector<16x512xf32>
    %140 = tpu.matmul %138, %139, %cst_86 {dimension_numbers = #tpu.dot_dimension_numbers<[1], [0], [0], [1], [0, 0, 1, 1], [], []>} : vector<16x16xbf16>, vector<16x512xbf16>, vector<16x512xf32> -> vector<16x512xf32>
    %141 = arith.addf %136, %140 : vector<16x512xf32>
    %c28 = arith.constant 28 : index
    %c0_87 = arith.constant 0 : index
    %c0_88 = arith.constant 0 : index
    %142 = vector.load %arg1[%c28, %c0_87, %c0_88] : memref<49x16x16xbf16, #tpu.memory_space<vmem>>, vector<1x16x16xbf16>
    %143 = vector.shape_cast %142 : vector<1x16x16xbf16> to vector<16x16xbf16>
    %144 = vector.extract_strided_slice %2 {offsets = [0, 88], sizes = [16, 512], strides = [1, 1]} : vector<16x1024xbf16> to vector<16x512xbf16>
    %cst_89 = arith.constant dense<0.000000e+00> : vector<16x512xf32>
    %145 = tpu.matmul %143, %144, %cst_89 {dimension_numbers = #tpu.dot_dimension_numbers<[1], [0], [0], [1], [0, 0, 1, 1], [], []>} : vector<16x16xbf16>, vector<16x512xbf16>, vector<16x512xf32> -> vector<16x512xf32>
    %146 = arith.addf %141, %145 : vector<16x512xf32>
    %c29 = arith.constant 29 : index
    %c0_90 = arith.constant 0 : index
    %c0_91 = arith.constant 0 : index
    %147 = vector.load %arg1[%c29, %c0_90, %c0_91] : memref<49x16x16xbf16, #tpu.memory_space<vmem>>, vector<1x16x16xbf16>
    %148 = vector.shape_cast %147 : vector<1x16x16xbf16> to vector<16x16xbf16>
    %149 = vector.extract_strided_slice %2 {offsets = [0, 89], sizes = [16, 512], strides = [1, 1]} : vector<16x1024xbf16> to vector<16x512xbf16>
    %cst_92 = arith.constant dense<0.000000e+00> : vector<16x512xf32>
    %150 = tpu.matmul %148, %149, %cst_92 {dimension_numbers = #tpu.dot_dimension_numbers<[1], [0], [0], [1], [0, 0, 1, 1], [], []>} : vector<16x16xbf16>, vector<16x512xbf16>, vector<16x512xf32> -> vector<16x512xf32>
    %151 = arith.addf %146, %150 : vector<16x512xf32>
    %c30 = arith.constant 30 : index
    %c0_93 = arith.constant 0 : index
    %c0_94 = arith.constant 0 : index
    %152 = vector.load %arg1[%c30, %c0_93, %c0_94] : memref<49x16x16xbf16, #tpu.memory_space<vmem>>, vector<1x16x16xbf16>
    %153 = vector.shape_cast %152 : vector<1x16x16xbf16> to vector<16x16xbf16>
    %154 = vector.extract_strided_slice %2 {offsets = [0, 90], sizes = [16, 512], strides = [1, 1]} : vector<16x1024xbf16> to vector<16x512xbf16>
    %cst_95 = arith.constant dense<0.000000e+00> : vector<16x512xf32>
    %155 = tpu.matmul %153, %154, %cst_95 {dimension_numbers = #tpu.dot_dimension_numbers<[1], [0], [0], [1], [0, 0, 1, 1], [], []>} : vector<16x16xbf16>, vector<16x512xbf16>, vector<16x512xf32> -> vector<16x512xf32>
    %156 = arith.addf %151, %155 : vector<16x512xf32>
    %c31 = arith.constant 31 : index
    %c0_96 = arith.constant 0 : index
    %c0_97 = arith.constant 0 : index
    %157 = vector.load %arg1[%c31, %c0_96, %c0_97] : memref<49x16x16xbf16, #tpu.memory_space<vmem>>, vector<1x16x16xbf16>
    %158 = vector.shape_cast %157 : vector<1x16x16xbf16> to vector<16x16xbf16>
    %159 = vector.extract_strided_slice %2 {offsets = [0, 91], sizes = [16, 512], strides = [1, 1]} : vector<16x1024xbf16> to vector<16x512xbf16>
    %cst_98 = arith.constant dense<0.000000e+00> : vector<16x512xf32>
    %160 = tpu.matmul %158, %159, %cst_98 {dimension_numbers = #tpu.dot_dimension_numbers<[1], [0], [0], [1], [0, 0, 1, 1], [], []>} : vector<16x16xbf16>, vector<16x512xbf16>, vector<16x512xf32> -> vector<16x512xf32>
    %161 = arith.addf %156, %160 : vector<16x512xf32>
    %c32 = arith.constant 32 : index
    %c0_99 = arith.constant 0 : index
    %c0_100 = arith.constant 0 : index
    %162 = vector.load %arg1[%c32, %c0_99, %c0_100] : memref<49x16x16xbf16, #tpu.memory_space<vmem>>, vector<1x16x16xbf16>
    %163 = vector.shape_cast %162 : vector<1x16x16xbf16> to vector<16x16xbf16>
    %164 = vector.extract_strided_slice %2 {offsets = [0, 92], sizes = [16, 512], strides = [1, 1]} : vector<16x1024xbf16> to vector<16x512xbf16>
    %cst_101 = arith.constant dense<0.000000e+00> : vector<16x512xf32>
    %165 = tpu.matmul %163, %164, %cst_101 {dimension_numbers = #tpu.dot_dimension_numbers<[1], [0], [0], [1], [0, 0, 1, 1], [], []>} : vector<16x16xbf16>, vector<16x512xbf16>, vector<16x512xf32> -> vector<16x512xf32>
    %166 = arith.addf %161, %165 : vector<16x512xf32>
    %c33 = arith.constant 33 : index
    %c0_102 = arith.constant 0 : index
    %c0_103 = arith.constant 0 : index
    %167 = vector.load %arg1[%c33, %c0_102, %c0_103] : memref<49x16x16xbf16, #tpu.memory_space<vmem>>, vector<1x16x16xbf16>
    %168 = vector.shape_cast %167 : vector<1x16x16xbf16> to vector<16x16xbf16>
    %169 = vector.extract_strided_slice %2 {offsets = [0, 93], sizes = [16, 512], strides = [1, 1]} : vector<16x1024xbf16> to vector<16x512xbf16>
    %cst_104 = arith.constant dense<0.000000e+00> : vector<16x512xf32>
    %170 = tpu.matmul %168, %169, %cst_104 {dimension_numbers = #tpu.dot_dimension_numbers<[1], [0], [0], [1], [0, 0, 1, 1], [], []>} : vector<16x16xbf16>, vector<16x512xbf16>, vector<16x512xf32> -> vector<16x512xf32>
    %171 = arith.addf %166, %170 : vector<16x512xf32>
    %c34 = arith.constant 34 : index
    %c0_105 = arith.constant 0 : index
    %c0_106 = arith.constant 0 : index
    %172 = vector.load %arg1[%c34, %c0_105, %c0_106] : memref<49x16x16xbf16, #tpu.memory_space<vmem>>, vector<1x16x16xbf16>
    %173 = vector.shape_cast %172 : vector<1x16x16xbf16> to vector<16x16xbf16>
    %174 = vector.extract_strided_slice %2 {offsets = [0, 94], sizes = [16, 512], strides = [1, 1]} : vector<16x1024xbf16> to vector<16x512xbf16>
    %cst_107 = arith.constant dense<0.000000e+00> : vector<16x512xf32>
    %175 = tpu.matmul %173, %174, %cst_107 {dimension_numbers = #tpu.dot_dimension_numbers<[1], [0], [0], [1], [0, 0, 1, 1], [], []>} : vector<16x16xbf16>, vector<16x512xbf16>, vector<16x512xf32> -> vector<16x512xf32>
    %176 = arith.addf %171, %175 : vector<16x512xf32>
    %c35 = arith.constant 35 : index
    %c0_108 = arith.constant 0 : index
    %c0_109 = arith.constant 0 : index
    %177 = vector.load %arg1[%c35, %c0_108, %c0_109] : memref<49x16x16xbf16, #tpu.memory_space<vmem>>, vector<1x16x16xbf16>
    %178 = vector.shape_cast %177 : vector<1x16x16xbf16> to vector<16x16xbf16>
    %179 = vector.extract_strided_slice %2 {offsets = [0, 110], sizes = [16, 512], strides = [1, 1]} : vector<16x1024xbf16> to vector<16x512xbf16>
    %cst_110 = arith.constant dense<0.000000e+00> : vector<16x512xf32>
    %180 = tpu.matmul %178, %179, %cst_110 {dimension_numbers = #tpu.dot_dimension_numbers<[1], [0], [0], [1], [0, 0, 1, 1], [], []>} : vector<16x16xbf16>, vector<16x512xbf16>, vector<16x512xf32> -> vector<16x512xf32>
    %181 = arith.addf %176, %180 : vector<16x512xf32>
    %c36 = arith.constant 36 : index
    %c0_111 = arith.constant 0 : index
    %c0_112 = arith.constant 0 : index
    %182 = vector.load %arg1[%c36, %c0_111, %c0_112] : memref<49x16x16xbf16, #tpu.memory_space<vmem>>, vector<1x16x16xbf16>
    %183 = vector.shape_cast %182 : vector<1x16x16xbf16> to vector<16x16xbf16>
    %184 = vector.extract_strided_slice %2 {offsets = [0, 111], sizes = [16, 512], strides = [1, 1]} : vector<16x1024xbf16> to vector<16x512xbf16>
    %cst_113 = arith.constant dense<0.000000e+00> : vector<16x512xf32>
    %185 = tpu.matmul %183, %184, %cst_113 {dimension_numbers = #tpu.dot_dimension_numbers<[1], [0], [0], [1], [0, 0, 1, 1], [], []>} : vector<16x16xbf16>, vector<16x512xbf16>, vector<16x512xf32> -> vector<16x512xf32>
    %186 = arith.addf %181, %185 : vector<16x512xf32>
    %c37 = arith.constant 37 : index
    %c0_114 = arith.constant 0 : index
    %c0_115 = arith.constant 0 : index
    %187 = vector.load %arg1[%c37, %c0_114, %c0_115] : memref<49x16x16xbf16, #tpu.memory_space<vmem>>, vector<1x16x16xbf16>
    %188 = vector.shape_cast %187 : vector<1x16x16xbf16> to vector<16x16xbf16>
    %189 = vector.extract_strided_slice %2 {offsets = [0, 112], sizes = [16, 512], strides = [1, 1]} : vector<16x1024xbf16> to vector<16x512xbf16>
    %cst_116 = arith.constant dense<0.000000e+00> : vector<16x512xf32>
    %190 = tpu.matmul %188, %189, %cst_116 {dimension_numbers = #tpu.dot_dimension_numbers<[1], [0], [0], [1], [0, 0, 1, 1], [], []>} : vector<16x16xbf16>, vector<16x512xbf16>, vector<16x512xf32> -> vector<16x512xf32>
    %191 = arith.addf %186, %190 : vector<16x512xf32>
    %c38 = arith.constant 38 : index
    %c0_117 = arith.constant 0 : index
    %c0_118 = arith.constant 0 : index
    %192 = vector.load %arg1[%c38, %c0_117, %c0_118] : memref<49x16x16xbf16, #tpu.memory_space<vmem>>, vector<1x16x16xbf16>
    %193 = vector.shape_cast %192 : vector<1x16x16xbf16> to vector<16x16xbf16>
    %194 = vector.extract_strided_slice %2 {offsets = [0, 113], sizes = [16, 512], strides = [1, 1]} : vector<16x1024xbf16> to vector<16x512xbf16>
    %cst_119 = arith.constant dense<0.000000e+00> : vector<16x512xf32>
    %195 = tpu.matmul %193, %194, %cst_119 {dimension_numbers = #tpu.dot_dimension_numbers<[1], [0], [0], [1], [0, 0, 1, 1], [], []>} : vector<16x16xbf16>, vector<16x512xbf16>, vector<16x512xf32> -> vector<16x512xf32>
    %196 = arith.addf %191, %195 : vector<16x512xf32>
    %c39 = arith.constant 39 : index
    %c0_120 = arith.constant 0 : index
    %c0_121 = arith.constant 0 : index
    %197 = vector.load %arg1[%c39, %c0_120, %c0_121] : memref<49x16x16xbf16, #tpu.memory_space<vmem>>, vector<1x16x16xbf16>
    %198 = vector.shape_cast %197 : vector<1x16x16xbf16> to vector<16x16xbf16>
    %199 = vector.extract_strided_slice %2 {offsets = [0, 114], sizes = [16, 512], strides = [1, 1]} : vector<16x1024xbf16> to vector<16x512xbf16>
    %cst_122 = arith.constant dense<0.000000e+00> : vector<16x512xf32>
    %200 = tpu.matmul %198, %199, %cst_122 {dimension_numbers = #tpu.dot_dimension_numbers<[1], [0], [0], [1], [0, 0, 1, 1], [], []>} : vector<16x16xbf16>, vector<16x512xbf16>, vector<16x512xf32> -> vector<16x512xf32>
    %201 = arith.addf %196, %200 : vector<16x512xf32>
    %c40 = arith.constant 40 : index
    %c0_123 = arith.constant 0 : index
    %c0_124 = arith.constant 0 : index
    %202 = vector.load %arg1[%c40, %c0_123, %c0_124] : memref<49x16x16xbf16, #tpu.memory_space<vmem>>, vector<1x16x16xbf16>
    %203 = vector.shape_cast %202 : vector<1x16x16xbf16> to vector<16x16xbf16>
    %204 = vector.extract_strided_slice %2 {offsets = [0, 115], sizes = [16, 512], strides = [1, 1]} : vector<16x1024xbf16> to vector<16x512xbf16>
    %cst_125 = arith.constant dense<0.000000e+00> : vector<16x512xf32>
    %205 = tpu.matmul %203, %204, %cst_125 {dimension_numbers = #tpu.dot_dimension_numbers<[1], [0], [0], [1], [0, 0, 1, 1], [], []>} : vector<16x16xbf16>, vector<16x512xbf16>, vector<16x512xf32> -> vector<16x512xf32>
    %206 = arith.addf %201, %205 : vector<16x512xf32>
    %c41 = arith.constant 41 : index
    %c0_126 = arith.constant 0 : index
    %c0_127 = arith.constant 0 : index
    %207 = vector.load %arg1[%c41, %c0_126, %c0_127] : memref<49x16x16xbf16, #tpu.memory_space<vmem>>, vector<1x16x16xbf16>
    %208 = vector.shape_cast %207 : vector<1x16x16xbf16> to vector<16x16xbf16>
    %209 = vector.extract_strided_slice %2 {offsets = [0, 116], sizes = [16, 512], strides = [1, 1]} : vector<16x1024xbf16> to vector<16x512xbf16>
    %cst_128 = arith.constant dense<0.000000e+00> : vector<16x512xf32>
    %210 = tpu.matmul %208, %209, %cst_128 {dimension_numbers = #tpu.dot_dimension_numbers<[1], [0], [0], [1], [0, 0, 1, 1], [], []>} : vector<16x16xbf16>, vector<16x512xbf16>, vector<16x512xf32> -> vector<16x512xf32>
    %211 = arith.addf %206, %210 : vector<16x512xf32>
    %c42 = arith.constant 42 : index
    %c0_129 = arith.constant 0 : index
    %c0_130 = arith.constant 0 : index
    %212 = vector.load %arg1[%c42, %c0_129, %c0_130] : memref<49x16x16xbf16, #tpu.memory_space<vmem>>, vector<1x16x16xbf16>
    %213 = vector.shape_cast %212 : vector<1x16x16xbf16> to vector<16x16xbf16>
    %214 = vector.extract_strided_slice %2 {offsets = [0, 132], sizes = [16, 512], strides = [1, 1]} : vector<16x1024xbf16> to vector<16x512xbf16>
    %cst_131 = arith.constant dense<0.000000e+00> : vector<16x512xf32>
    %215 = tpu.matmul %213, %214, %cst_131 {dimension_numbers = #tpu.dot_dimension_numbers<[1], [0], [0], [1], [0, 0, 1, 1], [], []>} : vector<16x16xbf16>, vector<16x512xbf16>, vector<16x512xf32> -> vector<16x512xf32>
    %216 = arith.addf %211, %215 : vector<16x512xf32>
    %c43 = arith.constant 43 : index
    %c0_132 = arith.constant 0 : index
    %c0_133 = arith.constant 0 : index
    %217 = vector.load %arg1[%c43, %c0_132, %c0_133] : memref<49x16x16xbf16, #tpu.memory_space<vmem>>, vector<1x16x16xbf16>
    %218 = vector.shape_cast %217 : vector<1x16x16xbf16> to vector<16x16xbf16>
    %219 = vector.extract_strided_slice %2 {offsets = [0, 133], sizes = [16, 512], strides = [1, 1]} : vector<16x1024xbf16> to vector<16x512xbf16>
    %cst_134 = arith.constant dense<0.000000e+00> : vector<16x512xf32>
    %220 = tpu.matmul %218, %219, %cst_134 {dimension_numbers = #tpu.dot_dimension_numbers<[1], [0], [0], [1], [0, 0, 1, 1], [], []>} : vector<16x16xbf16>, vector<16x512xbf16>, vector<16x512xf32> -> vector<16x512xf32>
    %221 = arith.addf %216, %220 : vector<16x512xf32>
    %c44 = arith.constant 44 : index
    %c0_135 = arith.constant 0 : index
    %c0_136 = arith.constant 0 : index
    %222 = vector.load %arg1[%c44, %c0_135, %c0_136] : memref<49x16x16xbf16, #tpu.memory_space<vmem>>, vector<1x16x16xbf16>
    %223 = vector.shape_cast %222 : vector<1x16x16xbf16> to vector<16x16xbf16>
    %224 = vector.extract_strided_slice %2 {offsets = [0, 134], sizes = [16, 512], strides = [1, 1]} : vector<16x1024xbf16> to vector<16x512xbf16>
    %cst_137 = arith.constant dense<0.000000e+00> : vector<16x512xf32>
    %225 = tpu.matmul %223, %224, %cst_137 {dimension_numbers = #tpu.dot_dimension_numbers<[1], [0], [0], [1], [0, 0, 1, 1], [], []>} : vector<16x16xbf16>, vector<16x512xbf16>, vector<16x512xf32> -> vector<16x512xf32>
    %226 = arith.addf %221, %225 : vector<16x512xf32>
    %c45 = arith.constant 45 : index
    %c0_138 = arith.constant 0 : index
    %c0_139 = arith.constant 0 : index
    %227 = vector.load %arg1[%c45, %c0_138, %c0_139] : memref<49x16x16xbf16, #tpu.memory_space<vmem>>, vector<1x16x16xbf16>
    %228 = vector.shape_cast %227 : vector<1x16x16xbf16> to vector<16x16xbf16>
    %229 = vector.extract_strided_slice %2 {offsets = [0, 135], sizes = [16, 512], strides = [1, 1]} : vector<16x1024xbf16> to vector<16x512xbf16>
    %cst_140 = arith.constant dense<0.000000e+00> : vector<16x512xf32>
    %230 = tpu.matmul %228, %229, %cst_140 {dimension_numbers = #tpu.dot_dimension_numbers<[1], [0], [0], [1], [0, 0, 1, 1], [], []>} : vector<16x16xbf16>, vector<16x512xbf16>, vector<16x512xf32> -> vector<16x512xf32>
    %231 = arith.addf %226, %230 : vector<16x512xf32>
    %c46 = arith.constant 46 : index
    %c0_141 = arith.constant 0 : index
    %c0_142 = arith.constant 0 : index
    %232 = vector.load %arg1[%c46, %c0_141, %c0_142] : memref<49x16x16xbf16, #tpu.memory_space<vmem>>, vector<1x16x16xbf16>
    %233 = vector.shape_cast %232 : vector<1x16x16xbf16> to vector<16x16xbf16>
    %234 = vector.extract_strided_slice %2 {offsets = [0, 136], sizes = [16, 512], strides = [1, 1]} : vector<16x1024xbf16> to vector<16x512xbf16>
    %cst_143 = arith.constant dense<0.000000e+00> : vector<16x512xf32>
    %235 = tpu.matmul %233, %234, %cst_143 {dimension_numbers = #tpu.dot_dimension_numbers<[1], [0], [0], [1], [0, 0, 1, 1], [], []>} : vector<16x16xbf16>, vector<16x512xbf16>, vector<16x512xf32> -> vector<16x512xf32>
    %236 = arith.addf %231, %235 : vector<16x512xf32>
    %c47 = arith.constant 47 : index
    %c0_144 = arith.constant 0 : index
    %c0_145 = arith.constant 0 : index
    %237 = vector.load %arg1[%c47, %c0_144, %c0_145] : memref<49x16x16xbf16, #tpu.memory_space<vmem>>, vector<1x16x16xbf16>
    %238 = vector.shape_cast %237 : vector<1x16x16xbf16> to vector<16x16xbf16>
    %239 = vector.extract_strided_slice %2 {offsets = [0, 137], sizes = [16, 512], strides = [1, 1]} : vector<16x1024xbf16> to vector<16x512xbf16>
    %cst_146 = arith.constant dense<0.000000e+00> : vector<16x512xf32>
    %240 = tpu.matmul %238, %239, %cst_146 {dimension_numbers = #tpu.dot_dimension_numbers<[1], [0], [0], [1], [0, 0, 1, 1], [], []>} : vector<16x16xbf16>, vector<16x512xbf16>, vector<16x512xf32> -> vector<16x512xf32>
    %241 = arith.addf %236, %240 : vector<16x512xf32>
    %c48 = arith.constant 48 : index
    %c0_147 = arith.constant 0 : index
    %c0_148 = arith.constant 0 : index
    %242 = vector.load %arg1[%c48, %c0_147, %c0_148] : memref<49x16x16xbf16, #tpu.memory_space<vmem>>, vector<1x16x16xbf16>
    %243 = vector.shape_cast %242 : vector<1x16x16xbf16> to vector<16x16xbf16>
    %244 = vector.extract_strided_slice %2 {offsets = [0, 138], sizes = [16, 512], strides = [1, 1]} : vector<16x1024xbf16> to vector<16x512xbf16>
    %cst_149 = arith.constant dense<0.000000e+00> : vector<16x512xf32>
    %245 = tpu.matmul %243, %244, %cst_149 {dimension_numbers = #tpu.dot_dimension_numbers<[1], [0], [0], [1], [0, 0, 1, 1], [], []>} : vector<16x16xbf16>, vector<16x512xbf16>, vector<16x512xf32> -> vector<16x512xf32>
    %246 = arith.addf %241, %245 : vector<16x512xf32>
    %c0_150 = arith.constant 0 : index
    %c0_151 = arith.constant 0 : index
    %247 = vector.load %arg4[%c0_150, %c0_151] : memref<16x1xf32, #tpu.memory_space<vmem>>, vector<16x1xf32>
    %248 = vector.broadcast %247 : vector<16x1xf32> to vector<16x512xf32>
    %249 = arith.addf %246, %248 : vector<16x512xf32>
    %250 = math.tanh %249 : vector<16x512xf32>
    %c0_152 = arith.constant 0 : index
    %c0_153 = arith.constant 0 : index
    %251 = vector.load %arg5[%c0_152, %c0_153] : memref<16x512xf32, #tpu.memory_space<vmem>>, vector<16x512xf32>
    tpu.vector_store %arg5[%c0_152, %c0_153], %250 {strides = array<i32>} : memref<16x512xf32, #tpu.memory_space<vmem>>, vector<16x512xf32>,
    return
  }
  func.func @transform_0(%arg0: i32) -> (i32, i32, i32) {
    %c0_i32 = arith.constant 0 : i32
    %c0_i32_0 = arith.constant 0 : i32
    %c0_i32_1 = arith.constant 0 : i32
    %c0_i32_2 = arith.constant 0 : i32
    return %c0_i32, %c0_i32_0, %c0_i32_1 : i32, i32, i32
  }
  func.func @transform_1(%arg0: i32) -> (i32, i32) {
    %c0_i32 = arith.constant 0 : i32
    %c0_i32_0 = arith.constant 0 : i32
    return %c0_i32, %arg0 : i32, i32
  }
  func.func @transform_2(%arg0: i32) -> (i32, i32) {
    %c1_i32 = arith.constant 1 : i32
    %0 = arith.addi %arg0, %c1_i32 : i32
    %c0_i32 = arith.constant 0 : i32
    %c0_i32_0 = arith.constant 0 : i32
    return %c0_i32, %0 : i32, i32
  }
  func.func @transform_3(%arg0: i32) -> (i32, i32) {
    %c0_i32 = arith.constant 0 : i32
    %c0_i32_0 = arith.constant 0 : i32
    %c0_i32_1 = arith.constant 0 : i32
    return %c0_i32, %c0_i32_0 : i32, i32
  }
  func.func @transform_4(%arg0: i32) -> (i32, i32) {
    %c0_i32 = arith.constant 0 : i32
    %c0_i32_0 = arith.constant 0 : i32
    return %c0_i32, %arg0 : i32, i32
  }
}

</mosaic_0001>

<bundles_post_ra>
// kernel: _lambda_.20
= control target key start
LH: loop header
LB: loop body
LE: loop exit
PB: predicated region body
PF: predicated region fallthrough
CT: control target
= control target key end

     0   :  { %s467_s12 = smov 0   ;;  %s469_s13 = smov 0   ;;  %s543_s0 = inlined_call_operand.vmem [shape: bf16[16,1024], index: 0, kind: input, shape index: {}]   ;;  %s544_s1 = inlined_call_operand.vmem [shape: f32[16,1], index: 1, kind: input, shape index: {}]   ;;  %s545_s2 = inlined_call_operand.vmem [shape: f32[16,1], index: 2, kind: input, shape index: {}]   ;;  %s546_s3 = inlined_call_operand.vmem [shape: bf16[16,1024], index: 3, kind: output, shape index: {}]  }
   0x1   :  { %s471_s14 = smov 0  }
   0x2 LB: > { %s370_s15 = sadd.s32 4294967295, %s444_s14   ;;  %s484_s16 = sadd.s32 1, %s444_s14   ;;  %s444_s14 = sphi %s471_s14, %s550_s14   ;;  %s440_s13 = sphi %s469_s13, %s549_s13   ;;  %s436_s12 = sphi %s467_s12, %s548_s12  }
   0x3   : > { %s17_s17 = ssub.s32 %s444_s14, %s484_s16  ;;  %s20_s18 = sadd.s32 1, %s440_s13 }
   0x4   : > { %p18_p0 = scmp.eq.s32.totalorder %s17_s17, 0  ;;  %p27_p1 = scmp.ne.s32.totalorder %s440_s13, %s436_s12 }
   0x5   : > { %p28_p2 = scmp.eq.s32.totalorder %s444_s14, 0  ;;  %p99_p3 = scmp.eq.s32.totalorder %s370_s15, 1 }
   0x6   : > { %s495_s19 = scalar_select %p18_p0, %s440_s13, %s20_s18  }
   0x7   : > { %p29_p4 = por %p28_p2, %p27_p1  ;;  %p497_p5 = por %p99_p3, %p27_p1 }
   0x8   : > { %p373_p6 = scmp.ge.s32.totalorder %s444_s14, 2 }
   0xa   : > { %127 = sbr.rel (%p373_p6) target bundleno = 24 (0x18), region = 24 }
  0x11   : > { %130 = sbr.rel (!%p29_p4) target bundleno = 24 (0x18), region = 28  ;;  %s132_s21 = sand.u32 (%p29_p4), 1, %s440_s13  }
  0x12   : > { %s389_s22 = sshll.u32 (%p29_p4), %s444_s14, 4  ;;  %s374_s23 = sshll.u32 (%p29_p4), %s132_s21, 5 }
  0x13   : > { %s137_s26 = scalar_lea.vmem (%p29_p4), %s543_s0, %s389_s22  ;;  %s134_s27 = scalar_lea.vmem (%p29_p4), [#allocation2], %s374_s23 }
  0x14   : > { %v150_v0 = vld [vmem:[%s137_s26] sm:$0xff] (%p29_p4)  ;;  %v152_v1 = vld [vmem:[%s137_s26 + $0x8] sm:$0xff] (%p29_p4) }
  0x15   : > { %v154_v2 = vld [vmem:[%s137_s26 + $0x20] sm:$0xff] (%p29_p4)  ;;  %151 = vst [vmem:[%s134_s27] sm:$0xff] (%p29_p4), %v150_v0  ;;  %153 = vst [vmem:[%s134_s27 + $0x8] sm:$0xff] (%p29_p4), %v152_v1  ;;  %v156_v3 = vld [vmem:[%s137_s26 + $0x28] sm:$0xff] (%p29_p4) }
  0x16   : > { %155 = vst [vmem:[%s134_s27 + $0x10] sm:$0xff] (%p29_p4), %v154_v2  ;;  %157 = vst [vmem:[%s134_s27 + $0x18] sm:$0xff] (%p29_p4), %v156_v3 }
  0x18 PF: > { %p377_p7 = scmp.ge.s32.totalorder %s444_s14, 1  ;;  %p162_p8 = scmp.lt.s32.totalorder %s444_s14, 3 }
  0x1a   : > { %p163_p9 = pnand %p377_p7, %p162_p8 }
  0x1b   : > { %v225_v4 = vld [vmem:[%s545_s2] sm:$0xff] (!%p163_p9)  ;;  %v446_v6 = vmov (!%p163_p9), 0   ;;  %v226_v7 = vld [vmem:[%s545_s2 + $0x8] sm:$0xff] (!%p163_p9)  ;;  %s169_s9 = sand.u32 (!%p163_p9), 1, %s436_s12  }
  0x1c   : > { %166 = sbr.rel (%p163_p9) target bundleno = 179 (0xb3), region = 51  ;;  %v205_v5 = vld [vmem:[%s544_s1] sm:$0xff] (!%p163_p9)  ;;  %421 = vset.pattern.permute.xlu1 (!%p163_p9), %v446_v6  ;;  %420 = vset.pattern.permute.xlu0 (!%p163_p9), %v446_v6  ;;  %v206_v8 = vld [vmem:[%s544_s1 + $0x8] sm:$0xff] (!%p163_p9)  ;;  %s522_s10 = sshll.u32 (!%p163_p9), %s169_s9, 5 }
  0x1d   : > { %229 = vperm.xlu1 (!%p163_p9), %421, %v225_v4   ;;  %209 = vperm.xlu0 (!%p163_p9), %420, %v205_v5   ;;  %s171_s11 = scalar_lea.vmem (!%p163_p9), [#allocation2], %s522_s10  ;;  %s190_s12 = scalar_lea.vmem (!%p163_p9), [#allocation3], %s522_s10 }
  0x1e   : > { %v193_v9 = vld [vmem:[%s171_s11] sm:$0xff] (!%p163_p9)  ;;  %v194_v10 = vld [vmem:[%s171_s11 + $0x8] sm:$0xff] (!%p163_p9)  ;;  %v195_v15 = vld [vmem:[%s171_s11 + $0x10] sm:$0xff] (!%p163_p9) }
  0x1f   : > { %v197_v11 = vunpack.c.l.bf16 (!%p163_p9), %v193_v9  ;;  %v198_v12 = vunpack.c.h.bf16 (!%p163_p9), %v193_v9  ;;  %v199_v13 = vunpack.c.l.bf16 (!%p163_p9), %v194_v10  ;;  %v200_v14 = vunpack.c.h.bf16 (!%p163_p9), %v194_v10  ;;  %v196_v16 = vld [vmem:[%s171_s11 + $0x18] sm:$0xff] (!%p163_p9) }
  0x20   : > { %v201_v23 = vunpack.c.l.bf16 (!%p163_p9), %v195_v15  ;;  %v202_v24 = vunpack.c.h.bf16 (!%p163_p9), %v195_v15  ;;  %v203_v25 = vunpack.c.l.bf16 (!%p163_p9), %v196_v16  ;;  %v204_v26 = vunpack.c.h.bf16 (!%p163_p9), %v196_v16 }
  0x21   : > { %234 = vperm.xlu1 (!%p163_p9), %421, %v226_v7   ;;  %214 = vperm.xlu0 (!%p163_p9), %420, %v206_v8  }
  0x23   : > { %s394_s17 = sshll.u32 (%p497_p5), %s370_s15, 4 }
  0x24   : > { %s290_s22 = scalar_lea.vmem (%p497_p5), %s546_s3, %s394_s17 }
  0x9c   : > { %v210_v17 = vpop.permute.xlu0 %209  ;;  %v230_v18 = vpop.permute.xlu1 %229 }
  0x9d   : > { %v217_v19 = vmul.f32 %v210_v17, %v197_v11  ;;  %v218_v20 = vmul.f32 %v210_v17, %v198_v12  ;;  %v219_v21 = vmul.f32 %v210_v17, %v199_v13  ;;  %v220_v22 = vmul.f32 %v210_v17, %v200_v14 }
  0x9f   : > { %v237_v27 = vadd.f32 %v230_v18, %v217_v19  ;;  %v238_v28 = vadd.f32 %v230_v18, %v218_v20  ;;  %v239_v29 = vadd.f32 %v230_v18, %v219_v21  ;;  %v240_v30 = vadd.f32 %v230_v18, %v220_v22 }
  0xa0   : > { %v215_v31 = vpop.permute.xlu0 %214  ;;  %v235_v42 = vpop.permute.xlu1 %234 }
  0xa1   : > { %v245_v32 = vmax.f32 %v237_v27, 0.0  ;;  %v246_v33 = vmax.f32 %v238_v28, 0.0  ;;  %v247_v34 = vmax.f32 %v239_v29, 0.0  ;;  %v248_v35 = vmax.f32 %v240_v30, 0.0 }
  0xa2   : > { %v221_v36 = vmul.f32 %v215_v31, %v201_v23  ;;  %v222_v37 = vmul.f32 %v215_v31, %v202_v24  ;;  %v223_v38 = vmul.f32 %v215_v31, %v203_v25  ;;  %v224_v39 = vmul.f32 %v215_v31, %v204_v26 }
  0xa3   : > { %v390_v40 = vpack.c.bf16 %v246_v33, %v245_v32  ;;  %v391_v41 = vpack.c.bf16 %v248_v35, %v247_v34 }
  0xa4   : > { %v241_v43 = vadd.f32 %v235_v42, %v221_v36  ;;  %v242_v44 = vadd.f32 %v235_v42, %v222_v37  ;;  %v243_v45 = vadd.f32 %v235_v42, %v223_v38  ;;  %v244_v46 = vadd.f32 %v235_v42, %v224_v39  ;;  %287 = sbr.rel (!%p497_p5) target bundleno = 179 (0xb3), region = 59 }
  0xa5   : > { %277 = vst [vmem:[%s190_s12] sm:$0xff] %v390_v40  ;;  %278 = vst [vmem:[%s190_s12 + $0x8] sm:$0xff] %v391_v41 }
  0xa6   : > { %v249_v47 = vmax.f32 %v241_v43, 0.0  ;;  %v250_v48 = vmax.f32 %v242_v44, 0.0  ;;  %v251_v49 = vmax.f32 %v243_v45, 0.0  ;;  %v252_v50 = vmax.f32 %v244_v46, 0.0 }
  0xa8   : > { %v392_v51 = vpack.c.bf16 %v250_v48, %v249_v47  ;;  %v393_v52 = vpack.c.bf16 %v252_v50, %v251_v49 }
  0xaa   : > { %279 = vst [vmem:[%s190_s12 + $0x10] sm:$0xff] %v392_v51  ;;  %280 = vst [vmem:[%s190_s12 + $0x18] sm:$0xff] %v393_v52 }
  0xac   : > { %v303_v53 = vld [vmem:[%s190_s12] sm:$0xff]  ;;  %v305_v54 = vld [vmem:[%s190_s12 + $0x8] sm:$0xff] }
  0xad   : > { %304 = vst [vmem:[%s290_s22] sm:$0xff] %v303_v53  ;;  %306 = vst [vmem:[%s290_s22 + $0x8] sm:$0xff] %v305_v54 }
  0xb1   : > { %v307_v55 = vld [vmem:[%s190_s12 + $0x10] sm:$0xff]  ;;  %v309_v56 = vld [vmem:[%s190_s12 + $0x18] sm:$0xff] }
  0xb2   : > { %308 = vst [vmem:[%s290_s22 + $0x20] sm:$0xff] %v307_v55  ;;  %310 = vst [vmem:[%s290_s22 + $0x28] sm:$0xff] %v309_v56 }
  0xb3 PF: > { %p10_p10 = scmp.ge.s32.totalorder %s484_s16, 4   ;;  %s548_s12 = smov %s440_s13 }
  0xb4   : > { %s549_s13 = smov %s495_s19  ;;  %s550_s14 = smov %s484_s16 }
  0xb5   :  { %12 = sbr.rel (!%p10_p10) target bundleno = 2 (0x2), region = 113 }

// kernel: _lambda_.22
= control target key start
LH: loop header
LB: loop body
LE: loop exit
PB: predicated region body
PF: predicated region fallthrough
CT: control target
= control target key end

     0   :  { %v81_v0 = vmov 0   ;;  %s126_s2 = inlined_call_operand.vmem [shape: f32[16,1], index: 2, kind: input, shape index: {}]   ;;  %s127_s1 = inlined_call_operand.vmem [shape: f32[16,1], index: 1, kind: input, shape index: {}]   ;;  %s128_s0 = inlined_call_operand.vmem [shape: bf16[16,256], index: 0, kind: input, shape index: {}]   ;;  %s129_s3 = inlined_call_operand.vmem [shape: bf16[16,256], index: 3, kind: output, shape index: {}]  }
   0x1   :  { %80 = vset.pattern.permute.xlu1 %v81_v0  ;;  %79 = vset.pattern.permute.xlu0 %v81_v0  ;;  %v36_v1 = vld [vmem:[%s126_s2] sm:$0xff]  ;;  %v37_v3 = vld [vmem:[%s126_s2 + $0x8] sm:$0xff] }
   0x2   :  { %v20_v2 = vld [vmem:[%s127_s1] sm:$0xff]  ;;  %40 = vperm.xlu1 %80, %v36_v1   ;;  %v21_v4 = vld [vmem:[%s127_s1 + $0x8] sm:$0xff] }
   0x3   :  { %24 = vperm.xlu0 %79, %v20_v2   ;;  %v14_v5 = vld [vmem:[%s128_s0] sm:$0xff]  ;;  %v15_v8 = vld [vmem:[%s128_s0 + $0x8] sm:$0xff] }
   0x4   :  { %v16_v6 = vunpack.c.l.bf16 %v14_v5  ;;  %v17_v7 = vunpack.c.h.bf16 %v14_v5  ;;  %v18_v13 = vunpack.c.l.bf16 %v15_v8  ;;  %v19_v14 = vunpack.c.h.bf16 %v15_v8 }
   0x6   :  { %45 = vperm.xlu1 %80, %v37_v3  }
   0x7   :  { %29 = vperm.xlu0 %79, %v21_v4  }
  0x81   :  { %v41_v9 = vpop.permute.xlu1 %40 }
  0x82   :  { %v25_v10 = vpop.permute.xlu0 %24 }
  0x83   :  { %v32_v11 = vmul.f32 %v25_v10, %v16_v6  ;;  %v33_v12 = vmul.f32 %v25_v10, %v17_v7 }
  0x85   :  { %v48_v15 = vadd.f32 %v41_v9, %v32_v11  ;;  %v49_v16 = vadd.f32 %v41_v9, %v33_v12  ;;  %v46_v22 = vpop.permute.xlu1 %45 }
  0x86   :  { %v30_v17 = vpop.permute.xlu0 %29 }
  0x87   :  { %v52_v18 = vmax.f32 %v48_v15, 0.0  ;;  %v53_v19 = vmax.f32 %v49_v16, 0.0  ;;  %v34_v20 = vmul.f32 %v30_v17, %v18_v13  ;;  %v35_v21 = vmul.f32 %v30_v17, %v19_v14 }
  0x89   :  { %v76_v23 = vpack.c.bf16 %v53_v19, %v52_v18  ;;  %v50_v24 = vadd.f32 %v46_v22, %v34_v20  ;;  %v51_v25 = vadd.f32 %v46_v22, %v35_v21 }
  0x8b   :  { %v54_v26 = vmax.f32 %v50_v24, 0.0  ;;  %v55_v27 = vmax.f32 %v51_v25, 0.0  ;;  %68 = vst [vmem:[%s129_s3] sm:$0xff] %v76_v23 }
  0x8d   :  { %v77_v28 = vpack.c.bf16 %v55_v27, %v54_v26 }
  0x8f   :  { %69 = vst [vmem:[%s129_s3 + $0x8] sm:$0xff] %v77_v28 }

// kernel: _lambda_.19
= control target key start
LH: loop header
LB: loop body
LE: loop exit
PB: predicated region body
PF: predicated region fallthrough
CT: control target
= control target key end

     0   :  { %s7537_s18 = smov 0   ;;  %s7539_s19 = smov 0   ;;  %s8886_s0 = inlined_call_operand.vmem [shape: bf16[49,16,16], index: 0, kind: input, shape index: {}]   ;;  %s8887_s1 = inlined_call_operand.vmem [shape: bf16[16,1536], index: 1, kind: input, shape index: {}, may-alias: {1,2}]   ;;  %s8888_s2 = inlined_call_operand.vmem [shape: bf16[16,1536], index: 2, kind: input, shape index: {}, may-alias: {1,2}]   ;;  %s8889_s3 = inlined_call_operand.vmem [shape: f32[1,1024], index: 3, kind: input, shape index: {}]   ;;  %s8890_s4 = inlined_call_operand.vmem [shape: bf16[16,1024], index: 4, kind: output, shape index: {0}]   ;;  %s8891_s5 = inlined_call_operand.vmem [shape: f32[2,16,2], index: 5, kind: output, shape index: {1}]  }
   0x1   :  { %s7541_s20 = smov 0   ;;  %s7543_s21 = smov 0  }
   0x2   :  { %s7545_s22 = smov 0  }
   0x3 LB: > { %s7563_s23 = sadd.s32 4294967295, %s7459_s22   ;;  %s7566_s24 = sadd.s32 1, %s7459_s22   ;;  %s7459_s22 = sphi %s7545_s22, %s8898_s22   ;;  %s7455_s21 = sphi %s7543_s21, %s8897_s21   ;;  %s7451_s20 = sphi %s7541_s20, %s8896_s20   ;;  %s7447_s19 = sphi %s7539_s19, %s8895_s19   ;;  %s7443_s18 = sphi %s7537_s18, %s8894_s18  }
   0x4   : > { %s41_s25 = ssub.s32 %s7459_s22, %s7566_s24  ;;  %s44_s26 = sadd.s32 1, %s7455_s21 }
   0x5   : > { %p42_p0 = scmp.eq.s32.totalorder %s41_s25, 0  ;;  %p51_p1 = scmp.ne.s32.totalorder %s7455_s21, %s7451_s20 }
   0x6   : > { %p52_p2 = scmp.eq.s32.totalorder %s7459_s22, 0  ;;  %s68_s27 = sadd.s32 1, %s7566_s24 }
   0x7   : > { %s7576_s28 = scalar_select %p42_p0, %s7455_s21, %s44_s26  }
   0x8   : > { %p53_p3 = por %p52_p2, %p51_p1  ;;  %s69_s29 = ssub.s32 %s7566_s24, %s68_s27 }
   0x9   : > { %p70_p4 = scmp.eq.s32.totalorder %s69_s29, 0  ;;  %s72_s30 = sadd.s32 1, %s7447_s19 }
   0xa   : > { %p79_p5 = scmp.ne.s32.totalorder %s7447_s19, %s7443_s18  ;;  %p135_p6 = scmp.eq.s32.totalorder %s7563_s23, 1 }
   0xb   : > { %s7584_s6 = scalar_select %p70_p4, %s7447_s19, %s72_s30  }
   0xc   : > { %p7586_p7 = por %p79_p5, %p52_p2  ;;  %p7590_p8 = por %p135_p6, %p51_p1 }
   0xd   : > { %p6606_p9 = scmp.ge.s32.totalorder %s7459_s22, 2 }
   0xf   : > { %186 = sbr.rel (%p6606_p9) target bundleno = 36 (0x24), region = 20 }
  0x16   : > { %189 = sbr.rel (!%p53_p3) target bundleno = 29 (0x1d), region = 24  ;;  %s191_s9 = sand.u32 (%p53_p3), 1, %s7455_s21  }
  0x17   : > { %s6881_s10 = sshll.u32 (%p53_p3), %s7459_s22, 4  ;;  %s6607_s11 = sshll.u32 (%p53_p3), %s191_s9, 5 }
  0x18   : > { %s196_s14 = scalar_lea.vmem (%p53_p3), %s8887_s1, %s6881_s10  ;;  %s193_s15 = scalar_lea.vmem (%p53_p3), [#allocation2], %s6607_s11 }
  0x19   : > { %v209_v0 = vld [vmem:[%s196_s14] sm:$0xff] (%p53_p3)  ;;  %v211_v1 = vld [vmem:[%s196_s14 + $0x8] sm:$0xff] (%p53_p3)  ;;  %v213_v2 = vld [vmem:[%s196_s14 + $0x30] sm:$0xff] (%p53_p3) }
  0x1a   : > { %210 = vst [vmem:[%s193_s15] sm:$0xff] (%p53_p3), %v209_v0  ;;  %212 = vst [vmem:[%s193_s15 + $0x8] sm:$0xff] (%p53_p3), %v211_v1  ;;  %v215_v3 = vld [vmem:[%s196_s14 + $0x38] sm:$0xff] (%p53_p3) }
  0x1b   : > { %214 = vst [vmem:[%s193_s15 + $0x10] sm:$0xff] (%p53_p3), %v213_v2  ;;  %216 = vst [vmem:[%s193_s15 + $0x18] sm:$0xff] (%p53_p3), %v215_v3 }
  0x1d PF: > { %222 = sbr.rel (!%p7586_p7) target bundleno = 36 (0x24), region = 47  ;;  %s224_s16 = sand.u32 (%p7586_p7), 1, %s7447_s19  }
  0x1e   : > { %s6611_s17 = sshll.u32 (%p7586_p7), %s7459_s22, 4  ;;  %s6610_s25 = sshll.u32 (%p7586_p7), %s224_s16, 5 }
  0x1f   : > { %s6521_s29 = scalar_lea.vmem (%p7586_p7), %s8888_s2, %s6611_s17  ;;  %s226_s30 = scalar_lea.vmem (%p7586_p7), [#allocation3], %s6610_s25 }
  0x20   : > { %v6612_v4 = vld [vmem:[%s6521_s29 + $0x10] sm:$0xff] (%p7586_p7)  ;;  %v6613_v5 = vld [vmem:[%s6521_s29 + $0x18] sm:$0xff] (%p7586_p7)  ;;  %v6614_v6 = vld [vmem:[%s6521_s29 + $0x40] sm:$0xff] (%p7586_p7) }
  0x21   : > { %244 = vst [vmem:[%s226_s30] sm:$0xff] (%p7586_p7), %v6612_v4  ;;  %246 = vst [vmem:[%s226_s30 + $0x8] sm:$0xff] (%p7586_p7), %v6613_v5  ;;  %v6615_v7 = vld [vmem:[%s6521_s29 + $0x48] sm:$0xff] (%p7586_p7) }
  0x22   : > { %248 = vst [vmem:[%s226_s30 + $0x10] sm:$0xff] (%p7586_p7), %v6614_v6  ;;  %250 = vst [vmem:[%s226_s30 + $0x18] sm:$0xff] (%p7586_p7), %v6615_v7 }
  0x24 PF: > { %p6616_p10 = scmp.ge.s32.totalorder %s7459_s22, 1  ;;  %p263_p11 = scmp.lt.s32.totalorder %s7459_s22, 3 }
  0x26   : > { %p264_p12 = pnand %p6616_p10, %p263_p11 }
  0x27   : > { %s270_s7 = sand.u32 (!%p264_p12), 1, %s7451_s20   ;;  %s277_s10 = sand.u32 (!%p264_p12), 1, %s7443_s18   ;;  %v7461_v8 = vmov (!%p264_p12), 0   ;;  %vm385_vm0 = vcmask (!%p264_p12), 1039360   ;;  %v7366_v20 = vld [vmem:[%s8886_s0 + $0x8] sm:$0xff] (!%p264_p12)   ;;  %vm394_vm1 = vcmask (!%p264_p12), 130048  }
  0x28   : > { %267 = sbr.rel (%p264_p12) target bundleno = 1118 (0x45e), region = 74  ;;  %s7610_s9 = sshll.u32 (!%p264_p12), %s270_s7, 5  ;;  %430 = vmatprep.mubr.bf16.mxu0 (!%p264_p12), %v7461_v8  ;;  %473 = vmatprep.mubr.bf16.mxu1 (!%p264_p12), %v7461_v8  ;;  %vm596_vm2 = vcmask (!%p264_p12), 1031168   ;;  %v7367_v30 = vld [vmem:[%s8886_s0] sm:$0xff] (!%p264_p12)   ;;  %vm720_vm3 = vcmask (!%p264_p12), 1022976   ;;  %vm844_vm4 = vcmask (!%p264_p12), 1014784  }
  0x29   : > { %s6618_s11 = sshll.u32 (!%p264_p12), %s277_s10, 5  ;;  %s7616_s12 = scalar_lea.vmem (!%p264_p12), [#allocation2], %s7610_s9  ;;  %v7368_v42 = vld [vmem:[%s8886_s0 + $0x10] sm:$0xff] (!%p264_p12)   ;;  %vm968_vm5 = vcmask (!%p264_p12), 1006592   ;;  %v7369_v53 = vld [vmem:[%s8886_s0 + $0x18] sm:$0xff] (!%p264_p12)   ;;  %vm1092_vm6 = vcmask (!%p264_p12), 998400  }
  0x2a   : > { %v7619_v9 = vld [vmem:[%s7616_s12 + $0x4] ss:$16 sps:$4 sm:$0xff] (!%p264_p12)   ;;  %v7622_v10 = vld [vmem:[%s7616_s12] ss:$16 sps:$4 sm:$0xff] (!%p264_p12)   ;;  %s7462_s20 = smov (!%p264_p12), 127   ;;  %s7628_s18 = scalar_lea.vmem (!%p264_p12), [#allocation3], %s6618_s11 }
  0x2b   : > { %377 = vrot.lane.b32.xlu0 (!%p264_p12), %v7619_v9, %s7462_s20  ;;  %v7626_v11 = vld [vmem:[%s7616_s12 + $0x8] ss:$16 sps:$4 sm:$0xff] (!%p264_p12)   ;;  %375 = vrot.lane.b32.xlu1 (!%p264_p12), %v7622_v10, %s7462_s20  ;;  %v7632_v12 = vld [vmem:[%s7616_s12 + $0xc] ss:$16 sps:$4 sm:$0xff] (!%p264_p12)   ;;  %s7463_s22 = smov (!%p264_p12), 126   ;;  %s7464_s13 = smov (!%p264_p12), 125  }
  0x2c   : > { %v7636_v13 = vld [vmem:[%s7628_s18] ss:$16 sps:$4 sm:$0xff] (!%p264_p12)   ;;  %s7465_s14 = smov (!%p264_p12), 124   ;;  %s7466_s15 = smov (!%p264_p12), 123   ;;  %vm1216_vm7 = vcmask (!%p264_p12), 867328   ;;  %vm1340_vm8 = vcmask (!%p264_p12), 859136  }
  0x2d   : > { %s7467_s16 = smov (!%p264_p12), 122   ;;  %s7468_s17 = smov (!%p264_p12), 106   ;;  %v7370_v0 = vld [vmem:[%s8886_s0 + $0x20] sm:$0xff] (!%p264_p12)   ;;  %vm1464_vm9 = vcmask (!%p264_p12), 850944   ;;  %vm1588_vm10 = vcmask (!%p264_p12), 842752   ;;  %vm1712_vm11 = vcmask (!%p264_p12), 834560  }
  0x2e   : > { %s7469_s25 = smov (!%p264_p12), 105   ;;  %s7470_s26 = smov (!%p264_p12), 104   ;;  %vm1836_vm12 = vcmask (!%p264_p12), 826368   ;;  %vm1960_vm13 = vcmask (!%p264_p12), 818176   ;;  %vm2084_vm14 = vcmask (!%p264_p12), 687104   ;;  %vm2208_vm15 = vcmask (!%p264_p12), 678912  }
  0x2f   : > { %379 = vrot.lane.b32.xlu0 %v7626_v11, %s7462_s20  ;;  %381 = vrot.lane.b32.xlu1 %v7632_v12, %s7462_s20  ;;  %s7471_s27 = smov 103   ;;  %s7472_s29 = smov 102  }
  0x30   : > { %s7473_s30 = smov 101   ;;  %s7474_s7 = smov 100  }
  0x31   : > { %s7483_s10 = smov 61   ;;  %s7488_s11 = smov 56  }
  0x32   : > { %p325_p0 = scmp.lt.s32.totalorder %s7563_s23, 1 }
  0x33   : > { %383 = vrot.lane.b32.xlu0 %v7636_v13, %s7462_s20  ;;  %588 = vrot.lane.b32.xlu1 %v7619_v9, %s7463_s22  ;;  %s7475_s20 = smov 84  }
  0x37   : > { %590 = vrot.lane.b32.xlu0 %v7626_v11, %s7463_s22  ;;  %586 = vrot.lane.b32.xlu1 %v7622_v10, %s7463_s22 }
  0x3b   : > { %592 = vrot.lane.b32.xlu0 %v7632_v12, %s7463_s22  ;;  %594 = vrot.lane.b32.xlu1 %v7636_v13, %s7463_s22  ;;  %s7480_s22 = smov 79  }
  0x3f   : > { %712 = vrot.lane.b32.xlu0 %v7619_v9, %s7464_s13  ;;  %714 = vrot.lane.b32.xlu1 %v7626_v11, %s7464_s13 }
  0x43   : > { %710 = vrot.lane.b32.xlu0 %v7622_v10, %s7464_s13  ;;  %716 = vrot.lane.b32.xlu1 %v7632_v12, %s7464_s13 }
  0x47   : > { %718 = vrot.lane.b32.xlu0 %v7636_v13, %s7464_s13  ;;  %836 = vrot.lane.b32.xlu1 %v7619_v9, %s7465_s14  ;;  %s7489_s13 = smov 40  }
  0x4b   : > { %838 = vrot.lane.b32.xlu0 %v7626_v11, %s7465_s14  ;;  %834 = vrot.lane.b32.xlu1 %v7622_v10, %s7465_s14 }
  0x4f   : > { %840 = vrot.lane.b32.xlu0 %v7632_v12, %s7465_s14  ;;  %842 = vrot.lane.b32.xlu1 %v7636_v13, %s7465_s14 }
  0x53   : > { %960 = vrot.lane.b32.xlu0 %v7619_v9, %s7466_s15  ;;  %962 = vrot.lane.b32.xlu1 %v7626_v11, %s7466_s15 }
  0x57   : > { %958 = vrot.lane.b32.xlu0 %v7622_v10, %s7466_s15  ;;  %964 = vrot.lane.b32.xlu1 %v7632_v12, %s7466_s15 }
  0x5b   : > { %966 = vrot.lane.b32.xlu0 %v7636_v13, %s7466_s15  ;;  %1084 = vrot.lane.b32.xlu1 %v7619_v9, %s7467_s16 }
  0x5f   : > { %1086 = vrot.lane.b32.xlu0 %v7626_v11, %s7467_s16  ;;  %1082 = vrot.lane.b32.xlu1 %v7622_v10, %s7467_s16 }
  0x63   : > { %1088 = vrot.lane.b32.xlu0 %v7632_v12, %s7467_s16  ;;  %1090 = vrot.lane.b32.xlu1 %v7636_v13, %s7467_s16 }
  0x67   : > { %1208 = vrot.lane.b32.xlu0 %v7619_v9, %s7468_s17  ;;  %1210 = vrot.lane.b32.xlu1 %v7626_v11, %s7468_s17 }
  0x6b   : > { %1206 = vrot.lane.b32.xlu0 %v7622_v10, %s7468_s17  ;;  %1212 = vrot.lane.b32.xlu1 %v7632_v12, %s7468_s17 }
  0x6f   : > { %1214 = vrot.lane.b32.xlu0 %v7636_v13, %s7468_s17  ;;  %1332 = vrot.lane.b32.xlu1 %v7619_v9, %s7469_s25  ;;  %s7476_s17 = smov 83  }
  0x73   : > { %1334 = vrot.lane.b32.xlu0 %v7626_v11, %s7469_s25  ;;  %1330 = vrot.lane.b32.xlu1 %v7622_v10, %s7469_s25 }
  0x77   : > { %1336 = vrot.lane.b32.xlu0 %v7632_v12, %s7469_s25  ;;  %1338 = vrot.lane.b32.xlu1 %v7636_v13, %s7469_s25  ;;  %s7481_s25 = smov 78  }
  0x7b   : > { %1456 = vrot.lane.b32.xlu0 %v7619_v9, %s7470_s26  ;;  %1458 = vrot.lane.b32.xlu1 %v7626_v11, %s7470_s26 }
  0x7f   : > { %1454 = vrot.lane.b32.xlu0 %v7622_v10, %s7470_s26  ;;  %1460 = vrot.lane.b32.xlu1 %v7632_v12, %s7470_s26 }
  0x83   : > { %1462 = vrot.lane.b32.xlu0 %v7636_v13, %s7470_s26  ;;  %1580 = vrot.lane.b32.xlu1 %v7619_v9, %s7471_s27  ;;  %s7486_s26 = smov 58  }
  0x87   : > { %1582 = vrot.lane.b32.xlu0 %v7626_v11, %s7471_s27  ;;  %1578 = vrot.lane.b32.xlu1 %v7622_v10, %s7471_s27 }
  0x8b   : > { %1584 = vrot.lane.b32.xlu0 %v7632_v12, %s7471_s27  ;;  %1586 = vrot.lane.b32.xlu1 %v7636_v13, %s7471_s27  ;;  %s7477_s27 = smov 82  }
  0x8f   : > { %1704 = vrot.lane.b32.xlu0 %v7619_v9, %s7472_s29  ;;  %1706 = vrot.lane.b32.xlu1 %v7626_v11, %s7472_s29 }
  0x93   : > { %1702 = vrot.lane.b32.xlu0 %v7622_v10, %s7472_s29  ;;  %1708 = vrot.lane.b32.xlu1 %v7632_v12, %s7472_s29 }
  0x97   : > { %1710 = vrot.lane.b32.xlu0 %v7636_v13, %s7472_s29  ;;  %1828 = vrot.lane.b32.xlu1 %v7619_v9, %s7473_s30  ;;  %s7482_s29 = smov 62  }
  0x9b   : > { %1830 = vrot.lane.b32.xlu0 %v7626_v11, %s7473_s30  ;;  %1826 = vrot.lane.b32.xlu1 %v7622_v10, %s7473_s30 }
  0x9d   : > { %v378_v14 = vpop.permute.xlu0 %377  ;;  %v376_v15 = vpop.permute.xlu1 %375 }
  0x9e   : > { %v386_v19 = vsel %vm385_vm0, %v376_v15, %v378_v14 }
  0x9f   : > { %1832 = vrot.lane.b32.xlu0 %v7632_v12, %s7473_s30  ;;  %1834 = vrot.lane.b32.xlu1 %v7636_v13, %s7473_s30  ;;  %s7487_s30 = smov 57  }
  0xa1   : > { %v380_v16 = vpop.permute.xlu0 %379  ;;  %v382_v17 = vpop.permute.xlu1 %381 }
  0xa2   : > { %v387_v18 = vsel %vm385_vm0, %v378_v14, %v380_v16  ;;  %v388_v24 = vsel %vm385_vm0, %v380_v16, %v382_v17 }
  0xa3   : > { %398 = vmatprep.subr.bf16.mxu0 %v387_v18  ;;  %1952 = vrot.lane.b32.xlu0 %v7619_v9, %s7474_s7 }
  0xa4   : > { %1954 = vrot.lane.b32.xlu1 %v7626_v11, %s7474_s7  ;;  %399 = vmatpush1.bf16.msra.mxu0 %v386_v19 }
  0xa5   : > { %v384_v21 = vpop.permute.xlu0 %383  ;;  %492 = vmatprep.subr.bf16.mxu0 %v7619_v9  ;;  %v589_v22 = vpop.permute.xlu1 %588 }
  0xa6   : > { %v389_v23 = vsel %vm385_vm0, %v382_v17, %v384_v21  ;;  %v7371_v17 = vld [vmem:[%s8886_s0 + $0x28] sm:$0xff]   ;;  %vm2332_vm0 = vcmask 670720  }
  0xa7   : > { %1950 = vrot.lane.b32.xlu0 %v7622_v10, %s7474_s7  ;;  %6632 = vmatmul.mubr.msk.bf16.vlgmr.msra.gmra.mrb[0].mxu0 %vm394_vm1, %v7366_v20 }
  0xa8   : > { %1956 = vrot.lane.b32.xlu1 %v7632_v12, %s7474_s7  ;;  %441 = vmatprep.subr.bf16.mxu1 %v389_v23 }
  0xa9   : > { %442 = vmatpush1.bf16.msra.mxu1 %v388_v24  ;;  %v591_v25 = vpop.permute.xlu0 %590  ;;  %493 = vmatpush1.bf16.msra.mxu0 %v7622_v10  ;;  %v587_v26 = vpop.permute.xlu1 %586 }
  0xaa   : > { %535 = vmatprep.subr.bf16.mxu1 %v7632_v12  ;;  %v598_v27 = vsel %vm596_vm2, %v589_v22, %v591_v25  ;;  %524 = vmatprep.mubr.bf16.mxu0 %v7461_v8  ;;  %v597_v32 = vsel %vm596_vm2, %v587_v26, %v589_v22 }
  0xab   : > { %1958 = vrot.lane.b32.xlu0 %v7636_v13, %s7474_s7  ;;  %608 = vmatprep.subr.bf16.mxu0 %v598_v27  ;;  %s7478_s7 = smov 81  }
  0xac   : > { %2076 = vrot.lane.b32.xlu1 %v7619_v9, %s7475_s20  ;;  %6633 = vmatmul.mubr.msk.bf16.vlgmr.msra.gmra.mrb[0].mxu1 %vm394_vm1, %v7366_v20 }
  0xad   : > { %536 = vmatpush1.bf16.msra.mxu1 %v7626_v11  ;;  %v593_v28 = vpop.permute.xlu0 %592  ;;  %567 = vmatprep.mubr.bf16.mxu1 %v7461_v8  ;;  %v595_v29 = vpop.permute.xlu1 %594 }
  0xae   : > { %v600_v31 = vsel %vm596_vm2, %v593_v28, %v595_v29  ;;  %v599_v38 = vsel %vm596_vm2, %v591_v25, %v593_v28  ;;  %v7372_v28 = vld [vmem:[%s8886_s0 + $0x30] sm:$0xff]   ;;  %vm2456_vm2 = vcmask 662528  }
  0xaf   : > { %2078 = vrot.lane.b32.xlu0 %v7626_v11, %s7475_s20  ;;  %651 = vmatprep.subr.bf16.mxu1 %v600_v31 }
  0xb0   : > { %2074 = vrot.lane.b32.xlu1 %v7622_v10, %s7475_s20 }
  0xb1   : > { %v713_v33 = vpop.permute.xlu0 %712  ;;  %v715_v34 = vpop.permute.xlu1 %714 }
  0xb2   : > { %v722_v35 = vsel %vm720_vm3, %v713_v33, %v715_v34 }
  0xb3   : > { %2080 = vrot.lane.b32.xlu0 %v7632_v12, %s7475_s20  ;;  %6635 = vmatmul.mubr.msk.bf16.vlgmr.msra.gmra.mrb[0].mxu0 %vm394_vm1, %v7367_v30 }
  0xb4   : > { %2082 = vrot.lane.b32.xlu1 %v7636_v13, %s7475_s20  ;;  %609 = vmatpush1.bf16.msra.mxu0 %v597_v32  ;;  %s7479_s20 = smov 80  }
  0xb5   : > { %v711_v36 = vpop.permute.xlu0 %710  ;;  %732 = vmatprep.subr.bf16.mxu0 %v722_v35  ;;  %640 = vmatprep.mubr.bf16.mxu0 %v7461_v8  ;;  %v717_v37 = vpop.permute.xlu1 %716 }
  0xb6   : > { %v721_v43 = vsel %vm720_vm3, %v711_v36, %v713_v33  ;;  %v723_v49 = vsel %vm720_vm3, %v715_v34, %v717_v37 }
  0xb7   : > { %2200 = vrot.lane.b32.xlu0 %v7619_v9, %s7476_s17 }
  0xb8   : > { %2202 = vrot.lane.b32.xlu1 %v7626_v11, %s7476_s17  ;;  %6636 = vmatmul.mubr.msk.bf16.vlgmr.msra.gmra.mrb[0].mxu1 %vm394_vm1, %v7367_v30 }
  0xb9   : > { %652 = vmatpush1.bf16.msra.mxu1 %v599_v38  ;;  %v719_v39 = vpop.permute.xlu0 %718  ;;  %683 = vmatprep.mubr.bf16.mxu1 %v7461_v8  ;;  %v837_v40 = vpop.permute.xlu1 %836 }
  0xba   : > { %v724_v41 = vsel %vm720_vm3, %v717_v37, %v719_v39  ;;  %v7373_v39 = vld [vmem:[%s8886_s0 + $0x38] sm:$0xff]   ;;  %vm2580_vm3 = vcmask 654336  }
  0xbb   : > { %2198 = vrot.lane.b32.xlu0 %v7622_v10, %s7476_s17  ;;  %775 = vmatprep.subr.bf16.mxu1 %v724_v41 }
  0xbc   : > { %2204 = vrot.lane.b32.xlu1 %v7632_v12, %s7476_s17 }
  0xbd   : > { %v839_v44 = vpop.permute.xlu0 %838  ;;  %v835_v45 = vpop.permute.xlu1 %834 }
  0xbe   : > { %v7757_v46 = vsel %vm844_vm4, %v837_v40, %v839_v44  ;;  %v845_v54 = vsel %vm844_vm4, %v835_v45, %v837_v40 }
  0xbf   : > { %2206 = vrot.lane.b32.xlu0 %v7636_v13, %s7476_s17  ;;  %6640 = vmatmul.mubr.msk.bf16.vlgmr.msra.gmra.mrb[0].mxu0 %vm394_vm1, %v7368_v42  ;;  %s7505_s17 = smov 119  }
  0xc0   : > { %2324 = vrot.lane.b32.xlu1 %v7619_v9, %s7477_s27  ;;  %733 = vmatpush1.bf16.msra.mxu0 %v721_v43 }
  0xc1   : > { %v841_v47 = vpop.permute.xlu0 %840  ;;  %856 = vmatprep.subr.bf16.mxu0 %v7757_v46  ;;  %764 = vmatprep.mubr.bf16.mxu0 %v7461_v8  ;;  %v7764_v48 = vpop.permute.xlu1 %842 }
  0xc2   : > { %v7770_v50 = vsel %vm844_vm4, %v841_v47, %v7764_v48  ;;  %v7793_v60 = vsel %vm844_vm4, %v839_v44, %v841_v47 }
  0xc3   : > { %2326 = vrot.lane.b32.xlu0 %v7626_v11, %s7477_s27 }
  0xc4   : > { %2322 = vrot.lane.b32.xlu1 %v7622_v10, %s7477_s27  ;;  %6641 = vmatmul.mubr.msk.bf16.vlgmr.msra.gmra.mrb[0].mxu1 %vm394_vm1, %v7368_v42 }
  0xc5   : > { %776 = vmatpush1.bf16.msra.mxu1 %v723_v49  ;;  %v961_v51 = vpop.permute.xlu0 %960  ;;  %807 = vmatprep.mubr.bf16.mxu1 %v7461_v8  ;;  %v963_v52 = vpop.permute.xlu1 %962 }
  0xc6   : > { %899 = vmatprep.subr.bf16.mxu1 %v7770_v50  ;;  %v7783_v57 = vsel %vm968_vm5, %v961_v51, %v963_v52 }
  0xc7   : > { %2328 = vrot.lane.b32.xlu0 %v7632_v12, %s7477_s27 }
  0xc8   : > { %2330 = vrot.lane.b32.xlu1 %v7636_v13, %s7477_s27  ;;  %s6887_s27 = sshll.u32 (%p7590_p8), %s7563_s23, 4 }
  0xc9   : > { %v959_v55 = vpop.permute.xlu0 %958  ;;  %v965_v56 = vpop.permute.xlu1 %964 }
  0xca   : > { %v969_v1 = vsel %vm968_vm5, %v959_v55, %v961_v51  ;;  %v7822_v7 = vsel %vm968_vm5, %v963_v52, %v965_v56 }
  0xcb   : > { %2448 = vrot.lane.b32.xlu0 %v7619_v9, %s7478_s7  ;;  %6645 = vmatmul.mubr.msk.bf16.vlgmr.msra.gmra.mrb[0].mxu0 %vm394_vm1, %v7369_v53 }
  0xcc   : > { %2450 = vrot.lane.b32.xlu1 %v7626_v11, %s7478_s7  ;;  %857 = vmatpush1.bf16.msra.mxu0 %v845_v54 }
  0xcd   : > { %v7788_v58 = vpop.permute.xlu0 %966  ;;  %980 = vmatprep.subr.bf16.mxu0 %v7783_v57  ;;  %888 = vmatprep.mubr.bf16.mxu0 %v7461_v8  ;;  %v1085_v59 = vpop.permute.xlu1 %1084 }
  0xce   : > { %v7798_v61 = vsel %vm968_vm5, %v965_v56, %v7788_v58 }
  0xcf   : > { %2446 = vrot.lane.b32.xlu0 %v7622_v10, %s7478_s7 }
  0xd0   : > { %2452 = vrot.lane.b32.xlu1 %v7632_v12, %s7478_s7  ;;  %6646 = vmatmul.mubr.msk.bf16.vlgmr.msra.gmra.mrb[0].mxu1 %vm394_vm1, %v7369_v53  ;;  %v7374_v53 = vld [vmem:[%s8886_s0 + $0x40] sm:$0xff]  }
  0xd1   : > { %900 = vmatpush1.bf16.msra.mxu1 %v7793_v60  ;;  %v1087_v62 = vpop.permute.xlu0 %1086  ;;  %931 = vmatprep.mubr.bf16.mxu1 %v7461_v8  ;;  %v1083_v63 = vpop.permute.xlu1 %1082 }
  0xd2   : > { %1023 = vmatprep.subr.bf16.mxu1 %v7798_v61  ;;  %v7814_v4 = vsel %vm1092_vm6, %v1085_v59, %v1087_v62  ;;  %v1093_v18 = vsel %vm1092_vm6, %v1083_v63, %v1085_v59 }
  0xd3   : > { %2454 = vrot.lane.b32.xlu0 %v7636_v13, %s7478_s7  ;;  %s6467_s7 = scalar_lea.vmem (%p7590_p8), %s8890_s4, %s6887_s27 }
  0xd4   : > { %2572 = vrot.lane.b32.xlu1 %v7619_v9, %s7479_s20 }
  0xd5   : > { %v1089_v2 = vpop.permute.xlu0 %1088  ;;  %v7811_v3 = vpop.permute.xlu1 %1090 }
  0xd6   : > { %v7827_v14 = vsel %vm1092_vm6, %v1089_v2, %v7811_v3  ;;  %v7846_v24 = vsel %vm1092_vm6, %v1087_v62, %v1089_v2 }
  0xd7   : > { %2574 = vrot.lane.b32.xlu0 %v7626_v11, %s7479_s20  ;;  %6650 = vmatmul.mubr.msk.bf16.vlgmr.msra.gmra.mrb[0].mxu0 %vm394_vm1, %v7370_v0 }
  0xd8   : > { %2570 = vrot.lane.b32.xlu1 %v7622_v10, %s7479_s20  ;;  %981 = vmatpush1.bf16.msra.mxu0 %v969_v1 }
  0xd9   : > { %v1209_v5 = vpop.permute.xlu0 %1208  ;;  %1104 = vmatprep.subr.bf16.mxu0 %v7814_v4  ;;  %1012 = vmatprep.mubr.bf16.mxu0 %v7461_v8  ;;  %v1211_v6 = vpop.permute.xlu1 %1210 }
  0xda   : > { %v1218_v21 = vsel %vm1216_vm7, %v1209_v5, %v1211_v6 }
  0xdb   : > { %2576 = vrot.lane.b32.xlu0 %v7632_v12, %s7479_s20 }
  0xdc   : > { %2578 = vrot.lane.b32.xlu1 %v7636_v13, %s7479_s20  ;;  %6651 = vmatmul.mubr.msk.bf16.vlgmr.msra.gmra.mrb[0].mxu1 %vm394_vm1, %v7370_v0 }
  0xdd   : > { %1024 = vmatpush1.bf16.msra.mxu1 %v7822_v7  ;;  %v1207_v15 = vpop.permute.xlu0 %1206  ;;  %1055 = vmatprep.mubr.bf16.mxu1 %v7461_v8  ;;  %v1213_v16 = vpop.permute.xlu1 %1212 }
  0xde   : > { %1147 = vmatprep.subr.bf16.mxu1 %v7827_v14  ;;  %v1217_v29 = vsel %vm1216_vm7, %v1207_v15, %v1209_v5  ;;  %v1219_v35 = vsel %vm1216_vm7, %v1211_v6, %v1213_v16  ;;  %v7375_v6 = vld [vmem:[%s8886_s0 + $0x48] sm:$0xff]  }
  0xdf   : > { %2696 = vrot.lane.b32.xlu0 %v7619_v9, %s7480_s22 }
  0xe0   : > { %2698 = vrot.lane.b32.xlu1 %v7626_v11, %s7480_s22 }
  0xe1   : > { %v1215_v19 = vpop.permute.xlu0 %1214  ;;  %v1333_v20 = vpop.permute.xlu1 %1332 }
  0xe2   : > { %v1220_v25 = vsel %vm1216_vm7, %v1213_v16, %v1215_v19  ;;  %vm2704_vm7 = vcmask 646144  }
  0xe3   : > { %2694 = vrot.lane.b32.xlu0 %v7622_v10, %s7480_s22  ;;  %6655 = vmatmul.mubr.msk.bf16.vlgmr.msra.gmra.mrb[0].mxu0 %vm394_vm1, %v7371_v17 }
  0xe4   : > { %2700 = vrot.lane.b32.xlu1 %v7632_v12, %s7480_s22  ;;  %1105 = vmatpush1.bf16.msra.mxu0 %v1093_v18 }
  0xe5   : > { %v1335_v22 = vpop.permute.xlu0 %1334  ;;  %1228 = vmatprep.subr.bf16.mxu0 %v1218_v21  ;;  %1136 = vmatprep.mubr.bf16.mxu0 %v7461_v8  ;;  %v1331_v23 = vpop.permute.xlu1 %1330 }
  0xe6   : > { %v1342_v32 = vsel %vm1340_vm8, %v1333_v20, %v1335_v22  ;;  %v1341_v40 = vsel %vm1340_vm8, %v1331_v23, %v1333_v20 }
  0xe7   : > { %2702 = vrot.lane.b32.xlu0 %v7636_v13, %s7480_s22  ;;  %s7484_s22 = smov 60  }
  0xe8   : > { %2820 = vrot.lane.b32.xlu1 %v7619_v9, %s7481_s25  ;;  %6656 = vmatmul.mubr.msk.bf16.vlgmr.msra.gmra.mrb[0].mxu1 %vm394_vm1, %v7371_v17 }
  0xe9   : > { %1148 = vmatpush1.bf16.msra.mxu1 %v7846_v24  ;;  %v1337_v26 = vpop.permute.xlu0 %1336  ;;  %1179 = vmatprep.mubr.bf16.mxu1 %v7461_v8  ;;  %v1339_v27 = vpop.permute.xlu1 %1338 }
  0xea   : > { %1271 = vmatprep.subr.bf16.mxu1 %v1220_v25  ;;  %v1344_v36 = vsel %vm1340_vm8, %v1337_v26, %v1339_v27  ;;  %v1343_v47 = vsel %vm1340_vm8, %v1335_v22, %v1337_v26  ;;  %v7376_v26 = vld [vmem:[%s8886_s0 + $0x50] sm:$0xff]   ;;  %vm2828_vm8 = vcmask 637952  }
  0xeb   : > { %2822 = vrot.lane.b32.xlu0 %v7626_v11, %s7481_s25 }
  0xec   : > { %2818 = vrot.lane.b32.xlu1 %v7622_v10, %s7481_s25 }
  0xed   : > { %v1457_v30 = vpop.permute.xlu0 %1456  ;;  %v7860_v31 = vpop.permute.xlu1 %1458 }
  0xee   : > { %v1466_v43 = vsel %vm1464_vm9, %v1457_v30, %v7860_v31 }
  0xef   : > { %2824 = vrot.lane.b32.xlu0 %v7632_v12, %s7481_s25  ;;  %6660 = vmatmul.mubr.msk.bf16.vlgmr.msra.gmra.mrb[0].mxu0 %vm394_vm1, %v7372_v28 }
  0xf0   : > { %2826 = vrot.lane.b32.xlu1 %v7636_v13, %s7481_s25  ;;  %1229 = vmatpush1.bf16.msra.mxu0 %v1217_v29  ;;  %s7485_s25 = smov 59  }
  0xf1   : > { %v1455_v33 = vpop.permute.xlu0 %1454  ;;  %1352 = vmatprep.subr.bf16.mxu0 %v1342_v32  ;;  %1260 = vmatprep.mubr.bf16.mxu0 %v7461_v8  ;;  %v1461_v34 = vpop.permute.xlu1 %1460 }
  0xf2   : > { %v1465_v54 = vsel %vm1464_vm9, %v1455_v33, %v1457_v30  ;;  %v1467_v0 = vsel %vm1464_vm9, %v7860_v31, %v1461_v34 }
  0xf3   : > { %2944 = vrot.lane.b32.xlu0 %v7619_v9, %s7482_s29 }
  0xf4   : > { %2946 = vrot.lane.b32.xlu1 %v7626_v11, %s7482_s29  ;;  %6661 = vmatmul.mubr.msk.bf16.vlgmr.msra.gmra.mrb[0].mxu1 %vm394_vm1, %v7372_v28 }
  0xf5   : > { %1272 = vmatpush1.bf16.msra.mxu1 %v1219_v35  ;;  %v1463_v37 = vpop.permute.xlu0 %1462  ;;  %1303 = vmatprep.mubr.bf16.mxu1 %v7461_v8  ;;  %v1581_v38 = vpop.permute.xlu1 %1580 }
  0xf6   : > { %1395 = vmatprep.subr.bf16.mxu1 %v1344_v36  ;;  %v1468_v49 = vsel %vm1464_vm9, %v1461_v34, %v1463_v37  ;;  %v7377_v37 = vld [vmem:[%s8886_s0 + $0x58] sm:$0xff]   ;;  %vm2952_vm9 = vcmask 506880  }
  0xf7   : > { %2942 = vrot.lane.b32.xlu0 %v7622_v10, %s7482_s29 }
  0xf8   : > { %2948 = vrot.lane.b32.xlu1 %v7632_v12, %s7482_s29 }
  0xf9   : > { %v7879_v41 = vpop.permute.xlu0 %1582  ;;  %v1579_v42 = vpop.permute.xlu1 %1578 }
  0xfa   : > { %v1590_v59 = vsel %vm1588_vm10, %v1581_v38, %v7879_v41  ;;  %v1589_v15 = vsel %vm1588_vm10, %v1579_v42, %v1581_v38 }
  0xfb   : > { %2950 = vrot.lane.b32.xlu0 %v7636_v13, %s7482_s29  ;;  %6665 = vmatmul.mubr.msk.bf16.vlgmr.msra.gmra.mrb[0].mxu0 %vm394_vm1, %v7373_v39  ;;  %s7491_s29 = smov 38  }
  0xfc   : > { %3068 = vrot.lane.b32.xlu1 %v7619_v9, %s7483_s10  ;;  %1353 = vmatpush1.bf16.msra.mxu0 %v1341_v40 }
  0xfd   : > { %v1585_v44 = vpop.permute.xlu0 %1584  ;;  %1476 = vmatprep.subr.bf16.mxu0 %v1466_v43  ;;  %1384 = vmatprep.mubr.bf16.mxu0 %v7461_v8  ;;  %v1587_v45 = vpop.permute.xlu1 %1586 }
  0xfe   : > { %v1592_v1 = vsel %vm1588_vm10, %v1585_v44, %v1587_v45  ;;  %v1591_v21 = vsel %vm1588_vm10, %v7879_v41, %v1585_v44  ;;  %vm3076_vm10 = vcmask 498688  }
  0xff   : > { %3070 = vrot.lane.b32.xlu0 %v7626_v11, %s7483_s10 }
 0x100   : > { %3066 = vrot.lane.b32.xlu1 %v7622_v10, %s7483_s10  ;;  %6666 = vmatmul.mubr.msk.bf16.vlgmr.msra.gmra.mrb[0].mxu1 %vm394_vm1, %v7373_v39 }
 0x101   : > { %1396 = vmatpush1.bf16.msra.mxu1 %v1343_v47  ;;  %v7892_v51 = vpop.permute.xlu0 %1704  ;;  %1427 = vmatprep.mubr.bf16.mxu1 %v7461_v8  ;;  %v7895_v52 = vpop.permute.xlu1 %1706 }
 0x102   : > { %1519 = vmatprep.subr.bf16.mxu1 %v1468_v49  ;;  %v1714_v18 = vsel %vm1712_vm11, %v7892_v51, %v7895_v52  ;;  %v8018_v49 = vld [vmem:[%s7616_s12] ss:$16 sps:$4 sm:$0xff]  }
 0x103   : > { %3072 = vrot.lane.b32.xlu0 %v7632_v12, %s7483_s10 }
 0x104   : > { %3074 = vrot.lane.b32.xlu1 %v7636_v13, %s7483_s10  ;;  %s7497_s10 = smov 17  }
 0x105   : > { %v1703_v55 = vpop.permute.xlu0 %1702  ;;  %v7903_v56 = vpop.permute.xlu1 %1708 }
 0x106   : > { %v1713_v27 = vsel %vm1712_vm11, %v1703_v55, %v7892_v51  ;;  %v1715_v33 = vsel %vm1712_vm11, %v7895_v52, %v7903_v56 }
 0x107   : > { %3192 = vrot.lane.b32.xlu0 %v7619_v9, %s7484_s22  ;;  %6670 = vmatmul.mubr.msk.bf16.vlgmr.msra.gmra.mrb[0].mxu0 %vm394_vm1, %v7374_v53 }
 0x108   : > { %3194 = vrot.lane.b32.xlu1 %v7626_v11, %s7484_s22  ;;  %1477 = vmatpush1.bf16.msra.mxu0 %v1465_v54  ;;  %v8038_v54 = vld [vmem:[%s7616_s12 + $0x4] ss:$16 sps:$4 sm:$0xff]  }
 0x109   : > { %v1711_v62 = vpop.permute.xlu0 %1710  ;;  %1600 = vmatprep.subr.bf16.mxu0 %v1590_v59  ;;  %1508 = vmatprep.mubr.bf16.mxu0 %v7461_v8  ;;  %v7911_v63 = vpop.permute.xlu1 %1828 }
 0x10a   : > { %v1716_v22 = vsel %vm1712_vm11, %v7903_v56, %v1711_v62  ;;  %v8048_v56 = vld [vmem:[%s7616_s12 + $0x8] ss:$16 sps:$4 sm:$0xff]   ;;  %vm3200_vm11 = vcmask 490496  }
 0x10b   : > { %3190 = vrot.lane.b32.xlu0 %v7622_v10, %s7484_s22 }
 0x10c   : > { %3196 = vrot.lane.b32.xlu1 %v7632_v12, %s7484_s22  ;;  %6671 = vmatmul.mubr.msk.bf16.vlgmr.msra.gmra.mrb[0].mxu1 %vm394_vm1, %v7374_v53 }
 0x10d   : > { %1520 = vmatpush1.bf16.msra.mxu1 %v1467_v0  ;;  %v7919_v2 = vpop.permute.xlu0 %1830  ;;  %1551 = vmatprep.mubr.bf16.mxu1 %v7461_v8  ;;  %v1827_v5 = vpop.permute.xlu1 %1826  ;;  %v8061_v0 = vld [vmem:[%s7616_s12 + $0xc] ss:$16 sps:$4 sm:$0xff]   ;;  %s7490_s12 = smov 39  }
 0x10e   : > { %1643 = vmatprep.subr.bf16.mxu1 %v1592_v1  ;;  %v1838_v30 = vsel %vm1836_vm12, %v7911_v63, %v7919_v2  ;;  %v1837_v38 = vsel %vm1836_vm12, %v1827_v5, %v7911_v63  ;;  %v7379_v1 = vld [vmem:[%s8886_s0 + $0x68] sm:$0xff]  }
 0x10f   : > { %3198 = vrot.lane.b32.xlu0 %v7636_v13, %s7484_s22 }
 0x110   : > { %3316 = vrot.lane.b32.xlu1 %v7619_v9, %s7485_s25 }
 0x111   : > { %v7928_v16 = vpop.permute.xlu0 %1832  ;;  %v1835_v17 = vpop.permute.xlu1 %1834 }
 0x112   : > { %v1840_v34 = vsel %vm1836_vm12, %v7928_v16, %v1835_v17  ;;  %v1839_v43 = vsel %vm1836_vm12, %v7919_v2, %v7928_v16  ;;  %v8068_v2 = vld [vmem:[%s7628_s18] ss:$16 sps:$4 sm:$0xff]   ;;  %vm3324_vm12 = vcmask 482304  }
 0x113   : > { %3318 = vrot.lane.b32.xlu0 %v7626_v11, %s7485_s25  ;;  %6675 = vmatmul.mubr.msk.bf16.vlgmr.msra.gmra.mrb[0].mxu0 %vm394_vm1, %v7375_v6 }
 0x114   : > { %3314 = vrot.lane.b32.xlu1 %v7622_v10, %s7485_s25  ;;  %1601 = vmatpush1.bf16.msra.mxu0 %v1589_v15 }
 0x115   : > { %v7936_v19 = vpop.permute.xlu0 %1952  ;;  %1724 = vmatprep.subr.bf16.mxu0 %v1714_v18  ;;  %1632 = vmatprep.mubr.bf16.mxu0 %v7461_v8 }
 0x116   : > { %v7939_v20 = vpop.permute.xlu1 %1954 }
 0x117   : > { %3320 = vrot.lane.b32.xlu0 %v7632_v12, %s7485_s25  ;;  %v1962_v41 = vsel %vm1960_vm13, %v7936_v19, %v7939_v20 }
 0x118   : > { %3322 = vrot.lane.b32.xlu1 %v7636_v13, %s7485_s25  ;;  %6676 = vmatmul.mubr.msk.bf16.vlgmr.msra.gmra.mrb[0].mxu1 %vm394_vm1, %v7375_v6 }
 0x119   : > { %1644 = vmatpush1.bf16.msra.mxu1 %v1591_v21  ;;  %v7948_v23 = vpop.permute.xlu0 %1950  ;;  %1675 = vmatprep.mubr.bf16.mxu1 %v7461_v8 }
 0x11a   : > { %v7951_v25 = vpop.permute.xlu1 %1956  ;;  %1767 = vmatprep.subr.bf16.mxu1 %v1716_v22 }
 0x11b   : > { %3440 = vrot.lane.b32.xlu0 %v7619_v9, %s7486_s26 }
 0x11c   : > { %3442 = vrot.lane.b32.xlu1 %v7626_v11, %s7486_s26 }
 0x11d   : > { %v1959_v28 = vpop.permute.xlu0 %1958 }
 0x11e   : > { %v7960_v29 = vpop.permute.xlu1 %2076  ;;  %v1964_v44 = vsel %vm1960_vm13, %v7951_v25, %v1959_v28 }
 0x11f   : > { %3438 = vrot.lane.b32.xlu0 %v7622_v10, %s7486_s26  ;;  %6680 = vmatmul.mubr.msk.bf16.vlgmr.msra.gmra.mrb[0].mxu0 %vm394_vm1, %v7376_v26 }
 0x120   : > { %3444 = vrot.lane.b32.xlu1 %v7632_v12, %s7486_s26  ;;  %1725 = vmatpush1.bf16.msra.mxu0 %v1713_v27 }
 0x121   : > { %v7968_v31 = vpop.permute.xlu0 %2078  ;;  %1848 = vmatprep.subr.bf16.mxu0 %v1838_v30  ;;  %1756 = vmatprep.mubr.bf16.mxu0 %v7461_v8 }
 0x122   : > { %v7971_v32 = vpop.permute.xlu1 %2074  ;;  %v2086_v53 = vsel %vm2084_vm14, %v7960_v29, %v7968_v31 }
 0x123   : > { %3446 = vrot.lane.b32.xlu0 %v7636_v13, %s7486_s26  ;;  %v2085_v5 = vsel %vm2084_vm14, %v7971_v32, %v7960_v29  ;;  %s7506_s26 = smov 118  }
 0x124   : > { %3564 = vrot.lane.b32.xlu1 %v7619_v9, %s7487_s30  ;;  %6681 = vmatmul.mubr.msk.bf16.vlgmr.msra.gmra.mrb[0].mxu1 %vm394_vm1, %v7376_v26 }
 0x125   : > { %1768 = vmatpush1.bf16.msra.mxu1 %v1715_v33  ;;  %v7981_v35 = vpop.permute.xlu0 %2080  ;;  %1799 = vmatprep.mubr.bf16.mxu1 %v7461_v8 }
 0x126   : > { %v2083_v36 = vpop.permute.xlu1 %2082  ;;  %1891 = vmatprep.subr.bf16.mxu1 %v1840_v34 }
 0x127   : > { %3566 = vrot.lane.b32.xlu0 %v7626_v11, %s7487_s30  ;;  %v2088_v59 = vsel %vm2084_vm14, %v7981_v35, %v2083_v36 }
 0x128   : > { %3562 = vrot.lane.b32.xlu1 %v7622_v10, %s7487_s30 }
 0x129   : > { %v7991_v39 = vpop.permute.xlu0 %2200 }
 0x12a   : > { %v7993_v40 = vpop.permute.xlu1 %2202 }
 0x12b   : > { %3568 = vrot.lane.b32.xlu0 %v7632_v12, %s7487_s30  ;;  %6685 = vmatmul.mubr.msk.bf16.vlgmr.msra.gmra.mrb[0].mxu0 %vm394_vm1, %v7377_v37  ;;  %v2210_v16 = vsel %vm2208_vm15, %v7991_v39, %v7993_v40 }
 0x12c   : > { %3570 = vrot.lane.b32.xlu1 %v7636_v13, %s7487_s30  ;;  %1849 = vmatpush1.bf16.msra.mxu0 %v1837_v38  ;;  %s7492_s30 = smov 37  }
 0x12d   : > { %v8001_v42 = vpop.permute.xlu0 %2198  ;;  %1972 = vmatprep.subr.bf16.mxu0 %v1962_v41  ;;  %1880 = vmatprep.mubr.bf16.mxu0 %v7461_v8 }
 0x12e   : > { %v8004_v10 = vpop.permute.xlu1 %2204 }
 0x12f   : > { %3688 = vrot.lane.b32.xlu0 %v7619_v9, %s7488_s11  ;;  %v7378_v9 = vld [vmem:[%s8886_s0 + $0x60] sm:$0xff]  }
 0x130   : > { %3690 = vrot.lane.b32.xlu1 %v7626_v11, %s7488_s11  ;;  %6686 = vmatmul.mubr.msk.bf16.vlgmr.msra.gmra.mrb[0].mxu1 %vm394_vm1, %v7377_v37  ;;  %v1961_v11 = vsel %vm1960_vm13, %v7948_v23, %v7936_v19  ;;  %v2087_v19 = vsel %vm2084_vm14, %v7968_v31, %v7981_v35  ;;  %v7380_v23 = vld [vmem:[%s8886_s0 + $0x70] sm:$0xff]   ;;  %v2211_v31 = vsel %vm2208_vm15, %v7993_v40, %v8004_v10  ;;  %v7381_v35 = vld [vmem:[%s8886_s0 + $0x78] sm:$0xff]   ;;  %vm3572_vm14 = vcmask 465920  }
 0x131   : > { %1892 = vmatpush1.bf16.msra.mxu1 %v1839_v43  ;;  %v2207_v45 = vpop.permute.xlu0 %2206  ;;  %1923 = vmatprep.mubr.bf16.mxu1 %v7461_v8 }
 0x132   : > { %v8015_v47 = vpop.permute.xlu1 %2324  ;;  %2015 = vmatprep.subr.bf16.mxu1 %v1964_v44 }
 0x133   : > { %3686 = vrot.lane.b32.xlu0 %v8018_v49, %s7488_s11 }
 0x134   : > { %3692 = vrot.lane.b32.xlu1 %v7632_v12, %s7488_s11 }
 0x135   : > { %v8028_v51 = vpop.permute.xlu0 %2326 }
 0x136   : > { %v8030_v52 = vpop.permute.xlu1 %2322  ;;  %v2334_v28 = vsel %vm2332_vm0, %v8015_v47, %v8028_v51 }
 0x137   : > { %3694 = vrot.lane.b32.xlu0 %v7636_v13, %s7488_s11  ;;  %6690 = vmatmul.mubr.msk.bf16.vlgmr.msra.gmra.mrb[0].mxu0 %vm394_vm1, %v7378_v9  ;;  %v1963_v13 = vsel %vm1960_vm13, %v7939_v20, %v7951_v25  ;;  %v2212_v20 = vsel %vm2208_vm15, %v8004_v10, %v2207_v45  ;;  %v2209_v25 = vsel %vm2208_vm15, %v8001_v42, %v7991_v39  ;;  %s7493_s11 = smov 36   ;;  %v7382_v45 = vld [vmem:[%s8886_s0 + $0x80] sm:$0xff]   ;;  %vm3448_vm13 = vcmask 474112  }
 0x138   : > { %3812 = vrot.lane.b32.xlu1 %v8038_v54, %s7489_s13  ;;  %1973 = vmatpush1.bf16.msra.mxu0 %v1961_v11  ;;  %v2333_v36 = vsel %vm2332_vm0, %v8030_v52, %v8015_v47  ;;  %vm3696_vm15 = vcmask 457728  }
 0x139   : > { %v8041_v12 = vpop.permute.xlu0 %2328  ;;  %2096 = vmatprep.subr.bf16.mxu0 %v2086_v53  ;;  %2004 = vmatprep.mubr.bf16.mxu0 %v7461_v8 }
 0x13a   : > { %v2331_v55 = vpop.permute.xlu1 %2330  ;;  %v2335_v42 = vsel %vm2332_vm0, %v8028_v51, %v8041_v12 }
 0x13b   : > { %3814 = vrot.lane.b32.xlu0 %v8048_v56, %s7489_s13  ;;  %v2336_v32 = vsel %vm2332_vm0, %v8041_v12, %v2331_v55  ;;  %vm3820_vm0 = vcmask 326656  }
 0x13c   : > { %3810 = vrot.lane.b32.xlu1 %v8018_v49, %s7489_s13  ;;  %6691 = vmatmul.mubr.msk.bf16.vlgmr.msra.gmra.mrb[0].mxu1 %vm394_vm1, %v7378_v9 }
 0x13d   : > { %2016 = vmatpush1.bf16.msra.mxu1 %v1963_v13  ;;  %v8055_v62 = vpop.permute.xlu0 %2448  ;;  %2047 = vmatprep.mubr.bf16.mxu1 %v7461_v8 }
 0x13e   : > { %v8058_v63 = vpop.permute.xlu1 %2450  ;;  %2139 = vmatprep.subr.bf16.mxu1 %v2088_v59 }
 0x13f   : > { %3816 = vrot.lane.b32.xlu0 %v8061_v0, %s7489_s13  ;;  %v2458_v39 = vsel %vm2456_vm2, %v8055_v62, %v8058_v63 }
 0x140   : > { %3818 = vrot.lane.b32.xlu1 %v8068_v2, %s7489_s13  ;;  %s7494_s13 = smov 35  }
 0x141   : > { %v8074_v6 = vpop.permute.xlu0 %2446 }
 0x142   : > { %v8076_v15 = vpop.permute.xlu1 %2452  ;;  %v2457_v47 = vsel %vm2456_vm2, %v8074_v6, %v8055_v62  ;;  %v7383_v62 = vld [vmem:[%s8886_s0 + $0x88] sm:$0xff]  }
 0x143   : > { %3936 = vrot.lane.b32.xlu0 %v8038_v54, %s7490_s12  ;;  %6695 = vmatmul.mubr.msk.bf16.vlgmr.msra.gmra.mrb[0].mxu0 %vm394_vm1, %v7379_v1  ;;  %v2459_v12 = vsel %vm2456_vm2, %v8058_v63, %v8076_v15 }
 0x144   : > { %3938 = vrot.lane.b32.xlu1 %v8048_v56, %s7490_s12  ;;  %2097 = vmatpush1.bf16.msra.mxu0 %v2085_v5 }
 0x145   : > { %v2455_v17 = vpop.permute.xlu0 %2454  ;;  %2220 = vmatprep.subr.bf16.mxu0 %v2210_v16  ;;  %2128 = vmatprep.mubr.bf16.mxu0 %v7461_v8 }
 0x146   : > { %v8085_v18 = vpop.permute.xlu1 %2572  ;;  %v2460_v10 = vsel %vm2456_vm2, %v8076_v15, %v2455_v17  ;;  %vm3944_vm2 = vcmask 318464  }
 0x147   : > { %3934 = vrot.lane.b32.xlu0 %v8018_v49, %s7490_s12 }
 0x148   : > { %3940 = vrot.lane.b32.xlu1 %v8061_v0, %s7490_s12  ;;  %6696 = vmatmul.mubr.msk.bf16.vlgmr.msra.gmra.mrb[0].mxu1 %vm394_vm1, %v7379_v1 }
 0x149   : > { %2140 = vmatpush1.bf16.msra.mxu1 %v2087_v19  ;;  %v8095_v21 = vpop.permute.xlu0 %2574  ;;  %2171 = vmatprep.mubr.bf16.mxu1 %v7461_v8 }
 0x14a   : > { %v8098_v22 = vpop.permute.xlu1 %2570  ;;  %2263 = vmatprep.subr.bf16.mxu1 %v2212_v20  ;;  %v2582_v51 = vsel %vm2580_vm3, %v8085_v18, %v8095_v21 }
 0x14b   : > { %3942 = vrot.lane.b32.xlu0 %v8068_v2, %s7490_s12  ;;  %v2581_v63 = vsel %vm2580_vm3, %v8098_v22, %v8085_v18  ;;  %s7495_s12 = smov 34  }
 0x14c   : > { %4060 = vrot.lane.b32.xlu1 %v8038_v54, %s7491_s29 }
 0x14d   : > { %v8108_v26 = vpop.permute.xlu0 %2576 }
 0x14e   : > { %v8110_v27 = vpop.permute.xlu1 %2578  ;;  %v2583_v17 = vsel %vm2580_vm3, %v8095_v21, %v8108_v26  ;;  %v7384_v21 = vld [vmem:[%s8886_s0 + $0x90] sm:$0xff]  }
 0x14f   : > { %4062 = vrot.lane.b32.xlu0 %v8048_v56, %s7491_s29  ;;  %6700 = vmatmul.mubr.msk.bf16.vlgmr.msra.gmra.mrb[0].mxu0 %vm394_vm1, %v7380_v23  ;;  %v2584_v55 = vsel %vm2580_vm3, %v8108_v26, %v8110_v27  ;;  %vm4068_vm3 = vcmask 310272  }
 0x150   : > { %4058 = vrot.lane.b32.xlu1 %v8018_v49, %s7491_s29  ;;  %2221 = vmatpush1.bf16.msra.mxu0 %v2209_v25 }
 0x151   : > { %v8118_v29 = vpop.permute.xlu0 %2696  ;;  %2344 = vmatprep.subr.bf16.mxu0 %v2334_v28  ;;  %2252 = vmatprep.mubr.bf16.mxu0 %v7461_v8 }
 0x152   : > { %v8121_v30 = vpop.permute.xlu1 %2698 }
 0x153   : > { %4064 = vrot.lane.b32.xlu0 %v8061_v0, %s7491_s29  ;;  %v2706_v6 = vsel %vm2704_vm7, %v8118_v29, %v8121_v30 }
 0x154   : > { %4066 = vrot.lane.b32.xlu1 %v8068_v2, %s7491_s29  ;;  %6701 = vmatmul.mubr.msk.bf16.vlgmr.msra.gmra.mrb[0].mxu1 %vm394_vm1, %v7380_v23  ;;  %s7496_s29 = smov 18  }
 0x155   : > { %2264 = vmatpush1.bf16.msra.mxu1 %v2211_v31  ;;  %v8131_v33 = vpop.permute.xlu0 %2694  ;;  %2295 = vmatprep.mubr.bf16.mxu1 %v7461_v8 }
 0x156   : > { %v8134_v34 = vpop.permute.xlu1 %2700  ;;  %2387 = vmatprep.subr.bf16.mxu1 %v2336_v32  ;;  %v2705_v22 = vsel %vm2704_vm7, %v8131_v33, %v8118_v29 }
 0x157   : > { %4184 = vrot.lane.b32.xlu0 %v8038_v54, %s7492_s30  ;;  %v2707_v29 = vsel %vm2704_vm7, %v8121_v30, %v8134_v34  ;;  %v7385_v30 = vld [vmem:[%s8886_s0 + $0x98] sm:$0xff]  }
 0x158   : > { %4186 = vrot.lane.b32.xlu1 %v8048_v56, %s7492_s30 }
 0x159   : > { %v8144_v37 = vpop.permute.xlu0 %2702 }
 0x15a   : > { %v8146_v38 = vpop.permute.xlu1 %2820  ;;  %v2708_v18 = vsel %vm2704_vm7, %v8134_v34, %v8144_v37  ;;  %vm4192_vm7 = vcmask 302080  }
 0x15b   : > { %4182 = vrot.lane.b32.xlu0 %v8018_v49, %s7492_s30  ;;  %6705 = vmatmul.mubr.msk.bf16.vlgmr.msra.gmra.mrb[0].mxu0 %vm394_vm1, %v7381_v35 }
 0x15c   : > { %4188 = vrot.lane.b32.xlu1 %v8061_v0, %s7492_s30  ;;  %2345 = vmatpush1.bf16.msra.mxu0 %v2333_v36 }
 0x15d   : > { %v8154_v40 = vpop.permute.xlu0 %2822  ;;  %2468 = vmatprep.subr.bf16.mxu0 %v2458_v39  ;;  %2376 = vmatprep.mubr.bf16.mxu0 %v7461_v8 }
 0x15e   : > { %v8157_v41 = vpop.permute.xlu1 %2818  ;;  %v2830_v26 = vsel %vm2828_vm8, %v8146_v38, %v8154_v40 }
 0x15f   : > { %4190 = vrot.lane.b32.xlu0 %v8068_v2, %s7492_s30  ;;  %v2829_v34 = vsel %vm2828_vm8, %v8157_v41, %v8146_v38 }
 0x160   : > { %4308 = vrot.lane.b32.xlu1 %v8038_v54, %s7493_s11  ;;  %6706 = vmatmul.mubr.msk.bf16.vlgmr.msra.gmra.mrb[0].mxu1 %vm394_vm1, %v7381_v35 }
 0x161   : > { %2388 = vmatpush1.bf16.msra.mxu1 %v2335_v42  ;;  %v8167_v43 = vpop.permute.xlu0 %2824  ;;  %2419 = vmatprep.mubr.bf16.mxu1 %v7461_v8 }
 0x162   : > { %v8170_v44 = vpop.permute.xlu1 %2826  ;;  %2511 = vmatprep.subr.bf16.mxu1 %v2460_v10  ;;  %v2831_v41 = vsel %vm2828_vm8, %v8154_v40, %v8167_v43  ;;  %v7386_v40 = vld [vmem:[%s8886_s0 + $0xa0] sm:$0xff]  }
 0x163   : > { %4310 = vrot.lane.b32.xlu0 %v8048_v56, %s7493_s11  ;;  %v2832_v31 = vsel %vm2828_vm8, %v8167_v43, %v8170_v44  ;;  %vm4316_vm8 = vcmask 293888  }
 0x164   : > { %4306 = vrot.lane.b32.xlu1 %v8018_v49, %s7493_s11 }
 0x165   : > { %v8180_v9 = vpop.permute.xlu0 %2944 }
 0x166   : > { %v8182_v11 = vpop.permute.xlu1 %2946 }
 0x167   : > { %4312 = vrot.lane.b32.xlu0 %v8061_v0, %s7493_s11  ;;  %6710 = vmatmul.mubr.msk.bf16.vlgmr.msra.gmra.mrb[0].mxu0 %vm394_vm1, %v7382_v45  ;;  %v2954_v37 = vsel %vm2952_vm9, %v8180_v9, %v8182_v11 }
 0x168   : > { %4314 = vrot.lane.b32.xlu1 %v8068_v2, %s7493_s11  ;;  %2469 = vmatpush1.bf16.msra.mxu0 %v2457_v47  ;;  %s7498_s11 = smov 16  }
 0x169   : > { %v8190_v52 = vpop.permute.xlu0 %2942  ;;  %2592 = vmatprep.subr.bf16.mxu0 %v2582_v51  ;;  %2500 = vmatprep.mubr.bf16.mxu0 %v7461_v8 }
 0x16a   : > { %v8193_v53 = vpop.permute.xlu1 %2948  ;;  %v2953_v43 = vsel %vm2952_vm9, %v8190_v52, %v8180_v9 }
 0x16b   : > { %4432 = vrot.lane.b32.xlu0 %v8038_v54, %s7494_s13  ;;  %v2955_v52 = vsel %vm2952_vm9, %v8182_v11, %v8193_v53  ;;  %v7387_v11 = vld [vmem:[%s8886_s0 + $0xa8] sm:$0xff]  }
 0x16c   : > { %4434 = vrot.lane.b32.xlu1 %v8048_v56, %s7494_s13  ;;  %6711 = vmatmul.mubr.msk.bf16.vlgmr.msra.gmra.mrb[0].mxu1 %vm394_vm1, %v7382_v45 }
 0x16d   : > { %2512 = vmatpush1.bf16.msra.mxu1 %v2459_v12  ;;  %v8204_v13 = vpop.permute.xlu0 %2950  ;;  %2543 = vmatprep.mubr.bf16.mxu1 %v7461_v8 }
 0x16e   : > { %v8207_v59 = vpop.permute.xlu1 %3068  ;;  %2635 = vmatprep.subr.bf16.mxu1 %v2584_v55  ;;  %v2956_v42 = vsel %vm2952_vm9, %v8193_v53, %v8204_v13  ;;  %vm4440_vm9 = vcmask 285696  }
 0x16f   : > { %4430 = vrot.lane.b32.xlu0 %v8018_v49, %s7494_s13 }
 0x170   : > { %4436 = vrot.lane.b32.xlu1 %v8061_v0, %s7494_s13 }
 0x171   : > { %v8217_v1 = vpop.permute.xlu0 %3070 }
 0x172   : > { %v8219_v5 = vpop.permute.xlu1 %3066  ;;  %v3078_v51 = vsel %vm3076_vm10, %v8207_v59, %v8217_v1 }
 0x173   : > { %4438 = vrot.lane.b32.xlu0 %v8068_v2, %s7494_s13  ;;  %6715 = vmatmul.mubr.msk.bf16.vlgmr.msra.gmra.mrb[0].mxu0 %vm394_vm1, %v7383_v62  ;;  %s7499_s13 = smov 15  }
 0x174   : > { %4556 = vrot.lane.b32.xlu1 %v8038_v54, %s7495_s12  ;;  %2593 = vmatpush1.bf16.msra.mxu0 %v2581_v63 }
 0x175   : > { %v8227_v15 = vpop.permute.xlu0 %3072  ;;  %2716 = vmatprep.subr.bf16.mxu0 %v2706_v6  ;;  %2624 = vmatprep.mubr.bf16.mxu0 %v7461_v8 }
 0x176   : > { %v8230_v16 = vpop.permute.xlu1 %3074 }
 0x177   : > { %4558 = vrot.lane.b32.xlu0 %v8048_v56, %s7495_s12  ;;  %v3080_v55 = vsel %vm3076_vm10, %v8227_v15, %v8230_v16 }
 0x178   : > { %4554 = vrot.lane.b32.xlu1 %v8018_v49, %s7495_s12  ;;  %6716 = vmatmul.mubr.msk.bf16.vlgmr.msra.gmra.mrb[0].mxu1 %vm394_vm1, %v7383_v62  ;;  %v3077_v62 = vsel %vm3076_vm10, %v8219_v5, %v8207_v59  ;;  %v3079_v59 = vsel %vm3076_vm10, %v8217_v1, %v8227_v15  ;;  %v7388_v1 = vld [vmem:[%s8886_s0 + $0xb0] sm:$0xff]   ;;  %vm4564_vm10 = vcmask 277504  }
 0x179   : > { %2636 = vmatpush1.bf16.msra.mxu1 %v2583_v17  ;;  %v8241_v19 = vpop.permute.xlu0 %3192  ;;  %2667 = vmatprep.mubr.bf16.mxu1 %v7461_v8 }
 0x17a   : > { %v8244_v20 = vpop.permute.xlu1 %3194  ;;  %2759 = vmatprep.subr.bf16.mxu1 %v2708_v18 }
 0x17b   : > { %4560 = vrot.lane.b32.xlu0 %v8061_v0, %s7495_s12  ;;  %v3202_v6 = vsel %vm3200_vm11, %v8241_v19, %v8244_v20 }
 0x17c   : > { %4562 = vrot.lane.b32.xlu1 %v8068_v2, %s7495_s12  ;;  %s7500_s12 = smov 14  }
 0x17d   : > { %v8254_v23 = vpop.permute.xlu0 %3190 }
 0x17e   : > { %v8256_v25 = vpop.permute.xlu1 %3196 }
 0x17f   : > { %4680 = vrot.lane.b32.xlu0 %v8038_v54, %s7496_s29  ;;  %6720 = vmatmul.mubr.msk.bf16.vlgmr.msra.gmra.mrb[0].mxu0 %vm394_vm1, %v7384_v21 }
 0x180   : > { %4682 = vrot.lane.b32.xlu1 %v8048_v56, %s7496_s29  ;;  %2717 = vmatpush1.bf16.msra.mxu0 %v2705_v22 }
 0x181   : > { %v8264_v27 = vpop.permute.xlu0 %3198  ;;  %2840 = vmatprep.subr.bf16.mxu0 %v2830_v26  ;;  %2748 = vmatprep.mubr.bf16.mxu0 %v7461_v8 }
 0x182   : > { %v8267_v28 = vpop.permute.xlu1 %3316  ;;  %v3204_v5 = vsel %vm3200_vm11, %v8256_v25, %v8264_v27 }
 0x183   : > { %4678 = vrot.lane.b32.xlu0 %v8018_v49, %s7496_s29 }
 0x184   : > { %4684 = vrot.lane.b32.xlu1 %v8061_v0, %s7496_s29  ;;  %6721 = vmatmul.mubr.msk.bf16.vlgmr.msra.gmra.mrb[0].mxu1 %vm394_vm1, %v7384_v21  ;;  %v3201_v21 = vsel %vm3200_vm11, %v8254_v23, %v8241_v19  ;;  %v3203_v19 = vsel %vm3200_vm11, %v8244_v20, %v8256_v25  ;;  %v7389_v20 = vld [vmem:[%s8886_s0 + $0xb8] sm:$0xff]   ;;  %vm4688_vm11 = vcmask 146432  }
 0x185   : > { %2760 = vmatpush1.bf16.msra.mxu1 %v2707_v29  ;;  %v8278_v32 = vpop.permute.xlu0 %3318  ;;  %2791 = vmatprep.mubr.bf16.mxu1 %v7461_v8 }
 0x186   : > { %v8281_v33 = vpop.permute.xlu1 %3314  ;;  %2883 = vmatprep.subr.bf16.mxu1 %v2832_v31  ;;  %v3326_v22 = vsel %vm3324_vm12, %v8267_v28, %v8278_v32 }
 0x187   : > { %4686 = vrot.lane.b32.xlu0 %v8068_v2, %s7496_s29  ;;  %s7501_s29 = smov 13   ;;  %v3325_v31 = vsel %vm3324_vm12, %v8281_v33, %v8267_v28 }
 0x188   : > { %4804 = vrot.lane.b32.xlu1 %v8038_v54, %s7497_s10 }
 0x189   : > { %v8291_v35 = vpop.permute.xlu0 %3320 }
 0x18a   : > { %v8293_v36 = vpop.permute.xlu1 %3322  ;;  %v3327_v28 = vsel %vm3324_vm12, %v8278_v32, %v8291_v35 }
 0x18b   : > { %4806 = vrot.lane.b32.xlu0 %v8048_v56, %s7497_s10  ;;  %6725 = vmatmul.mubr.msk.bf16.vlgmr.msra.gmra.mrb[0].mxu0 %vm394_vm1, %v7385_v30  ;;  %v3328_v23 = vsel %vm3324_vm12, %v8291_v35, %v8293_v36  ;;  %vm4812_vm12 = vcmask 138240  }
 0x18c   : > { %4802 = vrot.lane.b32.xlu1 %v8018_v49, %s7497_s10  ;;  %2841 = vmatpush1.bf16.msra.mxu0 %v2829_v34 }
 0x18d   : > { %v8301_v39 = vpop.permute.xlu0 %3440  ;;  %2964 = vmatprep.subr.bf16.mxu0 %v2954_v37  ;;  %2872 = vmatprep.mubr.bf16.mxu0 %v7461_v8  ;;  %v8454_v37 = vld [vmem:[%s7628_s18 + $0x4] ss:$16 sps:$4 sm:$0xff]   ;;  %s7503_s18 = smov 121  }
 0x18e   : > { %v8304_v38 = vpop.permute.xlu1 %3442 }
 0x18f   : > { %4808 = vrot.lane.b32.xlu0 %v8061_v0, %s7497_s10 }
 0x190   : > { %4810 = vrot.lane.b32.xlu1 %v8068_v2, %s7497_s10  ;;  %6726 = vmatmul.mubr.msk.bf16.vlgmr.msra.gmra.mrb[0].mxu1 %vm394_vm1, %v7385_v30  ;;  %v3450_v30 = vsel %vm3448_vm13, %v8301_v39, %v8304_v38  ;;  %s7502_s10 = smov 12  }
 0x191   : > { %2884 = vmatpush1.bf16.msra.mxu1 %v2831_v41  ;;  %v8315_v10 = vpop.permute.xlu0 %3438  ;;  %2915 = vmatprep.mubr.bf16.mxu1 %v7461_v8 }
 0x192   : > { %v8318_v44 = vpop.permute.xlu1 %3444  ;;  %3007 = vmatprep.subr.bf16.mxu1 %v2956_v42  ;;  %v3449_v41 = vsel %vm3448_vm13, %v8315_v10, %v8301_v39 }
 0x193   : > { %4928 = vrot.lane.b32.xlu0 %v8038_v54, %s7498_s11  ;;  %v3451_v39 = vsel %vm3448_vm13, %v8304_v38, %v8318_v44  ;;  %v7392_v38 = vld [vmem:[%s8886_s0 + $0xc8] sm:$0xff]  }
 0x194   : > { %4930 = vrot.lane.b32.xlu1 %v8048_v56, %s7498_s11 }
 0x195   : > { %v8328_v45 = vpop.permute.xlu0 %3446 }
 0x196   : > { %v8330_v47 = vpop.permute.xlu1 %3564  ;;  %v3452_v33 = vsel %vm3448_vm13, %v8318_v44, %v8328_v45  ;;  %vm5060_vm13 = vcmask 121856  }
 0x197   : > { %4926 = vrot.lane.b32.xlu0 %v8018_v49, %s7498_s11  ;;  %6730 = vmatmul.mubr.msk.bf16.vlgmr.msra.gmra.mrb[0].mxu0 %vm394_vm1, %v7386_v40 }
 0x198   : > { %4932 = vrot.lane.b32.xlu1 %v8061_v0, %s7498_s11  ;;  %2965 = vmatpush1.bf16.msra.mxu0 %v2953_v43 }
 0x199   : > { %v8338_v12 = vpop.permute.xlu0 %3566  ;;  %3088 = vmatprep.subr.bf16.mxu0 %v3078_v51  ;;  %2996 = vmatprep.mubr.bf16.mxu0 %v7461_v8 }
 0x19a   : > { %v8341_v9 = vpop.permute.xlu1 %3562  ;;  %v3574_v42 = vsel %vm3572_vm14, %v8330_v47, %v8338_v12 }
 0x19b   : > { %4934 = vrot.lane.b32.xlu0 %v8068_v2, %s7498_s11  ;;  %v3573_v51 = vsel %vm3572_vm14, %v8341_v9, %v8330_v47 }
 0x19c   : > { %5052 = vrot.lane.b32.xlu1 %v8038_v54, %s7499_s13  ;;  %6731 = vmatmul.mubr.msk.bf16.vlgmr.msra.gmra.mrb[0].mxu1 %vm394_vm1, %v7386_v40 }
 0x19d   : > { %3008 = vmatpush1.bf16.msra.mxu1 %v2955_v52  ;;  %v8352_v13 = vpop.permute.xlu0 %3568  ;;  %3039 = vmatprep.mubr.bf16.mxu1 %v7461_v8 }
 0x19e   : > { %3131 = vmatprep.subr.bf16.mxu1 %v3080_v55  ;;  %v8359_v53 = vpop.permute.xlu1 %3570  ;;  %v3575_v47 = vsel %vm3572_vm14, %v8338_v12, %v8352_v13 }
 0x19f   : > { %5054 = vrot.lane.b32.xlu0 %v8048_v56, %s7499_s13  ;;  %v3576_v10 = vsel %vm3572_vm14, %v8352_v13, %v8359_v53  ;;  %v7393_v53 = vld [vmem:[%s8886_s0 + $0xd0] sm:$0xff]   ;;  %vm5184_vm14 = vcmask 113664  }
 0x1a0   : > { %5050 = vrot.lane.b32.xlu1 %v8018_v49, %s7499_s13 }
 0x1a1   : > { %v8365_v63 = vpop.permute.xlu0 %3688 }
 0x1a2   : > { %v8374_v16 = vpop.permute.xlu1 %3690 }
 0x1a3   : > { %5056 = vrot.lane.b32.xlu0 %v8061_v0, %s7499_s13  ;;  %6735 = vmatmul.mubr.msk.bf16.vlgmr.msra.gmra.mrb[0].mxu0 %vm394_vm1, %v7387_v11  ;;  %v3698_v52 = vsel %vm3696_vm15, %v8365_v63, %v8374_v16 }
 0x1a4   : > { %5058 = vrot.lane.b32.xlu1 %v8068_v2, %s7499_s13  ;;  %3089 = vmatpush1.bf16.msra.mxu0 %v3077_v62  ;;  %s8849_s13 = scalar_lea.vmem [#allocation4], %s7610_s9 }
 0x1a5   : > { %3212 = vmatprep.subr.bf16.mxu0 %v3202_v6  ;;  %3120 = vmatprep.mubr.bf16.mxu0 %v7461_v8  ;;  %v8376_v17 = vpop.permute.xlu0 %3686  ;;  %s326_s9 = scalar_select %p325_p0, %s7563_s23, 1 }
 0x1a6   : > { %v8392_v15 = vpop.permute.xlu1 %3692  ;;  %v3697_v62 = vsel %vm3696_vm15, %v8376_v17, %v8365_v63 }
 0x1a7   : > { %5176 = vrot.lane.b32.xlu0 %v8038_v54, %s7500_s12 }
 0x1a8   : > { %5178 = vrot.lane.b32.xlu1 %v8048_v56, %s7500_s12  ;;  %6736 = vmatmul.mubr.msk.bf16.vlgmr.msra.gmra.mrb[0].mxu1 %vm394_vm1, %v7387_v11 }
 0x1a9   : > { %3132 = vmatpush1.bf16.msra.mxu1 %v3079_v59  ;;  %3163 = vmatprep.mubr.bf16.mxu1 %v7461_v8  ;;  %v8394_v18 = vpop.permute.xlu0 %3694  ;;  %v3699_v59 = vsel %vm3696_vm15, %v8374_v16, %v8392_v15  ;;  %v7394_v16 = vld [vmem:[%s8886_s0 + $0xd8] sm:$0xff]  }
 0x1aa   : > { %3255 = vmatprep.subr.bf16.mxu1 %v3204_v5  ;;  %v8407_v26 = vpop.permute.xlu1 %3812  ;;  %v3700_v9 = vsel %vm3696_vm15, %v8392_v15, %v8394_v18  ;;  %vm5308_vm15 = vcmask 105472  }
 0x1ab   : > { %5174 = vrot.lane.b32.xlu0 %v8018_v49, %s7500_s12 }
 0x1ac   : > { %5180 = vrot.lane.b32.xlu1 %v8061_v0, %s7500_s12 }
 0x1ad   : > { %v8409_v27 = vpop.permute.xlu0 %3814 }
 0x1ae   : > { %v8425_v25 = vpop.permute.xlu1 %3810  ;;  %v3822_v6 = vsel %vm3820_vm0, %v8407_v26, %v8409_v27 }
 0x1af   : > { %5182 = vrot.lane.b32.xlu0 %v8068_v2, %s7500_s12  ;;  %6740 = vmatmul.mubr.msk.bf16.vlgmr.msra.gmra.mrb[0].mxu0 %vm394_vm1, %v7388_v1  ;;  %v3821_v18 = vsel %vm3820_vm0, %v8425_v25, %v8407_v26 }
 0x1b0   : > { %5300 = vrot.lane.b32.xlu1 %v8038_v54, %s7501_s29  ;;  %3213 = vmatpush1.bf16.msra.mxu0 %v3201_v21 }
 0x1b1   : > { %3336 = vmatprep.subr.bf16.mxu0 %v3326_v22  ;;  %3244 = vmatprep.mubr.bf16.mxu0 %v7461_v8  ;;  %v8427_v29 = vpop.permute.xlu0 %3816 }
 0x1b2   : > { %v8440_v34 = vpop.permute.xlu1 %3818  ;;  %v3823_v22 = vsel %vm3820_vm0, %v8409_v27, %v8427_v29 }
 0x1b3   : > { %5302 = vrot.lane.b32.xlu0 %v8048_v56, %s7501_s29  ;;  %v3824_v5 = vsel %vm3820_vm0, %v8427_v29, %v8440_v34  ;;  %vm5432_vm0 = vcmask 97280  }
 0x1b4   : > { %5298 = vrot.lane.b32.xlu1 %v8018_v49, %s7501_s29  ;;  %6741 = vmatmul.mubr.msk.bf16.vlgmr.msra.gmra.mrb[0].mxu1 %vm394_vm1, %v7388_v1 }
 0x1b5   : > { %3256 = vmatpush1.bf16.msra.mxu1 %v3203_v19  ;;  %3287 = vmatprep.mubr.bf16.mxu1 %v7461_v8  ;;  %v8442_v36 = vpop.permute.xlu0 %3936 }
 0x1b6   : > { %3379 = vmatprep.subr.bf16.mxu1 %v3328_v23  ;;  %v8461_v32 = vpop.permute.xlu1 %3938 }
 0x1b7   : > { %5304 = vrot.lane.b32.xlu0 %v8061_v0, %s7501_s29  ;;  %v3946_v21 = vsel %vm3944_vm2, %v8442_v36, %v8461_v32 }
 0x1b8   : > { %5306 = vrot.lane.b32.xlu1 %v8068_v2, %s7501_s29 }
 0x1b9   : > { %v8463_v35 = vpop.permute.xlu0 %3934 }
 0x1ba   : > { %v8479_v40 = vpop.permute.xlu1 %3940  ;;  %v3945_v23 = vsel %vm3944_vm2, %v8463_v35, %v8442_v36 }
 0x1bb   : > { %5424 = vrot.lane.b32.xlu0 %v8038_v54, %s7502_s10  ;;  %6745 = vmatmul.mubr.msk.bf16.vlgmr.msra.gmra.mrb[0].mxu0 %vm394_vm1, %v7389_v20 }
 0x1bc   : > { %5426 = vrot.lane.b32.xlu1 %v8048_v56, %s7502_s10  ;;  %3337 = vmatpush1.bf16.msra.mxu0 %v3325_v31 }
 0x1bd   : > { %3460 = vmatprep.subr.bf16.mxu0 %v3450_v30  ;;  %3368 = vmatprep.mubr.bf16.mxu0 %v7461_v8  ;;  %v8481_v43 = vpop.permute.xlu0 %3942  ;;  %v7396_v30 = vld [vmem:[%s8886_s0 + $0xe8] sm:$0xff]  }
 0x1be   : > { %v8497_v44 = vpop.permute.xlu1 %4060 }
 0x1bf   : > { %5422 = vrot.lane.b32.xlu0 %v8018_v49, %s7502_s10  ;;  %v7391_v49 = vld [vmem:[%s8886_s0 + $0xc0] sm:$0xff]  }
 0x1c0   : > { %5428 = vrot.lane.b32.xlu1 %v8061_v0, %s7502_s10  ;;  %6746 = vmatmul.mubr.msk.bf16.vlgmr.msra.gmra.mrb[0].mxu1 %vm394_vm1, %v7389_v20  ;;  %v3947_v20 = vsel %vm3944_vm2, %v8461_v32, %v8479_v40 }
 0x1c1   : > { %3380 = vmatpush1.bf16.msra.mxu1 %v3327_v28  ;;  %3411 = vmatprep.mubr.bf16.mxu1 %v7461_v8  ;;  %v8499_v45 = vpop.permute.xlu0 %4062 }
 0x1c2   : > { %3503 = vmatprep.subr.bf16.mxu1 %v3452_v33  ;;  %v8512_v55 = vpop.permute.xlu1 %4058 }
 0x1c3   : > { %5430 = vrot.lane.b32.xlu0 %v8068_v2, %s7502_s10  ;;  %v4069_v28 = vsel %vm4068_vm3, %v8512_v55, %v8497_v44 }
 0x1c4   : > { %5546 = vrot.lane.b32.xlu1 %v8454_v37, %s7465_s14  ;;  %s6620_s14 = sshll.u32 %s7563_s23, 2 }
 0x1c5   : > { %v8514_v11 = vpop.permute.xlu0 %4064  ;;  %p320_p13 = scmp.lt.s32.totalorder %s6620_s14, 7 }
 0x1c6   : > { %v4067_v12 = vpop.permute.xlu1 %4066 }
 0x1c7   : > { %5655 = vrot.lane.b32.xlu0 %v8454_v37, %s7466_s15  ;;  %6750 = vmatmul.mubr.msk.bf16.vlgmr.msra.gmra.mrb[0].mxu0 %vm394_vm1, %v7391_v49  ;;  %v4072_v31 = vsel %vm4068_vm3, %v8514_v11, %v4067_v12  ;;  %s8900_s14 = smov (!%p320_p13, %s6620_s14), 7 }
 0x1c8   : > { %5764 = vrot.lane.b32.xlu1 %v8454_v37, %s7467_s16  ;;  %3461 = vmatpush1.bf16.msra.mxu0 %v3449_v41  ;;  %s7504_s16 = smov 120   ;;  %v7397_v41 = vld [vmem:[%s8886_s0 + $0xf0] sm:$0xff]   ;;  %s322_s22 = scalar_lea.vmem %s8889_s3, %s8900_s14 }
 0x1c9   : > { %3584 = vmatprep.subr.bf16.mxu0 %v3574_v42  ;;  %3492 = vmatprep.mubr.bf16.mxu0 %v7461_v8  ;;  %v8530_v13 = vpop.permute.xlu0 %4184 }
 0x1ca   : > { %v8545_v63 = vpop.permute.xlu1 %4186 }
 0x1cb   : > { %5875 = vrot.lane.b32.xlu0 %v8048_v56, %s7503_s18  ;;  %v4194_v33 = vsel %vm4192_vm7, %v8530_v13, %v8545_v63 }
 0x1cc   : > { %6751 = vmatmul.mubr.msk.bf16.vlgmr.msra.gmra.mrb[0].mxu1 %vm394_vm1, %v7391_v49  ;;  %5877 = vrot.lane.b32.xlu1 %v8061_v0, %s7503_s18 }
 0x1cd   : > { %3504 = vmatpush1.bf16.msra.mxu1 %v3451_v39  ;;  %3535 = vmatprep.mubr.bf16.mxu1 %v7461_v8  ;;  %v8547_v17 = vpop.permute.xlu0 %4182 }
 0x1ce   : > { %3627 = vmatprep.subr.bf16.mxu1 %v3576_v10  ;;  %v8561_v1 = vpop.permute.xlu1 %4188 }
 0x1cf   : > { %5873 = vrot.lane.b32.xlu0 %v8038_v54, %s7503_s18  ;;  %v4195_v10 = vsel %vm4192_vm7, %v8545_v63, %v8561_v1 }
 0x1d0   : > { %5879 = vrot.lane.b32.xlu1 %v8068_v2, %s7503_s18 }
 0x1d1   : > { %v4191_v15 = vpop.permute.xlu0 %4190 }
 0x1d2   : > { %v8576_v26 = vpop.permute.xlu1 %4308  ;;  %v4196_v35 = vsel %vm4192_vm7, %v8561_v1, %v4191_v15 }
 0x1d3   : > { %6755 = vmatmul.mubr.msk.bf16.vlgmr.msra.gmra.mrb[0].mxu0 %vm394_vm1, %v7392_v38  ;;  %5881 = vrot.lane.b32.xlu0 %v8454_v37, %s7503_s18 }
 0x1d4   : > { %3585 = vmatpush1.bf16.msra.mxu0 %v3573_v51  ;;  %3616 = vmatprep.mubr.bf16.mxu0 %v7461_v8  ;;  %v7398_v51 = vld [vmem:[%s8886_s0 + $0xf8] sm:$0xff]  }
 0x1d5   : > { %3708 = vmatprep.subr.bf16.mxu0 %v3698_v52  ;;  %5999 = vrot.lane.b32.xlu1 %v8048_v56, %s7504_s16  ;;  %v8578_v19 = vpop.permute.xlu0 %4310 }
 0x1d6   : > { %v4318_v39 = vsel %vm4316_vm8, %v8576_v26, %v8578_v19 }
 0x1d7   : > { %6001 = vrot.lane.b32.xlu0 %v8061_v0, %s7504_s16 }
 0x1d8   : > { %6756 = vmatmul.mubr.msk.bf16.vlgmr.msra.gmra.mrb[0].mxu1 %vm394_vm1, %v7392_v38 }
 0x1d9   : > { %3628 = vmatpush1.bf16.msra.mxu1 %v3575_v47  ;;  %3659 = vmatprep.mubr.bf16.mxu1 %v7461_v8  ;;  %v4313_v27 = vpop.permute.xlu0 %4312 }
 0x1da   : > { %3751 = vmatprep.subr.bf16.mxu1 %v3700_v9  ;;  %5997 = vrot.lane.b32.xlu1 %v8038_v54, %s7504_s16  ;;  %v4319_v9 = vsel %vm4316_vm8, %v8578_v19, %v4313_v27 }
 0x1db   : > { %6003 = vrot.lane.b32.xlu0 %v8068_v2, %s7504_s16 }
 0x1dd   : > { %v8602_v29 = vpop.permute.xlu0 %4432 }
 0x1de   : > { %6005 = vrot.lane.b32.xlu1 %v8454_v37, %s7504_s16 }
 0x1df   : > { %6760 = vmatmul.mubr.msk.bf16.vlgmr.msra.gmra.mrb[0].mxu0 %vm394_vm1, %v7393_v53  ;;  %6123 = vrot.lane.b32.xlu0 %v8048_v56, %s7505_s17 }
 0x1e0   : > { %3709 = vmatpush1.bf16.msra.mxu0 %v3697_v62  ;;  %3740 = vmatprep.mubr.bf16.mxu0 %v7461_v8  ;;  %v7399_v62 = vld [vmem:[%s8886_s0 + $0x100] sm:$0xff]  }
 0x1e1   : > { %3832 = vmatprep.subr.bf16.mxu0 %v3822_v6  ;;  %v4431_v36 = vpop.permute.xlu0 %4430 }
 0x1e2   : > { %6125 = vrot.lane.b32.xlu1 %v8061_v0, %s7505_s17  ;;  %v4441_v63 = vsel %vm4440_vm9, %v4431_v36, %v8602_v29 }
 0x1e3   : > { %6121 = vrot.lane.b32.xlu0 %v8038_v54, %s7505_s17 }
 0x1e4   : > { %6761 = vmatmul.mubr.msk.bf16.vlgmr.msra.gmra.mrb[0].mxu1 %vm394_vm1, %v7393_v53 }
 0x1e5   : > { %3752 = vmatpush1.bf16.msra.mxu1 %v3699_v59  ;;  %3783 = vmatprep.mubr.bf16.mxu1 %v7461_v8  ;;  %v4439_v32 = vpop.permute.xlu0 %4438 }
 0x1e6   : > { %3875 = vmatprep.subr.bf16.mxu1 %v3824_v5  ;;  %6127 = vrot.lane.b32.xlu1 %v8068_v2, %s7505_s17 }
 0x1e7   : > { %6129 = vrot.lane.b32.xlu0 %v8454_v37, %s7505_s17  ;;  %s6882_s17 = sshll.u32 %s326_s9, 4 }
 0x1ea   : > { %6247 = vrot.lane.b32.xlu1 %v8048_v56, %s7506_s26  ;;  %v3948_v56 = vsel %vm3944_vm2, %v8479_v40, %v8481_v43  ;;  %v4559_v40 = vpop.permute.xlu0 %4558  ;;  %v4193_v43 = vsel %vm4192_vm7, %v8547_v17, %v8530_v13  ;;  %vm6255_vm2 = vcmask 965632  }
 0x1eb   : > { %6765 = vmatmul.mubr.msk.bf16.vlgmr.msra.gmra.mrb[0].mxu0 %vm394_vm1, %v7394_v16  ;;  %6249 = vrot.lane.b32.xlu0 %v8061_v0, %s7506_s26  ;;  %v7395_v0 = vld [vmem:[%s8886_s0 + $0xe0] sm:$0xff]  }
 0x1ec   : > { %3833 = vmatpush1.bf16.msra.mxu0 %v3821_v18  ;;  %3864 = vmatprep.mubr.bf16.mxu0 %v7461_v8  ;;  %v7400_v18 = vld [vmem:[%s8886_s0 + $0x108] sm:$0xff]  }
 0x1ed   : > { %3956 = vmatprep.subr.bf16.mxu0 %v3946_v21 }
 0x1ee   : > { %6245 = vrot.lane.b32.xlu1 %v8038_v54, %s7506_s26  ;;  %v4307_v54 = vpop.permute.xlu1 %4306 }
 0x1ef   : > { %6251 = vrot.lane.b32.xlu0 %v8068_v2, %s7506_s26  ;;  %v4070_v2 = vsel %vm4068_vm3, %v8497_v44, %v8499_v45  ;;  %v4561_v44 = vpop.permute.xlu0 %4560 }
 0x1f0   : > { %6766 = vmatmul.mubr.msk.bf16.vlgmr.msra.gmra.mrb[0].mxu1 %vm394_vm1, %v7394_v16 }
 0x1f1   : > { %3876 = vmatpush1.bf16.msra.mxu1 %v3823_v22  ;;  %3907 = vmatprep.mubr.bf16.mxu1 %v7461_v8 }
 0x1f2   : > { %3999 = vmatprep.subr.bf16.mxu1 %v3948_v56  ;;  %6253 = vrot.lane.b32.xlu1 %v8454_v37, %s7506_s26  ;;  %v4315_v25 = vpop.permute.xlu1 %4314  ;;  %v4071_v37 = vsel %vm4068_vm3, %v8499_v45, %v8514_v11  ;;  %v4317_v11 = vsel %vm4316_vm8, %v4307_v54, %v8576_v26  ;;  %v4567_v56 = vsel %vm4564_vm10, %v4559_v40, %v4561_v44  ;;  %s329_s26 = scalar_lea.vmem %s8891_s5, %s6882_s17  ;;  %vm6450_vm3 = vcmask 15360  }
 0x1f3   : > { %v4320_v45 = vsel %vm4316_vm8, %v4313_v27, %v4315_v25  ;;  %v4681_v55 = vpop.permute.xlu0 %4680 }
 0x1f6   : > { %v8611_v34 = vpop.permute.xlu1 %4434 }
 0x1f7   : > { %6770 = vmatmul.mubr.msk.bf16.vlgmr.msra.gmra.mrb[0].mxu0 %vm394_vm1, %v7395_v0  ;;  %v4442_v47 = vsel %vm4440_vm9, %v8602_v29, %v8611_v34  ;;  %v4679_v12 = vpop.permute.xlu0 %4678 }
 0x1f8   : > { %3957 = vmatpush1.bf16.msra.mxu0 %v3945_v23  ;;  %3988 = vmatprep.mubr.bf16.mxu0 %v7461_v8  ;;  %v7401_v23 = vld [vmem:[%s8886_s0 + $0x110] sm:$0xff]   ;;  %v4689_v25 = vsel %vm4688_vm11, %v4679_v12, %v4681_v55 }
 0x1f9   : > { %4080 = vmatprep.subr.bf16.mxu0 %v4070_v2 }
 0x1fa   : > { %v4437_v49 = vpop.permute.xlu1 %4436 }
 0x1fb   : > { %v4444_v13 = vsel %vm4440_vm9, %v4437_v49, %v4439_v32  ;;  %v4687_v59 = vpop.permute.xlu0 %4686  ;;  %v4443_v5 = vsel %vm4440_vm9, %v8611_v34, %v4437_v49 }
 0x1fc   : > { %6771 = vmatmul.mubr.msk.bf16.vlgmr.msra.gmra.mrb[0].mxu1 %vm394_vm1, %v7395_v0 }
 0x1fd   : > { %4000 = vmatpush1.bf16.msra.mxu1 %v3947_v20  ;;  %4031 = vmatprep.mubr.bf16.mxu1 %v7461_v8 }
 0x1fe   : > { %4123 = vmatprep.subr.bf16.mxu1 %v4072_v31  ;;  %v4557_v42 = vpop.permute.xlu1 %4556 }
 0x1ff   : > { %v4566_v17 = vsel %vm4564_vm10, %v4557_v42, %v4559_v40  ;;  %v4807_v1 = vpop.permute.xlu0 %4806 }
 0x202   : > { %v4555_v38 = vpop.permute.xlu1 %4554 }
 0x203   : > { %6775 = vmatmul.mubr.msk.bf16.vlgmr.msra.gmra.mrb[0].mxu0 %vm394_vm1, %v7396_v30  ;;  %v4809_v22 = vpop.permute.xlu0 %4808  ;;  %v4565_v26 = vsel %vm4564_vm10, %v4555_v38, %v4557_v42 }
 0x204   : > { %4081 = vmatpush1.bf16.msra.mxu0 %v4069_v28  ;;  %4112 = vmatprep.mubr.bf16.mxu0 %v7461_v8  ;;  %v7402_v28 = vld [vmem:[%s8886_s0 + $0x118] sm:$0xff]  }
 0x205   : > { %4204 = vmatprep.subr.bf16.mxu0 %v4194_v33 }
 0x206   : > { %v4563_v52 = vpop.permute.xlu1 %4562 }
 0x207   : > { %v4568_v15 = vsel %vm4564_vm10, %v4561_v44, %v4563_v52  ;;  %v4929_v54 = vpop.permute.xlu0 %4928 }
 0x208   : > { %6776 = vmatmul.mubr.msk.bf16.vlgmr.msra.gmra.mrb[0].mxu1 %vm394_vm1, %v7396_v30 }
 0x209   : > { %4124 = vmatpush1.bf16.msra.mxu1 %v4071_v37  ;;  %4155 = vmatprep.mubr.bf16.mxu1 %v7461_v8 }
 0x20a   : > { %4247 = vmatprep.subr.bf16.mxu1 %v4196_v35  ;;  %v4683_v53 = vpop.permute.xlu1 %4682  ;;  %v4815_v35 = vsel %vm4812_vm12, %v4807_v1, %v4809_v22 }
 0x20b   : > { %v4690_v19 = vsel %vm4688_vm11, %v4681_v55, %v4683_v53  ;;  %v4927_v20 = vpop.permute.xlu0 %4926 }
 0x20c   : > { %v4937_v38 = vsel %vm394_vm1, %v4927_v20, %v4929_v54 }
 0x20e   : > { %v4685_v6 = vpop.permute.xlu1 %4684 }
 0x20f   : > { %6780 = vmatmul.mubr.msk.bf16.vlgmr.msra.gmra.mrb[0].mxu0 %vm394_vm1, %v7397_v41  ;;  %v4692_v27 = vsel %vm4688_vm11, %v4685_v6, %v4687_v59  ;;  %v4691_v31 = vsel %vm4688_vm11, %v4683_v53, %v4685_v6  ;;  %v4935_v34 = vpop.permute.xlu0 %4934 }
 0x210   : > { %4205 = vmatpush1.bf16.msra.mxu0 %v4193_v43  ;;  %4236 = vmatprep.mubr.bf16.mxu0 %v7461_v8  ;;  %v7403_v43 = vld [vmem:[%s8886_s0 + $0x120] sm:$0xff]  }
 0x211   : > { %4328 = vmatprep.subr.bf16.mxu0 %v4318_v39 }
 0x212   : > { %v4805_v16 = vpop.permute.xlu1 %4804 }
 0x213   : > { %v4814_v29 = vsel %vm4812_vm12, %v4805_v16, %v4807_v1  ;;  %v5055_v37 = vpop.permute.xlu0 %5054 }
 0x214   : > { %6781 = vmatmul.mubr.msk.bf16.vlgmr.msra.gmra.mrb[0].mxu1 %vm394_vm1, %v7397_v41 }
 0x215   : > { %4248 = vmatpush1.bf16.msra.mxu1 %v4195_v10  ;;  %4279 = vmatprep.mubr.bf16.mxu1 %v7461_v8 }
 0x216   : > { %4371 = vmatprep.subr.bf16.mxu1 %v4320_v45  ;;  %v4803_v21 = vpop.permute.xlu1 %4802 }
 0x217   : > { %v4813_v49 = vsel %vm4812_vm12, %v4803_v21, %v4805_v16  ;;  %v5057_v42 = vpop.permute.xlu0 %5056 }
 0x21a   : > { %v4811_v0 = vpop.permute.xlu1 %4810 }
 0x21b   : > { %6785 = vmatmul.mubr.msk.bf16.vlgmr.msra.gmra.mrb[0].mxu0 %vm394_vm1, %v7398_v51  ;;  %v4816_v36 = vsel %vm4812_vm12, %v4809_v22, %v4811_v0  ;;  %v5177_v10 = vpop.permute.xlu0 %5176 }
 0x21c   : > { %4329 = vmatpush1.bf16.msra.mxu0 %v4317_v11  ;;  %4360 = vmatprep.mubr.bf16.mxu0 %v7461_v8  ;;  %v7404_v11 = vld [vmem:[%s8886_s0 + $0x128] sm:$0xff]  }
 0x21d   : > { %4452 = vmatprep.subr.bf16.mxu0 %v4442_v47 }
 0x21e   : > { %v4931_v2 = vpop.permute.xlu1 %4930 }
 0x21f   : > { %v4938_v32 = vsel %vm394_vm1, %v4929_v54, %v4931_v2  ;;  %v5175_v52 = vpop.permute.xlu0 %5174 }
 0x220   : > { %6786 = vmatmul.mubr.msk.bf16.vlgmr.msra.gmra.mrb[0].mxu1 %vm394_vm1, %v7398_v51  ;;  %v5185_v16 = vsel %vm5184_vm14, %v5175_v52, %v5177_v10 }
 0x221   : > { %4372 = vmatpush1.bf16.msra.mxu1 %v4319_v9  ;;  %4403 = vmatprep.mubr.bf16.mxu1 %v7461_v8 }
 0x222   : > { %4495 = vmatprep.subr.bf16.mxu1 %v4444_v13  ;;  %v4933_v30 = vpop.permute.xlu1 %4932  ;;  %v5063_v13 = vsel %vm5060_vm13, %v5055_v37, %v5057_v42 }
 0x223   : > { %v4940_v40 = vsel %vm394_vm1, %v4933_v30, %v4935_v34  ;;  %v4939_v45 = vsel %vm394_vm1, %v4931_v2, %v4933_v30  ;;  %v5183_v9 = vpop.permute.xlu0 %5182 }
 0x226   : > { %v5053_v33 = vpop.permute.xlu1 %5052 }
 0x227   : > { %6790 = vmatmul.mubr.msk.bf16.vlgmr.msra.gmra.mrb[0].mxu0 %vm394_vm1, %v7399_v62  ;;  %v5062_v44 = vsel %vm5060_vm13, %v5053_v33, %v5055_v37  ;;  %v5303_v6 = vpop.permute.xlu0 %5302 }
 0x228   : > { %4453 = vmatpush1.bf16.msra.mxu0 %v4441_v63  ;;  %4484 = vmatprep.mubr.bf16.mxu0 %v7461_v8  ;;  %v7405_v63 = vld [vmem:[%s8886_s0 + $0x130] sm:$0xff]  }
 0x229   : > { %4576 = vmatprep.subr.bf16.mxu0 %v4566_v17 }
 0x22a   : > { %v5051_v41 = vpop.permute.xlu1 %5050 }
 0x22b   : > { %v5061_v53 = vsel %vm5060_vm13, %v5051_v41, %v5053_v33 }
 0x22c   : > { %6791 = vmatmul.mubr.msk.bf16.vlgmr.msra.gmra.mrb[0].mxu1 %vm394_vm1, %v7399_v62 }
 0x22d   : > { %4496 = vmatpush1.bf16.msra.mxu1 %v4443_v5  ;;  %4527 = vmatprep.mubr.bf16.mxu1 %v7461_v8  ;;  %v5305_v5 = vpop.permute.xlu0 %5304 }
 0x22e   : > { %4619 = vmatprep.subr.bf16.mxu1 %v4568_v15  ;;  %v5059_v39 = vpop.permute.xlu1 %5058 }
 0x22f   : > { %v5064_v55 = vsel %vm5060_vm13, %v5057_v42, %v5059_v39  ;;  %v7411_v42 = vld [vmem:[%s8886_s0 + $0x160] sm:$0xff]  }
 0x231   : > { %v5425_v21 = vpop.permute.xlu0 %5424 }
 0x232   : > { %v5179_v51 = vpop.permute.xlu1 %5178 }
 0x233   : > { %6795 = vmatmul.mubr.msk.bf16.vlgmr.msra.gmra.mrb[0].mxu0 %vm394_vm1, %v7400_v18  ;;  %v5186_v12 = vsel %vm5184_vm14, %v5177_v10, %v5179_v51 }
 0x234   : > { %4577 = vmatpush1.bf16.msra.mxu0 %v4565_v26  ;;  %4608 = vmatprep.mubr.bf16.mxu0 %v7461_v8  ;;  %v7406_v26 = vld [vmem:[%s8886_s0 + $0x138] sm:$0xff]  }
 0x235   : > { %4700 = vmatprep.subr.bf16.mxu0 %v4690_v19 }
 0x236   : > { %v5181_v47 = vpop.permute.xlu1 %5180 }
 0x237   : > { %v5188_v59 = vsel %vm5184_vm14, %v5181_v47, %v5183_v9  ;;  %v5187_v15 = vsel %vm5184_vm14, %v5179_v51, %v5181_v47  ;;  %v7412_v51 = vld [vmem:[%s8886_s0 + $0x168] sm:$0xff]  }
 0x238   : > { %6796 = vmatmul.mubr.msk.bf16.vlgmr.msra.gmra.mrb[0].mxu1 %vm394_vm1, %v7400_v18 }
 0x239   : > { %4620 = vmatpush1.bf16.msra.mxu1 %v4567_v56  ;;  %4651 = vmatprep.mubr.bf16.mxu1 %v7461_v8  ;;  %v5423_v56 = vpop.permute.xlu0 %5422 }
 0x23a   : > { %4743 = vmatprep.subr.bf16.mxu1 %v4692_v27  ;;  %v5301_v62 = vpop.permute.xlu1 %5300  ;;  %v5311_v27 = vsel %vm5308_vm15, %v5303_v6, %v5305_v5 }
 0x23b   : > { %v5310_v1 = vsel %vm5308_vm15, %v5301_v62, %v5303_v6 }
 0x23d   : > { %v5431_v2 = vpop.permute.xlu0 %5430 }
 0x23e   : > { %v5299_v17 = vpop.permute.xlu1 %5298 }
 0x23f   : > { %6800 = vmatmul.mubr.msk.bf16.vlgmr.msra.gmra.mrb[0].mxu0 %vm394_vm1, %v7401_v23  ;;  %v5309_v0 = vsel %vm5308_vm15, %v5299_v17, %v5301_v62  ;;  %v7413_v62 = vld [vmem:[%s8886_s0 + $0x170] sm:$0xff]  }
 0x240   : > { %4701 = vmatpush1.bf16.msra.mxu0 %v4689_v25  ;;  %4732 = vmatprep.mubr.bf16.mxu0 %v7461_v8  ;;  %v7407_v25 = vld [vmem:[%s8886_s0 + $0x140] sm:$0xff]  }
 0x241   : > { %4824 = vmatprep.subr.bf16.mxu0 %v4814_v29  ;;  %v5433_v29 = vsel %vm5432_vm0, %v5423_v56, %v5425_v21  ;;  %v6389_v56 = vld [vmem:[%s322_s22] sm:$0xf] }
 0x242   : > { %v5307_v18 = vpop.permute.xlu1 %5306 }
 0x243   : > { %v5312_v22 = vsel %vm5308_vm15, %v5305_v5, %v5307_v18 }
 0x244   : > { %6801 = vmatmul.mubr.msk.bf16.vlgmr.msra.gmra.mrb[0].mxu1 %vm394_vm1, %v7401_v23 }
 0x245   : > { %4744 = vmatpush1.bf16.msra.mxu1 %v4691_v31  ;;  %4775 = vmatprep.mubr.bf16.mxu1 %v7461_v8 }
 0x246   : > { %4867 = vmatprep.subr.bf16.mxu1 %v4816_v36  ;;  %v5427_v19 = vpop.permute.xlu1 %5426  ;;  %v7408_v36 = vld [vmem:[%s8886_s0 + $0x148] sm:$0xff]  }
 0x247   : > { %v5434_v54 = vsel %vm5432_vm0, %v5425_v21, %v5427_v19  ;;  %v7415_v21 = vld [vmem:[%s8886_s0 + $0x180] sm:$0xff]  }
 0x24a   : > { %v5429_v23 = vpop.permute.xlu1 %5428 }
 0x24b   : > { %6805 = vmatmul.mubr.msk.bf16.vlgmr.msra.gmra.mrb[0].mxu0 %vm394_vm1, %v7402_v28  ;;  %v5436_v20 = vsel %vm5432_vm0, %v5429_v23, %v5431_v2  ;;  %v5435_v31 = vsel %vm5432_vm0, %v5427_v19, %v5429_v23 }
 0x24c   : > { %4825 = vmatpush1.bf16.msra.mxu0 %v4813_v49  ;;  %4856 = vmatprep.mubr.bf16.mxu0 %v7461_v8 }
 0x24d   : > { %4948 = vmatprep.subr.bf16.mxu0 %v4938_v32 }
 0x24e   : > { %v5547_v30 = vpop.permute.xlu1 %5546 }
 0x24f   : > { %v5548_v34 = vsel %vm844_vm4, %v7764_v48, %v5547_v30  ;;  %vm5883_vm4 = vcmask 990208  }
 0x250   : > { %6806 = vmatmul.mubr.msk.bf16.vlgmr.msra.gmra.mrb[0].mxu1 %vm394_vm1, %v7402_v28 }
 0x251   : > { %4868 = vmatpush1.bf16.msra.mxu1 %v4815_v35  ;;  %4899 = vmatprep.mubr.bf16.mxu1 %v7461_v8 }
 0x252   : > { %4991 = vmatprep.subr.bf16.mxu1 %v4940_v40  ;;  %v5765_v28 = vpop.permute.xlu1 %5764 }
 0x256   : > { %v5878_v37 = vpop.permute.xlu1 %5877 }
 0x257   : > { %6810 = vmatmul.mubr.msk.bf16.vlgmr.msra.gmra.mrb[0].mxu0 %vm394_vm1, %v7403_v43 }
 0x258   : > { %4949 = vmatpush1.bf16.msra.mxu0 %v4937_v38  ;;  %4980 = vmatprep.mubr.bf16.mxu0 %v7461_v8 }
 0x259   : > { %5072 = vmatprep.subr.bf16.mxu0 %v5062_v44 }
 0x25c   : > { %6811 = vmatmul.mubr.msk.bf16.vlgmr.msra.gmra.mrb[0].mxu1 %vm394_vm1, %v7403_v43 }
 0x25d   : > { %4992 = vmatpush1.bf16.msra.mxu1 %v4939_v45  ;;  %5023 = vmatprep.mubr.bf16.mxu1 %v7461_v8 }
 0x25e   : > { %5115 = vmatprep.subr.bf16.mxu1 %v5064_v55 }
 0x263   : > { %6815 = vmatmul.mubr.msk.bf16.vlgmr.msra.gmra.mrb[0].mxu0 %vm394_vm1, %v7404_v11 }
 0x264   : > { %5073 = vmatpush1.bf16.msra.mxu0 %v5061_v53  ;;  %5104 = vmatprep.mubr.bf16.mxu0 %v7461_v8 }
 0x265   : > { %5196 = vmatprep.subr.bf16.mxu0 %v5186_v12 }
 0x268   : > { %6816 = vmatmul.mubr.msk.bf16.vlgmr.msra.gmra.mrb[0].mxu1 %vm394_vm1, %v7404_v11 }
 0x269   : > { %5116 = vmatpush1.bf16.msra.mxu1 %v5063_v13  ;;  %5147 = vmatprep.mubr.bf16.mxu1 %v7461_v8 }
 0x26a   : > { %5239 = vmatprep.subr.bf16.mxu1 %v5188_v59 }
 0x26f   : > { %6820 = vmatmul.mubr.msk.bf16.vlgmr.msra.gmra.mrb[0].mxu0 %vm394_vm1, %v7405_v63 }
 0x270   : > { %5197 = vmatpush1.bf16.msra.mxu0 %v5185_v16  ;;  %5228 = vmatprep.mubr.bf16.mxu0 %v7461_v8 }
 0x271   : > { %5320 = vmatprep.subr.bf16.mxu0 %v5310_v1  ;;  %v7414_v1 = vld [vmem:[%s8886_s0 + $0x178] sm:$0xff]  }
 0x274   : > { %6821 = vmatmul.mubr.msk.bf16.vlgmr.msra.gmra.mrb[0].mxu1 %vm394_vm1, %v7405_v63 }
 0x275   : > { %5240 = vmatpush1.bf16.msra.mxu1 %v5187_v15  ;;  %5271 = vmatprep.mubr.bf16.mxu1 %v7461_v8 }
 0x276   : > { %5363 = vmatprep.subr.bf16.mxu1 %v5312_v22  ;;  %v6391_v22 = vlaneseq }
 0x27b   : > { %6825 = vmatmul.mubr.msk.bf16.vlgmr.msra.gmra.mrb[0].mxu0 %vm394_vm1, %v7406_v26 }
 0x27c   : > { %5321 = vmatpush1.bf16.msra.mxu0 %v5309_v0  ;;  %5352 = vmatprep.mubr.bf16.mxu0 %v7461_v8 }
 0x27d   : > { %5444 = vmatprep.subr.bf16.mxu0 %v5434_v54 }
 0x280   : > { %6826 = vmatmul.mubr.msk.bf16.vlgmr.msra.gmra.mrb[0].mxu1 %vm394_vm1, %v7406_v26  ;;  %v6392_v26 = vshrl.u32 %v6391_v22, 7 }
 0x281   : > { %5364 = vmatpush1.bf16.msra.mxu1 %v5311_v27  ;;  %5395 = vmatprep.mubr.bf16.mxu1 %v7461_v8 }
 0x282   : > { %5487 = vmatprep.subr.bf16.mxu1 %v5436_v20  ;;  %v6393_v19 = vsub.s32 0, %v6392_v26  ;;  %v6401_v27 = vsub.s32 2, %v6392_v26  ;;  %v6405_v23 = vsub.s32 3, %v6392_v26 }
 0x284   : > { %v6394_v0 = vrot.slane %v6389_v56, %v6393_v19 }
 0x287   : > { %6830 = vmatmul.mubr.msk.bf16.vlgmr.msra.gmra.mrb[0].mxu0 %vm394_vm1, %v7407_v25 }
 0x288   : > { %5445 = vmatpush1.bf16.msra.mxu0 %v5433_v29  ;;  %5476 = vmatprep.mubr.bf16.mxu0 %v7461_v8 }
 0x289   : > { %5553 = vmatprep.subr.bf16.mxu0 %v7793_v60  ;;  %v5656_v60 = vpop.permute.xlu0 %5655 }
 0x28a   : > { %v5657_v48 = vsel %vm968_vm5, %v7788_v58, %v5656_v60  ;;  %v5766_v58 = vsel %vm1092_vm6, %v7811_v3, %v5765_v28  ;;  %vm6007_vm5 = vcmask 982016   ;;  %vm6131_vm6 = vcmask 973824  }
 0x28c   : > { %6831 = vmatmul.mubr.msk.bf16.vlgmr.msra.gmra.mrb[0].mxu1 %vm394_vm1, %v7407_v25 }
 0x28d   : > { %5488 = vmatpush1.bf16.msra.mxu1 %v5435_v31  ;;  %5519 = vmatprep.mubr.bf16.mxu1 %v7461_v8  ;;  %v5876_v33 = vpop.permute.xlu0 %5875 }
 0x28e   : > { %5596 = vmatprep.subr.bf16.mxu1 %v5548_v34  ;;  %v6402_v34 = vrot.slane %v6389_v56, %v6401_v27 }
 0x293   : > { %6835 = vmatmul.mubr.msk.bf16.vlgmr.msra.gmra.mrb[0].mxu0 %vm394_vm1, %v7408_v36 }
 0x294   : > { %5554 = vmatpush1.bf16.msra.mxu0 %v7757_v46  ;;  %5585 = vmatprep.mubr.bf16.mxu0 %v7461_v8  ;;  %v7409_v46 = vld [vmem:[%s8886_s0 + $0x150] sm:$0xff]  }
 0x295   : > { %5662 = vmatprep.subr.bf16.mxu0 %v7822_v7  ;;  %v5880_v7 = vpop.permute.xlu1 %5879 }
 0x296   : > { %v5886_v10 = vsel %vm5883_vm4, %v5878_v37, %v5880_v7 }
 0x298   : > { %6836 = vmatmul.mubr.msk.bf16.vlgmr.msra.gmra.mrb[0].mxu1 %vm394_vm1, %v7408_v36 }
 0x299   : > { %5597 = vmatpush1.bf16.msra.mxu1 %v7770_v50  ;;  %5628 = vmatprep.mubr.bf16.mxu1 %v7461_v8  ;;  %v5874_v50 = vpop.permute.xlu0 %5873  ;;  %v6000_v32 = vpop.permute.xlu1 %5999 }
 0x29a   : > { %5705 = vmatprep.subr.bf16.mxu1 %v5657_v48  ;;  %v5884_v40 = vsel %vm5883_vm4, %v5874_v50, %v5876_v33  ;;  %v6406_v48 = vrot.slane %v6389_v56, %v6405_v23 }
 0x29d   : > { %v5882_v49 = vpop.permute.xlu0 %5881  ;;  %v5998_v3 = vpop.permute.xlu1 %5997 }
 0x29e   : > { %v5887_v35 = vsel %vm5883_vm4, %v5880_v7, %v5882_v49  ;;  %v6008_v52 = vsel %vm6007_vm5, %v5998_v3, %v6000_v32 }
 0x29f   : > { %6840 = vmatmul.mubr.msk.bf16.vlgmr.msra.gmra.mrb[0].mxu0 %vm394_vm1, %v7409_v46 }
 0x2a0   : > { %5663 = vmatpush1.bf16.msra.mxu0 %v7783_v57  ;;  %5694 = vmatprep.mubr.bf16.mxu0 %v7461_v8  ;;  %v7410_v57 = vld [vmem:[%s8886_s0 + $0x158] sm:$0xff]  }
 0x2a1   : > { %5771 = vmatprep.subr.bf16.mxu0 %v7846_v24  ;;  %v5885_v24 = vsel %vm5883_vm4, %v5876_v33, %v5878_v37 }
 0x2a4   : > { %6841 = vmatmul.mubr.msk.bf16.vlgmr.msra.gmra.mrb[0].mxu1 %vm394_vm1, %v7409_v46 }
 0x2a5   : > { %5706 = vmatpush1.bf16.msra.mxu1 %v7798_v61  ;;  %5737 = vmatprep.mubr.bf16.mxu1 %v7461_v8  ;;  %v6002_v61 = vpop.permute.xlu0 %6001 }
 0x2a6   : > { %5814 = vmatprep.subr.bf16.mxu1 %v5766_v58  ;;  %v6009_v43 = vsel %vm6007_vm5, %v6000_v32, %v6002_v61 }
 0x2a9   : > { %v6004_v41 = vpop.permute.xlu0 %6003 }
 0x2aa   : > { %v6010_v9 = vsel %vm6007_vm5, %v6002_v61, %v6004_v41 }
 0x2ab   : > { %6845 = vmatmul.mubr.msk.bf16.vlgmr.msra.gmra.mrb[0].mxu0 %vm394_vm1, %v7410_v57 }
 0x2ac   : > { %5772 = vmatpush1.bf16.msra.mxu0 %v7814_v4  ;;  %5803 = vmatprep.mubr.bf16.mxu0 %v7461_v8  ;;  %v6006_v4 = vpop.permute.xlu1 %6005 }
 0x2ad   : > { %5895 = vmatprep.subr.bf16.mxu0 %v5885_v24  ;;  %v6011_v38 = vsel %vm6007_vm5, %v6004_v41, %v6006_v4 }
 0x2b0   : > { %6846 = vmatmul.mubr.msk.bf16.vlgmr.msra.gmra.mrb[0].mxu1 %vm394_vm1, %v7410_v57  ;;  %v6126_v39 = vpop.permute.xlu1 %6125 }
 0x2b1   : > { %5815 = vmatpush1.bf16.msra.mxu1 %v7827_v14  ;;  %5846 = vmatprep.mubr.bf16.mxu1 %v7461_v8  ;;  %v6124_v14 = vpop.permute.xlu0 %6123 }
 0x2b2   : > { %5938 = vmatprep.subr.bf16.mxu1 %v5887_v35  ;;  %v6133_v55 = vsel %vm6131_vm6, %v6124_v14, %v6126_v39 }
 0x2b4   : > { %v6128_v45 = vpop.permute.xlu1 %6127 }
 0x2b5   : > { %v6122_v44 = vpop.permute.xlu0 %6121  ;;  %v6134_v5 = vsel %vm6131_vm6, %v6126_v39, %v6128_v45 }
 0x2b6   : > { %v6132_v6 = vsel %vm6131_vm6, %v6122_v44, %v6124_v14 }
 0x2b7   : > { %6850 = vmatmul.mubr.msk.bf16.vlgmr.msra.gmra.mrb[0].mxu0 %vm394_vm1, %v7411_v42 }
 0x2b8   : > { %5896 = vmatpush1.bf16.msra.mxu0 %v5884_v40  ;;  %5927 = vmatprep.mubr.bf16.mxu0 %v7461_v8  ;;  %v6248_v47 = vpop.permute.xlu1 %6247 }
 0x2b9   : > { %6019 = vmatprep.subr.bf16.mxu0 %v6009_v43  ;;  %v6130_v11 = vpop.permute.xlu0 %6129 }
 0x2ba   : > { %v6135_v53 = vsel %vm6131_vm6, %v6128_v45, %v6130_v11 }
 0x2bc   : > { %6851 = vmatmul.mubr.msk.bf16.vlgmr.msra.gmra.mrb[0].mxu1 %vm394_vm1, %v7411_v42  ;;  %v6246_v13 = vpop.permute.xlu1 %6245 }
 0x2bd   : > { %5939 = vmatpush1.bf16.msra.mxu1 %v5886_v10  ;;  %5970 = vmatprep.mubr.bf16.mxu1 %v7461_v8  ;;  %v6250_v12 = vpop.permute.xlu0 %6249  ;;  %v6256_v15 = vsel %vm6255_vm2, %v6246_v13, %v6248_v47 }
 0x2be   : > { %6062 = vmatprep.subr.bf16.mxu1 %v6011_v38  ;;  %v6257_v59 = vsel %vm6255_vm2, %v6248_v47, %v6250_v12 }
 0x2c0   : > { %v6254_v17 = vpop.permute.xlu1 %6253 }
 0x2c1   : > { %v6252_v63 = vpop.permute.xlu0 %6251 }
 0x2c2   : > { %v6259_v16 = vsel %vm6255_vm2, %v6252_v63, %v6254_v17  ;;  %v6258_v18 = vsel %vm6255_vm2, %v6250_v12, %v6252_v63 }
 0x2c3   : > { %6855 = vmatmul.mubr.msk.bf16.vlgmr.msra.gmra.mrb[0].mxu0 %vm394_vm1, %v7412_v51 }
 0x2c4   : > { %6020 = vmatpush1.bf16.msra.mxu0 %v6008_v52  ;;  %6051 = vmatprep.mubr.bf16.mxu0 %v7461_v8 }
 0x2c5   : > { %6143 = vmatprep.subr.bf16.mxu0 %v6133_v55 }
 0x2c8   : > { %6856 = vmatmul.mubr.msk.bf16.vlgmr.msra.gmra.mrb[0].mxu1 %vm394_vm1, %v7412_v51 }
 0x2c9   : > { %6063 = vmatpush1.bf16.msra.mxu1 %v6010_v9  ;;  %6094 = vmatprep.mubr.bf16.mxu1 %v7461_v8 }
 0x2ca   : > { %6186 = vmatprep.subr.bf16.mxu1 %v6135_v53 }
 0x2cf   : > { %6860 = vmatmul.mubr.msk.bf16.vlgmr.msra.gmra.mrb[0].mxu0 %vm394_vm1, %v7413_v62 }
 0x2d0   : > { %6144 = vmatpush1.bf16.msra.mxu0 %v6132_v6  ;;  %6175 = vmatprep.mubr.bf16.mxu0 %v7461_v8 }
 0x2d1   : > { %6267 = vmatprep.subr.bf16.mxu0 %v6257_v59 }
 0x2d4   : > { %6861 = vmatmul.mubr.msk.bf16.vlgmr.msra.gmra.mrb[0].mxu1 %vm394_vm1, %v7413_v62 }
 0x2d5   : > { %6187 = vmatpush1.bf16.msra.mxu1 %v6134_v5  ;;  %6218 = vmatprep.mubr.bf16.mxu1 %v7461_v8 }
 0x2d6   : > { %6310 = vmatprep.subr.bf16.mxu1 %v6259_v16 }
 0x2db   : > { %6865 = vmatmul.mubr.msk.bf16.vlgmr.msra.gmra.mrb[0].mxu0 %vm394_vm1, %v7414_v1 }
 0x2dc   : > { %6268 = vmatpush1.bf16.msra.mxu0 %v6256_v15  ;;  %6299 = vmatprep.mubr.bf16.mxu0 %v7461_v8 }
 0x2e0   : > { %6866 = vmatmul.mubr.msk.bf16.vlgmr.msra.gmra.mrb[0].mxu1 %vm394_vm1, %v7414_v1 }
 0x2e1   : > { %6311 = vmatpush1.bf16.msra.mxu1 %v6258_v18  ;;  %6342 = vmatprep.mubr.bf16.mxu1 %v7461_v8  ;;  %v6397_v8 = vsub.s32 1, %v6392_v26 }
 0x2e3   : > { %v6398_v54 = vrot.slane %v6389_v56, %v6397_v8 }
 0x2e7   : > { %6870 = vmatmul.mubr.msk.bf16.vlgmr.msra.gmra.mrb[0].mxu0 %vm394_vm1, %v7415_v21 }
 0x2ec   : > { %6871 = vmatmul.mubr.msk.bf16.vlgmr.msra.gmra.mrb[0].mxu1 %vm394_vm1, %v7415_v21  ;;  %vm6447_vm1 = vcmask 7168  }
 0x3ba   : > { %v6301_v2 = vpop.f32.mrb[0].mxu0 }
 0x3bb   : > { %v6411_v20 = vmul.f32 %v6394_v0, %v6301_v2  ;;  %v6303_v25 = vpop.f32.mrb[1].mxu0 }
 0x3bc   : > { %v6883_v29 = vpack.c.bf16 %v6303_v25, %v6301_v2  ;;  %v6412_v31 = vmul.f32 %v6398_v54, %v6303_v25  ;;  %v6305_v30 = vpop.f32.mrb[2].mxu0 }
 0x3bd   : > { %v6429_v36 = vmul.f32 %v6411_v20, %v6301_v2  ;;  %v6415_v60 = vmul.f32 %v6394_v0, %v6305_v30  ;;  %v6307_v28 = vpop.f32.mrb[3].mxu0 }
 0x3be   : > { %6385 = vst [vmem:[%s8849_s13] sm:$0xff] %v6883_v29  ;;  %v6419_v46 = vadd.f32 %v6412_v31, %v6411_v20  ;;  %v6430_v33 = vmul.f32 %v6412_v31, %v6303_v25  ;;  %v6885_v37 = vpack.c.bf16 %v6307_v28, %v6305_v30  ;;  %v6416_v50 = vmul.f32 %v6398_v54, %v6307_v28 }
 0x3bf   : > { %v6433_v7 = vmul.f32 %v6415_v60, %v6305_v30  ;;  %v6344_v58 = vpop.f32.mrb[0].mxu1 }
 0x3c0   : > { %v6437_v57 = vadd.f32 %v6430_v33, %v6429_v36  ;;  %6387 = vst [vmem:[%s8849_s13 + $0x10] sm:$0xff] %v6885_v37  ;;  %v6424_v49 = vadd.f32 %v6416_v50, %v6415_v60  ;;  %v6434_v32 = vmul.f32 %v6416_v50, %v6307_v28  ;;  %v6413_v24 = vmul.f32 %v6402_v34, %v6344_v58  ;;  %v6346_v61 = vpop.f32.mrb[1].mxu1 }
 0x3c1   : > { %v6884_v3 = vpack.c.bf16 %v6346_v61, %v6344_v58  ;;  %v6414_v35 = vmul.f32 %v6406_v48, %v6346_v61  ;;  %v6348_v41 = vpop.f32.mrb[2].mxu1 }
 0x3c2   : > { %v6442_v42 = vadd.f32 %v6434_v32, %v6433_v7  ;;  %v6420_v4 = vadd.f32 %v6419_v46, %v6413_v24  ;;  %v6431_v40 = vmul.f32 %v6413_v24, %v6344_v58  ;;  %v6417_v43 = vmul.f32 %v6402_v34, %v6348_v41  ;;  %v6350_v14 = vpop.f32.mrb[3].mxu1 }
 0x3c3   : > { %6386 = vst [vmem:[%s8849_s13 + $0x8] sm:$0xff] %v6884_v3  ;;  %v6432_v39 = vmul.f32 %v6414_v35, %v6346_v61  ;;  %v6886_v10 = vpack.c.bf16 %v6350_v14, %v6348_v41  ;;  %v6418_v38 = vmul.f32 %v6406_v48, %v6350_v14 }
 0x3c4   : > { %v6438_v44 = vadd.f32 %v6437_v57, %v6431_v40  ;;  %v6425_v45 = vadd.f32 %v6424_v49, %v6417_v43  ;;  %v6435_v51 = vmul.f32 %v6417_v43, %v6348_v41  ;;  %v6421_v52 = vadd.f32 %v6420_v4, %v6414_v35 }
 0x3c5   : > { %6388 = vst [vmem:[%s8849_s13 + $0x18] sm:$0xff] %v6886_v10  ;;  %v6436_v55 = vmul.f32 %v6418_v38, %v6350_v14  ;;  %v6480_v17 = vld [vmem:[%s8849_s13] sm:$0xff] (%p7590_p8) }
 0x3c6   : > { %v6443_v11 = vadd.f32 %v6442_v42, %v6435_v51  ;;  %v6426_v47 = vadd.f32 %v6425_v45, %v6418_v38  ;;  %6422 = vadd.xlane.f32.xlu0 %v6421_v52  ;;  %v6439_v9 = vadd.f32 %v6438_v44, %v6432_v39  ;;  %6481 = vst [vmem:[%s6467_s7] sm:$0xff] (%p7590_p8), %v6480_v17 }
 0x3c7   : > { %v6484_v16 = vld [vmem:[%s8849_s13 + $0x10] sm:$0xff] (%p7590_p8) }
 0x3c8   : > { %v6444_v53 = vadd.f32 %v6443_v11, %v6436_v55  ;;  %6427 = vadd.xlane.f32.xlu1 %v6426_v47  ;;  %6485 = vst [vmem:[%s6467_s7 + $0x20] sm:$0xff] (%p7590_p8), %v6484_v16 }
 0x3ca   : > { %6440 = vadd.xlane.f32.xlu0 %v6439_v9  ;;  %v6482_v5 = vld [vmem:[%s8849_s13 + $0x8] sm:$0xff] (%p7590_p8) }
 0x3cb   : > { %6483 = vst [vmem:[%s6467_s7 + $0x8] sm:$0xff] (%p7590_p8), %v6482_v5 }
 0x3cc   : > { %v6486_v1 = vld [vmem:[%s8849_s13 + $0x18] sm:$0xff] (%p7590_p8) }
 0x3cd   : > { %6487 = vst [vmem:[%s6467_s7 + $0x28] sm:$0xff] (%p7590_p8), %v6486_v1 }
 0x3ce   : > { %6445 = vadd.xlane.f32.xlu0 %v6444_v53 }
 0x453   : > { %v6423_v12 = vpop.xlane.xlu0 %6422 }
 0x455   : > { %v6428_v6 = vpop.xlane.xlu1 %6427 }
 0x457   : > { %v6441_v13 = vpop.xlane.xlu0 %6440  ;;  %6464 = sbr.rel (!%p7590_p8) target bundleno = 1118 (0x45e), region = 86 }
 0x458   : > { %v6448_v62 = vsel %vm6447_vm1, %v6423_v12, %v6441_v13 }
 0x459   : > { %6451 = vst.msk [vmem:[%s329_s26] sm:$0xff] %vm6450_vm3, %v6448_v62 }
 0x45b   : > { %v6446_v59 = vpop.xlane.xlu0 %6445 }
 0x45c   : > { %v6449_v63 = vsel %vm6447_vm1, %v6428_v6, %v6446_v59 }
 0x45d   : > { %6452 = vst.msk [vmem:[%s329_s26 + $0x8] sm:$0xff] %vm6450_vm3, %v6449_v63 }
 0x45e PF: > { %p13_p1 = scmp.ge.s32.totalorder %s7566_s24, 4   ;;  %s8894_s18 = smov %s7447_s19 }
 0x45f   : > { %s8895_s19 = smov %s7584_s6  ;;  %s8896_s20 = smov %s7455_s21 }
 0x460   : > { %s8897_s21 = smov %s7576_s28  ;;  %s8898_s22 = smov %s7566_s24 }
 0x461   :  { %15 = sbr.rel (!%p13_p1) target bundleno = 3 (0x3), region = 211 }

// kernel: _lambda_.21
= control target key start
LH: loop header
LB: loop body
LE: loop exit
PB: predicated region body
PF: predicated region fallthrough
CT: control target
= control target key end

     0   :  { %s568_s20 = smov 119   ;;  %s569_s21 = smov 127   ;;  %v570_v5 = vmov 0   ;;  %vm178_vm0 = vcmask 1039360   ;;  %vm305_vm1 = vcmask 973824   ;;  %vm187_vm2 = vcmask 261120   ;;  %s675_s0 = inlined_call_operand.vmem [shape: bf16[4,16,32], index: 0, kind: input, shape index: {}]   ;;  %s676_s1 = inlined_call_operand.vmem [shape: bf16[32,512], index: 1, kind: input, shape index: {}, may-alias: {1,2}]   ;;  %s677_s2 = inlined_call_operand.vmem [shape: bf16[32,512], index: 2, kind: input, shape index: {}, may-alias: {1,2}]   ;;  %s678_s3 = inlined_call_operand.vmem [shape: f32[1,256], index: 3, kind: input, shape index: {}]   ;;  %s679_s4 = inlined_call_operand.vmem [shape: bf16[16,256], index: 4, kind: output, shape index: {0}]   ;;  %s680_s5 = inlined_call_operand.vmem [shape: f32[1,16,2], index: 5, kind: output, shape index: {1}]  }
   0x1   :  { %v605_v0 = vld [vmem:[%s676_s1 + $0x4] ss:$16 sps:$4 sm:$0xff]   ;;  %v558_v1 = vld [vmem:[%s677_s2 + $0x8] ss:$16 sps:$4 sm:$0xff]   ;;  %v615_v2 = vld [vmem:[%s676_s1] ss:$16 sps:$4 sm:$0xff]   ;;  %223 = vmatprep.mubr.bf16.mxu1 %v570_v5  ;;  %349 = vmatprep.mubr.bf16.mxu0 %v570_v5  ;;  %v459_v41 = vlaneseq }
   0x2   :  { %295 = vrot.lane.b32.xlu1 %v605_v0, %s568_s20  ;;  %168 = vrot.lane.b32.xlu0 %v605_v0, %s569_s21  ;;  %v560_v3 = vld [vmem:[%s677_s2 + $0x28] ss:$16 sps:$4 sm:$0xff]   ;;  %v561_v4 = vld [vmem:[%s676_s1 + $0x24] ss:$16 sps:$4 sm:$0xff]   ;;  %s571_s7 = smov 118   ;;  %vm384_vm3 = vcmask 965632  }
   0x3   :  { %v563_v6 = vld [vmem:[%s676_s1 + $0x20] ss:$16 sps:$4 sm:$0xff]   ;;  %v564_v27 = vld [vmem:[%s675_s0 + $0x8] sm:$0xff]   ;;  %v567_v40 = vld [vmem:[%s675_s0 + $0x18] sm:$0xff]   ;;  %v460_v42 = vshrl.u32 %v459_v41, 7  ;;  %vm489_vm4 = vcmask 7168  }
   0x4   :  { %v565_v28 = vld [vmem:[%s675_s0 + $0x10] sm:$0xff]   ;;  %v566_v39 = vld [vmem:[%s675_s0] sm:$0xff]   ;;  %vm492_vm5 = vcmask 15360  }
   0x5   :  { %v461_v43 = vsub.s32 0, %v460_v42  ;;  %v457_v44 = vld [vmem:[%s678_s3] sm:$0x3]  ;;  %v465_v45 = vsub.s32 1, %v460_v42 }
   0x6   :  { %297 = vrot.lane.b32.xlu1 %v558_v1, %s568_s20  ;;  %170 = vrot.lane.b32.xlu0 %v558_v1, %s569_s21 }
   0x7   :  { %v462_v47 = vrot.slane %v457_v44, %v461_v43  ;;  %v466_v50 = vrot.slane %v457_v44, %v465_v45 }
   0xa   :  { %293 = vrot.lane.b32.xlu1 %v615_v2, %s568_s20  ;;  %166 = vrot.lane.b32.xlu0 %v615_v2, %s569_s21 }
   0xe   :  { %176 = vrot.lane.b32.xlu1 %v560_v3, %s569_s21  ;;  %174 = vrot.lane.b32.xlu0 %v561_v4, %s569_s21 }
  0x12   :  { %303 = vrot.lane.b32.xlu1 %v560_v3, %s568_s20  ;;  %301 = vrot.lane.b32.xlu0 %v561_v4, %s568_s20 }
  0x16   :  { %299 = vrot.lane.b32.xlu1 %v563_v6, %s568_s20  ;;  %172 = vrot.lane.b32.xlu0 %v563_v6, %s569_s21 }
  0x1a   :  { %376 = vrot.lane.b32.xlu1 %v558_v1, %s571_s7  ;;  %374 = vrot.lane.b32.xlu0 %v605_v0, %s571_s7 }
  0x1e   :  { %380 = vrot.lane.b32.xlu1 %v561_v4, %s571_s7  ;;  %372 = vrot.lane.b32.xlu0 %v615_v2, %s571_s7 }
  0x22   :  { %378 = vrot.lane.b32.xlu1 %v563_v6, %s571_s7  ;;  %382 = vrot.lane.b32.xlu0 %v560_v3, %s571_s7 }
  0x74   :  { %v296_v7 = vpop.permute.xlu1 %295  ;;  %v169_v8 = vpop.permute.xlu0 %168 }
  0x78   :  { %v298_v9 = vpop.permute.xlu1 %297  ;;  %v171_v10 = vpop.permute.xlu0 %170 }
  0x79   :  { %v180_v11 = vsel %vm178_vm0, %v169_v8, %v171_v10  ;;  %v307_v12 = vsel %vm305_vm1, %v296_v7, %v298_v9 }
  0x7a   :  { %191 = vmatprep.subr.bf16.mxu1 %v180_v11  ;;  %317 = vmatprep.subr.bf16.mxu0 %v307_v12 }
  0x7c   :  { %v294_v13 = vpop.permute.xlu1 %293  ;;  %v167_v14 = vpop.permute.xlu0 %166 }
  0x7d   :  { %v179_v15 = vsel %vm178_vm0, %v167_v14, %v169_v8  ;;  %v306_v16 = vsel %vm305_vm1, %v294_v13, %v296_v7 }
  0x7e   :  { %192 = vmatpush1.bf16.msra.mxu1 %v179_v15  ;;  %318 = vmatpush1.bf16.msra.mxu0 %v306_v16 }
  0x80   :  { %v177_v17 = vpop.permute.xlu1 %176  ;;  %v175_v18 = vpop.permute.xlu0 %174 }
  0x81   :  { %v182_v19 = vsel %vm178_vm0, %v175_v18, %v177_v17 }
  0x82   :  { %193 = vmatprep.subr.bf16.mxu1 %v182_v19 }
  0x84   :  { %v304_v20 = vpop.permute.xlu1 %303  ;;  %v302_v21 = vpop.permute.xlu0 %301 }
  0x85   :  { %v309_v22 = vsel %vm305_vm1, %v302_v21, %v304_v20 }
  0x86   :  { %319 = vmatprep.subr.bf16.mxu0 %v309_v22 }
  0x88   :  { %v300_v23 = vpop.permute.xlu1 %299  ;;  %v173_v24 = vpop.permute.xlu0 %172 }
  0x89   :  { %v181_v25 = vsel %vm178_vm0, %v173_v24, %v175_v18  ;;  %v308_v26 = vsel %vm305_vm1, %v300_v23, %v302_v21 }
  0x8a   :  { %194 = vmatpush1.bf16.msra.mxu1 %v181_v25  ;;  %320 = vmatpush1.bf16.msra.mxu0 %v308_v26 }
  0x8b   :  { %242 = vmatprep.subr.bf16.mxu1 %v605_v0 }
  0x8c   :  { %v377_v29 = vpop.permute.xlu1 %376  ;;  %v375_v30 = vpop.permute.xlu0 %374 }
  0x8d   :  { %525 = vmatmul.mubr.msk.bf16.vlgmr.msra.gmra.mrb[0].mxu1 %vm187_vm2, %v564_v27  ;;  %531 = vmatmul.mubr.msk.bf16.vlgmr.msra.gmra.mrb[0].mxu0 %vm187_vm2, %v565_v28  ;;  %v386_v31 = vsel %vm384_vm3, %v375_v30, %v377_v29 }
  0x8e   :  { %396 = vmatprep.subr.bf16.mxu0 %v386_v31  ;;  %243 = vmatpush1.bf16.msra.mxu1 %v615_v2 }
  0x8f   :  { %244 = vmatprep.subr.bf16.mxu1 %v561_v4  ;;  %274 = vmatprep.mubr.bf16.mxu1 %v570_v5 }
  0x90   :  { %v381_v32 = vpop.permute.xlu1 %380  ;;  %v373_v33 = vpop.permute.xlu0 %372  ;;  %428 = vmatprep.mubr.bf16.mxu0 %v570_v5 }
  0x91   :  { %v385_v34 = vsel %vm384_vm3, %v373_v33, %v375_v30 }
  0x92   :  { %397 = vmatpush1.bf16.msra.mxu0 %v385_v34  ;;  %245 = vmatpush1.bf16.msra.mxu1 %v563_v6 }
  0x94   :  { %v379_v35 = vpop.permute.xlu1 %378  ;;  %v383_v36 = vpop.permute.xlu0 %382 }
  0x95   :  { %v387_v37 = vsel %vm384_vm3, %v379_v35, %v381_v32  ;;  %v388_v38 = vsel %vm384_vm3, %v381_v32, %v383_v36 }
  0x96   :  { %398 = vmatprep.subr.bf16.mxu0 %v388_v38 }
  0x97   :  { %399 = vmatpush1.bf16.msra.mxu0 %v387_v37 }
  0x99   :  { %527 = vmatmul.mubr.msk.bf16.vlgmr.msra.gmra.mrb[0].mxu1 %vm187_vm2, %v566_v39 }
  0x9a   :  { %535 = vmatmul.mubr.msk.bf16.vlgmr.msra.gmra.mrb[0].mxu0 %vm187_vm2, %v567_v40 }
 0x16c   :  { %v276_v46 = vpop.f32.mrb[0].mxu1 }
 0x16d   :  { %v278_v48 = vpop.f32.mrb[1].mxu1  ;;  %v430_v49 = vpop.f32.mrb[0].mxu0 }
 0x16e   :  { %v540_v51 = vadd.f32 %v430_v49, %v276_v46  ;;  %v280_v52 = vpop.f32.mrb[2].mxu1  ;;  %v432_v53 = vpop.f32.mrb[1].mxu0 }
 0x16f   :  { %v541_v54 = vadd.f32 %v432_v53, %v278_v48  ;;  %v282_v55 = vpop.f32.mrb[3].mxu1  ;;  %v434_v56 = vpop.f32.mrb[2].mxu0 }
 0x170   :  { %v542_v57 = vadd.f32 %v434_v56, %v280_v52  ;;  %v436_v58 = vpop.f32.mrb[3].mxu0  ;;  %v469_v59 = vmul.f32 %v540_v51, %v462_v47 }
 0x171   :  { %v538_v60 = vpack.c.bf16 %v541_v54, %v540_v51  ;;  %v543_v61 = vadd.f32 %v436_v58, %v282_v55  ;;  %v470_v62 = vmul.f32 %v541_v54, %v466_v50 }
 0x172   :  { %v471_v63 = vmul.f32 %v542_v57, %v462_v47  ;;  %v479_v0 = vmul.f32 %v540_v51, %v469_v59 }
 0x173   :  { %455 = vst [vmem:[%s679_s4] sm:$0xff] %v538_v60  ;;  %v539_v1 = vpack.c.bf16 %v543_v61, %v542_v57  ;;  %v473_v2 = vadd.f32 %v470_v62, %v469_v59  ;;  %v472_v3 = vmul.f32 %v543_v61, %v466_v50  ;;  %v480_v4 = vmul.f32 %v541_v54, %v470_v62 }
 0x174   :  { %v481_v5 = vmul.f32 %v542_v57, %v471_v63 }
 0x175   :  { %456 = vst [vmem:[%s679_s4 + $0x8] sm:$0xff] %v539_v1  ;;  %474 = vadd.xlane.f32.xlu0 %v473_v2  ;;  %v476_v6 = vadd.f32 %v472_v3, %v471_v63  ;;  %v483_v7 = vadd.f32 %v480_v4, %v479_v0  ;;  %v482_v8 = vmul.f32 %v543_v61, %v472_v3 }
 0x177   :  { %477 = vadd.xlane.f32.xlu1 %v476_v6  ;;  %v486_v9 = vadd.f32 %v482_v8, %v481_v5 }
 0x179   :  { %484 = vadd.xlane.f32.xlu0 %v483_v7 }
 0x17d   :  { %487 = vadd.xlane.f32.xlu0 %v486_v9 }
 0x202   :  { %v475_v10 = vpop.xlane.xlu0 %474 }
 0x204   :  { %v478_v13 = vpop.xlane.xlu1 %477 }
 0x206   :  { %v485_v11 = vpop.xlane.xlu0 %484 }
 0x207   :  { %v490_v12 = vsel %vm489_vm4, %v475_v10, %v485_v11 }
 0x208   :  { %493 = vst.msk [vmem:[%s680_s5] sm:$0xff] %vm492_vm5, %v490_v12 }
 0x20a   :  { %v488_v14 = vpop.xlane.xlu0 %487 }
 0x20b   :  { %v491_v15 = vsel %vm489_vm4, %v478_v13, %v488_v14 }
 0x20c   :  { %494 = vst.msk [vmem:[%s680_s5 + $0x8] sm:$0xff] %vm492_vm5, %v491_v15 }

// kernel: _lambda_.24
= control target key start
LH: loop header
LB: loop body
LE: loop exit
PB: predicated region body
PF: predicated region fallthrough
CT: control target
= control target key end

     0   :  { %v137_v0 = vmov 0   ;;  %s194_s1 = inlined_call_operand.vmem [shape: f32[32,1], index: 1, kind: input, shape index: {}]   ;;  %s195_s2 = inlined_call_operand.vmem [shape: f32[32,1], index: 2, kind: input, shape index: {}]   ;;  %s196_s0 = inlined_call_operand.vmem [shape: bf16[32,128], index: 0, kind: input, shape index: {}]   ;;  %s197_s3 = inlined_call_operand.vmem [shape: bf16[32,128], index: 3, kind: output, shape index: {}]  }
   0x1   :  { %136 = vset.pattern.permute.xlu1 %v137_v0  ;;  %135 = vset.pattern.permute.xlu0 %v137_v0  ;;  %v24_v1 = vld [vmem:[%s194_s1 + $0x10] sm:$0xff]  ;;  %v22_v2 = vld [vmem:[%s194_s1] sm:$0xff]  ;;  %v25_v3 = vld [vmem:[%s194_s1 + $0x18] sm:$0xff] }
   0x2   :  { %38 = vperm.xlu1 %136, %v24_v1   ;;  %28 = vperm.xlu0 %135, %v22_v2   ;;  %v23_v4 = vld [vmem:[%s194_s1 + $0x8] sm:$0xff]  ;;  %v50_v6 = vld [vmem:[%s195_s2] sm:$0xff]  ;;  %v53_v7 = vld [vmem:[%s195_s2 + $0x18] sm:$0xff] }
   0x3   :  { %v51_v5 = vld [vmem:[%s195_s2 + $0x8] sm:$0xff]  ;;  %v52_v8 = vld [vmem:[%s195_s2 + $0x10] sm:$0xff]  ;;  %v115_v11 = vld [vmem:[%s196_s0] sm:$0xff]  }
   0x4   :  { %v116_v12 = vunpack.c.l.bf16 %v115_v11  ;;  %v117_v13 = vunpack.c.h.bf16 %v115_v11  ;;  %v132_v14 = vld [vmem:[%s196_s0 + $0x8] sm:$0xff]  }
   0x5   :  { %v120_v17 = vunpack.c.l.bf16 %v132_v14  ;;  %v121_v19 = vunpack.c.h.bf16 %v132_v14 }
   0x6   :  { %43 = vperm.xlu1 %136, %v25_v3   ;;  %33 = vperm.xlu0 %135, %v23_v4  }
   0xa   :  { %61 = vperm.xlu1 %136, %v51_v5   ;;  %56 = vperm.xlu0 %135, %v50_v6  }
   0xe   :  { %71 = vperm.xlu1 %136, %v53_v7   ;;  %66 = vperm.xlu0 %135, %v52_v8  }
  0x81   :  { %v39_v9 = vpop.permute.xlu1 %38  ;;  %v29_v10 = vpop.permute.xlu0 %28 }
  0x82   :  { %v46_v18 = vmul.f32 %v116_v12, %v29_v10  ;;  %v48_v25 = vmul.f32 %v120_v17, %v39_v9 }
  0x85   :  { %v44_v15 = vpop.permute.xlu1 %43  ;;  %v34_v16 = vpop.permute.xlu0 %33 }
  0x86   :  { %v47_v20 = vmul.f32 %v117_v13, %v34_v16  ;;  %v49_v26 = vmul.f32 %v121_v19, %v44_v15 }
  0x89   :  { %v62_v21 = vpop.permute.xlu1 %61  ;;  %v57_v22 = vpop.permute.xlu0 %56 }
  0x8a   :  { %v75_v23 = vadd.f32 %v62_v21, %v47_v20  ;;  %v74_v24 = vadd.f32 %v57_v22, %v46_v18 }
  0x8c   :  { %v79_v27 = vmax.f32 %v75_v23, 0.0  ;;  %v78_v28 = vmax.f32 %v74_v24, 0.0 }
  0x8d   :  { %v72_v29 = vpop.permute.xlu1 %71  ;;  %v67_v30 = vpop.permute.xlu0 %66 }
  0x8e   :  { %v125_v31 = vpack.c.bf16 %v79_v27, %v78_v28  ;;  %v77_v32 = vadd.f32 %v72_v29, %v49_v26  ;;  %v76_v33 = vadd.f32 %v67_v30, %v48_v25 }
  0x90   :  { %126 = vst [vmem:[%s197_s3] sm:$0xff] %v125_v31   ;;  %v81_v34 = vmax.f32 %v77_v32, 0.0  ;;  %v80_v35 = vmax.f32 %v76_v33, 0.0 }
  0x92   :  { %v130_v36 = vpack.c.bf16 %v81_v34, %v80_v35 }
  0x94   :  { %133 = vst [vmem:[%s197_s3 + $0x8] sm:$0xff] %v130_v36  }

// kernel: _lambda_.23
= control target key start
LH: loop header
LB: loop body
LE: loop exit
PB: predicated region body
PF: predicated region fallthrough
CT: control target
= control target key end

     0   :  { %s830_s25 = smov 123   ;;  %s831_s26 = smov 127   ;;  %vm266_vm0 = vcmask 523264   ;;  %vm257_vm1 = vcmask 1039360   ;;  %vm418_vm2 = vcmask 1006592   ;;  %vm517_vm3 = vcmask 998400   ;;  %s1004_s0 = inlined_call_operand.vmem [shape: bf16[4,32,64], index: 0, kind: input, shape index: {}]   ;;  %s1005_s1 = inlined_call_operand.vmem [shape: bf16[64,256], index: 1, kind: input, shape index: {}, may-alias: {1,2}]   ;;  %s1006_s2 = inlined_call_operand.vmem [shape: bf16[64,256], index: 2, kind: input, shape index: {}, may-alias: {1,2}]   ;;  %s1007_s3 = inlined_call_operand.vmem [shape: f32[1,128], index: 3, kind: input, shape index: {}]   ;;  %s1008_s4 = inlined_call_operand.vmem [shape: bf16[32,128], index: 4, kind: output, shape index: {0}]   ;;  %s1009_s5 = inlined_call_operand.vmem [shape: f32[1,32,2], index: 5, kind: output, shape index: {1}]  }
   0x1   :  { %v30_v0 = vld [vmem:[%s1005_s1] sm:$0xf]  ;;  %v32_v1 = vld [vmem:[%s1005_s1 + $0x8] sm:$0xf]  ;;  %v663_v2 = vld [vmem:[%s1006_s2 + $0x4] sm:$0xf] }
   0x2   :  { %31 = vst [vmem:[#allocation2] sm:$0xf] %v30_v0  ;;  %33 = vst [vmem:[#allocation2 + $0x4] sm:$0xf] %v32_v1  ;;  %v664_v3 = vld [vmem:[%s1006_s2 + $0xc] sm:$0xf] }
   0x3   :  { %v665_v4 = vld [vmem:[%s1006_s2 + $0x14] sm:$0xf]  ;;  %103 = vst [vmem:[#allocation3] sm:$0xf] %v663_v2  ;;  %105 = vst [vmem:[#allocation3 + $0x4] sm:$0xf] %v664_v3 }
   0x4   :  { %107 = vst [vmem:[#allocation3 + $0x8] sm:$0xf] %v665_v4  ;;  %v666_v5 = vld [vmem:[%s1006_s2 + $0x1c] sm:$0xf]  ;;  %v34_v6 = vld [vmem:[%s1005_s1 + $0x10] sm:$0xf] }
   0x5   :  { %v36_v7 = vld [vmem:[%s1005_s1 + $0x18] sm:$0xf]  ;;  %109 = vst [vmem:[#allocation3 + $0xc] sm:$0xf] %v666_v5  ;;  %35 = vst [vmem:[#allocation2 + $0x8] sm:$0xf] %v34_v6 }
   0x6   :  { %37 = vst [vmem:[#allocation2 + $0xc] sm:$0xf] %v36_v7  ;;  %v667_v8 = vld [vmem:[%s1006_s2 + $0x24] sm:$0xf]  ;;  %v668_v9 = vld [vmem:[%s1006_s2 + $0x2c] sm:$0xf] }
   0x7   :  { %v38_v10 = vld [vmem:[%s1005_s1 + $0x20] sm:$0xf]  ;;  %111 = vst [vmem:[#allocation3 + $0x10] sm:$0xf] %v667_v8  ;;  %113 = vst [vmem:[#allocation3 + $0x14] sm:$0xf] %v668_v9 }
   0x8   :  { %39 = vst [vmem:[#allocation2 + $0x10] sm:$0xf] %v38_v10  ;;  %v40_v11 = vld [vmem:[%s1005_s1 + $0x28] sm:$0xf]  ;;  %v669_v12 = vld [vmem:[%s1006_s2 + $0x34] sm:$0xf] }
   0x9   :  { %v670_v13 = vld [vmem:[%s1006_s2 + $0x3c] sm:$0xf]  ;;  %41 = vst [vmem:[#allocation2 + $0x14] sm:$0xf] %v40_v11  ;;  %115 = vst [vmem:[#allocation3 + $0x18] sm:$0xf] %v669_v12 }
   0xa   :  { %117 = vst [vmem:[#allocation3 + $0x1c] sm:$0xf] %v670_v13  ;;  %v42_v14 = vld [vmem:[%s1005_s1 + $0x30] sm:$0xf]  ;;  %v44_v15 = vld [vmem:[%s1005_s1 + $0x38] sm:$0xf] }
   0xb   :  { %43 = vst [vmem:[#allocation2 + $0x18] sm:$0xf] %v42_v14  ;;  %45 = vst [vmem:[#allocation2 + $0x1c] sm:$0xf] %v44_v15  ;;  %v911_v16 = vld [vmem:[#allocation2] sm:$0xff]   ;;  %v822_v22 = vld [vmem:[%s1004_s0 + $0x10] sm:$0xff]  }
   0xc   :  { %402 = vrot.lane.b32.xlu1 %v911_v16, %s830_s25  ;;  %241 = vrot.lane.b32.xlu0 %v911_v16, %s831_s26  ;;  %v815_v17 = vld [vmem:[#allocation3] sm:$0xff]   ;;  %v816_v18 = vld [vmem:[#allocation3 + $0x8] sm:$0xff]   ;;  %s832_s29 = smov 122   ;;  %v823_v47 = vld [vmem:[%s1004_s0 + $0x18] sm:$0xff]   ;;  %vm636_vm4 = vcmask 7168   ;;  %vm641_vm5 = vcmask 15360  }
   0xd   :  { %v915_v19 = vld [vmem:[#allocation2 + $0x8] sm:$0xff]   ;;  %759 = vmatprep.mubr.msk.bf16.mxu1 %vm266_vm0, %v822_v22  ;;  %v824_v23 = vld [vmem:[%s1004_s0 + $0x20] sm:$0xff]   ;;  %v828_v55 = vld [vmem:[%s1004_s0 + $0x30] sm:$0xff]  }
   0xe   :  { %v818_v20 = vld [vmem:[#allocation3 + $0x10] sm:$0xff]   ;;  %783 = vmatprep.mubr.msk.bf16.mxu0 %vm266_vm0, %v824_v23  ;;  %v826_v50 = vld [vmem:[%s1004_s0] sm:$0xff]   ;;  %v825_v52 = vld [vmem:[%s1004_s0 + $0x28] sm:$0xff]  }
   0xf   :  { %v827_v63 = vld [vmem:[%s1004_s0 + $0x8] sm:$0xff]   ;;  %v829_v3 = vld [vmem:[%s1004_s0 + $0x38] sm:$0xff]   ;;  %v711_v9 = vld [vmem:[%s1007_s3] ss:$0 sm:$0xff] }
  0x10   :  { %404 = vrot.lane.b32.xlu1 %v815_v17, %s830_s25  ;;  %243 = vrot.lane.b32.xlu0 %v815_v17, %s831_s26  ;;  %v919_v21 = vld [vmem:[#allocation2 + $0x10] sm:$0xff]  }
  0x11   :  { %v820_v24 = vld [vmem:[#allocation3 + $0x18] sm:$0xff]  }
  0x12   :  { %v930_v25 = vld [vmem:[#allocation2 + $0x18] sm:$0xff]  }
  0x14   :  { %247 = vrot.lane.b32.xlu1 %v816_v18, %s831_s26  ;;  %245 = vrot.lane.b32.xlu0 %v915_v19, %s831_s26 }
  0x18   :  { %408 = vrot.lane.b32.xlu1 %v816_v18, %s830_s25  ;;  %406 = vrot.lane.b32.xlu0 %v915_v19, %s830_s25 }
  0x1c   :  { %251 = vrot.lane.b32.xlu1 %v818_v20, %s831_s26  ;;  %249 = vrot.lane.b32.xlu0 %v919_v21, %s831_s26 }
  0x20   :  { %412 = vrot.lane.b32.xlu1 %v818_v20, %s830_s25  ;;  %410 = vrot.lane.b32.xlu0 %v919_v21, %s830_s25 }
  0x24   :  { %255 = vrot.lane.b32.xlu1 %v820_v24, %s831_s26  ;;  %253 = vrot.lane.b32.xlu0 %v930_v25, %s831_s26 }
  0x28   :  { %416 = vrot.lane.b32.xlu1 %v820_v24, %s830_s25  ;;  %414 = vrot.lane.b32.xlu0 %v930_v25, %s830_s25 }
  0x2c   :  { %503 = vrot.lane.b32.xlu1 %v815_v17, %s832_s29  ;;  %501 = vrot.lane.b32.xlu0 %v911_v16, %s832_s29 }
  0x30   :  { %507 = vrot.lane.b32.xlu1 %v816_v18, %s832_s29  ;;  %505 = vrot.lane.b32.xlu0 %v915_v19, %s832_s29 }
  0x34   :  { %511 = vrot.lane.b32.xlu1 %v818_v20, %s832_s29  ;;  %509 = vrot.lane.b32.xlu0 %v919_v21, %s832_s29 }
  0x38   :  { %515 = vrot.lane.b32.xlu1 %v820_v24, %s832_s29  ;;  %513 = vrot.lane.b32.xlu0 %v930_v25, %s832_s29 }
  0x7e   :  { %v403_v26 = vpop.permute.xlu1 %402  ;;  %v242_v27 = vpop.permute.xlu0 %241 }
  0x82   :  { %v405_v28 = vpop.permute.xlu1 %404  ;;  %v244_v29 = vpop.permute.xlu0 %243 }
  0x83   :  { %v258_v30 = vsel %vm257_vm1, %v242_v27, %v244_v29  ;;  %v419_v31 = vsel %vm418_vm2, %v403_v26, %v405_v28 }
  0x84   :  { %751 = vmatprep.subr.bf16.mxu1 %v258_v30  ;;  %775 = vmatprep.subr.bf16.mxu0 %v419_v31 }
  0x85   :  { %752 = vmatpush3.bf16.msra.mxu1 %v258_v30  ;;  %776 = vmatpush3.bf16.msra.mxu0 %v419_v31 }
  0x86   :  { %v248_v32 = vpop.permute.xlu1 %247  ;;  %v246_v33 = vpop.permute.xlu0 %245 }
  0x87   :  { %v259_v34 = vsel %vm257_vm1, %v246_v33, %v248_v32 }
  0x88   :  { %753 = vmatprep.subr.bf16.mxu1 %v259_v34 }
  0x89   :  { %754 = vmatpush3.bf16.msra.mxu1 %v259_v34 }
  0x8a   :  { %v409_v35 = vpop.permute.xlu1 %408  ;;  %v407_v36 = vpop.permute.xlu0 %406 }
  0x8b   :  { %v420_v37 = vsel %vm418_vm2, %v407_v36, %v409_v35 }
  0x8c   :  { %777 = vmatprep.subr.bf16.mxu0 %v420_v37 }
  0x8d   :  { %778 = vmatpush3.bf16.msra.mxu0 %v420_v37 }
  0x8e   :  { %v252_v38 = vpop.permute.xlu1 %251  ;;  %v250_v39 = vpop.permute.xlu0 %249 }
  0x8f   :  { %v260_v40 = vsel %vm257_vm1, %v250_v39, %v252_v38 }
  0x90   :  { %755 = vmatprep.subr.bf16.mxu1 %v260_v40 }
  0x91   :  { %756 = vmatpush3.bf16.msra.mxu1 %v260_v40 }
  0x92   :  { %v413_v41 = vpop.permute.xlu1 %412  ;;  %v411_v42 = vpop.permute.xlu0 %410 }
  0x93   :  { %v421_v43 = vsel %vm418_vm2, %v411_v42, %v413_v41 }
  0x94   :  { %779 = vmatprep.subr.bf16.mxu0 %v421_v43 }
  0x95   :  { %780 = vmatpush3.bf16.msra.mxu0 %v421_v43 }
  0x96   :  { %v256_v44 = vpop.permute.xlu1 %255  ;;  %v254_v45 = vpop.permute.xlu0 %253 }
  0x97   :  { %v261_v46 = vsel %vm257_vm1, %v254_v45, %v256_v44 }
  0x98   :  { %757 = vmatprep.subr.bf16.mxu1 %v261_v46 }
  0x99   :  { %758 = vmatpush3.bf16.msra.mxu1 %v261_v46 }
  0x9a   :  { %v417_v48 = vpop.permute.xlu1 %416  ;;  %v415_v49 = vpop.permute.xlu0 %414  ;;  %763 = vmatprep.subr.bf16.mxu1 %v911_v16 }
  0x9b   :  { %v422_v51 = vsel %vm418_vm2, %v415_v49, %v417_v48 }
  0x9c   :  { %781 = vmatprep.subr.bf16.mxu0 %v422_v51  ;;  %760 = vmatmul.mubr.msk.bf16.vlgmr.msra.gmra.mrb[0].mxu1 %vm266_vm0, %v823_v47 }
  0x9d   :  { %764 = vmatpush3.bf16.msra.mxu1 %v911_v16  ;;  %782 = vmatpush3.bf16.msra.mxu0 %v422_v51 }
  0x9e   :  { %v504_v53 = vpop.permute.xlu1 %503  ;;  %v502_v54 = vpop.permute.xlu0 %501  ;;  %765 = vmatprep.subr.bf16.mxu1 %v915_v19  ;;  %771 = vmatprep.mubr.msk.bf16.mxu1 %vm266_vm0, %v826_v50 }
  0x9f   :  { %v518_v56 = vsel %vm517_vm3, %v502_v54, %v504_v53 }
  0xa0   :  { %787 = vmatprep.subr.bf16.mxu0 %v518_v56  ;;  %784 = vmatmul.mubr.msk.bf16.vlgmr.msra.gmra.mrb[0].mxu0 %vm266_vm0, %v825_v52 }
  0xa1   :  { %766 = vmatpush3.bf16.msra.mxu1 %v915_v19  ;;  %788 = vmatpush3.bf16.msra.mxu0 %v518_v56 }
  0xa2   :  { %v508_v57 = vpop.permute.xlu1 %507  ;;  %v506_v58 = vpop.permute.xlu0 %505  ;;  %767 = vmatprep.subr.bf16.mxu1 %v919_v21  ;;  %795 = vmatprep.mubr.msk.bf16.mxu0 %vm266_vm0, %v828_v55 }
  0xa3   :  { %v519_v59 = vsel %vm517_vm3, %v506_v58, %v508_v57 }
  0xa4   :  { %789 = vmatprep.subr.bf16.mxu0 %v519_v59 }
  0xa5   :  { %768 = vmatpush3.bf16.msra.mxu1 %v919_v21  ;;  %790 = vmatpush3.bf16.msra.mxu0 %v519_v59 }
  0xa6   :  { %v512_v60 = vpop.permute.xlu1 %511  ;;  %v510_v61 = vpop.permute.xlu0 %509  ;;  %769 = vmatprep.subr.bf16.mxu1 %v930_v25 }
  0xa7   :  { %v520_v62 = vsel %vm517_vm3, %v510_v61, %v512_v60 }
  0xa8   :  { %791 = vmatprep.subr.bf16.mxu0 %v520_v62 }
  0xa9   :  { %770 = vmatpush3.bf16.msra.mxu1 %v930_v25  ;;  %792 = vmatpush3.bf16.msra.mxu0 %v520_v62 }
  0xaa   :  { %v516_v0 = vpop.permute.xlu1 %515  ;;  %v514_v1 = vpop.permute.xlu0 %513 }
  0xab   :  { %v521_v2 = vsel %vm517_vm3, %v514_v1, %v516_v0 }
  0xac   :  { %772 = vmatmul.mubr.msk.bf16.vlgmr.msra.gmra.mrb[0].mxu1 %vm266_vm0, %v827_v63  ;;  %793 = vmatprep.subr.bf16.mxu0 %v521_v2 }
  0xad   :  { %794 = vmatpush3.bf16.msra.mxu0 %v521_v2 }
  0xb0   :  { %796 = vmatmul.mubr.msk.bf16.vlgmr.msra.gmra.mrb[0].mxu0 %vm266_vm0, %v829_v3 }
 0x17f   :  { %v773_v4 = vpop.f32.mrb[0].mxu1 }
 0x180   :  { %v372_v5 = vpop.f32.mrb[1].mxu1 }
 0x181   :  { %v774_v6 = vpop.f32.mrb[2].mxu1 }
 0x182   :  { %v375_v7 = vpop.f32.mrb[3].mxu1 }
 0x183   :  { %v797_v8 = vpop.f32.mrb[0].mxu0 }
 0x184   :  { %v799_v10 = vadd.f32 %v797_v8, %v773_v4  ;;  %v566_v11 = vpop.f32.mrb[1].mxu0 }
 0x185   :  { %v800_v12 = vadd.f32 %v566_v11, %v372_v5  ;;  %v798_v13 = vpop.f32.mrb[2].mxu0 }
 0x186   :  { %v801_v14 = vadd.f32 %v798_v13, %v774_v6  ;;  %v569_v15 = vpop.f32.mrb[3].mxu0  ;;  %v614_v16 = vmul.f32 %v799_v10, %v711_v9 }
 0x187   :  { %v802_v17 = vadd.f32 %v569_v15, %v375_v7  ;;  %v612_v21 = vmul.f32 %v800_v12, %v711_v9 }
 0x188   :  { %v724_v18 = vpack.c.bf16 %v801_v14, %v799_v10  ;;  %620 = vadd.xlane.f32.xlu0 %v614_v16  ;;  %v615_v23 = vmul.f32 %v801_v14, %v711_v9  ;;  %v626_v24 = vmul.f32 %v799_v10, %v614_v16 }
 0x189   :  { %v719_v19 = vpack.c.bf16 %v802_v17, %v800_v12  ;;  %v613_v20 = vmul.f32 %v802_v17, %v711_v9  ;;  %v624_v22 = vmul.f32 %v800_v12, %v612_v21 }
 0x18a   :  { %726 = vst [vmem:[%s1008_s4 + $0x8] sm:$0xff] %v724_v18   ;;  %v627_v26 = vmul.f32 %v801_v14, %v615_v23 }
 0x18b   :  { %720 = vst [vmem:[%s1008_s4] sm:$0xff] %v719_v19   ;;  %618 = vadd.xlane.f32.xlu1 %v613_v20  ;;  %v625_v25 = vmul.f32 %v802_v17, %v613_v20 }
 0x18c   :  { %616 = vadd.xlane.f32.xlu0 %v612_v21 }
 0x18f   :  { %628 = vadd.xlane.f32.xlu1 %v624_v22 }
 0x190   :  { %622 = vadd.xlane.f32.xlu0 %v615_v23 }
 0x193   :  { %632 = vadd.xlane.f32.xlu1 %v626_v24 }
 0x194   :  { %630 = vadd.xlane.f32.xlu0 %v625_v25 }
 0x198   :  { %634 = vadd.xlane.f32.xlu0 %v627_v26 }
 0x215   :  { %v621_v27 = vpop.xlane.xlu0 %620 }
 0x218   :  { %v619_v28 = vpop.xlane.xlu1 %618 }
 0x219   :  { %v617_v29 = vpop.xlane.xlu0 %616 }
 0x21c   :  { %v629_v30 = vpop.xlane.xlu1 %628 }
 0x21d   :  { %v637_v31 = vsel %vm636_vm4, %v617_v29, %v629_v30  ;;  %v623_v32 = vpop.xlane.xlu0 %622 }
 0x21e   :  { %642 = vst.msk [vmem:[%s1009_s5] sm:$0xff] %vm641_vm5, %v637_v31 }
 0x220   :  { %v633_v33 = vpop.xlane.xlu1 %632 }
 0x221   :  { %v639_v34 = vsel %vm636_vm4, %v621_v27, %v633_v33  ;;  %v631_v35 = vpop.xlane.xlu0 %630 }
 0x222   :  { %644 = vst.msk [vmem:[%s1009_s5 + $0x10] sm:$0xff] %vm641_vm5, %v639_v34  ;;  %v638_v36 = vsel %vm636_vm4, %v619_v28, %v631_v35 }
 0x223   :  { %643 = vst.msk [vmem:[%s1009_s5 + $0x8] sm:$0xff] %vm641_vm5, %v638_v36 }
 0x225   :  { %v635_v37 = vpop.xlane.xlu0 %634 }
 0x226   :  { %v640_v38 = vsel %vm636_vm4, %v623_v32, %v635_v37 }
 0x227   :  { %645 = vst.msk [vmem:[%s1009_s5 + $0x18] sm:$0xff] %vm641_vm5, %v640_v38 }

// kernel: tile.28
= control target key start
LH: loop header
LB: loop body
LE: loop exit
PB: predicated region body
PF: predicated region fallthrough
CT: control target
= control target key end

     0   :  { %s22_s0 = inlined_call_operand.vmem [shape: f32[16], index: 0, kind: input, shape index: {}]   ;;  %s23_s1 = inlined_call_operand.vmem [shape: f32[4,16], index: 1, kind: output, shape index: {}]  }
   0x1   :  { %v4_v0 = vld [vmem:[%s22_s0] ss:$0 sm:$0xff] }
   0x2   :  { %5 = vst [vmem:[%s23_s1] sm:$0xf] %v4_v0 }

// kernel: _lambda_.28
= control target key start
LH: loop header
LB: loop body
LE: loop exit
PB: predicated region body
PF: predicated region fallthrough
CT: control target
= control target key end

     0   :  { %v368_v2 = vmov 0   ;;  %vm258_vm0 = vcmask 990208   ;;  %s464_s0 = inlined_call_operand.vmem [shape: bf16[32,128], index: 0, kind: input, shape index: {}]   ;;  %s465_s1 = inlined_call_operand.vmem [shape: f32[32,1], index: 1, kind: input, shape index: {}]   ;;  %s466_s2 = inlined_call_operand.vmem [shape: f32[32,1], index: 2, kind: input, shape index: {}]   ;;  %s467_s3 = inlined_call_operand.vmem [shape: bf16[32,256], index: 3, kind: input, shape index: {}, may-alias: {3,4}]   ;;  %s468_s4 = inlined_call_operand.vmem [shape: bf16[32,256], index: 4, kind: input, shape index: {}, may-alias: {3,4}]   ;;  %s469_s5 = inlined_call_operand.vmem [shape: bf16[32,128], index: 5, kind: output, shape index: {}]  }
   0x1   :  { %v172_v0 = vld [vmem:[%s465_s1 + $0x10] sm:$0xff]  ;;  %v170_v1 = vld [vmem:[%s465_s1] sm:$0xff]  ;;  %343 = vset.pattern.permute.xlu1 %v368_v2  ;;  %342 = vset.pattern.permute.xlu0 %v368_v2  ;;  %v173_v3 = vld [vmem:[%s465_s1 + $0x18] sm:$0xff] }
   0x2   :  { %186 = vperm.xlu1 %343, %v172_v0   ;;  %176 = vperm.xlu0 %342, %v170_v1   ;;  %v171_v4 = vld [vmem:[%s465_s1 + $0x8] sm:$0xff]  ;;  %v33_v5 = vld [vmem:[%s467_s3] sm:$0xf]  ;;  %v304_v7 = vld [vmem:[%s468_s4 + $0x4] sm:$0xf] }
   0x3   :  { %34 = vst [vmem:[#allocation2] sm:$0xf] %v33_v5  ;;  %v35_v6 = vld [vmem:[%s467_s3 + $0x8] sm:$0xf]  ;;  %v305_v8 = vld [vmem:[%s468_s4 + $0xc] sm:$0xf] }
   0x4   :  { %36 = vst [vmem:[#allocation2 + $0x4] sm:$0xf] %v35_v6  ;;  %90 = vst [vmem:[#allocation3] sm:$0xf] %v304_v7  ;;  %v37_v9 = vld [vmem:[%s467_s3 + $0x10] sm:$0xf] }
   0x5   :  { %92 = vst [vmem:[#allocation3 + $0x4] sm:$0xf] %v305_v8  ;;  %v39_v10 = vld [vmem:[%s467_s3 + $0x18] sm:$0xf]  ;;  %v306_v11 = vld [vmem:[%s468_s4 + $0x14] sm:$0xf] }
   0x6   :  { %38 = vst [vmem:[#allocation2 + $0x8] sm:$0xf] %v37_v9  ;;  %40 = vst [vmem:[#allocation2 + $0xc] sm:$0xf] %v39_v10  ;;  %v307_v12 = vld [vmem:[%s468_s4 + $0x1c] sm:$0xf]  ;;  %191 = vperm.xlu1 %343, %v173_v3   ;;  %181 = vperm.xlu0 %342, %v171_v4  }
   0x7   :  { %94 = vst [vmem:[#allocation3 + $0x8] sm:$0xf] %v306_v11  ;;  %96 = vst [vmem:[#allocation3 + $0xc] sm:$0xf] %v307_v12  ;;  %v199_v13 = vld [vmem:[%s466_s2 + $0x8] sm:$0xff]  ;;  %v198_v14 = vld [vmem:[%s466_s2] sm:$0xff] }
   0x8   :  { %v201_v15 = vld [vmem:[%s466_s2 + $0x18] sm:$0xff]  ;;  %v200_v16 = vld [vmem:[%s466_s2 + $0x10] sm:$0xff]  ;;  %s369_s4 = smov 121   ;;  %v321_v39 = vld [vmem:[%s464_s0] sm:$0xff]  }
   0x9   :  { %v338_v40 = vld [vmem:[%s464_s0 + $0x8] sm:$0xff]   ;;  %v322_v41 = vunpack.c.l.bf16 %v321_v39  ;;  %v323_v42 = vunpack.c.h.bf16 %v321_v39 }
   0xa   :  { %209 = vperm.xlu1 %343, %v199_v13   ;;  %204 = vperm.xlu0 %342, %v198_v14   ;;  %v326_v45 = vunpack.c.l.bf16 %v338_v40  ;;  %v327_v47 = vunpack.c.h.bf16 %v338_v40 }
   0xb   :  { %v364_v17 = vld [vmem:[#allocation2] sm:$0xff]  }
   0xc   :  { %v365_v18 = vld [vmem:[#allocation3] sm:$0xff]   ;;  %v228_v19 = vunpack.c.h.bf16 %v364_v17  ;;  %v226_v21 = vunpack.c.l.bf16 %v364_v17 }
   0xd   :  { %v229_v20 = vunpack.c.h.bf16 %v365_v18  ;;  %v227_v22 = vunpack.c.l.bf16 %v365_v18  ;;  %v366_v23 = vld [vmem:[#allocation2 + $0x8] sm:$0xff]  }
   0xe   :  { %219 = vperm.xlu1 %343, %v201_v15   ;;  %214 = vperm.xlu0 %342, %v200_v16   ;;  %v367_v24 = vld [vmem:[#allocation3 + $0x8] sm:$0xff]   ;;  %v232_v27 = vunpack.c.h.bf16 %v366_v23  ;;  %v230_v29 = vunpack.c.l.bf16 %v366_v23 }
   0xf   :  { %v349_v25 = vpack.i.bf16 %v229_v20, %v228_v19  ;;  %v344_v26 = vpack.i.bf16 %v227_v22, %v226_v21  ;;  %v233_v28 = vunpack.c.h.bf16 %v367_v24  ;;  %v231_v30 = vunpack.c.l.bf16 %v367_v24 }
  0x11   :  { %v359_v31 = vpack.i.bf16 %v233_v28, %v232_v27  ;;  %v354_v32 = vpack.i.bf16 %v231_v30, %v230_v29 }
  0x12   :  { %350 = vrot.lane.b32.xlu1 %v349_v25, %s369_s4  ;;  %345 = vrot.lane.b32.xlu0 %v344_v26, %s369_s4 }
  0x16   :  { %360 = vrot.lane.b32.xlu1 %v359_v31, %s369_s4  ;;  %355 = vrot.lane.b32.xlu0 %v354_v32, %s369_s4 }
  0x81   :  { %v187_v33 = vpop.permute.xlu1 %186  ;;  %v177_v34 = vpop.permute.xlu0 %176 }
  0x82   :  { %v194_v46 = vmul.f32 %v322_v41, %v177_v34  ;;  %v196_v59 = vmul.f32 %v326_v45, %v187_v33 }
  0x85   :  { %v192_v35 = vpop.permute.xlu1 %191  ;;  %v182_v36 = vpop.permute.xlu0 %181 }
  0x86   :  { %v195_v48 = vmul.f32 %v323_v42, %v182_v36  ;;  %v197_v60 = vmul.f32 %v327_v47, %v192_v35 }
  0x89   :  { %v210_v37 = vpop.permute.xlu1 %209  ;;  %v205_v38 = vpop.permute.xlu0 %204 }
  0x8a   :  { %v223_v55 = vadd.f32 %v210_v37, %v195_v48  ;;  %v222_v56 = vadd.f32 %v205_v38, %v194_v46 }
  0x8d   :  { %v220_v43 = vpop.permute.xlu1 %219  ;;  %v215_v44 = vpop.permute.xlu0 %214 }
  0x8e   :  { %v225_v5 = vadd.f32 %v220_v43, %v197_v60  ;;  %v224_v6 = vadd.f32 %v215_v44, %v196_v59 }
  0x91   :  { %v351_v49 = vpop.permute.xlu1 %350  ;;  %v346_v50 = vpop.permute.xlu0 %345 }
  0x92   :  { %v353_v51 = vunpack.i.h.bf16 %v351_v49  ;;  %v352_v52 = vunpack.i.l.bf16 %v351_v49  ;;  %v348_v53 = vunpack.i.h.bf16 %v346_v50  ;;  %v347_v54 = vunpack.i.l.bf16 %v346_v50 }
  0x94   :  { %v260_v57 = vsel %vm258_vm0, %v352_v52, %v353_v51  ;;  %v259_v58 = vsel %vm258_vm0, %v347_v54, %v348_v53 }
  0x95   :  { %v268_v61 = vadd.f32 %v260_v57, %v223_v55  ;;  %v267_v62 = vadd.f32 %v259_v58, %v222_v56  ;;  %v361_v63 = vpop.permute.xlu1 %360  ;;  %v356_v0 = vpop.permute.xlu0 %355 }
  0x96   :  { %v363_v1 = vunpack.i.h.bf16 %v361_v63  ;;  %v362_v2 = vunpack.i.l.bf16 %v361_v63  ;;  %v358_v3 = vunpack.i.h.bf16 %v356_v0  ;;  %v357_v4 = vunpack.i.l.bf16 %v356_v0 }
  0x97   :  { %v331_v7 = vpack.c.bf16 %v268_v61, %v267_v62 }
  0x98   :  { %v262_v8 = vsel %vm258_vm0, %v362_v2, %v363_v1  ;;  %v261_v9 = vsel %vm258_vm0, %v357_v4, %v358_v3 }
  0x99   :  { %332 = vst [vmem:[%s469_s5] sm:$0xff] %v331_v7   ;;  %v270_v10 = vadd.f32 %v262_v8, %v225_v5  ;;  %v269_v11 = vadd.f32 %v261_v9, %v224_v6 }
  0x9b   :  { %v336_v12 = vpack.c.bf16 %v270_v10, %v269_v11 }
  0x9d   :  { %339 = vst [vmem:[%s469_s5 + $0x8] sm:$0xff] %v336_v12  }

// kernel: _lambda_.25
= control target key start
LH: loop header
LB: loop body
LE: loop exit
PB: predicated region body
PF: predicated region fallthrough
CT: control target
= control target key end

     0   :  { %vm192_vm0 = vcmask 261120   ;;  %s1267_s12 = smov 127   ;;  %s1268_s13 = smov 120   ;;  %vm510_vm1 = vcmask 990208   ;;  %vm187_vm2 = vcmask 1039360   ;;  %vm597_vm3 = vcmask 982016   ;;  %s1459_s0 = inlined_call_operand.vmem [shape: bf16[9,32,32], index: 0, kind: input, shape index: {}]   ;;  %s1460_s1 = inlined_call_operand.vmem [shape: bf16[32,256], index: 1, kind: input, shape index: {}, may-alias: {1,2}]   ;;  %s1461_s2 = inlined_call_operand.vmem [shape: bf16[32,256], index: 2, kind: input, shape index: {}, may-alias: {1,2}]   ;;  %s1462_s3 = inlined_call_operand.vmem [shape: f32[1,128], index: 3, kind: input, shape index: {}]   ;;  %s1463_s4 = inlined_call_operand.vmem [shape: bf16[32,128], index: 4, kind: output, shape index: {0}]   ;;  %s1464_s5 = inlined_call_operand.vmem [shape: f32[1,32,2], index: 5, kind: output, shape index: {1}]  }
   0x1   :  { %v34_v0 = vld [vmem:[%s1460_s1 + $0x10] sm:$0xf]  ;;  %v36_v1 = vld [vmem:[%s1460_s1 + $0x18] sm:$0xf]  ;;  %v30_v2 = vld [vmem:[%s1460_s1] sm:$0xf] }
   0x2   :  { %35 = vst [vmem:[#allocation2 + $0x8] sm:$0xf] %v34_v0  ;;  %37 = vst [vmem:[#allocation2 + $0xc] sm:$0xf] %v36_v1  ;;  %v32_v3 = vld [vmem:[%s1460_s1 + $0x8] sm:$0xf] }
   0x3   :  { %v1002_v4 = vld [vmem:[%s1461_s2 + $0x14] sm:$0xf]  ;;  %31 = vst [vmem:[#allocation2] sm:$0xf] %v30_v2  ;;  %33 = vst [vmem:[#allocation2 + $0x4] sm:$0xf] %v32_v3 }
   0x4   :  { %91 = vst [vmem:[#allocation3 + $0x8] sm:$0xf] %v1002_v4  ;;  %v1003_v5 = vld [vmem:[%s1461_s2 + $0x1c] sm:$0xf]  ;;  %v1000_v6 = vld [vmem:[%s1461_s2 + $0x4] sm:$0xf] }
   0x5   :  { %v1001_v7 = vld [vmem:[%s1461_s2 + $0xc] sm:$0xf]  ;;  %93 = vst [vmem:[#allocation3 + $0xc] sm:$0xf] %v1003_v5  ;;  %87 = vst [vmem:[#allocation3] sm:$0xf] %v1000_v6 }
   0x6   :  { %89 = vst [vmem:[#allocation3 + $0x4] sm:$0xf] %v1001_v7  ;;  %s1266_s1 = smov 121   ;;  %v1248_v12 = vld [vmem:[%s1459_s0 + $0x40] sm:$0xff]   ;;  %v1250_v13 = vld [vmem:[%s1459_s0 + $0x10] sm:$0xff]   ;;  %s1269_s14 = smov 116  }
   0x7   :  { %1168 = vmatprep.mubr.msk.bf16.mxu0 %vm192_vm0, %v1248_v12  ;;  %1136 = vmatprep.mubr.msk.bf16.mxu1 %vm192_vm0, %v1250_v13  ;;  %s1270_s15 = smov 126   ;;  %s1271_s16 = smov 115   ;;  %v1249_v23 = vld [vmem:[%s1459_s0 + $0x48] sm:$0xff]   ;;  %v1252_v25 = vld [vmem:[%s1459_s0 + $0x50] sm:$0xff]   ;;  %v1251_v31 = vld [vmem:[%s1459_s0 + $0x18] sm:$0xff]   ;;  %vm684_vm4 = vcmask 949248  }
   0x8   :  { %s1272_s17 = smov 122   ;;  %s1273_s18 = smov 114   ;;  %v1254_v34 = vld [vmem:[%s1459_s0] sm:$0xff]   ;;  %v1253_v36 = vld [vmem:[%s1459_s0 + $0x58] sm:$0xff]   ;;  %vm336_vm5 = vcmask 1031168   ;;  %v1255_v44 = vld [vmem:[%s1459_s0 + $0x8] sm:$0xff]  }
   0x9   :  { %v1328_v8 = vld [vmem:[#allocation2 + $0x8] sm:$0xff]   ;;  %v1256_v39 = vld [vmem:[%s1459_s0 + $0x60] sm:$0xff]   ;;  %vm771_vm6 = vcmask 941056   ;;  %v1260_v51 = vld [vmem:[%s1459_s0 + $0x70] sm:$0xff]   ;;  %vm423_vm7 = vcmask 998400   ;;  %vm858_vm8 = vcmask 932864  }
   0xa   :  { %v1330_v9 = vld [vmem:[#allocation2] sm:$0xff]   ;;  %506 = vrot.lane.b32.xlu1 %v1328_v8, %s1266_s1  ;;  %v1257_v49 = vld [vmem:[%s1459_s0 + $0x68] sm:$0xff]   ;;  %v1262_v59 = vld [vmem:[%s1459_s0 + $0x30] sm:$0xff]   ;;  %vm973_vm9 = vcmask 7168   ;;  %vm978_vm10 = vcmask 15360  }
   0xb   :  { %502 = vrot.lane.b32.xlu0 %v1330_v9, %s1266_s1  ;;  %v1258_v46 = vld [vmem:[%s1459_s0 + $0x20] sm:$0xff]   ;;  %v1259_v57 = vld [vmem:[%s1459_s0 + $0x28] sm:$0xff]   ;;  %v1261_v62 = vld [vmem:[%s1459_s0 + $0x78] sm:$0xff]  }
   0xc   :  { %v1246_v10 = vld [vmem:[#allocation3 + $0x8] sm:$0xff]   ;;  %v1264_v0 = vld [vmem:[%s1459_s0 + $0x80] sm:$0xff]   ;;  %v1265_v13 = vld [vmem:[%s1459_s0 + $0x88] sm:$0xff]  }
   0xd   :  { %v1247_v11 = vld [vmem:[#allocation3] sm:$0xff]  }
   0xe   :  { %508 = vrot.lane.b32.xlu1 %v1246_v10, %s1266_s1 }
   0xf   :  { %504 = vrot.lane.b32.xlu0 %v1247_v11, %s1266_s1 }
  0x12   :  { %181 = vrot.lane.b32.xlu1 %v1247_v11, %s1267_s12 }
  0x13   :  { %179 = vrot.lane.b32.xlu0 %v1330_v9, %s1267_s12 }
  0x16   :  { %591 = vrot.lane.b32.xlu1 %v1247_v11, %s1268_s13 }
  0x17   :  { %589 = vrot.lane.b32.xlu0 %v1330_v9, %s1268_s13 }
  0x1a   :  { %185 = vrot.lane.b32.xlu1 %v1246_v10, %s1267_s12 }
  0x1b   :  { %183 = vrot.lane.b32.xlu0 %v1328_v8, %s1267_s12 }
  0x1e   :  { %595 = vrot.lane.b32.xlu1 %v1246_v10, %s1268_s13 }
  0x1f   :  { %593 = vrot.lane.b32.xlu0 %v1328_v8, %s1268_s13 }
  0x22   :  { %678 = vrot.lane.b32.xlu1 %v1247_v11, %s1269_s14 }
  0x23   :  { %676 = vrot.lane.b32.xlu0 %v1330_v9, %s1269_s14 }
  0x26   :  { %682 = vrot.lane.b32.xlu1 %v1246_v10, %s1269_s14 }
  0x27   :  { %680 = vrot.lane.b32.xlu0 %v1328_v8, %s1269_s14 }
  0x2a   :  { %330 = vrot.lane.b32.xlu1 %v1247_v11, %s1270_s15 }
  0x2b   :  { %328 = vrot.lane.b32.xlu0 %v1330_v9, %s1270_s15 }
  0x2e   :  { %765 = vrot.lane.b32.xlu1 %v1247_v11, %s1271_s16 }
  0x2f   :  { %763 = vrot.lane.b32.xlu0 %v1330_v9, %s1271_s16 }
  0x32   :  { %334 = vrot.lane.b32.xlu1 %v1246_v10, %s1270_s15 }
  0x33   :  { %332 = vrot.lane.b32.xlu0 %v1328_v8, %s1270_s15 }
  0x36   :  { %769 = vrot.lane.b32.xlu1 %v1246_v10, %s1271_s16 }
  0x37   :  { %767 = vrot.lane.b32.xlu0 %v1328_v8, %s1271_s16 }
  0x3a   :  { %417 = vrot.lane.b32.xlu1 %v1247_v11, %s1272_s17 }
  0x3b   :  { %415 = vrot.lane.b32.xlu0 %v1330_v9, %s1272_s17 }
  0x3e   :  { %852 = vrot.lane.b32.xlu1 %v1247_v11, %s1273_s18 }
  0x3f   :  { %850 = vrot.lane.b32.xlu0 %v1330_v9, %s1273_s18 }
  0x42   :  { %421 = vrot.lane.b32.xlu1 %v1246_v10, %s1272_s17 }
  0x43   :  { %419 = vrot.lane.b32.xlu0 %v1328_v8, %s1272_s17 }
  0x46   :  { %856 = vrot.lane.b32.xlu1 %v1246_v10, %s1273_s18 }
  0x47   :  { %854 = vrot.lane.b32.xlu0 %v1328_v8, %s1273_s18 }
  0x7c   :  { %v507_v14 = vpop.permute.xlu1 %506 }
  0x7d   :  { %v503_v15 = vpop.permute.xlu0 %502 }
  0x80   :  { %v509_v16 = vpop.permute.xlu1 %508 }
  0x81   :  { %v505_v17 = vpop.permute.xlu0 %504  ;;  %v512_v20 = vsel %vm510_vm1, %v507_v14, %v509_v16 }
  0x82   :  { %v511_v18 = vsel %vm510_vm1, %v503_v15, %v505_v17 }
  0x83   :  { %1164 = vmatprep.subr.bf16.mxu0 %v511_v18 }
  0x84   :  { %1165 = vmatpush3.bf16.msra.mxu0 %v511_v18  ;;  %v182_v19 = vpop.permute.xlu1 %181 }
  0x85   :  { %1166 = vmatprep.subr.bf16.mxu0 %v512_v20  ;;  %v180_v21 = vpop.permute.xlu0 %179 }
  0x86   :  { %v188_v22 = vsel %vm187_vm2, %v180_v21, %v182_v19  ;;  %v1080_v19 = vld [vmem:[%s1462_s3] ss:$0 sm:$0xff] }
  0x87   :  { %1132 = vmatprep.subr.bf16.mxu1 %v188_v22 }
  0x88   :  { %1133 = vmatpush3.bf16.msra.mxu1 %v188_v22  ;;  %1167 = vmatpush3.bf16.msra.mxu0 %v512_v20  ;;  %v592_v24 = vpop.permute.xlu1 %591 }
  0x89   :  { %v590_v26 = vpop.permute.xlu0 %589 }
  0x8a   :  { %v598_v27 = vsel %vm597_vm3, %v590_v26, %v592_v24 }
  0x8b   :  { %1172 = vmatprep.subr.bf16.mxu0 %v598_v27  ;;  %1169 = vmatmul.mubr.msk.bf16.vlgmr.msra.gmra.mrb[0].mxu0 %vm192_vm0, %v1249_v23 }
  0x8c   :  { %1173 = vmatpush3.bf16.msra.mxu0 %v598_v27  ;;  %v186_v28 = vpop.permute.xlu1 %185  ;;  %1176 = vmatprep.mubr.msk.bf16.mxu0 %vm192_vm0, %v1252_v25 }
  0x8d   :  { %v184_v29 = vpop.permute.xlu0 %183 }
  0x8e   :  { %v189_v30 = vsel %vm187_vm2, %v184_v29, %v186_v28 }
  0x8f   :  { %1134 = vmatprep.subr.bf16.mxu1 %v189_v30 }
  0x90   :  { %1135 = vmatpush3.bf16.msra.mxu1 %v189_v30  ;;  %v596_v32 = vpop.permute.xlu1 %595 }
  0x91   :  { %v594_v33 = vpop.permute.xlu0 %593  ;;  %1140 = vmatprep.subr.bf16.mxu1 %v1330_v9 }
  0x92   :  { %v599_v35 = vsel %vm597_vm3, %v594_v33, %v596_v32 }
  0x93   :  { %1174 = vmatprep.subr.bf16.mxu0 %v599_v35  ;;  %1137 = vmatmul.mubr.msk.bf16.vlgmr.msra.gmra.mrb[0].mxu1 %vm192_vm0, %v1251_v31 }
  0x94   :  { %1175 = vmatpush3.bf16.msra.mxu0 %v599_v35  ;;  %v679_v37 = vpop.permute.xlu1 %678  ;;  %1141 = vmatpush3.bf16.msra.mxu1 %v1330_v9  ;;  %v1263_v9 = vld [vmem:[%s1459_s0 + $0x38] sm:$0xff]  }
  0x95   :  { %v677_v38 = vpop.permute.xlu0 %676  ;;  %1142 = vmatprep.subr.bf16.mxu1 %v1328_v8  ;;  %1144 = vmatprep.mubr.msk.bf16.mxu1 %vm192_vm0, %v1254_v34 }
  0x96   :  { %v685_v40 = vsel %vm684_vm4, %v677_v38, %v679_v37 }
  0x97   :  { %1180 = vmatprep.subr.bf16.mxu0 %v685_v40  ;;  %1177 = vmatmul.mubr.msk.bf16.vlgmr.msra.gmra.mrb[0].mxu0 %vm192_vm0, %v1253_v36 }
  0x98   :  { %1181 = vmatpush3.bf16.msra.mxu0 %v685_v40  ;;  %v683_v41 = vpop.permute.xlu1 %682  ;;  %1143 = vmatpush3.bf16.msra.mxu1 %v1328_v8 }
  0x99   :  { %v681_v42 = vpop.permute.xlu0 %680  ;;  %1184 = vmatprep.mubr.msk.bf16.mxu0 %vm192_vm0, %v1256_v39 }
  0x9a   :  { %v686_v43 = vsel %vm684_vm4, %v681_v42, %v683_v41 }
  0x9b   :  { %1182 = vmatprep.subr.bf16.mxu0 %v686_v43 }
  0x9c   :  { %1183 = vmatpush3.bf16.msra.mxu0 %v686_v43  ;;  %v331_v45 = vpop.permute.xlu1 %330 }
  0x9d   :  { %v329_v47 = vpop.permute.xlu0 %328 }
  0x9e   :  { %v337_v48 = vsel %vm336_vm5, %v329_v47, %v331_v45 }
  0x9f   :  { %1148 = vmatprep.subr.bf16.mxu1 %v337_v48  ;;  %1145 = vmatmul.mubr.msk.bf16.vlgmr.msra.gmra.mrb[0].mxu1 %vm192_vm0, %v1255_v44 }
  0xa0   :  { %1149 = vmatpush3.bf16.msra.mxu1 %v337_v48  ;;  %v766_v50 = vpop.permute.xlu1 %765  ;;  %1152 = vmatprep.mubr.msk.bf16.mxu1 %vm192_vm0, %v1258_v46 }
  0xa1   :  { %v764_v52 = vpop.permute.xlu0 %763 }
  0xa2   :  { %v772_v53 = vsel %vm771_vm6, %v764_v52, %v766_v50 }
  0xa3   :  { %1188 = vmatprep.subr.bf16.mxu0 %v772_v53  ;;  %1185 = vmatmul.mubr.msk.bf16.vlgmr.msra.gmra.mrb[0].mxu0 %vm192_vm0, %v1257_v49 }
  0xa4   :  { %1189 = vmatpush3.bf16.msra.mxu0 %v772_v53  ;;  %v335_v54 = vpop.permute.xlu1 %334  ;;  %1192 = vmatprep.mubr.msk.bf16.mxu0 %vm192_vm0, %v1260_v51 }
  0xa5   :  { %v333_v55 = vpop.permute.xlu0 %332 }
  0xa6   :  { %v338_v56 = vsel %vm336_vm5, %v333_v55, %v335_v54 }
  0xa7   :  { %1150 = vmatprep.subr.bf16.mxu1 %v338_v56 }
  0xa8   :  { %1151 = vmatpush3.bf16.msra.mxu1 %v338_v56  ;;  %v770_v58 = vpop.permute.xlu1 %769 }
  0xa9   :  { %v768_v60 = vpop.permute.xlu0 %767 }
  0xaa   :  { %v773_v61 = vsel %vm771_vm6, %v768_v60, %v770_v58 }
  0xab   :  { %1190 = vmatprep.subr.bf16.mxu0 %v773_v61  ;;  %1153 = vmatmul.mubr.msk.bf16.vlgmr.msra.gmra.mrb[0].mxu1 %vm192_vm0, %v1259_v57 }
  0xac   :  { %1191 = vmatpush3.bf16.msra.mxu0 %v773_v61  ;;  %v418_v63 = vpop.permute.xlu1 %417  ;;  %1160 = vmatprep.mubr.msk.bf16.mxu1 %vm192_vm0, %v1262_v59 }
  0xad   :  { %v416_v1 = vpop.permute.xlu0 %415 }
  0xae   :  { %v424_v2 = vsel %vm423_vm7, %v416_v1, %v418_v63 }
  0xaf   :  { %1156 = vmatprep.subr.bf16.mxu1 %v424_v2  ;;  %1193 = vmatmul.mubr.msk.bf16.vlgmr.msra.gmra.mrb[0].mxu0 %vm192_vm0, %v1261_v62 }
  0xb0   :  { %1157 = vmatpush3.bf16.msra.mxu1 %v424_v2  ;;  %v853_v3 = vpop.permute.xlu1 %852  ;;  %1200 = vmatprep.mubr.msk.bf16.mxu0 %vm192_vm0, %v1264_v0 }
  0xb1   :  { %v851_v4 = vpop.permute.xlu0 %850 }
  0xb2   :  { %v859_v5 = vsel %vm858_vm8, %v851_v4, %v853_v3 }
  0xb3   :  { %1196 = vmatprep.subr.bf16.mxu0 %v859_v5 }
  0xb4   :  { %1197 = vmatpush3.bf16.msra.mxu0 %v859_v5  ;;  %v422_v6 = vpop.permute.xlu1 %421 }
  0xb5   :  { %v420_v7 = vpop.permute.xlu0 %419 }
  0xb6   :  { %v425_v8 = vsel %vm423_vm7, %v420_v7, %v422_v6 }
  0xb7   :  { %1158 = vmatprep.subr.bf16.mxu1 %v425_v8 }
  0xb8   :  { %1159 = vmatpush3.bf16.msra.mxu1 %v425_v8  ;;  %v857_v10 = vpop.permute.xlu1 %856 }
  0xb9   :  { %v855_v11 = vpop.permute.xlu0 %854 }
  0xba   :  { %v860_v12 = vsel %vm858_vm8, %v855_v11, %v857_v10 }
  0xbb   :  { %1161 = vmatmul.mubr.msk.bf16.vlgmr.msra.gmra.mrb[0].mxu1 %vm192_vm0, %v1263_v9  ;;  %1198 = vmatprep.subr.bf16.mxu0 %v860_v12 }
  0xbc   :  { %1199 = vmatpush3.bf16.msra.mxu0 %v860_v12 }
  0xbf   :  { %1201 = vmatmul.mubr.msk.bf16.vlgmr.msra.gmra.mrb[0].mxu0 %vm192_vm0, %v1265_v13 }
 0x18e   :  { %v1162_v14 = vpop.f32.mrb[0].mxu1 }
 0x18f   :  { %v468_v15 = vpop.f32.mrb[1].mxu1 }
 0x190   :  { %v1163_v16 = vpop.f32.mrb[2].mxu1 }
 0x191   :  { %v471_v17 = vpop.f32.mrb[3].mxu1 }
 0x192   :  { %v1202_v18 = vpop.f32.mrb[0].mxu0 }
 0x193   :  { %v1204_v20 = vadd.f32 %v1202_v18, %v1162_v14  ;;  %v903_v21 = vpop.f32.mrb[1].mxu0 }
 0x194   :  { %v1205_v22 = vadd.f32 %v903_v21, %v468_v15  ;;  %v1203_v23 = vpop.f32.mrb[2].mxu0 }
 0x195   :  { %v1206_v24 = vadd.f32 %v1203_v23, %v1163_v16  ;;  %v906_v25 = vpop.f32.mrb[3].mxu0  ;;  %v951_v26 = vmul.f32 %v1204_v20, %v1080_v19 }
 0x196   :  { %v1207_v27 = vadd.f32 %v906_v25, %v471_v17  ;;  %v949_v31 = vmul.f32 %v1205_v22, %v1080_v19 }
 0x197   :  { %v1093_v28 = vpack.c.bf16 %v1206_v24, %v1204_v20  ;;  %957 = vadd.xlane.f32.xlu0 %v951_v26  ;;  %v952_v33 = vmul.f32 %v1206_v24, %v1080_v19  ;;  %v963_v34 = vmul.f32 %v1204_v20, %v951_v26 }
 0x198   :  { %v1088_v29 = vpack.c.bf16 %v1207_v27, %v1205_v22  ;;  %v950_v30 = vmul.f32 %v1207_v27, %v1080_v19  ;;  %v961_v32 = vmul.f32 %v1205_v22, %v949_v31 }
 0x199   :  { %1095 = vst [vmem:[%s1463_s4 + $0x8] sm:$0xff] %v1093_v28   ;;  %v964_v36 = vmul.f32 %v1206_v24, %v952_v33 }
 0x19a   :  { %1089 = vst [vmem:[%s1463_s4] sm:$0xff] %v1088_v29   ;;  %955 = vadd.xlane.f32.xlu1 %v950_v30  ;;  %v962_v35 = vmul.f32 %v1207_v27, %v950_v30 }
 0x19b   :  { %953 = vadd.xlane.f32.xlu0 %v949_v31 }
 0x19e   :  { %965 = vadd.xlane.f32.xlu1 %v961_v32 }
 0x19f   :  { %959 = vadd.xlane.f32.xlu0 %v952_v33 }
 0x1a2   :  { %969 = vadd.xlane.f32.xlu1 %v963_v34 }
 0x1a3   :  { %967 = vadd.xlane.f32.xlu0 %v962_v35 }
 0x1a7   :  { %971 = vadd.xlane.f32.xlu0 %v964_v36 }
 0x224   :  { %v958_v37 = vpop.xlane.xlu0 %957 }
 0x227   :  { %v956_v38 = vpop.xlane.xlu1 %955 }
 0x228   :  { %v954_v39 = vpop.xlane.xlu0 %953 }
 0x22b   :  { %v966_v40 = vpop.xlane.xlu1 %965 }
 0x22c   :  { %v974_v41 = vsel %vm973_vm9, %v954_v39, %v966_v40  ;;  %v960_v42 = vpop.xlane.xlu0 %959 }
 0x22d   :  { %979 = vst.msk [vmem:[%s1464_s5] sm:$0xff] %vm978_vm10, %v974_v41 }
 0x22f   :  { %v970_v43 = vpop.xlane.xlu1 %969 }
 0x230   :  { %v976_v44 = vsel %vm973_vm9, %v958_v37, %v970_v43  ;;  %v968_v45 = vpop.xlane.xlu0 %967 }
 0x231   :  { %981 = vst.msk [vmem:[%s1464_s5 + $0x10] sm:$0xff] %vm978_vm10, %v976_v44  ;;  %v975_v46 = vsel %vm973_vm9, %v956_v38, %v968_v45 }
 0x232   :  { %980 = vst.msk [vmem:[%s1464_s5 + $0x8] sm:$0xff] %vm978_vm10, %v975_v46 }
 0x234   :  { %v972_v47 = vpop.xlane.xlu0 %971 }
 0x235   :  { %v977_v48 = vsel %vm973_vm9, %v960_v42, %v972_v47 }
 0x236   :  { %982 = vst.msk [vmem:[%s1464_s5 + $0x18] sm:$0xff] %vm978_vm10, %v977_v48 }

// kernel: _lambda_.34
= control target key start
LH: loop header
LB: loop body
LE: loop exit
PB: predicated region body
PF: predicated region fallthrough
CT: control target
= control target key end

     0   :  { %v255_v0 = vmov 0   ;;  %s348_s1 = inlined_call_operand.vmem [shape: f32[64,1], index: 1, kind: input, shape index: {}]   ;;  %s349_s2 = inlined_call_operand.vmem [shape: f32[64,1], index: 2, kind: input, shape index: {}]   ;;  %s350_s0 = inlined_call_operand.vmem [shape: bf16[64,128], index: 0, kind: input, shape index: {}]   ;;  %s351_s3 = inlined_call_operand.vmem [shape: bf16[64,128], index: 3, kind: output, shape index: {}]  }
   0x1   :  { %254 = vset.pattern.permute.xlu1 %v255_v0  ;;  %253 = vset.pattern.permute.xlu0 %v255_v0  ;;  %v32_v1 = vld [vmem:[%s348_s1 + $0x10] sm:$0xff]  ;;  %v30_v2 = vld [vmem:[%s348_s1] sm:$0xff]  ;;  %v33_v3 = vld [vmem:[%s348_s1 + $0x18] sm:$0xff] }
   0x2   :  { %50 = vperm.xlu1 %254, %v32_v1   ;;  %40 = vperm.xlu0 %253, %v30_v2   ;;  %v31_v4 = vld [vmem:[%s348_s1 + $0x8] sm:$0xff]  ;;  %v34_v6 = vld [vmem:[%s348_s1 + $0x20] sm:$0xff]  ;;  %v37_v7 = vld [vmem:[%s348_s1 + $0x38] sm:$0xff] }
   0x3   :  { %v35_v5 = vld [vmem:[%s348_s1 + $0x28] sm:$0xff]  ;;  %v36_v8 = vld [vmem:[%s348_s1 + $0x30] sm:$0xff]  ;;  %v86_v10 = vld [vmem:[%s349_s2] sm:$0xff] }
   0x4   :  { %v87_v9 = vld [vmem:[%s349_s2 + $0x8] sm:$0xff]  ;;  %v89_v11 = vld [vmem:[%s349_s2 + $0x18] sm:$0xff]  ;;  %v88_v12 = vld [vmem:[%s349_s2 + $0x10] sm:$0xff] }
   0x5   :  { %v91_v13 = vld [vmem:[%s349_s2 + $0x28] sm:$0xff]  ;;  %v90_v14 = vld [vmem:[%s349_s2 + $0x20] sm:$0xff]  ;;  %v93_v15 = vld [vmem:[%s349_s2 + $0x38] sm:$0xff] }
   0x6   :  { %55 = vperm.xlu1 %254, %v33_v3   ;;  %45 = vperm.xlu0 %253, %v31_v4   ;;  %v92_v16 = vld [vmem:[%s349_s2 + $0x30] sm:$0xff]  ;;  %v211_v21 = vld [vmem:[%s350_s0] sm:$0xff]   ;;  %v246_v26 = vld [vmem:[%s350_s0 + $0x8] sm:$0xff]  }
   0x7   :  { %v212_v24 = vunpack.c.l.bf16 %v211_v21  ;;  %v213_v25 = vunpack.c.h.bf16 %v211_v21  ;;  %v216_v29 = vunpack.c.l.bf16 %v246_v26  ;;  %v217_v31 = vunpack.c.h.bf16 %v246_v26  ;;  %v247_v33 = vld [vmem:[%s350_s0 + $0x10] sm:$0xff]   ;;  %v248_v42 = vld [vmem:[%s350_s0 + $0x18] sm:$0xff]  }
   0x8   :  { %v221_v38 = vunpack.c.h.bf16 %v247_v33  ;;  %v220_v39 = vunpack.c.l.bf16 %v247_v33  ;;  %v225_v50 = vunpack.c.h.bf16 %v248_v42  ;;  %v224_v51 = vunpack.c.l.bf16 %v248_v42 }
   0xa   :  { %65 = vperm.xlu1 %254, %v35_v5   ;;  %60 = vperm.xlu0 %253, %v34_v6  }
   0xe   :  { %75 = vperm.xlu1 %254, %v37_v7   ;;  %70 = vperm.xlu0 %253, %v36_v8  }
  0x12   :  { %101 = vperm.xlu1 %254, %v87_v9   ;;  %96 = vperm.xlu0 %253, %v86_v10  }
  0x16   :  { %111 = vperm.xlu1 %254, %v89_v11   ;;  %106 = vperm.xlu0 %253, %v88_v12  }
  0x1a   :  { %121 = vperm.xlu1 %254, %v91_v13   ;;  %116 = vperm.xlu0 %253, %v90_v14  }
  0x1e   :  { %131 = vperm.xlu1 %254, %v93_v15   ;;  %126 = vperm.xlu0 %253, %v92_v16  }
  0x81   :  { %v51_v17 = vpop.permute.xlu1 %50  ;;  %v41_v18 = vpop.permute.xlu0 %40 }
  0x82   :  { %v78_v30 = vmul.f32 %v212_v24, %v41_v18  ;;  %v80_v40 = vmul.f32 %v216_v29, %v51_v17 }
  0x85   :  { %v56_v19 = vpop.permute.xlu1 %55  ;;  %v46_v20 = vpop.permute.xlu0 %45 }
  0x86   :  { %v79_v32 = vmul.f32 %v213_v25, %v46_v20  ;;  %v81_v41 = vmul.f32 %v217_v31, %v56_v19 }
  0x89   :  { %v66_v22 = vpop.permute.xlu1 %65  ;;  %v61_v23 = vpop.permute.xlu0 %60 }
  0x8a   :  { %v83_v52 = vmul.f32 %v221_v38, %v66_v22  ;;  %v82_v53 = vmul.f32 %v220_v39, %v61_v23 }
  0x8d   :  { %v76_v27 = vpop.permute.xlu1 %75  ;;  %v71_v28 = vpop.permute.xlu0 %70 }
  0x8e   :  { %v85_v61 = vmul.f32 %v225_v50, %v76_v27  ;;  %v84_v62 = vmul.f32 %v224_v51, %v71_v28 }
  0x91   :  { %v102_v34 = vpop.permute.xlu1 %101  ;;  %v97_v35 = vpop.permute.xlu0 %96 }
  0x92   :  { %v135_v36 = vadd.f32 %v102_v34, %v79_v32  ;;  %v134_v37 = vadd.f32 %v97_v35, %v78_v30 }
  0x94   :  { %v143_v43 = vmax.f32 %v135_v36, 0.0  ;;  %v142_v44 = vmax.f32 %v134_v37, 0.0 }
  0x95   :  { %v112_v45 = vpop.permute.xlu1 %111  ;;  %v107_v46 = vpop.permute.xlu0 %106 }
  0x96   :  { %v229_v47 = vpack.c.bf16 %v143_v43, %v142_v44  ;;  %v137_v48 = vadd.f32 %v112_v45, %v81_v41  ;;  %v136_v49 = vadd.f32 %v107_v46, %v80_v40 }
  0x98   :  { %230 = vst [vmem:[%s351_s3] sm:$0xff] %v229_v47   ;;  %v145_v54 = vmax.f32 %v137_v48, 0.0  ;;  %v144_v55 = vmax.f32 %v136_v49, 0.0 }
  0x99   :  { %v122_v56 = vpop.permute.xlu1 %121  ;;  %v117_v57 = vpop.permute.xlu0 %116 }
  0x9a   :  { %v234_v58 = vpack.c.bf16 %v145_v54, %v144_v55  ;;  %v139_v59 = vadd.f32 %v122_v56, %v83_v52  ;;  %v138_v60 = vadd.f32 %v117_v57, %v82_v53 }
  0x9c   :  { %249 = vst [vmem:[%s351_s3 + $0x8] sm:$0xff] %v234_v58   ;;  %v147_v63 = vmax.f32 %v139_v59, 0.0  ;;  %v146_v0 = vmax.f32 %v138_v60, 0.0 }
  0x9d   :  { %v132_v1 = vpop.permute.xlu1 %131  ;;  %v127_v2 = vpop.permute.xlu0 %126 }
  0x9e   :  { %v239_v3 = vpack.c.bf16 %v147_v63, %v146_v0  ;;  %v141_v4 = vadd.f32 %v132_v1, %v85_v61  ;;  %v140_v5 = vadd.f32 %v127_v2, %v84_v62 }
  0xa0   :  { %250 = vst [vmem:[%s351_s3 + $0x10] sm:$0xff] %v239_v3   ;;  %v149_v6 = vmax.f32 %v141_v4, 0.0  ;;  %v148_v7 = vmax.f32 %v140_v5, 0.0 }
  0xa2   :  { %v244_v8 = vpack.c.bf16 %v149_v6, %v148_v7 }
  0xa4   :  { %251 = vst [vmem:[%s351_s3 + $0x18] sm:$0xff] %v244_v8  }

// kernel: _lambda_.33
= control target key start
LH: loop header
LB: loop body
LE: loop exit
PB: predicated region body
PF: predicated region fallthrough
CT: control target
= control target key end

     0   :  { %vm210_vm0 = vcmask 261120   ;;  %s993_s11 = smov 127   ;;  %vm205_vm1 = vcmask 1039360   ;;  %vm422_vm2 = vcmask 1006592   ;;  %vm549_vm3 = vcmask 998400   ;;  %s1172_s0 = inlined_call_operand.vmem [shape: bf16[4,64,32], index: 0, kind: input, shape index: {}]   ;;  %s1173_s1 = inlined_call_operand.vmem [shape: bf16[32,256], index: 1, kind: input, shape index: {}, may-alias: {1,2}]   ;;  %s1174_s2 = inlined_call_operand.vmem [shape: bf16[32,256], index: 2, kind: input, shape index: {}, may-alias: {1,2}]   ;;  %s1175_s3 = inlined_call_operand.vmem [shape: f32[1,128], index: 3, kind: input, shape index: {}]   ;;  %s1176_s4 = inlined_call_operand.vmem [shape: bf16[64,128], index: 4, kind: output, shape index: {0}]   ;;  %s1177_s5 = inlined_call_operand.vmem [shape: f32[1,64,2], index: 5, kind: output, shape index: {1}]  }
   0x1   :  { %v30_v0 = vld [vmem:[%s1173_s1] sm:$0xf]  ;;  %v32_v1 = vld [vmem:[%s1173_s1 + $0x8] sm:$0xf]  ;;  %v769_v2 = vld [vmem:[%s1174_s2 + $0x4] sm:$0xf] }
   0x2   :  { %31 = vst [vmem:[#allocation2] sm:$0xf] %v30_v0  ;;  %33 = vst [vmem:[#allocation2 + $0x4] sm:$0xf] %v32_v1  ;;  %v770_v3 = vld [vmem:[%s1174_s2 + $0xc] sm:$0xf] }
   0x3   :  { %v771_v4 = vld [vmem:[%s1174_s2 + $0x14] sm:$0xf]  ;;  %87 = vst [vmem:[#allocation3] sm:$0xf] %v769_v2  ;;  %89 = vst [vmem:[#allocation3 + $0x4] sm:$0xf] %v770_v3 }
   0x4   :  { %91 = vst [vmem:[#allocation3 + $0x8] sm:$0xf] %v771_v4  ;;  %v772_v5 = vld [vmem:[%s1174_s2 + $0x1c] sm:$0xf]  ;;  %v34_v6 = vld [vmem:[%s1173_s1 + $0x10] sm:$0xf] }
   0x5   :  { %v36_v7 = vld [vmem:[%s1173_s1 + $0x18] sm:$0xf]  ;;  %93 = vst [vmem:[#allocation3 + $0xc] sm:$0xf] %v772_v5  ;;  %35 = vst [vmem:[#allocation2 + $0x8] sm:$0xf] %v34_v6 }
   0x6   :  { %37 = vst [vmem:[#allocation2 + $0xc] sm:$0xf] %v36_v7  ;;  %v976_v8 = vld [vmem:[%s1172_s0 + $0x20] sm:$0xff]   ;;  %s992_s2 = smov 123   ;;  %s994_s1 = smov 122   ;;  %v977_v23 = vld [vmem:[%s1172_s0 + $0x28] sm:$0xff]  }
   0x7   :  { %901 = vmatprep.mubr.msk.bf16.mxu1 %vm210_vm0, %v976_v8  ;;  %v978_v12 = vld [vmem:[%s1172_s0 + $0x40] sm:$0xff]   ;;  %v980_v26 = vld [vmem:[%s1172_s0 + $0x30] sm:$0xff]   ;;  %v979_v28 = vld [vmem:[%s1172_s0 + $0x48] sm:$0xff]   ;;  %vm734_vm4 = vcmask 7168   ;;  %vm743_vm5 = vcmask 15360  }
   0x8   :  { %925 = vmatprep.mubr.msk.bf16.mxu0 %vm210_vm0, %v978_v12  ;;  %v982_v29 = vld [vmem:[%s1172_s0 + $0x50] sm:$0xff]   ;;  %v981_v33 = vld [vmem:[%s1172_s0 + $0x38] sm:$0xff]   ;;  %v984_v34 = vld [vmem:[%s1172_s0] sm:$0xff]  }
   0x9   :  { %v972_v9 = vld [vmem:[#allocation2] sm:$0xff]   ;;  %v983_v38 = vld [vmem:[%s1172_s0 + $0x58] sm:$0xff]   ;;  %v985_v40 = vld [vmem:[%s1172_s0 + $0x8] sm:$0xff]  }
   0xa   :  { %414 = vrot.lane.b32.xlu1 %v972_v9, %s992_s2  ;;  %197 = vrot.lane.b32.xlu0 %v972_v9, %s993_s11  ;;  %v973_v10 = vld [vmem:[#allocation3] sm:$0xff]   ;;  %v986_v39 = vld [vmem:[%s1172_s0 + $0x60] sm:$0xff]   ;;  %v987_v42 = vld [vmem:[%s1172_s0 + $0x68] sm:$0xff]  }
   0xb   :  { %v988_v41 = vld [vmem:[%s1172_s0 + $0x10] sm:$0xff]   ;;  %v989_v44 = vld [vmem:[%s1172_s0 + $0x18] sm:$0xff]   ;;  %v841_v51 = vld [vmem:[%s1175_s3] ss:$0 sm:$0xff] }
   0xc   :  { %v974_v11 = vld [vmem:[#allocation3 + $0x8] sm:$0xff]   ;;  %v990_v43 = vld [vmem:[%s1172_s0 + $0x70] sm:$0xff]  }
   0xd   :  { %v975_v13 = vld [vmem:[#allocation2 + $0x8] sm:$0xff]   ;;  %v991_v45 = vld [vmem:[%s1172_s0 + $0x78] sm:$0xff]  }
   0xe   :  { %416 = vrot.lane.b32.xlu1 %v973_v10, %s992_s2  ;;  %199 = vrot.lane.b32.xlu0 %v973_v10, %s993_s11 }
  0x12   :  { %203 = vrot.lane.b32.xlu1 %v974_v11, %s993_s11  ;;  %201 = vrot.lane.b32.xlu0 %v975_v13, %s993_s11 }
  0x16   :  { %420 = vrot.lane.b32.xlu1 %v974_v11, %s992_s2  ;;  %418 = vrot.lane.b32.xlu0 %v975_v13, %s992_s2 }
  0x1a   :  { %543 = vrot.lane.b32.xlu1 %v973_v10, %s994_s1  ;;  %541 = vrot.lane.b32.xlu0 %v972_v9, %s994_s1 }
  0x1e   :  { %547 = vrot.lane.b32.xlu1 %v974_v11, %s994_s1  ;;  %545 = vrot.lane.b32.xlu0 %v975_v13, %s994_s1 }
  0x7c   :  { %v415_v14 = vpop.permute.xlu1 %414  ;;  %v198_v15 = vpop.permute.xlu0 %197 }
  0x80   :  { %v417_v16 = vpop.permute.xlu1 %416  ;;  %v200_v17 = vpop.permute.xlu0 %199 }
  0x81   :  { %v206_v18 = vsel %vm205_vm1, %v198_v15, %v200_v17  ;;  %v423_v19 = vsel %vm422_vm2, %v415_v14, %v417_v16 }
  0x82   :  { %897 = vmatprep.subr.bf16.mxu1 %v206_v18  ;;  %921 = vmatprep.subr.bf16.mxu0 %v423_v19 }
  0x83   :  { %898 = vmatpush3.bf16.msra.mxu1 %v206_v18  ;;  %922 = vmatpush3.bf16.msra.mxu0 %v423_v19 }
  0x84   :  { %v204_v20 = vpop.permute.xlu1 %203  ;;  %v202_v21 = vpop.permute.xlu0 %201 }
  0x85   :  { %v207_v22 = vsel %vm205_vm1, %v202_v21, %v204_v20 }
  0x86   :  { %899 = vmatprep.subr.bf16.mxu1 %v207_v22 }
  0x87   :  { %900 = vmatpush3.bf16.msra.mxu1 %v207_v22 }
  0x88   :  { %v421_v24 = vpop.permute.xlu1 %420  ;;  %v419_v25 = vpop.permute.xlu0 %418  ;;  %909 = vmatprep.subr.bf16.mxu1 %v972_v9 }
  0x89   :  { %v424_v27 = vsel %vm422_vm2, %v419_v25, %v421_v24 }
  0x8a   :  { %902 = vmatmul.mubr.msk.bf16.vlgmr.msra.gmra.mrb[0].mxu1 %vm210_vm0, %v977_v23  ;;  %923 = vmatprep.subr.bf16.mxu0 %v424_v27 }
  0x8b   :  { %924 = vmatpush3.bf16.msra.mxu0 %v424_v27  ;;  %910 = vmatpush3.bf16.msra.mxu1 %v972_v9 }
  0x8c   :  { %v544_v30 = vpop.permute.xlu1 %543  ;;  %v542_v31 = vpop.permute.xlu0 %541  ;;  %905 = vmatprep.mubr.msk.bf16.mxu1 %vm210_vm0, %v980_v26  ;;  %911 = vmatprep.subr.bf16.mxu1 %v975_v13 }
  0x8d   :  { %v550_v32 = vsel %vm549_vm3, %v542_v31, %v544_v30 }
  0x8e   :  { %926 = vmatmul.mubr.msk.bf16.vlgmr.msra.gmra.mrb[0].mxu0 %vm210_vm0, %v979_v28  ;;  %933 = vmatprep.subr.bf16.mxu0 %v550_v32 }
  0x8f   :  { %934 = vmatpush3.bf16.msra.mxu0 %v550_v32  ;;  %929 = vmatprep.mubr.msk.bf16.mxu0 %vm210_vm0, %v982_v29 }
  0x90   :  { %v548_v35 = vpop.permute.xlu1 %547  ;;  %v546_v36 = vpop.permute.xlu0 %545  ;;  %912 = vmatpush3.bf16.msra.mxu1 %v975_v13 }
  0x91   :  { %v551_v37 = vsel %vm549_vm3, %v546_v36, %v548_v35 }
  0x92   :  { %906 = vmatmul.mubr.msk.bf16.gmra.mrb[4].mxu1 %vm210_vm0, %v981_v33  ;;  %935 = vmatprep.subr.bf16.mxu0 %v551_v37 }
  0x93   :  { %936 = vmatpush3.bf16.msra.mxu0 %v551_v37  ;;  %913 = vmatprep.mubr.msk.bf16.mxu1 %vm210_vm0, %v984_v34 }
  0x96   :  { %930 = vmatmul.mubr.msk.bf16.gmra.mrb[4].mxu0 %vm210_vm0, %v983_v38 }
  0x97   :  { %937 = vmatprep.mubr.msk.bf16.mxu0 %vm210_vm0, %v986_v39 }
  0x9a   :  { %914 = vmatmul.mubr.msk.bf16.vlgmr.msra.gmra.mrb[0].mxu1 %vm210_vm0, %v985_v40 }
  0x9b   :  { %917 = vmatprep.mubr.msk.bf16.mxu1 %vm210_vm0, %v988_v41 }
  0x9e   :  { %938 = vmatmul.mubr.msk.bf16.vlgmr.msra.gmra.mrb[0].mxu0 %vm210_vm0, %v987_v42 }
  0x9f   :  { %941 = vmatprep.mubr.msk.bf16.mxu0 %vm210_vm0, %v990_v43 }
  0xa2   :  { %918 = vmatmul.mubr.msk.bf16.gmra.mrb[4].mxu1 %vm210_vm0, %v989_v44 }
  0xa6   :  { %942 = vmatmul.mubr.msk.bf16.gmra.mrb[4].mxu0 %vm210_vm0, %v991_v45 }
 0x16d   :  { %v915_v46 = vpop.f32.mrb[0].mxu1 }
 0x16e   :  { %v354_v47 = vpop.f32.mrb[1].mxu1 }
 0x16f   :  { %v916_v48 = vpop.f32.mrb[2].mxu1 }
 0x170   :  { %v357_v49 = vpop.f32.mrb[3].mxu1 }
 0x171   :  { %v939_v50 = vpop.f32.mrb[0].mxu0 }
 0x172   :  { %v945_v52 = vadd.f32 %v939_v50, %v915_v46  ;;  %v600_v53 = vpop.f32.mrb[1].mxu0 }
 0x173   :  { %v946_v54 = vadd.f32 %v600_v53, %v354_v47  ;;  %v940_v55 = vpop.f32.mrb[2].mxu0 }
 0x174   :  { %v947_v56 = vadd.f32 %v940_v55, %v916_v48  ;;  %v603_v57 = vpop.f32.mrb[3].mxu0  ;;  %v688_v58 = vmul.f32 %v945_v52, %v841_v51 }
 0x175   :  { %v948_v59 = vadd.f32 %v603_v57, %v357_v49  ;;  %v919_v60 = vpop.f32.mrb[4].mxu1  ;;  %v686_v3 = vmul.f32 %v946_v54, %v841_v51 }
 0x176   :  { %v858_v61 = vpack.c.bf16 %v947_v56, %v945_v52  ;;  %v370_v62 = vpop.f32.mrb[5].mxu1  ;;  %698 = vadd.xlane.f32.xlu0 %v688_v58  ;;  %v712_v63 = vmul.f32 %v945_v52, %v688_v58  ;;  %v689_v12 = vmul.f32 %v947_v56, %v841_v51 }
 0x177   :  { %v853_v0 = vpack.c.bf16 %v948_v59, %v946_v54  ;;  %v920_v1 = vpop.f32.mrb[6].mxu1  ;;  %v687_v7 = vmul.f32 %v948_v59, %v841_v51  ;;  %v710_v15 = vmul.f32 %v946_v54, %v686_v3 }
 0x178   :  { %870 = vst [vmem:[%s1176_s4 + $0x8] sm:$0xff] %v858_v61   ;;  %v373_v2 = vpop.f32.mrb[7].mxu1  ;;  %722 = vadd.xlane.f32.xlu1 %v712_v63  ;;  %v713_v17 = vmul.f32 %v947_v56, %v689_v12 }
 0x179   :  { %854 = vst [vmem:[%s1176_s4] sm:$0xff] %v853_v0   ;;  %v943_v4 = vpop.f32.mrb[4].mxu0  ;;  %v711_v19 = vmul.f32 %v948_v59, %v687_v7 }
 0x17a   :  { %v949_v5 = vadd.f32 %v943_v4, %v919_v60  ;;  %694 = vadd.xlane.f32.xlu0 %v686_v3  ;;  %v616_v6 = vpop.f32.mrb[5].mxu0 }
 0x17b   :  { %v950_v8 = vadd.f32 %v616_v6, %v370_v62  ;;  %v944_v9 = vpop.f32.mrb[6].mxu0 }
 0x17c   :  { %v951_v10 = vadd.f32 %v944_v9, %v920_v1  ;;  %696 = vadd.xlane.f32.xlu1 %v687_v7  ;;  %v619_v11 = vpop.f32.mrb[7].mxu0  ;;  %v692_v18 = vmul.f32 %v949_v5, %v841_v51 }
 0x17d   :  { %v952_v13 = vadd.f32 %v619_v11, %v373_v2  ;;  %v690_v20 = vmul.f32 %v950_v8, %v841_v51 }
 0x17e   :  { %v868_v14 = vpack.c.bf16 %v951_v10, %v949_v5  ;;  %700 = vadd.xlane.f32.xlu0 %v689_v12  ;;  %v693_v21 = vmul.f32 %v951_v10, %v841_v51  ;;  %v716_v24 = vmul.f32 %v949_v5, %v692_v18 }
 0x17f   :  { %v863_v16 = vpack.c.bf16 %v952_v13, %v950_v8  ;;  %v714_v22 = vmul.f32 %v950_v8, %v690_v20  ;;  %v691_v23 = vmul.f32 %v952_v13, %v841_v51 }
 0x180   :  { %872 = vst [vmem:[%s1176_s4 + $0x18] sm:$0xff] %v868_v14   ;;  %718 = vadd.xlane.f32.xlu1 %v710_v15  ;;  %v717_v26 = vmul.f32 %v951_v10, %v693_v21 }
 0x181   :  { %871 = vst [vmem:[%s1176_s4 + $0x10] sm:$0xff] %v863_v16   ;;  %v715_v25 = vmul.f32 %v952_v13, %v691_v23 }
 0x182   :  { %724 = vadd.xlane.f32.xlu0 %v713_v17 }
 0x184   :  { %706 = vadd.xlane.f32.xlu1 %v692_v18 }
 0x186   :  { %720 = vadd.xlane.f32.xlu0 %v711_v19 }
 0x188   :  { %702 = vadd.xlane.f32.xlu1 %v690_v20 }
 0x18a   :  { %708 = vadd.xlane.f32.xlu0 %v693_v21 }
 0x18c   :  { %726 = vadd.xlane.f32.xlu1 %v714_v22 }
 0x18e   :  { %704 = vadd.xlane.f32.xlu0 %v691_v23 }
 0x190   :  { %730 = vadd.xlane.f32.xlu1 %v716_v24 }
 0x192   :  { %728 = vadd.xlane.f32.xlu0 %v715_v25 }
 0x196   :  { %732 = vadd.xlane.f32.xlu0 %v717_v26 }
 0x203   :  { %v699_v27 = vpop.xlane.xlu0 %698 }
 0x205   :  { %v723_v28 = vpop.xlane.xlu1 %722 }
 0x206   :  { %v737_v29 = vsel %vm734_vm4, %v699_v27, %v723_v28 }
 0x207   :  { %746 = vst.msk [vmem:[%s1177_s5 + $0x10] sm:$0xff] %vm743_vm5, %v737_v29  ;;  %v695_v30 = vpop.xlane.xlu0 %694 }
 0x209   :  { %v697_v31 = vpop.xlane.xlu1 %696 }
 0x20b   :  { %v701_v32 = vpop.xlane.xlu0 %700 }
 0x20d   :  { %v719_v33 = vpop.xlane.xlu1 %718 }
 0x20e   :  { %v735_v34 = vsel %vm734_vm4, %v695_v30, %v719_v33 }
 0x20f   :  { %744 = vst.msk [vmem:[%s1177_s5] sm:$0xff] %vm743_vm5, %v735_v34  ;;  %v725_v35 = vpop.xlane.xlu0 %724 }
 0x210   :  { %v738_v36 = vsel %vm734_vm4, %v701_v32, %v725_v35 }
 0x211   :  { %747 = vst.msk [vmem:[%s1177_s5 + $0x18] sm:$0xff] %vm743_vm5, %v738_v36  ;;  %v707_v37 = vpop.xlane.xlu1 %706 }
 0x213   :  { %v721_v38 = vpop.xlane.xlu0 %720 }
 0x214   :  { %v736_v39 = vsel %vm734_vm4, %v697_v31, %v721_v38 }
 0x215   :  { %745 = vst.msk [vmem:[%s1177_s5 + $0x8] sm:$0xff] %vm743_vm5, %v736_v39  ;;  %v703_v40 = vpop.xlane.xlu1 %702 }
 0x217   :  { %v709_v41 = vpop.xlane.xlu0 %708 }
 0x219   :  { %v727_v42 = vpop.xlane.xlu1 %726 }
 0x21a   :  { %v739_v43 = vsel %vm734_vm4, %v703_v40, %v727_v42 }
 0x21b   :  { %748 = vst.msk [vmem:[%s1177_s5 + $0x20] sm:$0xff] %vm743_vm5, %v739_v43  ;;  %v705_v44 = vpop.xlane.xlu0 %704 }
 0x21d   :  { %v731_v45 = vpop.xlane.xlu1 %730 }
 0x21e   :  { %v741_v46 = vsel %vm734_vm4, %v707_v37, %v731_v45 }
 0x21f   :  { %750 = vst.msk [vmem:[%s1177_s5 + $0x30] sm:$0xff] %vm743_vm5, %v741_v46  ;;  %v729_v47 = vpop.xlane.xlu0 %728 }
 0x220   :  { %v740_v48 = vsel %vm734_vm4, %v705_v44, %v729_v47 }
 0x221   :  { %749 = vst.msk [vmem:[%s1177_s5 + $0x28] sm:$0xff] %vm743_vm5, %v740_v48 }
 0x223   :  { %v733_v49 = vpop.xlane.xlu0 %732 }
 0x224   :  { %v742_v50 = vsel %vm734_vm4, %v709_v41, %v733_v49 }
 0x225   :  { %751 = vst.msk [vmem:[%s1177_s5 + $0x38] sm:$0xff] %vm743_vm5, %v742_v50 }

// kernel: tile.38
= control target key start
LH: loop header
LB: loop body
LE: loop exit
PB: predicated region body
PF: predicated region fallthrough
CT: control target
= control target key end

     0   :  { %s22_s0 = inlined_call_operand.vmem [shape: f32[8], index: 0, kind: input, shape index: {}]   ;;  %s23_s1 = inlined_call_operand.vmem [shape: f32[4,8], index: 1, kind: output, shape index: {}]  }
   0x1   :  { %v4_v0 = vld [vmem:[%s22_s0] ss:$0 sm:$0xff] }
   0x2   :  { %5 = vst [vmem:[%s23_s1] sm:$0xf] %v4_v0 }

// kernel: _lambda_.36
= control target key start
LH: loop header
LB: loop body
LE: loop exit
PB: predicated region body
PF: predicated region fallthrough
CT: control target
= control target key end

     0   :  { %v141_v0 = vmov 0   ;;  %s210_s1 = inlined_call_operand.vmem [shape: f32[32,1], index: 1, kind: input, shape index: {}]   ;;  %s211_s2 = inlined_call_operand.vmem [shape: f32[32,1], index: 2, kind: input, shape index: {}]   ;;  %s212_s0 = inlined_call_operand.vmem [shape: bf16[32,256], index: 0, kind: input, shape index: {}]   ;;  %s213_s3 = inlined_call_operand.vmem [shape: bf16[32,256], index: 3, kind: output, shape index: {}]  }
   0x1   :  { %140 = vset.pattern.permute.xlu1 %v141_v0  ;;  %139 = vset.pattern.permute.xlu0 %v141_v0  ;;  %v28_v1 = vld [vmem:[%s210_s1 + $0x10] sm:$0xff]  ;;  %v26_v2 = vld [vmem:[%s210_s1] sm:$0xff]  ;;  %v29_v3 = vld [vmem:[%s210_s1 + $0x18] sm:$0xff] }
   0x2   :  { %42 = vperm.xlu1 %140, %v28_v1   ;;  %32 = vperm.xlu0 %139, %v26_v2   ;;  %v27_v4 = vld [vmem:[%s210_s1 + $0x8] sm:$0xff]  ;;  %v58_v6 = vld [vmem:[%s211_s2] sm:$0xff]  ;;  %v61_v7 = vld [vmem:[%s211_s2 + $0x18] sm:$0xff] }
   0x3   :  { %v59_v5 = vld [vmem:[%s211_s2 + $0x8] sm:$0xff]  ;;  %v60_v8 = vld [vmem:[%s211_s2 + $0x10] sm:$0xff]  ;;  %v14_v11 = vld [vmem:[%s212_s0] sm:$0xff] }
   0x4   :  { %v15_v12 = vld [vmem:[%s212_s0 + $0x8] sm:$0xff]  ;;  %v18_v13 = vunpack.c.l.bf16 %v14_v11  ;;  %v19_v14 = vunpack.c.h.bf16 %v14_v11  ;;  %v17_v15 = vld [vmem:[%s212_s0 + $0x18] sm:$0xff]  ;;  %v16_v20 = vld [vmem:[%s212_s0 + $0x10] sm:$0xff] }
   0x5   :  { %v20_v16 = vunpack.c.l.bf16 %v15_v12  ;;  %v21_v17 = vunpack.c.h.bf16 %v15_v12  ;;  %v24_v21 = vunpack.c.l.bf16 %v17_v15  ;;  %v25_v22 = vunpack.c.h.bf16 %v17_v15 }
   0x6   :  { %47 = vperm.xlu1 %140, %v29_v3   ;;  %37 = vperm.xlu0 %139, %v27_v4   ;;  %v22_v27 = vunpack.c.l.bf16 %v16_v20  ;;  %v23_v28 = vunpack.c.h.bf16 %v16_v20 }
   0xa   :  { %69 = vperm.xlu1 %140, %v59_v5   ;;  %64 = vperm.xlu0 %139, %v58_v6  }
   0xe   :  { %79 = vperm.xlu1 %140, %v61_v7   ;;  %74 = vperm.xlu0 %139, %v60_v8  }
  0x81   :  { %v43_v9 = vpop.permute.xlu1 %42  ;;  %v33_v10 = vpop.permute.xlu0 %32 }
  0x82   :  { %v50_v23 = vmul.f32 %v33_v10, %v18_v13  ;;  %v51_v24 = vmul.f32 %v33_v10, %v19_v14  ;;  %v54_v41 = vmul.f32 %v43_v9, %v22_v27  ;;  %v55_v42 = vmul.f32 %v43_v9, %v23_v28 }
  0x85   :  { %v48_v18 = vpop.permute.xlu1 %47  ;;  %v38_v19 = vpop.permute.xlu0 %37 }
  0x86   :  { %v52_v25 = vmul.f32 %v38_v19, %v20_v16  ;;  %v53_v26 = vmul.f32 %v38_v19, %v21_v17  ;;  %v56_v35 = vmul.f32 %v48_v18, %v24_v21  ;;  %v57_v36 = vmul.f32 %v48_v18, %v25_v22 }
  0x89   :  { %v70_v29 = vpop.permute.xlu1 %69  ;;  %v65_v30 = vpop.permute.xlu0 %64 }
  0x8a   :  { %v84_v31 = vadd.f32 %v70_v29, %v52_v25  ;;  %v85_v32 = vadd.f32 %v70_v29, %v53_v26  ;;  %v82_v33 = vadd.f32 %v65_v30, %v50_v23  ;;  %v83_v34 = vadd.f32 %v65_v30, %v51_v24 }
  0x8c   :  { %v92_v37 = vmax.f32 %v84_v31, 0.0  ;;  %v93_v38 = vmax.f32 %v85_v32, 0.0  ;;  %v90_v39 = vmax.f32 %v82_v33, 0.0  ;;  %v91_v40 = vmax.f32 %v83_v34, 0.0 }
  0x8d   :  { %v80_v43 = vpop.permute.xlu1 %79  ;;  %v75_v44 = vpop.permute.xlu0 %74 }
  0x8e   :  { %v135_v45 = vpack.c.bf16 %v93_v38, %v92_v37  ;;  %v134_v46 = vpack.c.bf16 %v91_v40, %v90_v39  ;;  %v88_v47 = vadd.f32 %v80_v43, %v56_v35  ;;  %v89_v48 = vadd.f32 %v80_v43, %v57_v36 }
  0x8f   :  { %v86_v49 = vadd.f32 %v75_v44, %v54_v41  ;;  %v87_v50 = vadd.f32 %v75_v44, %v55_v42 }
  0x90   :  { %123 = vst [vmem:[%s213_s3 + $0x8] sm:$0xff] %v135_v45  ;;  %122 = vst [vmem:[%s213_s3] sm:$0xff] %v134_v46  ;;  %v96_v51 = vmax.f32 %v88_v47, 0.0  ;;  %v97_v52 = vmax.f32 %v89_v48, 0.0 }
  0x91   :  { %v94_v53 = vmax.f32 %v86_v49, 0.0  ;;  %v95_v54 = vmax.f32 %v87_v50, 0.0 }
  0x92   :  { %v137_v55 = vpack.c.bf16 %v97_v52, %v96_v51 }
  0x93   :  { %v136_v56 = vpack.c.bf16 %v95_v54, %v94_v53 }
  0x94   :  { %125 = vst [vmem:[%s213_s3 + $0x18] sm:$0xff] %v137_v55 }
  0x95   :  { %124 = vst [vmem:[%s213_s3 + $0x10] sm:$0xff] %v136_v56 }

// kernel: _lambda_.35
= control target key start
LH: loop header
LB: loop body
LE: loop exit
PB: predicated region body
PF: predicated region fallthrough
CT: control target
= control target key end

     0   :  { %s654_s20 = smov 119   ;;  %s655_s21 = smov 127   ;;  %v656_v2 = vmov 0   ;;  %vm146_vm0 = vcmask 1039360   ;;  %vm301_vm1 = vcmask 973824   ;;  %vm151_vm2 = vcmask 130048   ;;  %s756_s0 = inlined_call_operand.vmem [shape: bf16[4,32,16], index: 0, kind: input, shape index: {}]   ;;  %s757_s1 = inlined_call_operand.vmem [shape: bf16[16,512], index: 1, kind: input, shape index: {}, may-alias: {1,2}]   ;;  %s758_s2 = inlined_call_operand.vmem [shape: bf16[16,512], index: 2, kind: input, shape index: {}, may-alias: {1,2}]   ;;  %s759_s3 = inlined_call_operand.vmem [shape: f32[1,256], index: 3, kind: input, shape index: {}]   ;;  %s760_s4 = inlined_call_operand.vmem [shape: bf16[32,256], index: 4, kind: output, shape index: {0}]   ;;  %s761_s5 = inlined_call_operand.vmem [shape: f32[1,32,2], index: 5, kind: output, shape index: {1}]  }
   0x1   :  { %v642_v0 = vld [vmem:[%s757_s1 + $0x4] ss:$16 sps:$4 sm:$0xff]   ;;  %v644_v1 = vld [vmem:[%s758_s2 + $0x8] ss:$16 sps:$4 sm:$0xff]   ;;  %190 = vmatprep.mubr.bf16.mxu1 %v656_v2  ;;  %344 = vmatprep.mubr.bf16.mxu0 %v656_v2  ;;  %v645_v3 = vld [vmem:[%s757_s1] ss:$16 sps:$4 sm:$0xff]   ;;  %v496_v27 = vlaneseq }
   0x2   :  { %297 = vrot.lane.b32.xlu1 %v642_v0, %s654_s20  ;;  %142 = vrot.lane.b32.xlu0 %v642_v0, %s655_s21  ;;  %s657_s26 = smov 118   ;;  %v646_v14 = vld [vmem:[%s756_s0 + $0x10] sm:$0xff]   ;;  %v647_v15 = vld [vmem:[%s756_s0 + $0x20] sm:$0xff]   ;;  %vm394_vm3 = vcmask 965632   ;;  %vm546_vm4 = vcmask 7168   ;;  %vm551_vm5 = vcmask 15360  }
   0x3   :  { %v648_v21 = vld [vmem:[%s756_s0 + $0x18] sm:$0xff]   ;;  %v649_v22 = vld [vmem:[%s756_s0 + $0x28] sm:$0xff]   ;;  %v650_v23 = vld [vmem:[%s756_s0] sm:$0xff]   ;;  %v497_v28 = vshrl.u32 %v496_v27, 7 }
   0x4   :  { %v651_v24 = vld [vmem:[%s756_s0 + $0x30] sm:$0xff]   ;;  %v652_v25 = vld [vmem:[%s756_s0 + $0x8] sm:$0xff]   ;;  %v653_v26 = vld [vmem:[%s756_s0 + $0x38] sm:$0xff]  }
   0x5   :  { %v498_v29 = vsub.s32 0, %v497_v28  ;;  %v494_v30 = vld [vmem:[%s759_s3] sm:$0x3]  ;;  %v502_v31 = vsub.s32 1, %v497_v28 }
   0x6   :  { %299 = vrot.lane.b32.xlu1 %v644_v1, %s654_s20  ;;  %144 = vrot.lane.b32.xlu0 %v644_v1, %s655_s21 }
   0x7   :  { %v499_v32 = vrot.slane %v494_v30, %v498_v29  ;;  %v503_v35 = vrot.slane %v494_v30, %v502_v31 }
   0xa   :  { %295 = vrot.lane.b32.xlu1 %v645_v3, %s654_s20  ;;  %140 = vrot.lane.b32.xlu0 %v645_v3, %s655_s21 }
   0xe   :  { %392 = vrot.lane.b32.xlu1 %v644_v1, %s657_s26  ;;  %390 = vrot.lane.b32.xlu0 %v642_v0, %s657_s26 }
  0x12   :  { %388 = vrot.lane.b32.xlu0 %v645_v3, %s657_s26 }
  0x74   :  { %v298_v4 = vpop.permute.xlu1 %297  ;;  %v143_v5 = vpop.permute.xlu0 %142 }
  0x78   :  { %v300_v6 = vpop.permute.xlu1 %299  ;;  %v145_v7 = vpop.permute.xlu0 %144 }
  0x79   :  { %v148_v8 = vsel %vm146_vm0, %v143_v5, %v145_v7  ;;  %v303_v9 = vsel %vm301_vm1, %v298_v4, %v300_v6 }
  0x7a   :  { %158 = vmatprep.subr.bf16.mxu1 %v148_v8  ;;  %312 = vmatprep.subr.bf16.mxu0 %v303_v9 }
  0x7c   :  { %v296_v10 = vpop.permute.xlu1 %295  ;;  %v141_v11 = vpop.permute.xlu0 %140 }
  0x7d   :  { %v147_v12 = vsel %vm146_vm0, %v141_v11, %v143_v5  ;;  %v302_v13 = vsel %vm301_vm1, %v296_v10, %v298_v4 }
  0x7e   :  { %159 = vmatpush1.bf16.msra.mxu1 %v147_v12  ;;  %313 = vmatpush1.bf16.msra.mxu0 %v302_v13 }
  0x7f   :  { %227 = vmatprep.subr.bf16.mxu1 %v642_v0 }
  0x80   :  { %v393_v16 = vpop.permute.xlu1 %392  ;;  %v391_v17 = vpop.permute.xlu0 %390 }
  0x81   :  { %584 = vmatmul.mubr.msk.bf16.vlgmr.msra.gmra.mrb[0].mxu1 %vm151_vm2, %v646_v14  ;;  %596 = vmatmul.mubr.msk.bf16.vlgmr.msra.gmra.mrb[0].mxu0 %vm151_vm2, %v647_v15  ;;  %v396_v18 = vsel %vm394_vm3, %v391_v17, %v393_v16 }
  0x82   :  { %405 = vmatprep.subr.bf16.mxu0 %v396_v18  ;;  %228 = vmatpush1.bf16.msra.mxu1 %v645_v3 }
  0x83   :  { %200 = vmatprep.mubr.bf16.mxu1 %v656_v2  ;;  %354 = vmatprep.mubr.bf16.mxu0 %v656_v2 }
  0x84   :  { %v389_v19 = vpop.permute.xlu0 %388 }
  0x85   :  { %v395_v20 = vsel %vm394_vm3, %v389_v19, %v391_v17 }
  0x86   :  { %406 = vmatpush1.bf16.msra.mxu0 %v395_v20 }
  0x89   :  { %585 = vmatmul.mubr.msk.bf16.gmra.mrb[4].mxu1 %vm151_vm2, %v648_v21  ;;  %597 = vmatmul.mubr.msk.bf16.gmra.mrb[4].mxu0 %vm151_vm2, %v649_v22 }
  0x8a   :  { %259 = vmatprep.mubr.bf16.mxu1 %v656_v2  ;;  %437 = vmatprep.mubr.bf16.mxu0 %v656_v2 }
  0x91   :  { %588 = vmatmul.mubr.msk.bf16.vlgmr.msra.gmra.mrb[0].mxu1 %vm151_vm2, %v650_v23  ;;  %604 = vmatmul.mubr.msk.bf16.vlgmr.msra.gmra.mrb[0].mxu0 %vm151_vm2, %v651_v24 }
  0x92   :  { %269 = vmatprep.mubr.bf16.mxu1 %v656_v2  ;;  %447 = vmatprep.mubr.bf16.mxu0 %v656_v2 }
  0x99   :  { %589 = vmatmul.mubr.msk.bf16.gmra.mrb[4].mxu1 %vm151_vm2, %v652_v25  ;;  %605 = vmatmul.mubr.msk.bf16.gmra.mrb[4].mxu0 %vm151_vm2, %v653_v26 }
 0x164   :  { %v261_v33 = vpop.f32.mrb[0].mxu1  ;;  %v439_v34 = vpop.f32.mrb[0].mxu0 }
 0x165   :  { %v614_v36 = vadd.f32 %v439_v34, %v261_v33  ;;  %v263_v37 = vpop.f32.mrb[1].mxu1  ;;  %v441_v38 = vpop.f32.mrb[1].mxu0 }
 0x166   :  { %v615_v39 = vadd.f32 %v441_v38, %v263_v37  ;;  %v265_v40 = vpop.f32.mrb[2].mxu1  ;;  %v443_v41 = vpop.f32.mrb[2].mxu0 }
 0x167   :  { %v616_v42 = vadd.f32 %v443_v41, %v265_v40  ;;  %v267_v43 = vpop.f32.mrb[3].mxu1  ;;  %v445_v44 = vpop.f32.mrb[3].mxu0  ;;  %v506_v45 = vmul.f32 %v614_v36, %v499_v32 }
 0x168   :  { %v610_v46 = vpack.c.bf16 %v615_v39, %v614_v36  ;;  %v617_v47 = vadd.f32 %v445_v44, %v267_v43  ;;  %v507_v48 = vmul.f32 %v615_v39, %v503_v35 }
 0x169   :  { %v508_v49 = vmul.f32 %v616_v42, %v499_v32  ;;  %v526_v50 = vmul.f32 %v614_v36, %v506_v45 }
 0x16a   :  { %490 = vst [vmem:[%s760_s4] sm:$0xff] %v610_v46  ;;  %v611_v51 = vpack.c.bf16 %v617_v47, %v616_v42  ;;  %v514_v52 = vadd.f32 %v507_v48, %v506_v45  ;;  %v509_v53 = vmul.f32 %v617_v47, %v503_v35  ;;  %v527_v54 = vmul.f32 %v615_v39, %v507_v48 }
 0x16b   :  { %v528_v55 = vmul.f32 %v616_v42, %v508_v49 }
 0x16c   :  { %491 = vst [vmem:[%s760_s4 + $0x8] sm:$0xff] %v611_v51  ;;  %v271_v56 = vpop.f32.mrb[4].mxu1  ;;  %515 = vadd.xlane.f32.xlu1 %v514_v52  ;;  %v449_v57 = vpop.f32.mrb[4].mxu0  ;;  %v517_v58 = vadd.f32 %v509_v53, %v508_v49  ;;  %v529_v59 = vmul.f32 %v617_v47, %v509_v53  ;;  %v534_v60 = vadd.f32 %v527_v54, %v526_v50 }
 0x16d   :  { %v618_v61 = vadd.f32 %v449_v57, %v271_v56  ;;  %v273_v62 = vpop.f32.mrb[5].mxu1  ;;  %v451_v63 = vpop.f32.mrb[5].mxu0 }
 0x16e   :  { %v619_v0 = vadd.f32 %v451_v63, %v273_v62  ;;  %v275_v1 = vpop.f32.mrb[6].mxu1  ;;  %518 = vadd.xlane.f32.xlu0 %v517_v58  ;;  %v453_v2 = vpop.f32.mrb[6].mxu0  ;;  %v537_v3 = vadd.f32 %v529_v59, %v528_v55 }
 0x16f   :  { %v620_v4 = vadd.f32 %v453_v2, %v275_v1  ;;  %v277_v5 = vpop.f32.mrb[7].mxu1  ;;  %v455_v6 = vpop.f32.mrb[7].mxu0  ;;  %v510_v7 = vmul.f32 %v618_v61, %v499_v32 }
 0x170   :  { %v612_v8 = vpack.c.bf16 %v619_v0, %v618_v61  ;;  %v621_v9 = vadd.f32 %v455_v6, %v277_v5  ;;  %538 = vadd.xlane.f32.xlu1 %v537_v3  ;;  %v511_v10 = vmul.f32 %v619_v0, %v503_v35 }
 0x171   :  { %v512_v11 = vmul.f32 %v620_v4, %v499_v32  ;;  %v530_v12 = vmul.f32 %v618_v61, %v510_v7 }
 0x172   :  { %492 = vst [vmem:[%s760_s4 + $0x10] sm:$0xff] %v612_v8  ;;  %v613_v13 = vpack.c.bf16 %v621_v9, %v620_v4  ;;  %535 = vadd.xlane.f32.xlu0 %v534_v60  ;;  %v520_v14 = vadd.f32 %v511_v10, %v510_v7  ;;  %v513_v15 = vmul.f32 %v621_v9, %v503_v35 }
 0x173   :  { %v531_v16 = vmul.f32 %v619_v0, %v511_v10  ;;  %v532_v17 = vmul.f32 %v620_v4, %v512_v11 }
 0x174   :  { %493 = vst [vmem:[%s760_s4 + $0x18] sm:$0xff] %v613_v13  ;;  %v523_v18 = vadd.f32 %v513_v15, %v512_v11  ;;  %v533_v20 = vmul.f32 %v621_v9, %v513_v15 }
 0x175   :  { %v540_v19 = vadd.f32 %v531_v16, %v530_v12 }
 0x176   :  { %521 = vadd.xlane.f32.xlu0 %v520_v14  ;;  %524 = vadd.xlane.f32.xlu1 %v523_v18  ;;  %v543_v21 = vadd.f32 %v533_v20, %v532_v17 }
 0x17a   :  { %541 = vadd.xlane.f32.xlu0 %v540_v19  ;;  %544 = vadd.xlane.f32.xlu1 %v543_v21 }
 0x1f9   :  { %v516_v22 = vpop.xlane.xlu1 %515 }
 0x1fb   :  { %v519_v23 = vpop.xlane.xlu0 %518 }
 0x1fd   :  { %v539_v24 = vpop.xlane.xlu1 %538 }
 0x1fe   :  { %v548_v25 = vsel %vm546_vm4, %v519_v23, %v539_v24 }
 0x1ff   :  { %553 = vst.msk [vmem:[%s761_s5 + $0x8] sm:$0xff] %vm551_vm5, %v548_v25  ;;  %v536_v26 = vpop.xlane.xlu0 %535 }
 0x200   :  { %v547_v27 = vsel %vm546_vm4, %v516_v22, %v536_v26 }
 0x201   :  { %552 = vst.msk [vmem:[%s761_s5] sm:$0xff] %vm551_vm5, %v547_v27 }
 0x203   :  { %v522_v28 = vpop.xlane.xlu0 %521  ;;  %v525_v29 = vpop.xlane.xlu1 %524 }
 0x207   :  { %v542_v30 = vpop.xlane.xlu0 %541  ;;  %v545_v31 = vpop.xlane.xlu1 %544 }
 0x208   :  { %v549_v32 = vsel %vm546_vm4, %v522_v28, %v542_v30  ;;  %v550_v33 = vsel %vm546_vm4, %v525_v29, %v545_v31 }
 0x209   :  { %554 = vst.msk [vmem:[%s761_s5 + $0x10] sm:$0xff] %vm551_vm5, %v549_v32  ;;  %555 = vst.msk [vmem:[%s761_s5 + $0x18] sm:$0xff] %vm551_vm5, %v550_v33 }

// kernel: _lambda_.37
= control target key start
LH: loop header
LB: loop body
LE: loop exit
PB: predicated region body
PF: predicated region fallthrough
CT: control target
= control target key end

     0   :  { %s7389_s15 = smov 0   ;;  %s7391_s16 = smov 0   ;;  %s8745_s0 = inlined_call_operand.vmem [shape: bf16[49,16,16], index: 0, kind: input, shape index: {}]   ;;  %s8746_s1 = inlined_call_operand.vmem [shape: bf16[16,1536], index: 1, kind: input, shape index: {}, may-alias: {1,2}]   ;;  %s8747_s2 = inlined_call_operand.vmem [shape: bf16[16,1536], index: 2, kind: input, shape index: {}, may-alias: {1,2}]   ;;  %s8748_s3 = inlined_call_operand.vmem [shape: f32[16,1], index: 3, kind: input, shape index: {}]   ;;  %s8749_s4 = inlined_call_operand.vmem [shape: f32[16,1024], index: 4, kind: output, shape index: {}]  }
   0x1   :  { %s7393_s17 = smov 0   ;;  %s7395_s18 = smov 0  }
   0x2   :  { %s7397_s19 = smov 0  }
   0x3 LB: > { %s6454_s20 = sadd.s32 4294967295, %s7316_s19   ;;  %s7416_s21 = sadd.s32 1, %s7316_s19   ;;  %s7316_s19 = sphi %s7397_s19, %s8756_s19   ;;  %s7312_s18 = sphi %s7395_s18, %s8755_s18   ;;  %s7308_s17 = sphi %s7393_s17, %s8754_s17   ;;  %s7304_s16 = sphi %s7391_s16, %s8753_s16   ;;  %s7300_s15 = sphi %s7389_s15, %s8752_s15  }
   0x4   : > { %s39_s22 = ssub.s32 %s7316_s19, %s7416_s21  ;;  %s42_s23 = sadd.s32 1, %s7312_s18 }
   0x5   : > { %p40_p0 = scmp.eq.s32.totalorder %s39_s22, 0  ;;  %p49_p1 = scmp.ne.s32.totalorder %s7312_s18, %s7308_s17 }
   0x6   : > { %p50_p2 = scmp.eq.s32.totalorder %s7316_s19, 0  ;;  %s66_s24 = sadd.s32 1, %s7416_s21 }
   0x7   : > { %s7426_s25 = scalar_select %p40_p0, %s7312_s18, %s42_s23  }
   0x8   : > { %p51_p3 = por %p50_p2, %p49_p1  ;;  %s67_s26 = ssub.s32 %s7416_s21, %s66_s24 }
   0x9   : > { %p68_p4 = scmp.eq.s32.totalorder %s67_s26, 0  ;;  %s70_s27 = sadd.s32 1, %s7304_s16 }
   0xa   : > { %p77_p5 = scmp.ne.s32.totalorder %s7304_s16, %s7300_s15  ;;  %p128_p6 = scmp.eq.s32.totalorder %s6454_s20, 1 }
   0xb   : > { %s7435_s28 = scalar_select %p68_p4, %s7304_s16, %s70_s27  }
   0xc   : > { %p7437_p7 = por %p77_p5, %p50_p2  ;;  %p7441_p8 = por %p128_p6, %p49_p1 }
   0xd   : > { %p6457_p9 = scmp.ge.s32.totalorder %s7316_s19, 2 }
   0xf   : > { %156 = sbr.rel (%p6457_p9) target bundleno = 36 (0x24), region = 24 }
  0x16   : > { %159 = sbr.rel (!%p51_p3) target bundleno = 29 (0x1d), region = 28  ;;  %s161_s5 = sand.u32 (%p51_p3), 1, %s7312_s18  }
  0x17   : > { %s6725_s6 = sshll.u32 (%p51_p3), %s7316_s19, 4  ;;  %s6458_s7 = sshll.u32 (%p51_p3), %s161_s5, 5 }
  0x18   : > { %s166_s10 = scalar_lea.vmem (%p51_p3), %s8746_s1, %s6725_s6  ;;  %s163_s11 = scalar_lea.vmem (%p51_p3), [#allocation2], %s6458_s7 }
  0x19   : > { %v179_v0 = vld [vmem:[%s166_s10] sm:$0xff] (%p51_p3)  ;;  %v181_v1 = vld [vmem:[%s166_s10 + $0x8] sm:$0xff] (%p51_p3)  ;;  %v183_v2 = vld [vmem:[%s166_s10 + $0x30] sm:$0xff] (%p51_p3) }
  0x1a   : > { %180 = vst [vmem:[%s163_s11] sm:$0xff] (%p51_p3), %v179_v0  ;;  %182 = vst [vmem:[%s163_s11 + $0x8] sm:$0xff] (%p51_p3), %v181_v1  ;;  %v185_v3 = vld [vmem:[%s166_s10 + $0x38] sm:$0xff] (%p51_p3) }
  0x1b   : > { %184 = vst [vmem:[%s163_s11 + $0x10] sm:$0xff] (%p51_p3), %v183_v2  ;;  %186 = vst [vmem:[%s163_s11 + $0x18] sm:$0xff] (%p51_p3), %v185_v3 }
  0x1d PF: > { %192 = sbr.rel (!%p7437_p7) target bundleno = 36 (0x24), region = 51  ;;  %s194_s12 = sand.u32 (%p7437_p7), 1, %s7304_s16  }
  0x1e   : > { %s6462_s13 = sshll.u32 (%p7437_p7), %s7316_s19, 4  ;;  %s6461_s14 = sshll.u32 (%p7437_p7), %s194_s12, 5 }
  0x1f   : > { %s6398_s24 = scalar_lea.vmem (%p7437_p7), %s8747_s2, %s6462_s13  ;;  %s196_s26 = scalar_lea.vmem (%p7437_p7), [#allocation3], %s6461_s14 }
  0x20   : > { %v6463_v4 = vld [vmem:[%s6398_s24 + $0x10] sm:$0xff] (%p7437_p7)  ;;  %v6464_v5 = vld [vmem:[%s6398_s24 + $0x18] sm:$0xff] (%p7437_p7)  ;;  %v6465_v6 = vld [vmem:[%s6398_s24 + $0x40] sm:$0xff] (%p7437_p7) }
  0x21   : > { %214 = vst [vmem:[%s196_s26] sm:$0xff] (%p7437_p7), %v6463_v4  ;;  %216 = vst [vmem:[%s196_s26 + $0x8] sm:$0xff] (%p7437_p7), %v6464_v5  ;;  %v6466_v7 = vld [vmem:[%s6398_s24 + $0x48] sm:$0xff] (%p7437_p7) }
  0x22   : > { %218 = vst [vmem:[%s196_s26 + $0x10] sm:$0xff] (%p7437_p7), %v6465_v6  ;;  %220 = vst [vmem:[%s196_s26 + $0x18] sm:$0xff] (%p7437_p7), %v6466_v7 }
  0x24 PF: > { %p6467_p10 = scmp.ge.s32.totalorder %s7316_s19, 1  ;;  %p225_p11 = scmp.lt.s32.totalorder %s7316_s19, 3 }
  0x26   : > { %p226_p12 = pnand %p6467_p10, %p225_p11 }
  0x27   : > { %s232_s27 = sand.u32 (!%p226_p12), 1, %s7308_s17   ;;  %s239_s5 = sand.u32 (!%p226_p12), 1, %s7300_s15   ;;  %v7318_v8 = vmov (!%p226_p12), 0   ;;  %vm326_vm0 = vcmask (!%p226_p12), 1039360   ;;  %v7207_v21 = vld [vmem:[%s8745_s0 + $0x8] sm:$0xff] (!%p226_p12)   ;;  %vm335_vm1 = vcmask (!%p226_p12), 130048  }
  0x28   : > { %229 = sbr.rel (%p226_p12) target bundleno = 985 (0x3d9), region = 74  ;;  %s6468_s29 = sshll.u32 (!%p226_p12), %s232_s27, 5  ;;  %414 = vmatprep.mubr.bf16.mxu1 (!%p226_p12), %v7318_v8  ;;  %371 = vmatprep.mubr.bf16.mxu0 (!%p226_p12), %v7318_v8  ;;  %vm537_vm2 = vcmask (!%p226_p12), 1031168   ;;  %v7208_v31 = vld [vmem:[%s8745_s0] sm:$0xff] (!%p226_p12)   ;;  %vm661_vm3 = vcmask (!%p226_p12), 1022976   ;;  %v7209_v42 = vld [vmem:[%s8745_s0 + $0x10] sm:$0xff] (!%p226_p12)  }
  0x29   : > { %s6469_s6 = sshll.u32 (!%p226_p12), %s239_s5, 5  ;;  %7197 = vset.pattern.permute.xlu0 (!%p226_p12), %v7318_v8  ;;  %7198 = vset.pattern.permute.xlu1 (!%p226_p12), %v7318_v8  ;;  %s7468_s7 = scalar_lea.vmem (!%p226_p12), [#allocation2], %s6468_s29  ;;  %vm785_vm4 = vcmask (!%p226_p12), 1014784   ;;  %v7210_v53 = vld [vmem:[%s8745_s0 + $0x18] sm:$0xff] (!%p226_p12)   ;;  %vm909_vm5 = vcmask (!%p226_p12), 1006592   ;;  %v7211_v0 = vld [vmem:[%s8745_s0 + $0x20] sm:$0xff] (!%p226_p12)  }
  0x2a   : > { %v7471_v9 = vld [vmem:[%s7468_s7 + $0xc] ss:$16 sps:$4 sm:$0xff] (!%p226_p12)   ;;  %v7474_v10 = vld [vmem:[%s7468_s7 + $0x4] ss:$16 sps:$4 sm:$0xff] (!%p226_p12)   ;;  %s7319_s15 = smov (!%p226_p12), 127   ;;  %s7477_s8 = scalar_lea.vmem (!%p226_p12), [#allocation3], %s6469_s6 }
  0x2b   : > { %322 = vrot.lane.b32.xlu1 (!%p226_p12), %v7471_v9, %s7319_s15  ;;  %v7480_v11 = vld [vmem:[%s7477_s8] ss:$16 sps:$4 sm:$0xff] (!%p226_p12)   ;;  %318 = vrot.lane.b32.xlu0 (!%p226_p12), %v7474_v10, %s7319_s15  ;;  %v7484_v12 = vld [vmem:[%s7468_s7 + $0x8] ss:$16 sps:$4 sm:$0xff] (!%p226_p12)   ;;  %s7320_s9 = smov (!%p226_p12), 126   ;;  %s7321_s10 = smov (!%p226_p12), 125  }
  0x2c   : > { %v7488_v13 = vld [vmem:[%s7468_s7] ss:$16 sps:$4 sm:$0xff] (!%p226_p12)   ;;  %s7322_s11 = smov (!%p226_p12), 124   ;;  %s7323_s12 = smov (!%p226_p12), 123   ;;  %vm1033_vm6 = vcmask (!%p226_p12), 998400   ;;  %vm1157_vm7 = vcmask (!%p226_p12), 867328  }
  0x2d   : > { %s7324_s13 = smov (!%p226_p12), 122   ;;  %s7325_s14 = smov (!%p226_p12), 106   ;;  %vm1281_vm8 = vcmask (!%p226_p12), 859136   ;;  %vm1405_vm9 = vcmask (!%p226_p12), 850944   ;;  %vm1529_vm10 = vcmask (!%p226_p12), 842752   ;;  %vm1653_vm11 = vcmask (!%p226_p12), 834560  }
  0x2e   : > { %s7326_s22 = smov (!%p226_p12), 105   ;;  %s7327_s23 = smov (!%p226_p12), 104   ;;  %vm1777_vm12 = vcmask (!%p226_p12), 826368   ;;  %vm1901_vm13 = vcmask (!%p226_p12), 818176   ;;  %vm2025_vm14 = vcmask (!%p226_p12), 687104   ;;  %vm2149_vm15 = vcmask (!%p226_p12), 678912  }
  0x2f   : > { %324 = vrot.lane.b32.xlu1 %v7480_v11, %s7319_s15  ;;  %320 = vrot.lane.b32.xlu0 %v7484_v12, %s7319_s15  ;;  %s7328_s24 = smov 103   ;;  %s7329_s26 = smov 102  }
  0x30   : > { %s7330_s29 = smov 101   ;;  %s7331_s5 = smov 100  }
  0x31   : > { %s7335_s6 = smov 81   ;;  %s6726_s17 = sshll.u32 (%p7441_p8), %s6454_s20, 5 }
  0x33   : > { %529 = vrot.lane.b32.xlu1 %v7474_v10, %s7320_s9  ;;  %316 = vrot.lane.b32.xlu0 %v7488_v13, %s7319_s15  ;;  %s7336_s15 = smov 80  }
  0x37   : > { %533 = vrot.lane.b32.xlu1 %v7471_v9, %s7320_s9  ;;  %531 = vrot.lane.b32.xlu0 %v7484_v12, %s7320_s9 }
  0x3b   : > { %527 = vrot.lane.b32.xlu1 %v7488_v13, %s7320_s9  ;;  %535 = vrot.lane.b32.xlu0 %v7480_v11, %s7320_s9  ;;  %s7332_s9 = smov 84  }
  0x3f   : > { %655 = vrot.lane.b32.xlu1 %v7484_v12, %s7321_s10  ;;  %653 = vrot.lane.b32.xlu0 %v7474_v10, %s7321_s10 }
  0x43   : > { %659 = vrot.lane.b32.xlu1 %v7480_v11, %s7321_s10  ;;  %657 = vrot.lane.b32.xlu0 %v7471_v9, %s7321_s10 }
  0x47   : > { %777 = vrot.lane.b32.xlu1 %v7474_v10, %s7322_s11  ;;  %651 = vrot.lane.b32.xlu0 %v7488_v13, %s7321_s10  ;;  %s7354_s10 = smov 17  }
  0x4b   : > { %781 = vrot.lane.b32.xlu1 %v7471_v9, %s7322_s11  ;;  %779 = vrot.lane.b32.xlu0 %v7484_v12, %s7322_s11 }
  0x4f   : > { %775 = vrot.lane.b32.xlu1 %v7488_v13, %s7322_s11  ;;  %783 = vrot.lane.b32.xlu0 %v7480_v11, %s7322_s11 }
  0x53   : > { %903 = vrot.lane.b32.xlu1 %v7484_v12, %s7323_s12  ;;  %901 = vrot.lane.b32.xlu0 %v7474_v10, %s7323_s12 }
  0x57   : > { %907 = vrot.lane.b32.xlu1 %v7480_v11, %s7323_s12  ;;  %905 = vrot.lane.b32.xlu0 %v7471_v9, %s7323_s12 }
  0x5b   : > { %1025 = vrot.lane.b32.xlu1 %v7474_v10, %s7324_s13  ;;  %899 = vrot.lane.b32.xlu0 %v7488_v13, %s7323_s12 }
  0x5f   : > { %1029 = vrot.lane.b32.xlu1 %v7471_v9, %s7324_s13  ;;  %1027 = vrot.lane.b32.xlu0 %v7484_v12, %s7324_s13 }
  0x63   : > { %1023 = vrot.lane.b32.xlu1 %v7488_v13, %s7324_s13  ;;  %1031 = vrot.lane.b32.xlu0 %v7480_v11, %s7324_s13 }
  0x67   : > { %1151 = vrot.lane.b32.xlu1 %v7484_v12, %s7325_s14  ;;  %1149 = vrot.lane.b32.xlu0 %v7474_v10, %s7325_s14 }
  0x6b   : > { %1155 = vrot.lane.b32.xlu1 %v7480_v11, %s7325_s14  ;;  %1153 = vrot.lane.b32.xlu0 %v7471_v9, %s7325_s14 }
  0x6f   : > { %1273 = vrot.lane.b32.xlu1 %v7474_v10, %s7326_s22  ;;  %1147 = vrot.lane.b32.xlu0 %v7488_v13, %s7325_s14  ;;  %s7337_s14 = smov 79  }
  0x73   : > { %1277 = vrot.lane.b32.xlu1 %v7471_v9, %s7326_s22  ;;  %1275 = vrot.lane.b32.xlu0 %v7484_v12, %s7326_s22 }
  0x77   : > { %1271 = vrot.lane.b32.xlu1 %v7488_v13, %s7326_s22  ;;  %1279 = vrot.lane.b32.xlu0 %v7480_v11, %s7326_s22  ;;  %s7333_s22 = smov 83  }
  0x7b   : > { %1399 = vrot.lane.b32.xlu1 %v7484_v12, %s7327_s23  ;;  %1397 = vrot.lane.b32.xlu0 %v7474_v10, %s7327_s23 }
  0x7f   : > { %1403 = vrot.lane.b32.xlu1 %v7480_v11, %s7327_s23  ;;  %1401 = vrot.lane.b32.xlu0 %v7471_v9, %s7327_s23 }
  0x83   : > { %1521 = vrot.lane.b32.xlu1 %v7474_v10, %s7328_s24  ;;  %1395 = vrot.lane.b32.xlu0 %v7488_v13, %s7327_s23  ;;  %s7342_s23 = smov 59  }
  0x87   : > { %1525 = vrot.lane.b32.xlu1 %v7471_v9, %s7328_s24  ;;  %1523 = vrot.lane.b32.xlu0 %v7484_v12, %s7328_s24 }
  0x8b   : > { %1519 = vrot.lane.b32.xlu1 %v7488_v13, %s7328_s24  ;;  %1527 = vrot.lane.b32.xlu0 %v7480_v11, %s7328_s24  ;;  %s7338_s24 = smov 78  }
  0x8f   : > { %1647 = vrot.lane.b32.xlu1 %v7484_v12, %s7329_s26  ;;  %1645 = vrot.lane.b32.xlu0 %v7474_v10, %s7329_s26 }
  0x93   : > { %1651 = vrot.lane.b32.xlu1 %v7480_v11, %s7329_s26  ;;  %1649 = vrot.lane.b32.xlu0 %v7471_v9, %s7329_s26 }
  0x97   : > { %1769 = vrot.lane.b32.xlu1 %v7474_v10, %s7330_s29  ;;  %1643 = vrot.lane.b32.xlu0 %v7488_v13, %s7329_s26  ;;  %s7334_s26 = smov 82  }
  0x9b   : > { %1773 = vrot.lane.b32.xlu1 %v7471_v9, %s7330_s29  ;;  %1771 = vrot.lane.b32.xlu0 %v7484_v12, %s7330_s29 }
  0x9d   : > { %v323_v14 = vpop.permute.xlu1 %322  ;;  %v319_v15 = vpop.permute.xlu0 %318 }
  0x9f   : > { %1767 = vrot.lane.b32.xlu1 %v7488_v13, %s7330_s29  ;;  %1775 = vrot.lane.b32.xlu0 %v7480_v11, %s7330_s29  ;;  %s7343_s29 = smov 58  }
  0xa1   : > { %v325_v16 = vpop.permute.xlu1 %324  ;;  %v321_v17 = vpop.permute.xlu0 %320 }
  0xa2   : > { %v330_v18 = vsel %vm326_vm0, %v323_v14, %v325_v16  ;;  %v328_v19 = vsel %vm326_vm0, %v319_v15, %v321_v17  ;;  %v329_v20 = vsel %vm326_vm0, %v321_v17, %v323_v14  ;;  %v7212_v17 = vld [vmem:[%s8745_s0 + $0x28] sm:$0xff]  }
  0xa3   : > { %382 = vmatprep.subr.bf16.mxu1 %v330_v18  ;;  %1895 = vrot.lane.b32.xlu1 %v7484_v12, %s7331_s5 }
  0xa4   : > { %339 = vmatprep.subr.bf16.mxu0 %v328_v19  ;;  %1893 = vrot.lane.b32.xlu0 %v7474_v10, %s7331_s5 }
  0xa5   : > { %383 = vmatpush1.bf16.msra.mxu1 %v329_v20  ;;  %v530_v22 = vpop.permute.xlu1 %529  ;;  %v317_v23 = vpop.permute.xlu0 %316 }
  0xa6   : > { %476 = vmatprep.subr.bf16.mxu1 %v7471_v9  ;;  %v327_v24 = vsel %vm326_vm0, %v317_v23, %v319_v15  ;;  %vm2273_vm0 = vcmask 670720  }
  0xa7   : > { %1899 = vrot.lane.b32.xlu1 %v7480_v11, %s7331_s5  ;;  %340 = vmatpush1.bf16.msra.mxu0 %v327_v24 }
  0xa8   : > { %6481 = vmatmul.mubr.msk.bf16.vlgmr.msra.gmra.mrb[0].mxu1 %vm335_vm1, %v7207_v21  ;;  %1897 = vrot.lane.b32.xlu0 %v7471_v9, %s7331_s5 }
  0xa9   : > { %v534_v25 = vpop.permute.xlu1 %533  ;;  %477 = vmatpush1.bf16.msra.mxu1 %v7484_v12  ;;  %v532_v26 = vpop.permute.xlu0 %531  ;;  %433 = vmatprep.subr.bf16.mxu0 %v7474_v10 }
  0xaa   : > { %508 = vmatprep.mubr.bf16.mxu1 %v7318_v8  ;;  %v539_v27 = vsel %vm537_vm2, %v530_v22, %v532_v26  ;;  %6480 = vmatmul.mubr.msk.bf16.vlgmr.msra.gmra.mrb[0].mxu0 %vm335_vm1, %v7207_v21  ;;  %v540_v34 = vsel %vm537_vm2, %v532_v26, %v534_v25 }
  0xab   : > { %2017 = vrot.lane.b32.xlu1 %v7474_v10, %s7332_s9  ;;  %434 = vmatpush1.bf16.msra.mxu0 %v7488_v13 }
  0xac   : > { %1891 = vrot.lane.b32.xlu0 %v7488_v13, %s7331_s5  ;;  %465 = vmatprep.mubr.bf16.mxu0 %v7318_v8  ;;  %s7339_s5 = smov 62  }
  0xad   : > { %v528_v28 = vpop.permute.xlu1 %527  ;;  %v536_v29 = vpop.permute.xlu0 %535  ;;  %549 = vmatprep.subr.bf16.mxu0 %v539_v27 }
  0xae   : > { %v541_v30 = vsel %vm537_vm2, %v534_v25, %v536_v29  ;;  %v538_v36 = vsel %vm537_vm2, %v528_v28, %v530_v22  ;;  %v7213_v28 = vld [vmem:[%s8745_s0 + $0x30] sm:$0xff]   ;;  %vm2397_vm2 = vcmask 662528  }
  0xaf   : > { %2021 = vrot.lane.b32.xlu1 %v7471_v9, %s7332_s9  ;;  %592 = vmatprep.subr.bf16.mxu1 %v541_v30 }
  0xb0   : > { %2019 = vrot.lane.b32.xlu0 %v7484_v12, %s7332_s9 }
  0xb1   : > { %v656_v32 = vpop.permute.xlu1 %655  ;;  %v654_v33 = vpop.permute.xlu0 %653 }
  0xb2   : > { %v663_v38 = vsel %vm661_vm3, %v654_v33, %v656_v32 }
  0xb3   : > { %2015 = vrot.lane.b32.xlu1 %v7488_v13, %s7332_s9 }
  0xb4   : > { %6484 = vmatmul.mubr.msk.bf16.vlgmr.msra.gmra.mrb[0].mxu1 %vm335_vm1, %v7208_v31  ;;  %2023 = vrot.lane.b32.xlu0 %v7480_v11, %s7332_s9  ;;  %s7340_s9 = smov 61  }
  0xb5   : > { %593 = vmatpush1.bf16.msra.mxu1 %v540_v34  ;;  %v660_v35 = vpop.permute.xlu1 %659  ;;  %624 = vmatprep.mubr.bf16.mxu1 %v7318_v8  ;;  %v658_v37 = vpop.permute.xlu0 %657 }
  0xb6   : > { %v665_v39 = vsel %vm661_vm3, %v658_v37, %v660_v35  ;;  %6483 = vmatmul.mubr.msk.bf16.vlgmr.msra.gmra.mrb[0].mxu0 %vm335_vm1, %v7208_v31  ;;  %v664_v45 = vsel %vm661_vm3, %v656_v32, %v658_v37 }
  0xb7   : > { %2143 = vrot.lane.b32.xlu1 %v7484_v12, %s7333_s22  ;;  %550 = vmatpush1.bf16.msra.mxu0 %v538_v36 }
  0xb8   : > { %2141 = vrot.lane.b32.xlu0 %v7474_v10, %s7333_s22  ;;  %716 = vmatprep.subr.bf16.mxu1 %v665_v39  ;;  %v7214_v39 = vld [vmem:[%s8745_s0 + $0x38] sm:$0xff]  }
  0xb9   : > { %v778_v40 = vpop.permute.xlu1 %777  ;;  %v652_v41 = vpop.permute.xlu0 %651  ;;  %673 = vmatprep.subr.bf16.mxu0 %v663_v38  ;;  %581 = vmatprep.mubr.bf16.mxu0 %v7318_v8 }
  0xba   : > { %v662_v47 = vsel %vm661_vm3, %v652_v41, %v654_v33  ;;  %vm2521_vm3 = vcmask 654336  }
  0xbb   : > { %2147 = vrot.lane.b32.xlu1 %v7480_v11, %s7333_s22 }
  0xbc   : > { %2145 = vrot.lane.b32.xlu0 %v7471_v9, %s7333_s22 }
  0xbd   : > { %v782_v43 = vpop.permute.xlu1 %781  ;;  %v780_v44 = vpop.permute.xlu0 %779 }
  0xbe   : > { %v7617_v49 = vsel %vm785_vm4, %v778_v40, %v780_v44  ;;  %v7636_v56 = vsel %vm785_vm4, %v780_v44, %v782_v43 }
  0xbf   : > { %2265 = vrot.lane.b32.xlu1 %v7474_v10, %s7334_s26 }
  0xc0   : > { %2139 = vrot.lane.b32.xlu0 %v7488_v13, %s7333_s22  ;;  %6489 = vmatmul.mubr.msk.bf16.vlgmr.msra.gmra.mrb[0].mxu1 %vm335_vm1, %v7209_v42  ;;  %s7341_s22 = smov 60  }
  0xc1   : > { %717 = vmatpush1.bf16.msra.mxu1 %v664_v45  ;;  %v776_v46 = vpop.permute.xlu1 %775  ;;  %748 = vmatprep.mubr.bf16.mxu1 %v7318_v8  ;;  %v7613_v48 = vpop.permute.xlu0 %783 }
  0xc2   : > { %v7621_v50 = vsel %vm785_vm4, %v782_v43, %v7613_v48  ;;  %6488 = vmatmul.mubr.msk.bf16.vlgmr.msra.gmra.mrb[0].mxu0 %vm335_vm1, %v7209_v42  ;;  %v786_v59 = vsel %vm785_vm4, %v776_v46, %v778_v40 }
  0xc3   : > { %2269 = vrot.lane.b32.xlu1 %v7471_v9, %s7334_s26  ;;  %674 = vmatpush1.bf16.msra.mxu0 %v662_v47 }
  0xc4   : > { %2267 = vrot.lane.b32.xlu0 %v7484_v12, %s7334_s26  ;;  %840 = vmatprep.subr.bf16.mxu1 %v7621_v50 }
  0xc5   : > { %v904_v51 = vpop.permute.xlu1 %903  ;;  %v902_v52 = vpop.permute.xlu0 %901  ;;  %797 = vmatprep.subr.bf16.mxu0 %v7617_v49  ;;  %705 = vmatprep.mubr.bf16.mxu0 %v7318_v8 }
  0xc6   : > { %v7651_v61 = vsel %vm909_vm5, %v902_v52, %v904_v51 }
  0xc7   : > { %2263 = vrot.lane.b32.xlu1 %v7488_v13, %s7334_s26 }
  0xc8   : > { %2271 = vrot.lane.b32.xlu0 %v7480_v11, %s7334_s26  ;;  %s7351_s26 = smov 35  }
  0xc9   : > { %v7633_v54 = vpop.permute.xlu1 %907  ;;  %v906_v55 = vpop.permute.xlu0 %905 }
  0xca   : > { %v7641_v57 = vsel %vm909_vm5, %v906_v55, %v7633_v54  ;;  %v7665_v3 = vsel %vm909_vm5, %v904_v51, %v906_v55 }
  0xcb   : > { %2391 = vrot.lane.b32.xlu1 %v7484_v12, %s7335_s6 }
  0xcc   : > { %2389 = vrot.lane.b32.xlu0 %v7474_v10, %s7335_s6  ;;  %6494 = vmatmul.mubr.msk.bf16.vlgmr.msra.gmra.mrb[0].mxu1 %vm335_vm1, %v7210_v53 }
  0xcd   : > { %841 = vmatpush1.bf16.msra.mxu1 %v7636_v56  ;;  %v1026_v58 = vpop.permute.xlu1 %1025  ;;  %872 = vmatprep.mubr.bf16.mxu1 %v7318_v8  ;;  %v900_v60 = vpop.permute.xlu0 %899 }
  0xce   : > { %964 = vmatprep.subr.bf16.mxu1 %v7641_v57  ;;  %6493 = vmatmul.mubr.msk.bf16.vlgmr.msra.gmra.mrb[0].mxu0 %vm335_vm1, %v7210_v53  ;;  %v910_v6 = vsel %vm909_vm5, %v900_v60, %v902_v52  ;;  %v7215_v53 = vld [vmem:[%s8745_s0 + $0x40] sm:$0xff]  }
  0xcf   : > { %2395 = vrot.lane.b32.xlu1 %v7480_v11, %s7335_s6  ;;  %798 = vmatpush1.bf16.msra.mxu0 %v786_v59 }
  0xd0   : > { %2393 = vrot.lane.b32.xlu0 %v7471_v9, %s7335_s6  ;;  %829 = vmatprep.mubr.bf16.mxu0 %v7318_v8 }
  0xd1   : > { %v1030_v62 = vpop.permute.xlu1 %1029  ;;  %v1028_v63 = vpop.permute.xlu0 %1027  ;;  %921 = vmatprep.subr.bf16.mxu0 %v7651_v61 }
  0xd2   : > { %v7680_v14 = vsel %vm1033_vm6, %v1026_v58, %v1028_v63  ;;  %v7694_v20 = vsel %vm1033_vm6, %v1028_v63, %v1030_v62 }
  0xd3   : > { %2513 = vrot.lane.b32.xlu1 %v7474_v10, %s7336_s15 }
  0xd4   : > { %2387 = vrot.lane.b32.xlu0 %v7488_v13, %s7335_s6  ;;  %s7357_s6 = smov 14  }
  0xd5   : > { %v1024_v1 = vpop.permute.xlu1 %1023  ;;  %v7662_v2 = vpop.permute.xlu0 %1031 }
  0xd6   : > { %v7670_v4 = vsel %vm1033_vm6, %v1030_v62, %v7662_v2  ;;  %v1034_v23 = vsel %vm1033_vm6, %v1024_v1, %v1026_v58 }
  0xd7   : > { %2517 = vrot.lane.b32.xlu1 %v7471_v9, %s7336_s15 }
  0xd8   : > { %2515 = vrot.lane.b32.xlu0 %v7484_v12, %s7336_s15  ;;  %6499 = vmatmul.mubr.msk.bf16.vlgmr.msra.gmra.mrb[0].mxu1 %vm335_vm1, %v7211_v0 }
  0xd9   : > { %965 = vmatpush1.bf16.msra.mxu1 %v7665_v3  ;;  %v1152_v5 = vpop.permute.xlu1 %1151  ;;  %996 = vmatprep.mubr.bf16.mxu1 %v7318_v8  ;;  %v1150_v7 = vpop.permute.xlu0 %1149 }
  0xda   : > { %1088 = vmatprep.subr.bf16.mxu1 %v7670_v4  ;;  %6498 = vmatmul.mubr.msk.bf16.vlgmr.msra.gmra.mrb[0].mxu0 %vm335_vm1, %v7211_v0  ;;  %v1159_v25 = vsel %vm1157_vm7, %v1150_v7, %v1152_v5 }
  0xdb   : > { %2511 = vrot.lane.b32.xlu1 %v7488_v13, %s7336_s15  ;;  %922 = vmatpush1.bf16.msra.mxu0 %v910_v6 }
  0xdc   : > { %2519 = vrot.lane.b32.xlu0 %v7480_v11, %s7336_s15  ;;  %953 = vmatprep.mubr.bf16.mxu0 %v7318_v8  ;;  %s7344_s15 = smov 57  }
  0xdd   : > { %v1156_v15 = vpop.permute.xlu1 %1155  ;;  %v1154_v16 = vpop.permute.xlu0 %1153  ;;  %1045 = vmatprep.subr.bf16.mxu0 %v7680_v14 }
  0xde   : > { %v1161_v21 = vsel %vm1157_vm7, %v1154_v16, %v1156_v15  ;;  %v1160_v31 = vsel %vm1157_vm7, %v1152_v5, %v1154_v16 }
  0xdf   : > { %2639 = vrot.lane.b32.xlu1 %v7484_v12, %s7337_s14 }
  0xe0   : > { %2637 = vrot.lane.b32.xlu0 %v7474_v10, %s7337_s14 }
  0xe1   : > { %v7691_v18 = vpop.permute.xlu1 %1273  ;;  %v1148_v19 = vpop.permute.xlu0 %1147 }
  0xe2   : > { %v1158_v34 = vsel %vm1157_vm7, %v1148_v19, %v1150_v7  ;;  %v7216_v7 = vld [vmem:[%s8745_s0 + $0x48] sm:$0xff]   ;;  %vm2645_vm7 = vcmask 646144  }
  0xe3   : > { %2643 = vrot.lane.b32.xlu1 %v7480_v11, %s7337_s14 }
  0xe4   : > { %2641 = vrot.lane.b32.xlu0 %v7471_v9, %s7337_s14  ;;  %6504 = vmatmul.mubr.msk.bf16.vlgmr.msra.gmra.mrb[0].mxu1 %vm335_vm1, %v7212_v17 }
  0xe5   : > { %1089 = vmatpush1.bf16.msra.mxu1 %v7694_v20  ;;  %v1278_v22 = vpop.permute.xlu1 %1277  ;;  %1120 = vmatprep.mubr.bf16.mxu1 %v7318_v8  ;;  %v1276_v24 = vpop.permute.xlu0 %1275 }
  0xe6   : > { %1212 = vmatprep.subr.bf16.mxu1 %v1161_v21  ;;  %6503 = vmatmul.mubr.msk.bf16.vlgmr.msra.gmra.mrb[0].mxu0 %vm335_vm1, %v7212_v17  ;;  %v1283_v36 = vsel %vm1281_vm8, %v7691_v18, %v1276_v24  ;;  %v1284_v42 = vsel %vm1281_vm8, %v1276_v24, %v1278_v22 }
  0xe7   : > { %2761 = vrot.lane.b32.xlu1 %v7474_v10, %s7338_s24  ;;  %1046 = vmatpush1.bf16.msra.mxu0 %v1034_v23 }
  0xe8   : > { %2635 = vrot.lane.b32.xlu0 %v7488_v13, %s7337_s14  ;;  %1077 = vmatprep.mubr.bf16.mxu0 %v7318_v8  ;;  %s7345_s14 = smov 56  }
  0xe9   : > { %v1272_v26 = vpop.permute.xlu1 %1271  ;;  %v1280_v27 = vpop.permute.xlu0 %1279  ;;  %1169 = vmatprep.subr.bf16.mxu0 %v1159_v25 }
  0xea   : > { %v1285_v32 = vsel %vm1281_vm8, %v1278_v22, %v1280_v27  ;;  %v1282_v45 = vsel %vm1281_vm8, %v1272_v26, %v7691_v18  ;;  %v7217_v26 = vld [vmem:[%s8745_s0 + $0x50] sm:$0xff]   ;;  %vm2769_vm8 = vcmask 637952  }
  0xeb   : > { %2765 = vrot.lane.b32.xlu1 %v7471_v9, %s7338_s24 }
  0xec   : > { %2763 = vrot.lane.b32.xlu0 %v7484_v12, %s7338_s24 }
  0xed   : > { %v1400_v29 = vpop.permute.xlu1 %1399  ;;  %v7713_v30 = vpop.permute.xlu0 %1397 }
  0xee   : > { %v1407_v47 = vsel %vm1405_vm9, %v7713_v30, %v1400_v29 }
  0xef   : > { %2759 = vrot.lane.b32.xlu1 %v7488_v13, %s7338_s24 }
  0xf0   : > { %2767 = vrot.lane.b32.xlu0 %v7480_v11, %s7338_s24  ;;  %6509 = vmatmul.mubr.msk.bf16.vlgmr.msra.gmra.mrb[0].mxu1 %vm335_vm1, %v7213_v28  ;;  %s7346_s24 = smov 40  }
  0xf1   : > { %1213 = vmatpush1.bf16.msra.mxu1 %v1160_v31  ;;  %v1404_v33 = vpop.permute.xlu1 %1403  ;;  %1244 = vmatprep.mubr.bf16.mxu1 %v7318_v8  ;;  %v1402_v35 = vpop.permute.xlu0 %1401 }
  0xf2   : > { %1336 = vmatprep.subr.bf16.mxu1 %v1285_v32  ;;  %6508 = vmatmul.mubr.msk.bf16.vlgmr.msra.gmra.mrb[0].mxu0 %vm335_vm1, %v7213_v28  ;;  %v1409_v43 = vsel %vm1405_vm9, %v1402_v35, %v1404_v33  ;;  %v1408_v59 = vsel %vm1405_vm9, %v1400_v29, %v1402_v35 }
  0xf3   : > { %2887 = vrot.lane.b32.xlu1 %v7484_v12, %s7339_s5  ;;  %1170 = vmatpush1.bf16.msra.mxu0 %v1158_v34 }
  0xf4   : > { %2885 = vrot.lane.b32.xlu0 %v7474_v10, %s7339_s5  ;;  %1201 = vmatprep.mubr.bf16.mxu0 %v7318_v8 }
  0xf5   : > { %v7727_v37 = vpop.permute.xlu1 %1521  ;;  %v1396_v38 = vpop.permute.xlu0 %1395  ;;  %1293 = vmatprep.subr.bf16.mxu0 %v1283_v36 }
  0xf6   : > { %v1406_v63 = vsel %vm1405_vm9, %v1396_v38, %v7713_v30  ;;  %vm2893_vm9 = vcmask 506880  }
  0xf7   : > { %2891 = vrot.lane.b32.xlu1 %v7480_v11, %s7339_s5 }
  0xf8   : > { %2889 = vrot.lane.b32.xlu0 %v7471_v9, %s7339_s5 }
  0xf9   : > { %v1526_v40 = vpop.permute.xlu1 %1525  ;;  %v1524_v41 = vpop.permute.xlu0 %1523 }
  0xfa   : > { %v1531_v1 = vsel %vm1529_vm10, %v7727_v37, %v1524_v41  ;;  %v1532_v17 = vsel %vm1529_vm10, %v1524_v41, %v1526_v40 }
  0xfb   : > { %3009 = vrot.lane.b32.xlu1 %v7474_v10, %s7340_s9 }
  0xfc   : > { %2883 = vrot.lane.b32.xlu0 %v7488_v13, %s7339_s5  ;;  %6514 = vmatmul.mubr.msk.bf16.vlgmr.msra.gmra.mrb[0].mxu1 %vm335_vm1, %v7214_v39  ;;  %s7348_s5 = smov 38  }
  0xfd   : > { %1337 = vmatpush1.bf16.msra.mxu1 %v1284_v42  ;;  %v1520_v44 = vpop.permute.xlu1 %1519  ;;  %1368 = vmatprep.mubr.bf16.mxu1 %v7318_v8  ;;  %v1528_v46 = vpop.permute.xlu0 %1527 }
  0xfe   : > { %1460 = vmatprep.subr.bf16.mxu1 %v1409_v43  ;;  %6513 = vmatmul.mubr.msk.bf16.vlgmr.msra.gmra.mrb[0].mxu0 %vm335_vm1, %v7214_v39  ;;  %v1533_v60 = vsel %vm1529_vm10, %v1526_v40, %v1528_v46  ;;  %v1530_v21 = vsel %vm1529_vm10, %v1520_v44, %v7727_v37  ;;  %v7218_v37 = vld [vmem:[%s8745_s0 + $0x58] sm:$0xff]   ;;  %vm3017_vm10 = vcmask 498688  }
  0xff   : > { %3013 = vrot.lane.b32.xlu1 %v7471_v9, %s7340_s9  ;;  %1294 = vmatpush1.bf16.msra.mxu0 %v1282_v45 }
 0x100   : > { %3011 = vrot.lane.b32.xlu0 %v7484_v12, %s7340_s9  ;;  %1325 = vmatprep.mubr.bf16.mxu0 %v7318_v8 }
 0x101   : > { %v7748_v51 = vpop.permute.xlu1 %1647  ;;  %v7751_v52 = vpop.permute.xlu0 %1645  ;;  %1417 = vmatprep.subr.bf16.mxu0 %v1407_v47  ;;  %v7219_v47 = vld [vmem:[%s8745_s0 + $0x60] sm:$0xff]  }
 0x102   : > { %v1655_v23 = vsel %vm1653_vm11, %v7751_v52, %v7748_v51 }
 0x103   : > { %3007 = vrot.lane.b32.xlu1 %v7488_v13, %s7340_s9 }
 0x104   : > { %3015 = vrot.lane.b32.xlu0 %v7480_v11, %s7340_s9  ;;  %s7349_s9 = smov 37  }
 0x105   : > { %v1652_v55 = vpop.permute.xlu1 %1651  ;;  %v1650_v58 = vpop.permute.xlu0 %1649 }
 0x106   : > { %v1657_v18 = vsel %vm1653_vm11, %v1650_v58, %v1652_v55  ;;  %v1656_v29 = vsel %vm1653_vm11, %v7748_v51, %v1650_v58 }
 0x107   : > { %3135 = vrot.lane.b32.xlu1 %v7484_v12, %s7341_s22 }
 0x108   : > { %3133 = vrot.lane.b32.xlu0 %v7474_v10, %s7341_s22  ;;  %6519 = vmatmul.mubr.msk.bf16.vlgmr.msra.gmra.mrb[0].mxu1 %vm335_vm1, %v7215_v53 }
 0x109   : > { %1461 = vmatpush1.bf16.msra.mxu1 %v1408_v59  ;;  %v7763_v62 = vpop.permute.xlu1 %1769  ;;  %1492 = vmatprep.mubr.bf16.mxu1 %v7318_v8  ;;  %v1644_v0 = vpop.permute.xlu0 %1643 }
 0x10a   : > { %1584 = vmatprep.subr.bf16.mxu1 %v1533_v60  ;;  %6518 = vmatmul.mubr.msk.bf16.vlgmr.msra.gmra.mrb[0].mxu0 %vm335_vm1, %v7215_v53  ;;  %v1654_v32 = vsel %vm1653_vm11, %v1644_v0, %v7751_v52  ;;  %v7888_v53 = vld [vmem:[%s7468_s7 + $0x4] ss:$16 sps:$4 sm:$0xff]   ;;  %v7907_v60 = vld [vmem:[%s7468_s7 + $0x8] ss:$16 sps:$4 sm:$0xff]   ;;  %v7916_v0 = vld [vmem:[%s7468_s7] ss:$16 sps:$4 sm:$0xff]  }
 0x10b   : > { %3139 = vrot.lane.b32.xlu1 %v7480_v11, %s7341_s22  ;;  %1418 = vmatpush1.bf16.msra.mxu0 %v1406_v63  ;;  %vm3141_vm11 = vcmask 490496  }
 0x10c   : > { %3137 = vrot.lane.b32.xlu0 %v7471_v9, %s7341_s22  ;;  %1449 = vmatprep.mubr.bf16.mxu0 %v7318_v8 }
 0x10d   : > { %v7773_v5 = vpop.permute.xlu1 %1773  ;;  %v7776_v6 = vpop.permute.xlu0 %1771  ;;  %1541 = vmatprep.subr.bf16.mxu0 %v1531_v1  ;;  %v7920_v1 = vld [vmem:[%s7477_s8] ss:$16 sps:$4 sm:$0xff]  }
 0x10e   : > { %v1779_v34 = vsel %vm1777_vm12, %v7763_v62, %v7776_v6  ;;  %v1780_v40 = vsel %vm1777_vm12, %v7776_v6, %v7773_v5 }
 0x10f   : > { %3257 = vrot.lane.b32.xlu1 %v7474_v10, %s7342_s23 }
 0x110   : > { %3131 = vrot.lane.b32.xlu0 %v7488_v13, %s7341_s22  ;;  %s7350_s22 = smov 36  }
 0x111   : > { %v7783_v15 = vpop.permute.xlu1 %1767  ;;  %v1776_v16 = vpop.permute.xlu0 %1775 }
 0x112   : > { %v1781_v30 = vsel %vm1777_vm12, %v7773_v5, %v1776_v16  ;;  %v1778_v42 = vsel %vm1777_vm12, %v7783_v15, %v7763_v62  ;;  %v7220_v5 = vld [vmem:[%s8745_s0 + $0x68] sm:$0xff]   ;;  %vm3265_vm12 = vcmask 482304  }
 0x113   : > { %3261 = vrot.lane.b32.xlu1 %v7471_v9, %s7342_s23 }
 0x114   : > { %3259 = vrot.lane.b32.xlu0 %v7484_v12, %s7342_s23  ;;  %6524 = vmatmul.mubr.msk.bf16.vlgmr.msra.gmra.mrb[0].mxu1 %vm335_vm1, %v7216_v7 }
 0x115   : > { %1585 = vmatpush1.bf16.msra.mxu1 %v1532_v17  ;;  %v7790_v19 = vpop.permute.xlu1 %1895  ;;  %1616 = vmatprep.mubr.bf16.mxu1 %v7318_v8 }
 0x116   : > { %v7795_v22 = vpop.permute.xlu0 %1893  ;;  %1708 = vmatprep.subr.bf16.mxu1 %v1657_v18  ;;  %6523 = vmatmul.mubr.msk.bf16.vlgmr.msra.gmra.mrb[0].mxu0 %vm335_vm1, %v7216_v7 }
 0x117   : > { %3255 = vrot.lane.b32.xlu1 %v7488_v13, %s7342_s23  ;;  %1542 = vmatpush1.bf16.msra.mxu0 %v1530_v21  ;;  %v1903_v44 = vsel %vm1901_vm13, %v7795_v22, %v7790_v19 }
 0x118   : > { %3263 = vrot.lane.b32.xlu0 %v7480_v11, %s7342_s23  ;;  %1573 = vmatprep.mubr.bf16.mxu0 %v7318_v8  ;;  %s7355_s23 = smov 16  }
 0x119   : > { %v1900_v24 = vpop.permute.xlu1 %1899  ;;  %1665 = vmatprep.subr.bf16.mxu0 %v1655_v23 }
 0x11a   : > { %v7804_v25 = vpop.permute.xlu0 %1897 }
 0x11b   : > { %3383 = vrot.lane.b32.xlu1 %v7484_v12, %s7343_s29  ;;  %v1904_v52 = vsel %vm1901_vm13, %v7790_v19, %v7804_v25 }
 0x11c   : > { %3381 = vrot.lane.b32.xlu0 %v7474_v10, %s7343_s29 }
 0x11d   : > { %v7811_v27 = vpop.permute.xlu1 %2017 }
 0x11e   : > { %v7813_v28 = vpop.permute.xlu0 %1891 }
 0x11f   : > { %3387 = vrot.lane.b32.xlu1 %v7480_v11, %s7343_s29  ;;  %v1902_v58 = vsel %vm1901_vm13, %v7813_v28, %v7795_v22 }
 0x120   : > { %3385 = vrot.lane.b32.xlu0 %v7471_v9, %s7343_s29  ;;  %6529 = vmatmul.mubr.msk.bf16.vlgmr.msra.gmra.mrb[0].mxu1 %vm335_vm1, %v7217_v26 }
 0x121   : > { %1709 = vmatpush1.bf16.msra.mxu1 %v1656_v29  ;;  %v7822_v31 = vpop.permute.xlu1 %2021  ;;  %1740 = vmatprep.mubr.bf16.mxu1 %v7318_v8 }
 0x122   : > { %v7827_v33 = vpop.permute.xlu0 %2019  ;;  %1832 = vmatprep.subr.bf16.mxu1 %v1781_v30  ;;  %6528 = vmatmul.mubr.msk.bf16.vlgmr.msra.gmra.mrb[0].mxu0 %vm335_vm1, %v7217_v26 }
 0x123   : > { %3505 = vrot.lane.b32.xlu1 %v7474_v10, %s7344_s15  ;;  %1666 = vmatpush1.bf16.msra.mxu0 %v1654_v32  ;;  %v2028_v15 = vsel %vm2025_vm14, %v7827_v33, %v7822_v31 }
 0x124   : > { %3379 = vrot.lane.b32.xlu0 %v7488_v13, %s7343_s29  ;;  %1697 = vmatprep.mubr.bf16.mxu0 %v7318_v8  ;;  %s7356_s29 = smov 15  }
 0x125   : > { %v7835_v35 = vpop.permute.xlu1 %2015  ;;  %1789 = vmatprep.subr.bf16.mxu0 %v1779_v34 }
 0x126   : > { %v2024_v36 = vpop.permute.xlu0 %2023  ;;  %v2026_v18 = vsel %vm2025_vm14, %v7835_v35, %v7811_v27  ;;  %v7222_v35 = vld [vmem:[%s8745_s0 + $0x78] sm:$0xff]  }
 0x127   : > { %3509 = vrot.lane.b32.xlu1 %v7471_v9, %s7344_s15  ;;  %v1905_v9 = vsel %vm1901_vm13, %v7804_v25, %v1900_v24  ;;  %v7221_v24 = vld [vmem:[%s8745_s0 + $0x70] sm:$0xff]   ;;  %vm3389_vm13 = vcmask 474112  }
 0x128   : > { %3507 = vrot.lane.b32.xlu0 %v7484_v12, %s7344_s15 }
 0x129   : > { %v7843_v38 = vpop.permute.xlu1 %2143 }
 0x12a   : > { %v7845_v39 = vpop.permute.xlu0 %2141 }
 0x12b   : > { %3503 = vrot.lane.b32.xlu1 %v7488_v13, %s7344_s15  ;;  %v2151_v21 = vsel %vm2149_vm15, %v7845_v39, %v7843_v38 }
 0x12c   : > { %3511 = vrot.lane.b32.xlu0 %v7480_v11, %s7344_s15  ;;  %6534 = vmatmul.mubr.msk.bf16.vlgmr.msra.gmra.mrb[0].mxu1 %vm335_vm1, %v7218_v37  ;;  %s6470_s15 = sshll.u32 %s232_s27, 6 }
 0x12d   : > { %1833 = vmatpush1.bf16.msra.mxu1 %v1780_v40  ;;  %v2148_v41 = vpop.permute.xlu1 %2147  ;;  %1864 = vmatprep.mubr.bf16.mxu1 %v7318_v8 }
 0x12e   : > { %v7859_v43 = vpop.permute.xlu0 %2145  ;;  %1956 = vmatprep.subr.bf16.mxu1 %v1905_v9  ;;  %6533 = vmatmul.mubr.msk.bf16.vlgmr.msra.gmra.mrb[0].mxu0 %vm335_vm1, %v7218_v37 }
 0x12f   : > { %3631 = vrot.lane.b32.xlu1 %v7484_v12, %s7345_s14  ;;  %1790 = vmatpush1.bf16.msra.mxu0 %v1778_v42  ;;  %v7874_v12 = vld [vmem:[%s7468_s7 + $0xc] ss:$16 sps:$4 sm:$0xff]   ;;  %s7347_s7 = smov 39   ;;  %v2153_v16 = vsel %vm2149_vm15, %v7859_v43, %v2148_v41 }
 0x130   : > { %3629 = vrot.lane.b32.xlu0 %v7474_v10, %s7345_s14  ;;  %1821 = vmatprep.mubr.bf16.mxu0 %v7318_v8 }
 0x131   : > { %v7867_v45 = vpop.permute.xlu1 %2265  ;;  %1913 = vmatprep.subr.bf16.mxu0 %v1903_v44 }
 0x132   : > { %v7870_v46 = vpop.permute.xlu0 %2139 }
 0x133   : > { %3635 = vrot.lane.b32.xlu1 %v7480_v11, %s7345_s14  ;;  %v2029_v11 = vsel %vm2025_vm14, %v7822_v31, %v2024_v36  ;;  %v2150_v30 = vsel %vm2149_vm15, %v7870_v46, %v7845_v39 }
 0x134   : > { %3633 = vrot.lane.b32.xlu0 %v7874_v12, %s7345_s14 }
 0x135   : > { %v7880_v51 = vpop.permute.xlu1 %2269 }
 0x136   : > { %v7882_v10 = vpop.permute.xlu0 %2267 }
 0x137   : > { %3753 = vrot.lane.b32.xlu1 %v7888_v53, %s7346_s24  ;;  %v2275_v32 = vsel %vm2273_vm0, %v7867_v45, %v7882_v10 }
 0x138   : > { %3627 = vrot.lane.b32.xlu0 %v7488_v13, %s7345_s14  ;;  %6539 = vmatmul.mubr.msk.bf16.vlgmr.msra.gmra.mrb[0].mxu1 %vm335_vm1, %v7219_v47  ;;  %v2027_v13 = vsel %vm2025_vm14, %v7811_v27, %v7827_v33  ;;  %v2152_v27 = vsel %vm2149_vm15, %v7843_v38, %v7859_v43  ;;  %v2276_v38 = vsel %vm2273_vm0, %v7882_v10, %v7880_v51  ;;  %vm3513_vm14 = vcmask 465920   ;;  %s6347_s14 = scalar_lea.vmem (%p7441_p8), %s8749_s4, %s6726_s17 }
 0x139   : > { %1957 = vmatpush1.bf16.msra.mxu1 %v1904_v52  ;;  %v7895_v55 = vpop.permute.xlu1 %2263  ;;  %1988 = vmatprep.mubr.bf16.mxu1 %v7318_v8  ;;  %vm3637_vm15 = vcmask 457728  }
 0x13a   : > { %v2272_v59 = vpop.permute.xlu0 %2271  ;;  %2080 = vmatprep.subr.bf16.mxu1 %v2029_v11  ;;  %6538 = vmatmul.mubr.msk.bf16.vlgmr.msra.gmra.mrb[0].mxu0 %vm335_vm1, %v7219_v47  ;;  %v2274_v9 = vsel %vm2273_vm0, %v7895_v55, %v7867_v45  ;;  %v7223_v45 = vld [vmem:[%s8745_s0 + $0x80] sm:$0xff]  }
 0x13b   : > { %3757 = vrot.lane.b32.xlu1 %v7874_v12, %s7346_s24  ;;  %1914 = vmatpush1.bf16.msra.mxu0 %v1902_v58  ;;  %v2277_v28 = vsel %vm2273_vm0, %v7880_v51, %v2272_v59  ;;  %vm3761_vm0 = vcmask 326656  }
 0x13c   : > { %3755 = vrot.lane.b32.xlu0 %v7907_v60, %s7346_s24  ;;  %1945 = vmatprep.mubr.bf16.mxu0 %v7318_v8 }
 0x13d   : > { %v7910_v62 = vpop.permute.xlu1 %2391  ;;  %2037 = vmatprep.subr.bf16.mxu0 %v2027_v13 }
 0x13e   : > { %v7913_v63 = vpop.permute.xlu0 %2389 }
 0x13f   : > { %3751 = vrot.lane.b32.xlu1 %v7916_v0, %s7346_s24  ;;  %v2399_v42 = vsel %vm2397_vm2, %v7913_v63, %v7910_v62 }
 0x140   : > { %3759 = vrot.lane.b32.xlu0 %v7920_v1, %s7346_s24 }
 0x141   : > { %v2396_v6 = vpop.permute.xlu1 %2395 }
 0x142   : > { %v7926_v7 = vpop.permute.xlu0 %2393 }
 0x143   : > { %3879 = vrot.lane.b32.xlu1 %v7907_v60, %s7347_s7  ;;  %v2401_v39 = vsel %vm2397_vm2, %v7926_v7, %v2396_v6  ;;  %v2400_v51 = vsel %vm2397_vm2, %v7910_v62, %v7926_v7  ;;  %v7224_v62 = vld [vmem:[%s8745_s0 + $0x88] sm:$0xff]  }
 0x144   : > { %3877 = vrot.lane.b32.xlu0 %v7888_v53, %s7347_s7  ;;  %6544 = vmatmul.mubr.msk.bf16.vlgmr.msra.gmra.mrb[0].mxu1 %vm335_vm1, %v7220_v5 }
 0x145   : > { %2081 = vmatpush1.bf16.msra.mxu1 %v2028_v15  ;;  %v7936_v17 = vpop.permute.xlu1 %2513  ;;  %2112 = vmatprep.mubr.bf16.mxu1 %v7318_v8 }
 0x146   : > { %v7942_v19 = vpop.permute.xlu0 %2387  ;;  %2204 = vmatprep.subr.bf16.mxu1 %v2153_v16  ;;  %6543 = vmatmul.mubr.msk.bf16.vlgmr.msra.gmra.mrb[0].mxu0 %vm335_vm1, %v7220_v5 }
 0x147   : > { %3883 = vrot.lane.b32.xlu1 %v7920_v1, %s7347_s7  ;;  %2038 = vmatpush1.bf16.msra.mxu0 %v2026_v18  ;;  %v2398_v11 = vsel %vm2397_vm2, %v7942_v19, %v7913_v63  ;;  %vm3885_vm2 = vcmask 318464  }
 0x148   : > { %3881 = vrot.lane.b32.xlu0 %v7874_v12, %s7347_s7  ;;  %2069 = vmatprep.mubr.bf16.mxu0 %v7318_v8 }
 0x149   : > { %v7950_v22 = vpop.permute.xlu1 %2517  ;;  %2161 = vmatprep.subr.bf16.mxu0 %v2151_v21 }
 0x14a   : > { %v7953_v23 = vpop.permute.xlu0 %2515 }
 0x14b   : > { %4001 = vrot.lane.b32.xlu1 %v7888_v53, %s7348_s5  ;;  %v2523_v58 = vsel %vm2521_vm3, %v7936_v17, %v7953_v23  ;;  %v2524_v6 = vsel %vm2521_vm3, %v7953_v23, %v7950_v22 }
 0x14c   : > { %3875 = vrot.lane.b32.xlu0 %v7916_v0, %s7347_s7 }
 0x14d   : > { %v7960_v25 = vpop.permute.xlu1 %2511 }
 0x14e   : > { %v2520_v26 = vpop.permute.xlu0 %2519  ;;  %v2522_v16 = vsel %vm2521_vm3, %v7960_v25, %v7936_v17  ;;  %v7225_v17 = vld [vmem:[%s8745_s0 + $0x90] sm:$0xff]  }
 0x14f   : > { %4005 = vrot.lane.b32.xlu1 %v7874_v12, %s7348_s5  ;;  %v2525_v10 = vsel %vm2521_vm3, %v7950_v22, %v2520_v26  ;;  %vm4009_vm3 = vcmask 310272  }
 0x150   : > { %4003 = vrot.lane.b32.xlu0 %v7907_v60, %s7348_s5  ;;  %6549 = vmatmul.mubr.msk.bf16.vlgmr.msra.gmra.mrb[0].mxu1 %vm335_vm1, %v7221_v24 }
 0x151   : > { %2205 = vmatpush1.bf16.msra.mxu1 %v2152_v27  ;;  %v7970_v29 = vpop.permute.xlu1 %2639  ;;  %2236 = vmatprep.mubr.bf16.mxu1 %v7318_v8 }
 0x152   : > { %v7976_v31 = vpop.permute.xlu0 %2637  ;;  %2328 = vmatprep.subr.bf16.mxu1 %v2277_v28  ;;  %6548 = vmatmul.mubr.msk.bf16.vlgmr.msra.gmra.mrb[0].mxu0 %vm335_vm1, %v7221_v24 }
 0x153   : > { %3999 = vrot.lane.b32.xlu1 %v7916_v0, %s7348_s5  ;;  %2162 = vmatpush1.bf16.msra.mxu0 %v2150_v30  ;;  %v2647_v19 = vsel %vm2645_vm7, %v7976_v31, %v7970_v29 }
 0x154   : > { %4007 = vrot.lane.b32.xlu0 %v7920_v1, %s7348_s5  ;;  %2193 = vmatprep.mubr.bf16.mxu0 %v7318_v8  ;;  %s7352_s5 = smov 34  }
 0x155   : > { %v7984_v33 = vpop.permute.xlu1 %2643  ;;  %2285 = vmatprep.subr.bf16.mxu0 %v2275_v32 }
 0x156   : > { %v7987_v34 = vpop.permute.xlu0 %2641 }
 0x157   : > { %4127 = vrot.lane.b32.xlu1 %v7907_v60, %s7349_s9  ;;  %v2649_v7 = vsel %vm2645_vm7, %v7987_v34, %v7984_v33  ;;  %v2648_v25 = vsel %vm2645_vm7, %v7970_v29, %v7987_v34 }
 0x158   : > { %4125 = vrot.lane.b32.xlu0 %v7888_v53, %s7349_s9 }
 0x159   : > { %v7994_v36 = vpop.permute.xlu1 %2761 }
 0x15a   : > { %v7996_v37 = vpop.permute.xlu0 %2635 }
 0x15b   : > { %4131 = vrot.lane.b32.xlu1 %v7920_v1, %s7349_s9  ;;  %v2646_v28 = vsel %vm2645_vm7, %v7996_v37, %v7976_v31  ;;  %v7226_v31 = vld [vmem:[%s8745_s0 + $0x98] sm:$0xff]   ;;  %vm4133_vm7 = vcmask 302080  }
 0x15c   : > { %4129 = vrot.lane.b32.xlu0 %v7874_v12, %s7349_s9  ;;  %6554 = vmatmul.mubr.msk.bf16.vlgmr.msra.gmra.mrb[0].mxu1 %vm335_vm1, %v7222_v35 }
 0x15d   : > { %2329 = vmatpush1.bf16.msra.mxu1 %v2276_v38  ;;  %v8006_v40 = vpop.permute.xlu1 %2765  ;;  %2360 = vmatprep.mubr.bf16.mxu1 %v7318_v8 }
 0x15e   : > { %v8012_v41 = vpop.permute.xlu0 %2763  ;;  %2452 = vmatprep.subr.bf16.mxu1 %v2401_v39  ;;  %6553 = vmatmul.mubr.msk.bf16.vlgmr.msra.gmra.mrb[0].mxu0 %vm335_vm1, %v7222_v35 }
 0x15f   : > { %4249 = vrot.lane.b32.xlu1 %v7888_v53, %s7350_s22  ;;  %2286 = vmatpush1.bf16.msra.mxu0 %v2274_v9  ;;  %v2771_v30 = vsel %vm2769_vm8, %v7994_v36, %v8012_v41  ;;  %v2772_v37 = vsel %vm2769_vm8, %v8012_v41, %v8006_v40 }
 0x160   : > { %4123 = vrot.lane.b32.xlu0 %v7916_v0, %s7349_s9  ;;  %2317 = vmatprep.mubr.bf16.mxu0 %v7318_v8  ;;  %s7353_s9 = smov 18  }
 0x161   : > { %v8020_v43 = vpop.permute.xlu1 %2759  ;;  %2409 = vmatprep.subr.bf16.mxu0 %v2399_v42 }
 0x162   : > { %v8023_v44 = vpop.permute.xlu0 %2767  ;;  %v2770_v9 = vsel %vm2769_vm8, %v8020_v43, %v7994_v36  ;;  %v7227_v36 = vld [vmem:[%s8745_s0 + $0xa0] sm:$0xff]  }
 0x163   : > { %4253 = vrot.lane.b32.xlu1 %v7874_v12, %s7350_s22  ;;  %v2773_v26 = vsel %vm2769_vm8, %v8006_v40, %v8023_v44  ;;  %vm4257_vm8 = vcmask 293888  }
 0x164   : > { %4251 = vrot.lane.b32.xlu0 %v7907_v60, %s7350_s22 }
 0x165   : > { %v8030_v46 = vpop.permute.xlu1 %2887 }
 0x166   : > { %v8032_v47 = vpop.permute.xlu0 %2885 }
 0x167   : > { %4247 = vrot.lane.b32.xlu1 %v7916_v0, %s7350_s22  ;;  %v2895_v41 = vsel %vm2893_vm9, %v8032_v47, %v8030_v46 }
 0x168   : > { %4255 = vrot.lane.b32.xlu0 %v7920_v1, %s7350_s22  ;;  %6559 = vmatmul.mubr.msk.bf16.vlgmr.msra.gmra.mrb[0].mxu1 %vm335_vm1, %v7223_v45 }
 0x169   : > { %2453 = vmatpush1.bf16.msra.mxu1 %v2400_v51  ;;  %v8042_v52 = vpop.permute.xlu1 %2891  ;;  %2484 = vmatprep.mubr.bf16.mxu1 %v7318_v8 }
 0x16a   : > { %v8048_v55 = vpop.permute.xlu0 %2889  ;;  %2576 = vmatprep.subr.bf16.mxu1 %v2525_v10  ;;  %6558 = vmatmul.mubr.msk.bf16.vlgmr.msra.gmra.mrb[0].mxu0 %vm335_vm1, %v7223_v45 }
 0x16b   : > { %4375 = vrot.lane.b32.xlu1 %v7907_v60, %s7351_s26  ;;  %2410 = vmatpush1.bf16.msra.mxu0 %v2398_v11  ;;  %v2897_v38 = vsel %vm2893_vm9, %v8048_v55, %v8042_v52  ;;  %v2896_v51 = vsel %vm2893_vm9, %v8030_v46, %v8048_v55 }
 0x16c   : > { %4373 = vrot.lane.b32.xlu0 %v7888_v53, %s7351_s26  ;;  %2441 = vmatprep.mubr.bf16.mxu0 %v7318_v8 }
 0x16d   : > { %v8056_v59 = vpop.permute.xlu1 %3009  ;;  %2533 = vmatprep.subr.bf16.mxu0 %v2523_v58 }
 0x16e   : > { %v8059_v13 = vpop.permute.xlu0 %2883 }
 0x16f   : > { %4379 = vrot.lane.b32.xlu1 %v7920_v1, %s7351_s26  ;;  %v2894_v11 = vsel %vm2893_vm9, %v8059_v13, %v8032_v47  ;;  %v7228_v13 = vld [vmem:[%s8745_s0 + $0xa8] sm:$0xff]   ;;  %vm4381_vm9 = vcmask 285696  }
 0x170   : > { %4377 = vrot.lane.b32.xlu0 %v7874_v12, %s7351_s26 }
 0x171   : > { %v8066_v63 = vpop.permute.xlu1 %3013 }
 0x172   : > { %v8068_v5 = vpop.permute.xlu0 %3011 }
 0x173   : > { %4497 = vrot.lane.b32.xlu1 %v7888_v53, %s7352_s5  ;;  %v3019_v55 = vsel %vm3017_vm10, %v8056_v59, %v8068_v5 }
 0x174   : > { %4371 = vrot.lane.b32.xlu0 %v7916_v0, %s7351_s26  ;;  %6564 = vmatmul.mubr.msk.bf16.vlgmr.msra.gmra.mrb[0].mxu1 %vm335_vm1, %v7224_v62  ;;  %s7361_s26 = smov 120  }
 0x175   : > { %2577 = vmatpush1.bf16.msra.mxu1 %v2524_v6  ;;  %v8079_v15 = vpop.permute.xlu1 %3007  ;;  %2608 = vmatprep.mubr.bf16.mxu1 %v7318_v8 }
 0x176   : > { %v8085_v18 = vpop.permute.xlu0 %3015  ;;  %2700 = vmatprep.subr.bf16.mxu1 %v2649_v7  ;;  %6563 = vmatmul.mubr.msk.bf16.vlgmr.msra.gmra.mrb[0].mxu0 %vm335_vm1, %v7224_v62  ;;  %v3020_v7 = vsel %vm3017_vm10, %v8068_v5, %v8066_v63 }
 0x177   : > { %4501 = vrot.lane.b32.xlu1 %v7874_v12, %s7352_s5  ;;  %2534 = vmatpush1.bf16.msra.mxu0 %v2522_v16  ;;  %v3021_v10 = vsel %vm3017_vm10, %v8066_v63, %v8085_v18  ;;  %v3018_v18 = vsel %vm3017_vm10, %v8079_v15, %v8056_v59  ;;  %v7229_v59 = vld [vmem:[%s8745_s0 + $0xb0] sm:$0xff]   ;;  %vm4505_vm10 = vcmask 277504  }
 0x178   : > { %4499 = vrot.lane.b32.xlu0 %v7907_v60, %s7352_s5  ;;  %2565 = vmatprep.mubr.bf16.mxu0 %v7318_v8 }
 0x179   : > { %v8093_v21 = vpop.permute.xlu1 %3135  ;;  %2657 = vmatprep.subr.bf16.mxu0 %v2647_v19 }
 0x17a   : > { %v8096_v22 = vpop.permute.xlu0 %3133 }
 0x17b   : > { %4495 = vrot.lane.b32.xlu1 %v7916_v0, %s7352_s5  ;;  %v3143_v63 = vsel %vm3141_vm11, %v8096_v22, %v8093_v21 }
 0x17c   : > { %4503 = vrot.lane.b32.xlu0 %v7920_v1, %s7352_s5  ;;  %s7362_s5 = smov 119  }
 0x17d   : > { %v8103_v23 = vpop.permute.xlu1 %3139 }
 0x17e   : > { %v8105_v24 = vpop.permute.xlu0 %3137 }
 0x17f   : > { %4623 = vrot.lane.b32.xlu1 %v7907_v60, %s7353_s9  ;;  %v3145_v16 = vsel %vm3141_vm11, %v8105_v24, %v8103_v23  ;;  %v3144_v23 = vsel %vm3141_vm11, %v8093_v21, %v8105_v24 }
 0x180   : > { %4621 = vrot.lane.b32.xlu0 %v7888_v53, %s7353_s9  ;;  %6569 = vmatmul.mubr.msk.bf16.vlgmr.msra.gmra.mrb[0].mxu1 %vm335_vm1, %v7225_v17 }
 0x181   : > { %2701 = vmatpush1.bf16.msra.mxu1 %v2648_v25  ;;  %v8116_v27 = vpop.permute.xlu1 %3257  ;;  %2732 = vmatprep.mubr.bf16.mxu1 %v7318_v8 }
 0x182   : > { %v8122_v29 = vpop.permute.xlu0 %3131  ;;  %2824 = vmatprep.subr.bf16.mxu1 %v2773_v26  ;;  %6568 = vmatmul.mubr.msk.bf16.vlgmr.msra.gmra.mrb[0].mxu0 %vm335_vm1, %v7225_v17 }
 0x183   : > { %4627 = vrot.lane.b32.xlu1 %v7920_v1, %s7353_s9  ;;  %2658 = vmatpush1.bf16.msra.mxu0 %v2646_v28  ;;  %v3142_v26 = vsel %vm3141_vm11, %v8122_v29, %v8096_v22  ;;  %v7230_v22 = vld [vmem:[%s8745_s0 + $0xb8] sm:$0xff]   ;;  %vm4629_vm11 = vcmask 146432  }
 0x184   : > { %4625 = vrot.lane.b32.xlu0 %v7874_v12, %s7353_s9  ;;  %2689 = vmatprep.mubr.bf16.mxu0 %v7318_v8 }
 0x185   : > { %v8130_v32 = vpop.permute.xlu1 %3261  ;;  %2781 = vmatprep.subr.bf16.mxu0 %v2771_v30 }
 0x186   : > { %v8133_v33 = vpop.permute.xlu0 %3259 }
 0x187   : > { %4745 = vrot.lane.b32.xlu1 %v7888_v53, %s7354_s10  ;;  %v3267_v21 = vsel %vm3265_vm12, %v8116_v27, %v8133_v33 }
 0x188   : > { %4619 = vrot.lane.b32.xlu0 %v7916_v0, %s7353_s9  ;;  %s8704_s9 = scalar_lea.vmem [#allocation4], %s6470_s15 }
 0x189   : > { %v8140_v34 = vpop.permute.xlu1 %3255 }
 0x18a   : > { %v8142_v35 = vpop.permute.xlu0 %3263 }
 0x18b   : > { %4749 = vrot.lane.b32.xlu1 %v7874_v12, %s7354_s10  ;;  %v3269_v25 = vsel %vm3265_vm12, %v8130_v32, %v8142_v35 }
 0x18c   : > { %4747 = vrot.lane.b32.xlu0 %v7907_v60, %s7354_s10  ;;  %6574 = vmatmul.mubr.msk.bf16.vlgmr.msra.gmra.mrb[0].mxu1 %vm335_vm1, %v7226_v31 }
 0x18d   : > { %2825 = vmatpush1.bf16.msra.mxu1 %v2772_v37  ;;  %v8153_v39 = vpop.permute.xlu1 %3383  ;;  %2856 = vmatprep.mubr.bf16.mxu1 %v7318_v8  ;;  %v3266_v37 = vsel %vm3265_vm12, %v8140_v34, %v8116_v27  ;;  %v7232_v27 = vld [vmem:[%s8745_s0 + $0xc0] sm:$0xff]  }
 0x18e   : > { %v8159_v40 = vpop.permute.xlu0 %3381  ;;  %2948 = vmatprep.subr.bf16.mxu1 %v2897_v38  ;;  %6573 = vmatmul.mubr.msk.bf16.vlgmr.msra.gmra.mrb[0].mxu0 %vm335_vm1, %v7226_v31  ;;  %v3268_v31 = vsel %vm3265_vm12, %v8133_v33, %v8130_v32  ;;  %v8299_v32 = vld [vmem:[%s7477_s8 + $0x4] ss:$16 sps:$4 sm:$0xff]   ;;  %vm4753_vm12 = vcmask 138240  }
 0x18f   : > { %4743 = vrot.lane.b32.xlu1 %v7916_v0, %s7354_s10  ;;  %2782 = vmatpush1.bf16.msra.mxu0 %v2770_v9  ;;  %v3391_v33 = vsel %vm3389_vm13, %v8159_v40, %v8153_v39 }
 0x190   : > { %4751 = vrot.lane.b32.xlu0 %v7920_v1, %s7354_s10  ;;  %2813 = vmatprep.mubr.bf16.mxu0 %v7318_v8  ;;  %s7358_s10 = smov 13  }
 0x191   : > { %v8167_v42 = vpop.permute.xlu1 %3387  ;;  %2905 = vmatprep.subr.bf16.mxu0 %v2895_v41 }
 0x192   : > { %v8170_v44 = vpop.permute.xlu0 %3385 }
 0x193   : > { %4871 = vrot.lane.b32.xlu1 %v7907_v60, %s7355_s23  ;;  %v3393_v35 = vsel %vm3389_vm13, %v8170_v44, %v8167_v42  ;;  %v3392_v42 = vsel %vm3389_vm13, %v8153_v39, %v8170_v44 }
 0x194   : > { %4869 = vrot.lane.b32.xlu0 %v7888_v53, %s7355_s23 }
 0x195   : > { %v8177_v43 = vpop.permute.xlu1 %3505 }
 0x196   : > { %v8179_v45 = vpop.permute.xlu0 %3379 }
 0x197   : > { %4875 = vrot.lane.b32.xlu1 %v7920_v1, %s7355_s23 }
 0x198   : > { %4873 = vrot.lane.b32.xlu0 %v7874_v12, %s7355_s23  ;;  %6579 = vmatmul.mubr.msk.bf16.vlgmr.msra.gmra.mrb[0].mxu1 %vm335_vm1, %v7227_v36 }
 0x199   : > { %2949 = vmatpush1.bf16.msra.mxu1 %v2896_v51  ;;  %v8190_v52 = vpop.permute.xlu1 %3509  ;;  %2980 = vmatprep.mubr.bf16.mxu1 %v7318_v8 }
 0x19a   : > { %v8196_v46 = vpop.permute.xlu0 %3507  ;;  %3072 = vmatprep.subr.bf16.mxu1 %v3021_v10  ;;  %6578 = vmatmul.mubr.msk.bf16.vlgmr.msra.gmra.mrb[0].mxu0 %vm335_vm1, %v7227_v36  ;;  %v3390_v36 = vsel %vm3389_vm13, %v8179_v45, %v8159_v40  ;;  %v7233_v40 = vld [vmem:[%s8745_s0 + $0xc8] sm:$0xff]   ;;  %vm5001_vm13 = vcmask 121856  }
 0x19b   : > { %4993 = vrot.lane.b32.xlu1 %v7888_v53, %s7356_s29  ;;  %2906 = vmatpush1.bf16.msra.mxu0 %v2894_v11  ;;  %v3515_v39 = vsel %vm3513_vm14, %v8177_v43, %v8196_v46  ;;  %v3516_v11 = vsel %vm3513_vm14, %v8196_v46, %v8190_v52 }
 0x19c   : > { %4867 = vrot.lane.b32.xlu0 %v7916_v0, %s7355_s23  ;;  %2937 = vmatprep.mubr.bf16.mxu0 %v7318_v8  ;;  %s7359_s23 = smov 12  }
 0x19d   : > { %v8204_v58 = vpop.permute.xlu1 %3503  ;;  %3029 = vmatprep.subr.bf16.mxu0 %v3019_v55 }
 0x19e   : > { %v8207_v47 = vpop.permute.xlu0 %3511 }
 0x19f   : > { %4997 = vrot.lane.b32.xlu1 %v7874_v12, %s7356_s29 }
 0x1a0   : > { %4995 = vrot.lane.b32.xlu0 %v7907_v60, %s7356_s29 }
 0x1a1   : > { %v8214_v62 = vpop.permute.xlu1 %3631 }
 0x1a2   : > { %v8216_v6 = vpop.permute.xlu0 %3629 }
 0x1a3   : > { %4991 = vrot.lane.b32.xlu1 %v7916_v0, %s7356_s29 }
 0x1a4   : > { %4999 = vrot.lane.b32.xlu0 %v7920_v1, %s7356_s29  ;;  %6584 = vmatmul.mubr.msk.bf16.vlgmr.msra.gmra.mrb[0].mxu1 %vm335_vm1, %v7228_v13 }
 0x1a5   : > { %3073 = vmatpush1.bf16.msra.mxu1 %v3020_v7  ;;  %3104 = vmatprep.mubr.bf16.mxu1 %v7318_v8  ;;  %v8235_v5 = vpop.permute.xlu1 %3635 }
 0x1a6   : > { %3196 = vmatprep.subr.bf16.mxu1 %v3145_v16  ;;  %v8237_v19 = vpop.permute.xlu0 %3633  ;;  %6583 = vmatmul.mubr.msk.bf16.vlgmr.msra.gmra.mrb[0].mxu0 %vm335_vm1, %v7228_v13 }
 0x1a7   : > { %5119 = vrot.lane.b32.xlu1 %v7907_v60, %s7357_s6  ;;  %3030 = vmatpush1.bf16.msra.mxu0 %v3018_v18  ;;  %v3641_v55 = vsel %vm3637_vm15, %v8237_v19, %v8235_v5 }
 0x1a8   : > { %5117 = vrot.lane.b32.xlu0 %v7888_v53, %s7357_s6  ;;  %3061 = vmatprep.mubr.bf16.mxu0 %v7318_v8 }
 0x1a9   : > { %3153 = vmatprep.subr.bf16.mxu0 %v3143_v63  ;;  %v8247_v15 = vpop.permute.xlu1 %3753 }
 0x1aa   : > { %v8249_v17 = vpop.permute.xlu0 %3627 }
 0x1ab   : > { %5123 = vrot.lane.b32.xlu1 %v7920_v1, %s7357_s6 }
 0x1ac   : > { %5121 = vrot.lane.b32.xlu0 %v7874_v12, %s7357_s6 }
 0x1ad   : > { %v8268_v24 = vpop.permute.xlu1 %3757 }
 0x1ae   : > { %v8270_v28 = vpop.permute.xlu0 %3755 }
 0x1af   : > { %5241 = vrot.lane.b32.xlu1 %v7888_v53, %s7358_s10  ;;  %v3763_v63 = vsel %vm3761_vm0, %v8247_v15, %v8270_v28 }
 0x1b0   : > { %5115 = vrot.lane.b32.xlu0 %v7916_v0, %s7357_s6  ;;  %6589 = vmatmul.mubr.msk.bf16.vlgmr.msra.gmra.mrb[0].mxu1 %vm335_vm1, %v7229_v59  ;;  %s7363_s6 = smov 118  }
 0x1b1   : > { %3197 = vmatpush1.bf16.msra.mxu1 %v3144_v23  ;;  %3228 = vmatprep.mubr.bf16.mxu1 %v7318_v8  ;;  %v8280_v29 = vpop.permute.xlu1 %3751 }
 0x1b2   : > { %3320 = vmatprep.subr.bf16.mxu1 %v3269_v25  ;;  %6588 = vmatmul.mubr.msk.bf16.vlgmr.msra.gmra.mrb[0].mxu0 %vm335_vm1, %v7229_v59  ;;  %v8282_v30 = vpop.permute.xlu0 %3759  ;;  %v3764_v59 = vsel %vm3761_vm0, %v8270_v28, %v8268_v24 }
 0x1b3   : > { %5245 = vrot.lane.b32.xlu1 %v7874_v12, %s7358_s10  ;;  %3154 = vmatpush1.bf16.msra.mxu0 %v3142_v26  ;;  %v3765_v18 = vsel %vm3761_vm0, %v8268_v24, %v8282_v30 }
 0x1b4   : > { %5243 = vrot.lane.b32.xlu0 %v7907_v60, %s7358_s10  ;;  %3185 = vmatprep.mubr.bf16.mxu0 %v7318_v8 }
 0x1b5   : > { %3277 = vmatprep.subr.bf16.mxu0 %v3267_v21  ;;  %v8304_v38 = vpop.permute.xlu1 %3879 }
 0x1b6   : > { %v8306_v9 = vpop.permute.xlu0 %3877 }
 0x1b7   : > { %5239 = vrot.lane.b32.xlu1 %v7916_v0, %s7358_s10  ;;  %v3887_v26 = vsel %vm3885_vm2, %v8306_v9, %v8304_v38 }
 0x1b8   : > { %5247 = vrot.lane.b32.xlu0 %v7920_v1, %s7358_s10 }
 0x1b9   : > { %v8317_v34 = vpop.permute.xlu1 %3883 }
 0x1ba   : > { %v8319_v41 = vpop.permute.xlu0 %3881 }
 0x1bb   : > { %5367 = vrot.lane.b32.xlu1 %v7907_v60, %s7359_s23  ;;  %v3889_v25 = vsel %vm3885_vm2, %v8319_v41, %v8317_v34 }
 0x1bc   : > { %5365 = vrot.lane.b32.xlu0 %v7888_v53, %s7359_s23  ;;  %6594 = vmatmul.mubr.msk.bf16.vlgmr.msra.gmra.mrb[0].mxu1 %vm335_vm1, %v7230_v22 }
 0x1bd   : > { %3321 = vmatpush1.bf16.msra.mxu1 %v3268_v31  ;;  %3352 = vmatprep.mubr.bf16.mxu1 %v7318_v8  ;;  %v8340_v44 = vpop.permute.xlu1 %4001 }
 0x1be   : > { %3444 = vmatprep.subr.bf16.mxu1 %v3393_v35  ;;  %6593 = vmatmul.mubr.msk.bf16.vlgmr.msra.gmra.mrb[0].mxu0 %vm335_vm1, %v7230_v22  ;;  %v8342_v51 = vpop.permute.xlu0 %3875  ;;  %v7237_v35 = vld [vmem:[%s8745_s0 + $0xe8] sm:$0xff]  }
 0x1bf   : > { %5371 = vrot.lane.b32.xlu1 %v7920_v1, %s7359_s23  ;;  %3278 = vmatpush1.bf16.msra.mxu0 %v3266_v37  ;;  %v3886_v22 = vsel %vm3885_vm2, %v8342_v51, %v8306_v9 }
 0x1c0   : > { %5369 = vrot.lane.b32.xlu0 %v7874_v12, %s7359_s23  ;;  %3309 = vmatprep.mubr.bf16.mxu0 %v7318_v8 }
 0x1c1   : > { %3401 = vmatprep.subr.bf16.mxu0 %v3391_v33  ;;  %v8352_v45 = vpop.permute.xlu1 %4005 }
 0x1c2   : > { %v8354_v10 = vpop.permute.xlu0 %4003 }
 0x1c3   : > { %5487 = vrot.lane.b32.xlu1 %v8299_v32, %s7322_s11  ;;  %s7360_s11 = smov 121   ;;  %v4012_v37 = vsel %vm4009_vm3, %v8354_v10, %v8352_v45 }
 0x1c4   : > { %5363 = vrot.lane.b32.xlu0 %v7916_v0, %s7359_s23  ;;  %v3517_v0 = vsel %vm3513_vm14, %v8190_v52, %v8207_v47  ;;  %v3514_v47 = vsel %vm3513_vm14, %v8204_v58, %v8177_v43  ;;  %v3639_v52 = vsel %vm3637_vm15, %v8216_v6, %v8214_v62  ;;  %v7234_v43 = vld [vmem:[%s8745_s0 + $0xd0] sm:$0xff]   ;;  %v3640_v58 = vsel %vm3637_vm15, %v8214_v62, %v8237_v19 }
 0x1c5   : > { %v8373_v46 = vpop.permute.xlu1 %3999  ;;  %v3638_v62 = vsel %vm3637_vm15, %v8249_v17, %v8216_v6  ;;  %v7235_v6 = vld [vmem:[%s8745_s0 + $0xd8] sm:$0xff]   ;;  %vm5125_vm14 = vcmask 113664   ;;  %vm5249_vm15 = vcmask 105472  }
 0x1c6   : > { %v4008_v13 = vpop.permute.xlu0 %4007  ;;  %v4010_v9 = vsel %vm4009_vm3, %v8373_v46, %v8340_v44 }
 0x1c7   : > { %5705 = vrot.lane.b32.xlu1 %v8299_v32, %s7324_s13  ;;  %v4013_v28 = vsel %vm4009_vm3, %v8352_v45, %v4008_v13 }
 0x1c8   : > { %5596 = vrot.lane.b32.xlu0 %v8299_v32, %s7323_s12  ;;  %6599 = vmatmul.mubr.msk.bf16.vlgmr.msra.gmra.mrb[0].mxu1 %vm335_vm1, %v7232_v27 }
 0x1c9   : > { %3445 = vmatpush1.bf16.msra.mxu1 %v3392_v42  ;;  %3476 = vmatprep.mubr.bf16.mxu1 %v7318_v8  ;;  %v8386_v7 = vpop.permute.xlu1 %4127  ;;  %v7238_v42 = vld [vmem:[%s8745_s0 + $0xf0] sm:$0xff]  }
 0x1ca   : > { %3568 = vmatprep.subr.bf16.mxu1 %v3517_v0  ;;  %6598 = vmatmul.mubr.msk.bf16.vlgmr.msra.gmra.mrb[0].mxu0 %vm335_vm1, %v7232_v27  ;;  %v8388_v16 = vpop.permute.xlu0 %4125 }
 0x1cb   : > { %5818 = vrot.lane.b32.xlu1 %v7874_v12, %s7360_s11  ;;  %3402 = vmatpush1.bf16.msra.mxu0 %v3390_v36  ;;  %v4135_v27 = vsel %vm4133_vm7, %v8388_v16, %v8386_v7 }
 0x1cc   : > { %5816 = vrot.lane.b32.xlu0 %v7907_v60, %s7360_s11  ;;  %3433 = vmatprep.mubr.bf16.mxu0 %v7318_v8 }
 0x1cd   : > { %3525 = vmatprep.subr.bf16.mxu0 %v3515_v39  ;;  %v4132_v5 = vpop.permute.xlu1 %4131 }
 0x1ce   : > { %v8404_v19 = vpop.permute.xlu0 %4129 }
 0x1cf   : > { %5822 = vrot.lane.b32.xlu1 %v8299_v32, %s7360_s11  ;;  %v4136_v0 = vsel %vm4133_vm7, %v8386_v7, %v8404_v19 }
 0x1d0   : > { %5820 = vrot.lane.b32.xlu0 %v7920_v1, %s7360_s11 }
 0x1d1   : > { %v8417_v17 = vpop.permute.xlu1 %4249 }
 0x1d2   : > { %v8419_v23 = vpop.permute.xlu0 %4123 }
 0x1d3   : > { %5940 = vrot.lane.b32.xlu1 %v7907_v60, %s7361_s26  ;;  %v4134_v51 = vsel %vm4133_vm7, %v8419_v23, %v8388_v16  ;;  %v7240_v16 = vld [vmem:[%s8745_s0 + $0x100] sm:$0xff]   ;;  %v7241_v23 = vld [vmem:[%s8745_s0 + $0x108] sm:$0xff]  }
 0x1d4   : > { %6604 = vmatmul.mubr.msk.bf16.vlgmr.msra.gmra.mrb[0].mxu1 %vm335_vm1, %v7233_v40  ;;  %5814 = vrot.lane.b32.xlu0 %v7888_v53, %s7360_s11 }
 0x1d5   : > { %3569 = vmatpush1.bf16.msra.mxu1 %v3516_v11  ;;  %3600 = vmatprep.mubr.bf16.mxu1 %v7318_v8  ;;  %v8435_v21 = vpop.permute.xlu1 %4253  ;;  %v7239_v11 = vld [vmem:[%s8745_s0 + $0xf8] sm:$0xff]  }
 0x1d6   : > { %3692 = vmatprep.subr.bf16.mxu1 %v3641_v55  ;;  %6603 = vmatmul.mubr.msk.bf16.vlgmr.msra.gmra.mrb[0].mxu0 %vm335_vm1, %v7233_v40 }
 0x1d7   : > { %5944 = vrot.lane.b32.xlu1 %v7920_v1, %s7361_s26  ;;  %3526 = vmatpush1.bf16.msra.mxu0 %v3514_v47 }
 0x1d8   : > { %5942 = vrot.lane.b32.xlu0 %v7874_v12, %s7361_s26  ;;  %3557 = vmatprep.mubr.bf16.mxu0 %v7318_v8 }
 0x1d9   : > { %3649 = vmatprep.subr.bf16.mxu0 %v3639_v52 }
 0x1db   : > { %5938 = vrot.lane.b32.xlu1 %v7888_v53, %s7361_s26 }
 0x1dc   : > { %5946 = vrot.lane.b32.xlu0 %v8299_v32, %s7361_s26 }
 0x1df   : > { %6066 = vrot.lane.b32.xlu1 %v7874_v12, %s7362_s5 }
 0x1e0   : > { %6609 = vmatmul.mubr.msk.bf16.vlgmr.msra.gmra.mrb[0].mxu1 %vm335_vm1, %v7234_v43  ;;  %6064 = vrot.lane.b32.xlu0 %v7907_v60, %s7362_s5 }
 0x1e1   : > { %3693 = vmatpush1.bf16.msra.mxu1 %v3640_v58  ;;  %3724 = vmatprep.mubr.bf16.mxu1 %v7318_v8 }
 0x1e2   : > { %3816 = vmatprep.subr.bf16.mxu1 %v3765_v18  ;;  %6608 = vmatmul.mubr.msk.bf16.vlgmr.msra.gmra.mrb[0].mxu0 %vm335_vm1, %v7234_v43 }
 0x1e3   : > { %6070 = vrot.lane.b32.xlu1 %v8299_v32, %s7362_s5  ;;  %3650 = vmatpush1.bf16.msra.mxu0 %v3638_v62 }
 0x1e4   : > { %6068 = vrot.lane.b32.xlu0 %v7920_v1, %s7362_s5  ;;  %3681 = vmatprep.mubr.bf16.mxu0 %v7318_v8 }
 0x1e5   : > { %3773 = vmatprep.subr.bf16.mxu0 %v3763_v63 }
 0x1e7   : > { %6188 = vrot.lane.b32.xlu1 %v7907_v60, %s7363_s6  ;;  %v3762_v60 = vsel %vm3761_vm0, %v8280_v29, %v8247_v15  ;;  %v3888_v15 = vsel %vm3885_vm2, %v8304_v38, %v8319_v41  ;;  %v4011_v29 = vsel %vm4009_vm3, %v8340_v44, %v8354_v10  ;;  %v4137_v38 = vsel %vm4133_vm7, %v8404_v19, %v4132_v5 }
 0x1e8   : > { %6062 = vrot.lane.b32.xlu0 %v7888_v53, %s7362_s5  ;;  %vm5373_vm0 = vcmask 97280   ;;  %vm6196_vm2 = vcmask 965632  }
 0x1eb   : > { %6192 = vrot.lane.b32.xlu1 %v7920_v1, %s7363_s6  ;;  %v4252_v1 = vpop.permute.xlu0 %4251 }
 0x1ec   : > { %6614 = vmatmul.mubr.msk.bf16.vlgmr.msra.gmra.mrb[0].mxu1 %vm335_vm1, %v7235_v6  ;;  %6190 = vrot.lane.b32.xlu0 %v7874_v12, %s7363_s6  ;;  %v7236_v12 = vld [vmem:[%s8745_s0 + $0xe0] sm:$0xff]   ;;  %v4259_v40 = vsel %vm4257_vm8, %v8417_v17, %v4252_v1  ;;  %v4260_v55 = vsel %vm4257_vm8, %v4252_v1, %v8435_v21 }
 0x1ed   : > { %3817 = vmatpush1.bf16.msra.mxu1 %v3764_v59  ;;  %3848 = vmatprep.mubr.bf16.mxu1 %v7318_v8 }
 0x1ee   : > { %3940 = vmatprep.subr.bf16.mxu1 %v3889_v25  ;;  %6613 = vmatmul.mubr.msk.bf16.vlgmr.msra.gmra.mrb[0].mxu0 %vm335_vm1, %v7235_v6 }
 0x1ef   : > { %6186 = vrot.lane.b32.xlu1 %v7888_v53, %s7363_s6  ;;  %3774 = vmatpush1.bf16.msra.mxu0 %v3762_v60  ;;  %v4248_v53 = vpop.permute.xlu1 %4247  ;;  %v4256_v24 = vpop.permute.xlu0 %4255 }
 0x1f0   : > { %6194 = vrot.lane.b32.xlu0 %v8299_v32, %s7363_s6  ;;  %3805 = vmatprep.mubr.bf16.mxu0 %v7318_v8  ;;  %v4261_v44 = vsel %vm4257_vm8, %v8435_v21, %v4256_v24  ;;  %v4258_v13 = vsel %vm4257_vm8, %v4248_v53, %v8417_v17  ;;  %v7242_v24 = vld [vmem:[%s8745_s0 + $0x110] sm:$0xff]  }
 0x1f1   : > { %3897 = vmatprep.subr.bf16.mxu0 %v3887_v26 }
 0x1f3   : > { %v4376_v30 = vpop.permute.xlu1 %4375  ;;  %v8456_v31 = vpop.permute.xlu0 %4373 }
 0x1f4   : > { %v4383_v43 = vsel %vm4381_vm9, %v8456_v31, %v4376_v30 }
 0x1f7   : > { %v4380_v32 = vpop.permute.xlu1 %4379  ;;  %v4378_v33 = vpop.permute.xlu0 %4377 }
 0x1f8   : > { %6619 = vmatmul.mubr.msk.bf16.vlgmr.msra.gmra.mrb[0].mxu1 %vm335_vm1, %v7236_v12  ;;  %v4385_v46 = vsel %vm4381_vm9, %v4378_v33, %v4380_v32  ;;  %v4384_v18 = vsel %vm4381_vm9, %v4376_v30, %v4378_v33  ;;  %v7243_v33 = vld [vmem:[%s8745_s0 + $0x118] sm:$0xff]  }
 0x1f9   : > { %3941 = vmatpush1.bf16.msra.mxu1 %v3888_v15  ;;  %3972 = vmatprep.mubr.bf16.mxu1 %v7318_v8 }
 0x1fa   : > { %4064 = vmatprep.subr.bf16.mxu1 %v4013_v28  ;;  %6618 = vmatmul.mubr.msk.bf16.vlgmr.msra.gmra.mrb[0].mxu0 %vm335_vm1, %v7236_v12 }
 0x1fb   : > { %3898 = vmatpush1.bf16.msra.mxu0 %v3886_v22  ;;  %3929 = vmatprep.mubr.bf16.mxu0 %v7318_v8  ;;  %v8476_v34 = vpop.permute.xlu1 %4497  ;;  %v4372_v41 = vpop.permute.xlu0 %4371 }
 0x1fc   : > { %4021 = vmatprep.subr.bf16.mxu0 %v4011_v29  ;;  %v4382_v19 = vsel %vm4381_vm9, %v4372_v41, %v8456_v31 }
 0x1ff   : > { %v4502_v36 = vpop.permute.xlu1 %4501  ;;  %v4500_v39 = vpop.permute.xlu0 %4499 }
 0x200   : > { %v4507_v6 = vsel %vm4505_vm10, %v8476_v34, %v4500_v39  ;;  %v4508_v25 = vsel %vm4505_vm10, %v4500_v39, %v4502_v36  ;;  %v7244_v39 = vld [vmem:[%s8745_s0 + $0x120] sm:$0xff]  }
 0x203   : > { %v4496_v45 = vpop.permute.xlu1 %4495  ;;  %v4504_v10 = vpop.permute.xlu0 %4503 }
 0x204   : > { %6624 = vmatmul.mubr.msk.bf16.vlgmr.msra.gmra.mrb[0].mxu1 %vm335_vm1, %v7237_v35  ;;  %v4509_v5 = vsel %vm4505_vm10, %v4502_v36, %v4504_v10  ;;  %v4506_v1 = vsel %vm4505_vm10, %v4496_v45, %v8476_v34 }
 0x205   : > { %4065 = vmatpush1.bf16.msra.mxu1 %v4012_v37  ;;  %4096 = vmatprep.mubr.bf16.mxu1 %v7318_v8 }
 0x206   : > { %4188 = vmatprep.subr.bf16.mxu1 %v4137_v38  ;;  %6623 = vmatmul.mubr.msk.bf16.vlgmr.msra.gmra.mrb[0].mxu0 %vm335_vm1, %v7237_v35 }
 0x207   : > { %4022 = vmatpush1.bf16.msra.mxu0 %v4010_v9  ;;  %4053 = vmatprep.mubr.bf16.mxu0 %v7318_v8  ;;  %v4624_v47 = vpop.permute.xlu1 %4623  ;;  %v4622_v52 = vpop.permute.xlu0 %4621 }
 0x208   : > { %4145 = vmatprep.subr.bf16.mxu0 %v4135_v27  ;;  %v4631_v12 = vsel %vm4629_vm11, %v4622_v52, %v4624_v47 }
 0x20b   : > { %v4628_v58 = vpop.permute.xlu1 %4627  ;;  %v4626_v7 = vpop.permute.xlu0 %4625 }
 0x20c   : > { %v4633_v21 = vsel %vm4629_vm11, %v4626_v7, %v4628_v58  ;;  %v4632_v28 = vsel %vm4629_vm11, %v4624_v47, %v4626_v7 }
 0x20f   : > { %v4746_v62 = vpop.permute.xlu1 %4745  ;;  %v4620_v63 = vpop.permute.xlu0 %4619 }
 0x210   : > { %6629 = vmatmul.mubr.msk.bf16.vlgmr.msra.gmra.mrb[0].mxu1 %vm335_vm1, %v7238_v42  ;;  %v4630_v31 = vsel %vm4629_vm11, %v4620_v63, %v4622_v52  ;;  %v7245_v52 = vld [vmem:[%s8745_s0 + $0x128] sm:$0xff]   ;;  %v7246_v63 = vld [vmem:[%s8745_s0 + $0x130] sm:$0xff]  }
 0x211   : > { %4189 = vmatpush1.bf16.msra.mxu1 %v4136_v0  ;;  %4220 = vmatprep.mubr.bf16.mxu1 %v7318_v8 }
 0x212   : > { %4312 = vmatprep.subr.bf16.mxu1 %v4261_v44  ;;  %6628 = vmatmul.mubr.msk.bf16.vlgmr.msra.gmra.mrb[0].mxu0 %vm335_vm1, %v7238_v42 }
 0x213   : > { %4146 = vmatpush1.bf16.msra.mxu0 %v4134_v51  ;;  %4177 = vmatprep.mubr.bf16.mxu0 %v7318_v8  ;;  %v4750_v59 = vpop.permute.xlu1 %4749  ;;  %v4748_v17 = vpop.permute.xlu0 %4747 }
 0x214   : > { %4269 = vmatprep.subr.bf16.mxu0 %v4259_v40  ;;  %v4755_v35 = vsel %vm4753_vm12, %v4746_v62, %v4748_v17  ;;  %v4756_v38 = vsel %vm4753_vm12, %v4748_v17, %v4750_v59 }
 0x217   : > { %v4744_v60 = vpop.permute.xlu1 %4743  ;;  %v4752_v26 = vpop.permute.xlu0 %4751 }
 0x218   : > { %v4757_v30 = vsel %vm4753_vm12, %v4750_v59, %v4752_v26  ;;  %v4754_v41 = vsel %vm4753_vm12, %v4744_v60, %v4746_v62 }
 0x21b   : > { %v4872_v15 = vpop.permute.xlu1 %4871  ;;  %v4870_v53 = vpop.permute.xlu0 %4869 }
 0x21c   : > { %6634 = vmatmul.mubr.msk.bf16.vlgmr.msra.gmra.mrb[0].mxu1 %vm335_vm1, %v7239_v11  ;;  %v4879_v42 = vsel %vm335_vm1, %v4870_v53, %v4872_v15 }
 0x21d   : > { %4313 = vmatpush1.bf16.msra.mxu1 %v4260_v55  ;;  %4344 = vmatprep.mubr.bf16.mxu1 %v7318_v8 }
 0x21e   : > { %4436 = vmatprep.subr.bf16.mxu1 %v4385_v46  ;;  %6633 = vmatmul.mubr.msk.bf16.vlgmr.msra.gmra.mrb[0].mxu0 %vm335_vm1, %v7239_v11 }
 0x21f   : > { %4270 = vmatpush1.bf16.msra.mxu0 %v4258_v13  ;;  %4301 = vmatprep.mubr.bf16.mxu0 %v7318_v8  ;;  %v4876_v22 = vpop.permute.xlu1 %4875  ;;  %v4874_v29 = vpop.permute.xlu0 %4873 }
 0x220   : > { %4393 = vmatprep.subr.bf16.mxu0 %v4383_v43  ;;  %v4881_v34 = vsel %vm335_vm1, %v4874_v29, %v4876_v22  ;;  %v4880_v44 = vsel %vm335_vm1, %v4872_v15, %v4874_v29  ;;  %v7248_v29 = vld [vmem:[%s8745_s0 + $0x140] sm:$0xff]  }
 0x223   : > { %v4994_v37 = vpop.permute.xlu1 %4993  ;;  %v4868_v32 = vpop.permute.xlu0 %4867 }
 0x224   : > { %v4878_v10 = vsel %vm335_vm1, %v4868_v32, %v4870_v53 }
 0x227   : > { %v4998_v9 = vpop.permute.xlu1 %4997  ;;  %v4996_v27 = vpop.permute.xlu0 %4995 }
 0x228   : > { %6639 = vmatmul.mubr.msk.bf16.vlgmr.msra.gmra.mrb[0].mxu1 %vm335_vm1, %v7240_v16  ;;  %v5003_v11 = vsel %vm5001_vm13, %v4994_v37, %v4996_v27  ;;  %v5004_v46 = vsel %vm5001_vm13, %v4996_v27, %v4998_v9 }
 0x229   : > { %4437 = vmatpush1.bf16.msra.mxu1 %v4384_v18  ;;  %4468 = vmatprep.mubr.bf16.mxu1 %v7318_v8 }
 0x22a   : > { %4560 = vmatprep.subr.bf16.mxu1 %v4509_v5  ;;  %6638 = vmatmul.mubr.msk.bf16.vlgmr.msra.gmra.mrb[0].mxu0 %vm335_vm1, %v7240_v16  ;;  %v6302_v5 = vld [vmem:[%s8748_s3] sm:$0xff] }
 0x22b   : > { %4394 = vmatpush1.bf16.msra.mxu0 %v4382_v19  ;;  %4425 = vmatprep.mubr.bf16.mxu0 %v7318_v8  ;;  %v4992_v0 = vpop.permute.xlu1 %4991  ;;  %v5000_v36 = vpop.permute.xlu0 %4999  ;;  %v6303_v19 = vld [vmem:[%s8748_s3 + $0x8] sm:$0xff] }
 0x22c   : > { %4517 = vmatprep.subr.bf16.mxu0 %v4507_v6  ;;  %v5005_v45 = vsel %vm5001_vm13, %v4998_v9, %v5000_v36  ;;  %v5002_v7 = vsel %vm5001_vm13, %v4992_v0, %v4994_v37  ;;  %6306 = vperm.xlu0 %7197, %v6302_v5   ;;  %v7252_v36 = vld [vmem:[%s8745_s0 + $0x160] sm:$0xff]  }
 0x22d   : > { %6311 = vperm.xlu1 %7198, %v6303_v19  }
 0x22f   : > { %v5120_v51 = vpop.permute.xlu1 %5119  ;;  %v5118_v40 = vpop.permute.xlu0 %5117 }
 0x230   : > { %v5127_v16 = vsel %vm5125_vm14, %v5118_v40, %v5120_v51 }
 0x233   : > { %v5124_v55 = vpop.permute.xlu1 %5123  ;;  %v5122_v47 = vpop.permute.xlu0 %5121 }
 0x234   : > { %6644 = vmatmul.mubr.msk.bf16.vlgmr.msra.gmra.mrb[0].mxu1 %vm335_vm1, %v7241_v23  ;;  %v5129_v58 = vsel %vm5125_vm14, %v5122_v47, %v5124_v55  ;;  %v5128_v6 = vsel %vm5125_vm14, %v5120_v51, %v5122_v47 }
 0x235   : > { %4561 = vmatpush1.bf16.msra.mxu1 %v4508_v25  ;;  %4592 = vmatprep.mubr.bf16.mxu1 %v7318_v8 }
 0x236   : > { %4684 = vmatprep.subr.bf16.mxu1 %v4633_v21  ;;  %6643 = vmatmul.mubr.msk.bf16.vlgmr.msra.gmra.mrb[0].mxu0 %vm335_vm1, %v7241_v23 }
 0x237   : > { %4518 = vmatpush1.bf16.msra.mxu0 %v4506_v1  ;;  %4549 = vmatprep.mubr.bf16.mxu0 %v7318_v8  ;;  %v5242_v13 = vpop.permute.xlu1 %5241  ;;  %v5116_v43 = vpop.permute.xlu0 %5115  ;;  %v7247_v1 = vld [vmem:[%s8745_s0 + $0x138] sm:$0xff]  }
 0x238   : > { %4641 = vmatprep.subr.bf16.mxu0 %v4631_v12  ;;  %v5126_v25 = vsel %vm5125_vm14, %v5116_v43, %v5118_v40 }
 0x23b   : > { %v5246_v18 = vpop.permute.xlu1 %5245  ;;  %v5244_v62 = vpop.permute.xlu0 %5243 }
 0x23c   : > { %v5251_v60 = vsel %vm5249_vm15, %v5242_v13, %v5244_v62  ;;  %v5252_v12 = vsel %vm5249_vm15, %v5244_v62, %v5246_v18 }
 0x23f   : > { %v5240_v59 = vpop.permute.xlu1 %5239  ;;  %v5248_v17 = vpop.permute.xlu0 %5247 }
 0x240   : > { %6649 = vmatmul.mubr.msk.bf16.vlgmr.msra.gmra.mrb[0].mxu1 %vm335_vm1, %v7242_v24  ;;  %v5253_v23 = vsel %vm5249_vm15, %v5246_v18, %v5248_v17 }
 0x241   : > { %4685 = vmatpush1.bf16.msra.mxu1 %v4632_v28  ;;  %4716 = vmatprep.mubr.bf16.mxu1 %v7318_v8  ;;  %v5250_v28 = vsel %vm5249_vm15, %v5240_v59, %v5242_v13  ;;  %v7255_v59 = vld [vmem:[%s8745_s0 + $0x178] sm:$0xff]  }
 0x242   : > { %4808 = vmatprep.subr.bf16.mxu1 %v4757_v30  ;;  %6648 = vmatmul.mubr.msk.bf16.vlgmr.msra.gmra.mrb[0].mxu0 %vm335_vm1, %v7242_v24 }
 0x243   : > { %4642 = vmatpush1.bf16.msra.mxu0 %v4630_v31  ;;  %4673 = vmatprep.mubr.bf16.mxu0 %v7318_v8  ;;  %v5368_v26 = vpop.permute.xlu1 %5367  ;;  %v5366_v21 = vpop.permute.xlu0 %5365 }
 0x244   : > { %4765 = vmatprep.subr.bf16.mxu0 %v4755_v35  ;;  %v5375_v22 = vsel %vm5373_vm0, %v5366_v21, %v5368_v26 }
 0x247   : > { %v5372_v15 = vpop.permute.xlu1 %5371  ;;  %v5370_v53 = vpop.permute.xlu0 %5369 }
 0x248   : > { %v5377_v24 = vsel %vm5373_vm0, %v5370_v53, %v5372_v15  ;;  %v5376_v30 = vsel %vm5373_vm0, %v5368_v26, %v5370_v53 }
 0x24b   : > { %v5488_v31 = vpop.permute.xlu1 %5487  ;;  %v5364_v35 = vpop.permute.xlu0 %5363 }
 0x24c   : > { %6654 = vmatmul.mubr.msk.bf16.vlgmr.msra.gmra.mrb[0].mxu1 %vm335_vm1, %v7243_v33  ;;  %v5489_v37 = vsel %vm785_vm4, %v7613_v48, %v5488_v31  ;;  %v5374_v32 = vsel %vm5373_vm0, %v5364_v35, %v5366_v21  ;;  %vm5824_vm4 = vcmask 990208  }
 0x24d   : > { %4809 = vmatpush1.bf16.msra.mxu1 %v4756_v38  ;;  %4840 = vmatprep.mubr.bf16.mxu1 %v7318_v8 }
 0x24e   : > { %4932 = vmatprep.subr.bf16.mxu1 %v4881_v34  ;;  %6653 = vmatmul.mubr.msk.bf16.vlgmr.msra.gmra.mrb[0].mxu0 %vm335_vm1, %v7243_v33  ;;  %v7249_v33 = vld [vmem:[%s8745_s0 + $0x148] sm:$0xff]  }
 0x24f   : > { %4766 = vmatpush1.bf16.msra.mxu0 %v4754_v41  ;;  %4797 = vmatprep.mubr.bf16.mxu0 %v7318_v8  ;;  %v5597_v38 = vpop.permute.xlu0 %5596  ;;  %v5706_v9 = vpop.permute.xlu1 %5705 }
 0x250   : > { %4889 = vmatprep.subr.bf16.mxu0 %v4879_v42  ;;  %v5598_v48 = vsel %vm909_vm5, %v7633_v54, %v5597_v38  ;;  %v5707_v34 = vsel %vm1033_vm6, %v7662_v2, %v5706_v9  ;;  %vm5948_vm5 = vcmask 982016   ;;  %vm6072_vm6 = vcmask 973824  }
 0x253   : > { %v5819_v54 = vpop.permute.xlu1 %5818 }
 0x258   : > { %6659 = vmatmul.mubr.msk.bf16.vlgmr.msra.gmra.mrb[0].mxu1 %vm335_vm1, %v7244_v39 }
 0x259   : > { %4933 = vmatpush1.bf16.msra.mxu1 %v4880_v44  ;;  %4964 = vmatprep.mubr.bf16.mxu1 %v7318_v8 }
 0x25a   : > { %5056 = vmatprep.subr.bf16.mxu1 %v5005_v45  ;;  %6658 = vmatmul.mubr.msk.bf16.vlgmr.msra.gmra.mrb[0].mxu0 %vm335_vm1, %v7244_v39 }
 0x25b   : > { %4890 = vmatpush1.bf16.msra.mxu0 %v4878_v10  ;;  %4921 = vmatprep.mubr.bf16.mxu0 %v7318_v8 }
 0x25c   : > { %5013 = vmatprep.subr.bf16.mxu0 %v5003_v11  ;;  %v7253_v11 = vld [vmem:[%s8745_s0 + $0x168] sm:$0xff]  }
 0x264   : > { %6664 = vmatmul.mubr.msk.bf16.vlgmr.msra.gmra.mrb[0].mxu1 %vm335_vm1, %v7245_v52 }
 0x265   : > { %5057 = vmatpush1.bf16.msra.mxu1 %v5004_v46  ;;  %5088 = vmatprep.mubr.bf16.mxu1 %v7318_v8 }
 0x266   : > { %5180 = vmatprep.subr.bf16.mxu1 %v5129_v58  ;;  %6663 = vmatmul.mubr.msk.bf16.vlgmr.msra.gmra.mrb[0].mxu0 %vm335_vm1, %v7245_v52 }
 0x267   : > { %5014 = vmatpush1.bf16.msra.mxu0 %v5002_v7  ;;  %5045 = vmatprep.mubr.bf16.mxu0 %v7318_v8 }
 0x268   : > { %5137 = vmatprep.subr.bf16.mxu0 %v5127_v16  ;;  %v7254_v16 = vld [vmem:[%s8745_s0 + $0x170] sm:$0xff]  }
 0x270   : > { %6669 = vmatmul.mubr.msk.bf16.vlgmr.msra.gmra.mrb[0].mxu1 %vm335_vm1, %v7246_v63 }
 0x271   : > { %5181 = vmatpush1.bf16.msra.mxu1 %v5128_v6  ;;  %5212 = vmatprep.mubr.bf16.mxu1 %v7318_v8 }
 0x272   : > { %5304 = vmatprep.subr.bf16.mxu1 %v5253_v23  ;;  %6668 = vmatmul.mubr.msk.bf16.vlgmr.msra.gmra.mrb[0].mxu0 %vm335_vm1, %v7246_v63 }
 0x273   : > { %5138 = vmatpush1.bf16.msra.mxu0 %v5126_v25  ;;  %5169 = vmatprep.mubr.bf16.mxu0 %v7318_v8 }
 0x274   : > { %5261 = vmatprep.subr.bf16.mxu0 %v5251_v60  ;;  %v7256_v60 = vld [vmem:[%s8745_s0 + $0x180] sm:$0xff]  }
 0x27c   : > { %6674 = vmatmul.mubr.msk.bf16.vlgmr.msra.gmra.mrb[0].mxu1 %vm335_vm1, %v7247_v1 }
 0x27d   : > { %5305 = vmatpush1.bf16.msra.mxu1 %v5252_v12  ;;  %5336 = vmatprep.mubr.bf16.mxu1 %v7318_v8 }
 0x27e   : > { %5428 = vmatprep.subr.bf16.mxu1 %v5377_v24  ;;  %6673 = vmatmul.mubr.msk.bf16.vlgmr.msra.gmra.mrb[0].mxu0 %vm335_vm1, %v7247_v1 }
 0x27f   : > { %5262 = vmatpush1.bf16.msra.mxu0 %v5250_v28  ;;  %5293 = vmatprep.mubr.bf16.mxu0 %v7318_v8 }
 0x280   : > { %5385 = vmatprep.subr.bf16.mxu0 %v5375_v22 }
 0x288   : > { %6679 = vmatmul.mubr.msk.bf16.vlgmr.msra.gmra.mrb[0].mxu1 %vm335_vm1, %v7248_v29 }
 0x289   : > { %5429 = vmatpush1.bf16.msra.mxu1 %v5376_v30  ;;  %5460 = vmatprep.mubr.bf16.mxu1 %v7318_v8 }
 0x28a   : > { %5537 = vmatprep.subr.bf16.mxu1 %v5489_v37  ;;  %6678 = vmatmul.mubr.msk.bf16.vlgmr.msra.gmra.mrb[0].mxu0 %vm335_vm1, %v7248_v29 }
 0x28b   : > { %5386 = vmatpush1.bf16.msra.mxu0 %v5374_v32  ;;  %5417 = vmatprep.mubr.bf16.mxu0 %v7318_v8 }
 0x28c   : > { %5494 = vmatprep.subr.bf16.mxu0 %v7636_v56  ;;  %v5817_v56 = vpop.permute.xlu0 %5816 }
 0x290   : > { %v5821_v27 = vpop.permute.xlu0 %5820 }
 0x294   : > { %6684 = vmatmul.mubr.msk.bf16.vlgmr.msra.gmra.mrb[0].mxu1 %vm335_vm1, %v7249_v33 }
 0x295   : > { %5538 = vmatpush1.bf16.msra.mxu1 %v7621_v50  ;;  %5569 = vmatprep.mubr.bf16.mxu1 %v7318_v8  ;;  %v7250_v50 = vld [vmem:[%s8745_s0 + $0x150] sm:$0xff]  }
 0x296   : > { %5646 = vmatprep.subr.bf16.mxu1 %v5598_v48  ;;  %6683 = vmatmul.mubr.msk.bf16.vlgmr.msra.gmra.mrb[0].mxu0 %vm335_vm1, %v7249_v33 }
 0x297   : > { %5495 = vmatpush1.bf16.msra.mxu0 %v7617_v49  ;;  %5526 = vmatprep.mubr.bf16.mxu0 %v7318_v8  ;;  %v5823_v49 = vpop.permute.xlu1 %5822 }
 0x298   : > { %5603 = vmatprep.subr.bf16.mxu0 %v7665_v3  ;;  %v5815_v3 = vpop.permute.xlu0 %5814  ;;  %v5828_v2 = vsel %vm5824_vm4, %v5821_v27, %v5823_v49 }
 0x29b   : > { %v5941_v42 = vpop.permute.xlu1 %5940 }
 0x29c   : > { %v5943_v41 = vpop.permute.xlu0 %5942 }
 0x29d   : > { %v5950_v40 = vsel %vm5948_vm5, %v5941_v42, %v5943_v41 }
 0x29f   : > { %v5945_v0 = vpop.permute.xlu1 %5944 }
 0x2a0   : > { %6689 = vmatmul.mubr.msk.bf16.vlgmr.msra.gmra.mrb[0].mxu1 %vm335_vm1, %v7250_v50  ;;  %v5951_v55 = vsel %vm5948_vm5, %v5943_v41, %v5945_v0 }
 0x2a1   : > { %5647 = vmatpush1.bf16.msra.mxu1 %v7641_v57  ;;  %5678 = vmatprep.mubr.bf16.mxu1 %v7318_v8  ;;  %v7251_v57 = vld [vmem:[%s8745_s0 + $0x158] sm:$0xff]  }
 0x2a2   : > { %5755 = vmatprep.subr.bf16.mxu1 %v5707_v34  ;;  %6688 = vmatmul.mubr.msk.bf16.vlgmr.msra.gmra.mrb[0].mxu0 %vm335_vm1, %v7250_v50 }
 0x2a3   : > { %5604 = vmatpush1.bf16.msra.mxu0 %v7651_v61  ;;  %5635 = vmatprep.mubr.bf16.mxu0 %v7318_v8  ;;  %v5826_v61 = vsel %vm5824_vm4, %v5817_v56, %v5819_v54  ;;  %v5939_v51 = vpop.permute.xlu1 %5938 }
 0x2a4   : > { %5712 = vmatprep.subr.bf16.mxu0 %v7694_v20  ;;  %v5947_v20 = vpop.permute.xlu0 %5946  ;;  %v5949_v13 = vsel %vm5948_vm5, %v5939_v51, %v5941_v42 }
 0x2a5   : > { %v5952_v44 = vsel %vm5948_vm5, %v5945_v0, %v5947_v20 }
 0x2a7   : > { %v6067_v45 = vpop.permute.xlu1 %6066 }
 0x2a8   : > { %v6065_v39 = vpop.permute.xlu0 %6064 }
 0x2a9   : > { %v6074_v58 = vsel %vm6072_vm6, %v6065_v39, %v6067_v45 }
 0x2ab   : > { %v6071_v47 = vpop.permute.xlu1 %6070 }
 0x2ac   : > { %6694 = vmatmul.mubr.msk.bf16.vlgmr.msra.gmra.mrb[0].mxu1 %vm335_vm1, %v7251_v57  ;;  %v6069_v10 = vpop.permute.xlu0 %6068 }
 0x2ad   : > { %5756 = vmatpush1.bf16.msra.mxu1 %v7670_v4  ;;  %5787 = vmatprep.mubr.bf16.mxu1 %v7318_v8  ;;  %v5827_v4 = vsel %vm5824_vm4, %v5819_v54, %v5821_v27  ;;  %v6076_v46 = vsel %vm6072_vm6, %v6069_v10, %v6071_v47  ;;  %v6075_v62 = vsel %vm6072_vm6, %v6067_v45, %v6069_v10 }
 0x2ae   : > { %5879 = vmatprep.subr.bf16.mxu1 %v5828_v2  ;;  %6693 = vmatmul.mubr.msk.bf16.vlgmr.msra.gmra.mrb[0].mxu0 %vm335_vm1, %v7251_v57 }
 0x2af   : > { %5713 = vmatpush1.bf16.msra.mxu0 %v7680_v14  ;;  %5744 = vmatprep.mubr.bf16.mxu0 %v7318_v8  ;;  %v5825_v14 = vsel %vm5824_vm4, %v5815_v3, %v5817_v56  ;;  %v6189_v7 = vpop.permute.xlu1 %6188 }
 0x2b0   : > { %5836 = vmatprep.subr.bf16.mxu0 %v5826_v61  ;;  %v6063_v52 = vpop.permute.xlu0 %6062 }
 0x2b1   : > { %v6073_v19 = vsel %vm6072_vm6, %v6063_v52, %v6065_v39 }
 0x2b3   : > { %v6193_v63 = vpop.permute.xlu1 %6192 }
 0x2b4   : > { %v6191_v43 = vpop.permute.xlu0 %6190 }
 0x2b5   : > { %v6198_v6 = vsel %vm6196_vm2, %v6189_v7, %v6191_v43  ;;  %v6199_v17 = vsel %vm6196_vm2, %v6191_v43, %v6193_v63 }
 0x2b7   : > { %v6187_v23 = vpop.permute.xlu1 %6186 }
 0x2b8   : > { %6699 = vmatmul.mubr.msk.bf16.vlgmr.msra.gmra.mrb[0].mxu1 %vm335_vm1, %v7252_v36  ;;  %v6195_v18 = vpop.permute.xlu0 %6194  ;;  %v6197_v25 = vsel %vm6196_vm2, %v6187_v23, %v6189_v7 }
 0x2b9   : > { %5880 = vmatpush1.bf16.msra.mxu1 %v5827_v4  ;;  %5911 = vmatprep.mubr.bf16.mxu1 %v7318_v8  ;;  %v6200_v5 = vsel %vm6196_vm2, %v6193_v63, %v6195_v18 }
 0x2ba   : > { %6003 = vmatprep.subr.bf16.mxu1 %v5952_v44  ;;  %6698 = vmatmul.mubr.msk.bf16.vlgmr.msra.gmra.mrb[0].mxu0 %vm335_vm1, %v7252_v36 }
 0x2bb   : > { %5837 = vmatpush1.bf16.msra.mxu0 %v5825_v14  ;;  %5868 = vmatprep.mubr.bf16.mxu0 %v7318_v8  ;;  %v6312_v1 = vpop.permute.xlu1 %6311 }
 0x2bc   : > { %5960 = vmatprep.subr.bf16.mxu0 %v5950_v40  ;;  %v6307_v26 = vpop.permute.xlu0 %6306 }
 0x2c4   : > { %6704 = vmatmul.mubr.msk.bf16.vlgmr.msra.gmra.mrb[0].mxu1 %vm335_vm1, %v7253_v11 }
 0x2c5   : > { %6004 = vmatpush1.bf16.msra.mxu1 %v5951_v55  ;;  %6035 = vmatprep.mubr.bf16.mxu1 %v7318_v8 }
 0x2c6   : > { %6127 = vmatprep.subr.bf16.mxu1 %v6076_v46  ;;  %6703 = vmatmul.mubr.msk.bf16.vlgmr.msra.gmra.mrb[0].mxu0 %vm335_vm1, %v7253_v11 }
 0x2c7   : > { %5961 = vmatpush1.bf16.msra.mxu0 %v5949_v13  ;;  %5992 = vmatprep.mubr.bf16.mxu0 %v7318_v8 }
 0x2c8   : > { %6084 = vmatprep.subr.bf16.mxu0 %v6074_v58 }
 0x2d0   : > { %6709 = vmatmul.mubr.msk.bf16.vlgmr.msra.gmra.mrb[0].mxu1 %vm335_vm1, %v7254_v16 }
 0x2d1   : > { %6128 = vmatpush1.bf16.msra.mxu1 %v6075_v62  ;;  %6159 = vmatprep.mubr.bf16.mxu1 %v7318_v8 }
 0x2d2   : > { %6251 = vmatprep.subr.bf16.mxu1 %v6200_v5  ;;  %6708 = vmatmul.mubr.msk.bf16.vlgmr.msra.gmra.mrb[0].mxu0 %vm335_vm1, %v7254_v16 }
 0x2d3   : > { %6085 = vmatpush1.bf16.msra.mxu0 %v6073_v19  ;;  %6116 = vmatprep.mubr.bf16.mxu0 %v7318_v8 }
 0x2d4   : > { %6208 = vmatprep.subr.bf16.mxu0 %v6198_v6 }
 0x2dc   : > { %6714 = vmatmul.mubr.msk.bf16.vlgmr.msra.gmra.mrb[0].mxu1 %vm335_vm1, %v7255_v59 }
 0x2dd   : > { %6252 = vmatpush1.bf16.msra.mxu1 %v6199_v17  ;;  %6283 = vmatprep.mubr.bf16.mxu1 %v7318_v8 }
 0x2de   : > { %6713 = vmatmul.mubr.msk.bf16.vlgmr.msra.gmra.mrb[0].mxu0 %vm335_vm1, %v7255_v59 }
 0x2df   : > { %6209 = vmatpush1.bf16.msra.mxu0 %v6197_v25  ;;  %6240 = vmatprep.mubr.bf16.mxu0 %v7318_v8 }
 0x2e8   : > { %6719 = vmatmul.mubr.msk.bf16.vlgmr.msra.gmra.mrb[0].mxu1 %vm335_vm1, %v7256_v60 }
 0x2ea   : > { %6718 = vmatmul.mubr.msk.bf16.vlgmr.msra.gmra.mrb[0].mxu0 %vm335_vm1, %v7256_v60 }
 0x3bb   : > { %v6285_v21 = vpop.f32.mrb[0].mxu1 }
 0x3bc   : > { %v6316_v12 = vadd.f32 %v6307_v26, %v6285_v21  ;;  %v6287_v15 = vpop.f32.mrb[1].mxu1 }
 0x3bd   : > { %v6317_v53 = vadd.f32 %v6307_v26, %v6287_v15  ;;  %v6289_v24 = vpop.f32.mrb[2].mxu1  ;;  %v6242_v8 = vpop.f32.mrb[0].mxu0 }
 0x3be   : > { %7257 = vtanh.f32 %v6316_v12  ;;  %v6320_v28 = vadd.f32 %v6312_v1, %v6289_v24  ;;  %v6291_v22 = vpop.f32.mrb[3].mxu1  ;;  %v6314_v30 = vadd.f32 %v6307_v26, %v6242_v8  ;;  %v6244_v31 = vpop.f32.mrb[1].mxu0 }
 0x3bf   : > { %7259 = vtanh.f32 %v6317_v53  ;;  %v6321_v29 = vadd.f32 %v6312_v1, %v6291_v22  ;;  %v6315_v35 = vadd.f32 %v6307_v26, %v6244_v31  ;;  %v6246_v37 = vpop.f32.mrb[2].mxu0 }
 0x3c0   : > { %7261 = vtanh.f32 %v6320_v28  ;;  %v6318_v32 = vadd.f32 %v6312_v1, %v6246_v37  ;;  %v6248_v33 = vpop.f32.mrb[3].mxu0 }
 0x3c1   : > { %7263 = vtanh.f32 %v6321_v29  ;;  %v6319_v38 = vadd.f32 %v6312_v1, %v6248_v33 }
 0x3c2   : > { %7265 = vtanh.f32 %v6314_v30 }
 0x3c3   : > { %7267 = vtanh.f32 %v6315_v35 }
 0x3c4   : > { %7269 = vtanh.f32 %v6318_v32 }
 0x3c5   : > { %7271 = vtanh.f32 %v6319_v38 }
 0x3c8   : > { %v7258_v48 = vpop.eup %7257 }
 0x3c9   : > { %v7260_v56 = vpop.eup %7259  ;;  %6332 = vst [vmem:[%s8704_s9 + $0x10] sm:$0xff] %v7258_v48 }
 0x3ca   : > { %v7262_v9 = vpop.eup %7261  ;;  %6333 = vst [vmem:[%s8704_s9 + $0x18] sm:$0xff] %v7260_v56  ;;  %6344 = sbr.rel (!%p7441_p8) target bundleno = 985 (0x3d9), region = 86 }
 0x3cb   : > { %v7264_v50 = vpop.eup %7263  ;;  %6336 = vst [vmem:[%s8704_s9 + $0x30] sm:$0xff] %v7262_v9 }
 0x3cc   : > { %v7266_v54 = vpop.eup %7265  ;;  %6337 = vst [vmem:[%s8704_s9 + $0x38] sm:$0xff] %v7264_v50 }
 0x3cd   : > { %v7268_v27 = vpop.eup %7267  ;;  %6330 = vst [vmem:[%s8704_s9] sm:$0xff] %v7266_v54 }
 0x3ce   : > { %v7270_v34 = vpop.eup %7269  ;;  %6331 = vst [vmem:[%s8704_s9 + $0x8] sm:$0xff] %v7268_v27 }
 0x3cf   : > { %v7272_v49 = vpop.eup %7271  ;;  %6334 = vst [vmem:[%s8704_s9 + $0x20] sm:$0xff] %v7270_v34 }
 0x3d0   : > { %6335 = vst [vmem:[%s8704_s9 + $0x28] sm:$0xff] %v7272_v49  ;;  %v6364_v41 = vld [vmem:[%s8704_s9 + $0x10] sm:$0xff] (%p7441_p8) }
 0x3d1   : > { %v6366_v2 = vld [vmem:[%s8704_s9 + $0x18] sm:$0xff]  ;;  %6365 = vst [vmem:[%s6347_s14 + $0x10] sm:$0xff] %v6364_v41 }
 0x3d2   : > { %6367 = vst [vmem:[%s6347_s14 + $0x18] sm:$0xff] %v6366_v2  ;;  %v6372_v20 = vld [vmem:[%s8704_s9 + $0x30] sm:$0xff] }
 0x3d3   : > { %v6374_v0 = vld [vmem:[%s8704_s9 + $0x38] sm:$0xff]  ;;  %6373 = vst [vmem:[%s6347_s14 + $0x50] sm:$0xff] %v6372_v20 }
 0x3d4   : > { %v6360_v3 = vld [vmem:[%s8704_s9] sm:$0xff]  ;;  %6375 = vst [vmem:[%s6347_s14 + $0x58] sm:$0xff] %v6374_v0 }
 0x3d5   : > { %v6362_v57 = vld [vmem:[%s8704_s9 + $0x8] sm:$0xff]  ;;  %6361 = vst [vmem:[%s6347_s14] sm:$0xff] %v6360_v3 }
 0x3d6   : > { %v6368_v42 = vld [vmem:[%s8704_s9 + $0x20] sm:$0xff]  ;;  %6363 = vst [vmem:[%s6347_s14 + $0x8] sm:$0xff] %v6362_v57 }
 0x3d7   : > { %v6370_v61 = vld [vmem:[%s8704_s9 + $0x28] sm:$0xff]  ;;  %6369 = vst [vmem:[%s6347_s14 + $0x40] sm:$0xff] %v6368_v42 }
 0x3d8   : > { %6371 = vst [vmem:[%s6347_s14 + $0x48] sm:$0xff] %v6370_v61 }
 0x3d9 PF: > { %p11_p13 = scmp.ge.s32.totalorder %s7416_s21, 4   ;;  %s8752_s15 = smov %s7304_s16 }
 0x3da   : > { %s8753_s16 = smov %s7435_s28  ;;  %s8754_s17 = smov %s7312_s18 }
 0x3db   : > { %s8755_s18 = smov %s7426_s25  ;;  %s8756_s19 = smov %s7416_s21 }
 0x3dc   :  { %13 = sbr.rel (!%p11_p13) target bundleno = 3 (0x3), region = 196 }

</bundles_post_ra>
